<compile_context>
chip_gen: v6e
topology: v6e:2x2x1
jax: 0.10.0
libtpu: 0.0.40
codegen_flags: <defaults>
</compile_context>

<pallas_src>
import functools
import math

import jax
import jax.numpy as jnp
from jax.experimental import pallas as pl
from jax.experimental.pallas import tpu as pltpu

# -----------------------------------------------------------------------------
# Config (bs % 6 == 0 and bs - 4 == 4*bs//6  =>  bs = 12)
# -----------------------------------------------------------------------------
CFG = dict(
    encoder_dim=[16, 32, 64, 128],   # encoder_dim[2] must equal embed_dim (prompt heads)
    dim=32,
    embed_dim=64,
    img_size=32,
    domain_num=[2, 2, 2, 2],
    task_num=[1, 1, 1, 1],
    task_deco_num=1,
    batch_size=12,
)

LANE = 128                       # channel widths are zero-padded to full 128-lane vregs
ROW_TILE = 1024                  # target rows per block at large sizes (HBM roofline knee)
MIN_TILE = 512                   # split into >=2 blocks once each can be >= this
VMEM_LIMIT = 32 * 1024 * 1024    # safe for v7x's 64 MiB VMEM; fine on v5e/v6e

VMEM_SPEC = pl.BlockSpec(memory_space=pltpu.MemorySpace.VMEM)


def _ceil_to(n, m):
    return ((n + m - 1) // m) * m


def _row_plan(rows):
    """Return (rows_per_block, num_blocks).

    Small inputs: one whole-array block (no pipeline-warmup waste).
    Large inputs: >= 2 blocks (both v7x TensorCores get work), each a multiple of 8 rows,
    sized around ROW_TILE; ragged last block is handled by Pallas (no explicit row pad)."""
    if rows < 2 * MIN_TILE:
        return rows, 1
    nblk = max(2, pl.cdiv(rows, ROW_TILE))
    tile = _ceil_to(pl.cdiv(rows, nblk), 8)
    return tile, pl.cdiv(rows, tile)


def _gelu(x):
    # tanh-approx GELU: the transcendental lands on the EUP slot instead of ~10 VALU ops.
    # PyTorch nn.GELU default is exact erf (~1e-3 abs deviation) -- documented tradeoff.
    c = 0.7978845608028654  # sqrt(2/pi)
    return 0.5 * x * (1.0 + jnp.tanh(c * (x + 0.044715 * x * x * x)))


# -----------------------------------------------------------------------------
# Pallas kernels
# -----------------------------------------------------------------------------
def _mlp_kernel(x_ref, w1_ref, b1_ref, w2_ref, b2_ref, o_ref):
    """mlp32 = Linear -> GELU -> Linear.  bf16 MXU operands, f32 accumulate/elementwise."""
    h = jnp.dot(x_ref[...], w1_ref[...], preferred_element_type=jnp.float32) + b1_ref[...]
    h = _gelu(h)
    o_ref[...] = (jnp.dot(h.astype(w2_ref.dtype), w2_ref[...],
                          preferred_element_type=jnp.float32) + b2_ref[...]).astype(o_ref.dtype)


def _make_mlp_ln_mlp_kernel(ln_dim):
    inv_n = 1.0 / float(ln_dim)

    def mlp_ln_mlp_kernel(x_ref, w1_ref, b1_ref, w2_ref, b2_ref, g_ref, be_ref,
                          w3_ref, b3_ref, w4_ref, b4_ref, o_ref):
        """Fused mlp16 -> norm1 -> mlp1: the (rows, dim) intermediate never leaves VMEM."""
        h = jnp.dot(x_ref[...], w1_ref[...], preferred_element_type=jnp.float32) + b1_ref[...]
        h = _gelu(h)
        y = jnp.dot(h.astype(w2_ref.dtype), w2_ref[...],
                    preferred_element_type=jnp.float32) + b2_ref[...]
        # LayerNorm over the true ln_dim channels.  Padded columns of y are exactly zero
        # (zero-padded w2/b2), so sums over the padded width are already the true sums.
        mu = jnp.sum(y, axis=-1, keepdims=True) * inv_n
        ex2 = jnp.sum(y * y, axis=-1, keepdims=True) * inv_n
        xn = (y - mu) * jax.lax.rsqrt(ex2 - mu * mu + 1e-5)
        xn = xn * g_ref[...] + be_ref[...]   # gamma/beta padded with zeros -> pad cols stay 0
        h2 = jnp.dot(xn.astype(w3_ref.dtype), w3_ref[...],
                     preferred_element_type=jnp.float32) + b3_ref[...]
        h2 = _gelu(h2)
        o_ref[...] = (jnp.dot(h2.astype(w4_ref.dtype), w4_ref[...],
                              preferred_element_type=jnp.float32) + b4_ref[...]).astype(o_ref.dtype)

    return mlp_ln_mlp_kernel


def _make_norm_mlps_kernel(ln_dim):
    inv_n = 1.0 / float(ln_dim)

    def norm_mlps_kernel(a_ref, b_ref, ga_ref, bea_ref, gb_ref, beb_ref,
                         wa_ref, wb_ref, b1_ref, w2_ref, b2_ref, o_ref):
        """norm (over 2*embed) -> mlp_s.  The rgb/depth 64-ch halves arrive as TWO inputs
        (each zero-padded to 128 lanes) so the channel concat is never materialized in HBM;
        LN stats span both halves, W1 of mlp_s is pre-split into the matching halves."""
        a = a_ref[...]
        b = b_ref[...]
        mu = (jnp.sum(a, -1, keepdims=True) + jnp.sum(b, -1, keepdims=True)) * inv_n
        ex2 = (jnp.sum(a * a, -1, keepdims=True) + jnp.sum(b * b, -1, keepdims=True)) * inv_n
        rs = jax.lax.rsqrt(ex2 - mu * mu + 1e-5)
        an = ((a - mu) * rs) * ga_ref[...] + bea_ref[...]
        bn = ((b - mu) * rs) * gb_ref[...] + beb_ref[...]
        h = (jnp.dot(an.astype(wa_ref.dtype), wa_ref[...], preferred_element_type=jnp.float32)
             + jnp.dot(bn.astype(wb_ref.dtype), wb_ref[...], preferred_element_type=jnp.float32)
             + b1_ref[...])
        h = _gelu(h)
        o_ref[...] = (jnp.dot(h.astype(w2_ref.dtype), w2_ref[...],
                              preferred_element_type=jnp.float32) + b2_ref[...]).astype(o_ref.dtype)

    return norm_mlps_kernel


def _prompt_heads_kernel(p1_ref, p2_ref, p3_ref, p4_ref,
                         w1_ref, b1_ref, w2_ref, b2_ref, w4_ref, b4_ref,
                         wl_ref, bl_ref, rw_ref, o_ref):
    """All 6 prompt-projection heads (R/D/T/V domain + S/C task) in one launch.

    Per head: cat([lin1(p1), lin2(p2), p3, lin4(p4)], -1) @ W_low + b_low, then a weighted
    row-reduce (mean over domain rows / row-0 select for task heads).  The concat + single
    256-K matmul is expressed as 4 block-partial sums (FP reassociation only).  W_low and
    the output last dim are zero-padded to 128 lanes, and the per-head rows are accumulated
    into one (6, 128) tile so the kernel issues a single lane-dense store."""
    n_heads, ed_p = o_ref.shape
    ed = p3_ref.shape[-1]              # true embed dim (== encoder_dim[2])
    head_ids = jax.lax.broadcasted_iota(jnp.int32, (n_heads, 1), 0)
    acc = jnp.zeros((n_heads, ed_p), jnp.float32)
    for t in range(n_heads):           # static unroll: ~36 tiny matmuls total
        h1 = jnp.dot(p1_ref[t], w1_ref[t], preferred_element_type=jnp.float32) + b1_ref[t]
        h2 = jnp.dot(p2_ref[t], w2_ref[t], preferred_element_type=jnp.float32) + b2_ref[t]
        h4 = jnp.dot(p4_ref[t], w4_ref[t], preferred_element_type=jnp.float32) + b4_ref[t]
        wl = wl_ref[t]                                            # (4*ed, ed_p)
        out = (jnp.dot(h1, wl[0 * ed:1 * ed], preferred_element_type=jnp.float32)
               + jnp.dot(h2, wl[1 * ed:2 * ed], preferred_element_type=jnp.float32)
               + jnp.dot(p3_ref[t], wl[2 * ed:3 * ed], preferred_element_type=jnp.float32)
               + jnp.dot(h4, wl[3 * ed:4 * ed], preferred_element_type=jnp.float32)
               + bl_ref[t])                                       # (nd, ed_p)
        row = jnp.sum(out * rw_ref[t], axis=0, keepdims=True)     # (1, ed_p)
        acc = acc + jnp.where(head_ids == t, row, 0.0)
    o_ref[...] = acc


# -----------------------------------------------------------------------------
# Row-tiled pallas_call helper + wrappers
# -----------------------------------------------------------------------------
def _rows_pallas_call(kernel, xs, consts, cout_p, out_dtype, tr_per_row=0):
    rows = xs[0].shape[0]
    tile, nblk = _row_plan(rows)
    x_specs = [pl.BlockSpec((tile, x.shape[1]), lambda i: (i, 0)) for x in xs]
    c_specs = [pl.BlockSpec(c.shape, lambda i: (0, 0)) for c in consts]
    flops = 2 * rows * sum(c.shape[0] * c.shape[1] for c in consts
                           if c.ndim == 2 and c.shape[0] > 1)
    bytes_acc = (sum(x.size * x.dtype.itemsize for x in xs)
                 + rows * cout_p * jnp.dtype(out_dtype).itemsize
                 + sum(c.size * c.dtype.itemsize for c in consts))
    return pl.pallas_call(
        kernel,
        out_shape=jax.ShapeDtypeStruct((rows, cout_p), out_dtype),
        grid=(nblk,),
        in_specs=x_specs + c_specs,
        out_specs=pl.BlockSpec((tile, cout_p), lambda i: (i, 0)),
        compiler_params=pltpu.CompilerParams(
            dimension_semantics=("parallel",),
            vmem_limit_bytes=VMEM_LIMIT),
        cost_estimate=pl.CostEstimate(
            flops=int(flops),
            transcendentals=int(rows * tr_per_row),
            bytes_accessed=int(bytes_acc)),
    )(*xs, *consts)


def pallas_mlp32(x, pp):
    """mlp32 (Linear->GELU->Linear), hidden/out lane-padded to 128.  Output keeps the
    padded columns (zeros beyond enc[2]); callers slice only where externally consumed."""
    lead = x.shape[:-1]
    x2 = x.reshape(-1, x.shape[-1]).astype(jnp.bfloat16)   # convert fuses into XLA producer
    out = _rows_pallas_call(_mlp_kernel, [x2], list(pp["mlp32"]), LANE, jnp.float32,
                            tr_per_row=LANE)
    return out.reshape(*lead, LANE)


def pallas_mlp16_norm1_mlp1(x, pp, cfg):
    """Fused mlp16 -> norm1 -> mlp1 in one launch (no HBM round trip for the intermediate)."""
    lead = x.shape[:-1]
    x2 = x.reshape(-1, x.shape[-1]).astype(jnp.bfloat16)
    kern = _make_mlp_ln_mlp_kernel(cfg["dim"])
    out = _rows_pallas_call(kern, [x2], list(pp["fused16"]), LANE, jnp.float32,
                            tr_per_row=2 * LANE + 1)
    return out.reshape(*lead, LANE)


def pallas_norm_mlps(a, b, pp, cfg):
    """norm (over 2*embed) + mlp_s, fed by the rgb/depth halves as two inputs (no concat)."""
    lead = a.shape[:-1]
    a2 = a.reshape(-1, a.shape[-1])
    b2 = b.reshape(-1, b.shape[-1])
    kern = _make_norm_mlps_kernel(2 * cfg["embed_dim"])
    out = _rows_pallas_call(kern, [a2, b2], list(pp["mlps2"]), LANE, jnp.float32,
                            tr_per_row=LANE + 1)
    return out.reshape(*lead, LANE)


def _prompt_heads_call(pp, cfg):
    """All domain/task prompt-projection heads in a single Pallas launch."""
    ed = cfg["embed_dim"]
    ed_p = _ceil_to(ed, LANE)
    args = pp["prompt_heads"]
    out = pl.pallas_call(
        _prompt_heads_kernel,
        out_shape=jax.ShapeDtypeStruct((6, ed_p), jnp.float32),
        in_specs=[VMEM_SPEC] * len(args),
        out_specs=VMEM_SPEC,
    )(*args)
    out = out[:, :ed]                                              # (6, ed)
    domain_prompt_total = [out[t][None, None, :] for t in range(4)]   # each (1, 1, ed)
    task_prompt_total2 = [out[4][None, None, :], out[5][None, None, :]]
    return domain_prompt_total, task_prompt_total2


# -----------------------------------------------------------------------------
# One-time parameter preprocessing (outside jit): pad / split / stack / bf16-cast
# -----------------------------------------------------------------------------
def _prep_prompt_heads(params, cfg):
    nd, ed = cfg["domain_num"][0], cfg["embed_dim"]
    ed_p = _ceil_to(ed, LANE)
    assert all(t == 1 for t in cfg["task_num"]), "fused prompt heads assume task_num == 1"
    assert all(d == nd for d in cfg["domain_num"])
    heads = [("R", "domain_promptR"), ("D", "domain_promptD"), ("T", "domain_promptT"),
             ("V", "domain_promptV"), ("S", "task_promptR"), ("C", "task_promptCR")]

    def prompt_rows(src, i):
        p = params[f"{src}_{i}"][0]                     # (n, enc[i-1])
        if p.shape[0] < nd:                             # pad 1-row task prompts to nd rows
            p = jnp.pad(p, ((0, nd - p.shape[0]), (0, 0)))
        return p

    P1 = jnp.stack([prompt_rows(src, 1) for _, src in heads])
    P2 = jnp.stack([prompt_rows(src, 2) for _, src in heads])
    P3 = jnp.stack([prompt_rows(src, 3) for _, src in heads])
    P4 = jnp.stack([prompt_rows(src, 4) for _, src in heads])

    def wstack(suffix, pad_cols=0):
        W = jnp.stack([jnp.pad(params[f"linear{t}{suffix}"][0], ((0, 0), (0, pad_cols)))
                       for t, _ in heads])
        B = jnp.stack([jnp.pad(params[f"linear{t}{suffix}"][1], (0, pad_cols))[None, :]
                       for t, _ in heads])
        return W, B

    W1, B1 = wstack("1")
    W2, B2 = wstack("2")
    W4, B4 = wstack("4")
    WL, BL = wstack("_low", pad_cols=ed_p - ed)
    # row-reduce weights: mean over nd rows (domain heads), row-0 select (task heads)
    rw = jnp.concatenate(
        [jnp.full((4, nd, 1), 1.0 / nd, jnp.float32),
         jnp.zeros((2, nd, 1), jnp.float32).at[:, 0, :].set(1.0)], axis=0)
    return (P1, P2, P3, P4, W1, B1, W2, B2, W4, B4, WL, BL, rw)


def preprocess_params(params, cfg):
    """One-time weight prep (run once, outside jit): lane-pad to 128, cast matmul weights
    to bf16, split/stack the prompt-projection heads.  Removes all per-step pad/stack ops."""
    enc, ed = cfg["encoder_dim"], cfg["embed_dim"]
    assert enc[2] == ed, "prompt-head concat requires encoder_dim[2] == embed_dim"

    def pad_w(w, rows_p=None, cols_p=None):
        cin, cout = w.shape
        rows_p = cin if rows_p is None else rows_p
        cols_p = _ceil_to(cout, LANE) if cols_p is None else cols_p
        return jnp.pad(w, ((0, rows_p - cin), (0, cols_p - cout))).astype(jnp.bfloat16)

    def pad_v(v, cols_p=None):   # bias / LN row-vector -> (1, cols_p) f32 (zero padded)
        cols_p = _ceil_to(v.shape[0], LANE) if cols_p is None else cols_p
        return jnp.pad(v, (0, cols_p - v.shape[0])).reshape(1, cols_p).astype(jnp.float32)

    pp = {"patch": params["patch"]}

    # mlp32: Linear(enc3, enc2) -> GELU -> Linear(enc2, enc2)
    w1, b1, w2, b2 = params["mlp32"]
    pp["mlp32"] = (pad_w(w1), pad_v(b1), pad_w(w2, rows_p=LANE), pad_v(b2))

    # fused mlp16 -> norm1 -> mlp1
    w1, b1, w2, b2 = params["mlp16"]
    w3, b3, w4, b4 = params["mlp1"]
    g, be = params["norm1"]
    pp["fused16"] = (pad_w(w1), pad_v(b1), pad_w(w2, rows_p=LANE), pad_v(b2),
                     pad_v(g), pad_v(be),          # gamma/beta zero-padded (pad cols -> 0)
                     pad_w(w3, rows_p=LANE), pad_v(b3),
                     pad_w(w4, rows_p=LANE), pad_v(b4))

    # norm (2*embed) + mlp_s; W1 / gamma / beta split into the rgb | depth 64-ch halves
    g, be = params["norm"]
    w1, b1, w2, b2 = params["mlp_s"]
    pp["mlps2"] = (pad_v(g[:ed]), pad_v(be[:ed]), pad_v(g[ed:]), pad_v(be[ed:]),
                   pad_w(w1[:ed], rows_p=LANE), pad_w(w1[ed:], rows_p=LANE), pad_v(b1),
                   pad_w(w2, rows_p=LANE), pad_v(b2))

    pp["prompt_heads"] = _prep_prompt_heads(params, cfg)
    return pp


# -----------------------------------------------------------------------------
# Deterministic parameter init (PyTorch nn.Linear default: U(-1/sqrt(fan_in), ...))
# -----------------------------------------------------------------------------
def _init_linear(key, cin, cout):
    k1, k2 = jax.random.split(key)
    bound = 1.0 / math.sqrt(cin)
    w = jax.random.uniform(k1, (cin, cout), jnp.float32, -bound, bound)
    b = jax.random.uniform(k2, (cout,), jnp.float32, -bound, bound)
    return w, b


def _init_mlp(key, cin, chid, cout):
    k1, k2 = jax.random.split(key)
    w1, b1 = _init_linear(k1, cin, chid)
    w2, b2 = _init_linear(k2, chid, cout)
    return (w1, b1, w2, b2)


def init_params(cfg, key):
    enc = cfg["encoder_dim"]
    dim, ed = cfg["dim"], cfg["embed_dim"]
    keys = iter(jax.random.split(key, 128))
    p = {}
    p["mlp32"] = _init_mlp(next(keys), enc[3], enc[2], enc[2])
    p["mlp16"] = _init_mlp(next(keys), enc[2], dim, dim)
    p["norm1"] = (jnp.ones((dim,), jnp.float32), jnp.zeros((dim,), jnp.float32))
    p["mlp1"] = _init_mlp(next(keys), dim, ed, ed)
    p["norm"] = (jnp.ones((ed * 2,), jnp.float32), jnp.zeros((ed * 2,), jnp.float32))
    p["mlp_s"] = _init_mlp(next(keys), ed * 2, ed, ed)

    def prompt(n, c):
        return jax.random.normal(next(keys), (1, n, c), jnp.float32)

    for name in ["domain_promptR", "domain_promptD", "domain_promptT", "domain_promptV"]:
        for i in range(4):
            p[f"{name}_{i+1}"] = prompt(cfg["domain_num"][i], enc[i])
    for name in ["task_promptR", "task_promptCR"]:
        for i in range(4):
            p[f"{name}_{i+1}"] = prompt(cfg["task_num"][i], enc[i])

    for tag in ["R", "D", "T", "V", "S", "C"]:
        p[f"linear{tag}1"] = _init_linear(next(keys), enc[0], ed)
        p[f"linear{tag}2"] = _init_linear(next(keys), enc[1], ed)
        p[f"linear{tag}4"] = _init_linear(next(keys), enc[3], ed)
        p[f"linear{tag}_low"] = _init_linear(next(keys), ed * 4, ed)

    # patch-embed weights for the backbone stand-in
    p["patch"] = [_init_linear(next(keys), 3, enc[i]) for i in range(4)]
    return p


# -----------------------------------------------------------------------------
# Backbone stand-in
# -----------------------------------------------------------------------------
def standin_backbone(x_nchw, pp, cfg):
    # TODO(synk): swin_transformer (prompted Swin backbone w/ task/domain prompt injection)
    # source was not provided; deterministic patch-pool + linear patch-embed stand-in.
    # The K=3 patch-embed matmuls are left to plain XLA (a K=3 contraction fills <3% of
    # the MXU; a Pallas launch per scale would be pure overhead).
    B, C, H, W = x_nchw.shape
    feas = []
    for i, s in enumerate([4, 8, 16, 32]):
        pooled = x_nchw.reshape(B, C, H // s, s, W // s, s).mean(axis=(3, 5))   # (B,C,h,w)
        tok = pooled.transpose(0, 2, 3, 1).reshape(B, (H // s) * (W // s), C)   # (B,N,3)
        w, b = pp["patch"][i]
        feas.append(tok @ w + b)
    return feas  # [1/4, 1/8, 1/16, 1/32]


# -----------------------------------------------------------------------------
# Forward pass
# -----------------------------------------------------------------------------
def image_depth_net_forward(pp, cfg, image_Input, depth_Input):
    enc, ed = cfg["encoder_dim"], cfg["embed_dim"]

    # TODO(synk): the per-batch task/domain prompt assembly feeding the backbone cannot be
    # reproduced (backbone source missing); the stand-in backbone ignores prompts.
    rgb_fea_1_4, rgb_fea_1_8, rgb_fea_1_16, rgb_fea_1_32 = standin_backbone(image_Input, pp, cfg)
    _, _, depth_fea_1_16, depth_fea_1_32 = standin_backbone(depth_Input[:-4], pp, cfg)
    del rgb_fea_1_4, rgb_fea_1_8   # decoder stand-in does not consume them

    # ---- mlp32: one launch per branch (no row-concat / slice-back HBM copies) ----
    depth_fea_1_32 = pallas_mlp32(depth_fea_1_32, pp)[..., :enc[2]]
    rgb_fea_1_32 = pallas_mlp32(rgb_fea_1_32, pp)[..., :enc[2]]

    # TODO(synk): decoder_module (fuse_32_16: deconv-based 1/32->1/16 fuse) source not
    # provided; the 1/16 tokens pass through unchanged, which makes mlp16 -> norm1 -> mlp1
    # back-to-back, so they are fused into a single kernel launch per branch.
    depth_fea_1_16 = pallas_mlp16_norm1_mlp1(depth_fea_1_16, pp, cfg)   # (Bd, N16, 128) padded
    rgb_fea_1_16 = pallas_mlp16_norm1_mlp1(rgb_fea_1_16, pp, cfg)       # (B , N16, 128) padded

    rgb_fea = rgb_fea_1_16[-4:]                                         # (4, N16, 128) padded
    # norm + mlp_s reads the rgb / depth 64-ch halves as two inputs (channel concat fused away)
    mixed = pallas_norm_mlps(rgb_fea_1_16[:-4], depth_fea_1_16, pp, cfg)
    rgb_fea_1_16 = jnp.concatenate([mixed, rgb_fea], axis=0)[..., :ed]  # (B, N16, ed)

    # TODO(synk): Transformer / token_Transformer / Decoder sources not provided;
    # outputs_saliency / outputs_contour / task_prompt_total1 cannot be reproduced.
    fused_tokens = rgb_fea_1_16
    outputs_saliency = outputs_contour = outputs_saliency_s = outputs_contour_s = None
    task_prompt_total1 = None

    # ---- prompt projection heads: all 6 heads in ONE fused Pallas kernel ----
    domain_prompt_total, task_prompt_total2 = _prompt_heads_call(pp, cfg)

    aux = dict(fused_tokens=fused_tokens,
               rgb_fea_1_32=rgb_fea_1_32,
               depth_fea_1_32=depth_fea_1_32)
    return (outputs_saliency, outputs_contour, outputs_saliency_s, outputs_contour_s,
            domain_prompt_total, task_prompt_total2, task_prompt_total1, aux)


# -----------------------------------------------------------------------------
if __name__ == "__main__":
    key = jax.random.PRNGKey(0)
    kp, ki, kd = jax.random.split(key, 3)
    raw_params = init_params(CFG, kp)
    pp = preprocess_params(raw_params, CFG)   # one-time: pad / split / stack / bf16-cast

    bs, S = CFG["batch_size"], CFG["img_size"]
    image_Input = jax.random.normal(ki, (bs, 3, S, S), jnp.float32)   # NCHW, like PyTorch
    depth_Input = jax.random.normal(kd, (bs, 3, S, S), jnp.float32)

    fwd = jax.jit(lambda p, img, dep: image_depth_net_forward(p, CFG, img, dep))
    out = fwd(pp, image_Input, depth_Input)
    jax.block_until_ready(jax.tree_util.tree_leaves(out))

    print("KERNEL_OK")
</pallas_src>

<mosaic_0001>
module attributes {stable_mosaic.version = 11 : i64} {
  func.func @_prompt_heads_kernel(%arg0: memref<6x2x16xf32, #tpu.memory_space<vmem>>, %arg1: memref<6x2x32xf32, #tpu.memory_space<vmem>>, %arg2: memref<6x2x64xf32, #tpu.memory_space<vmem>>, %arg3: memref<6x2x128xf32, #tpu.memory_space<vmem>>, %arg4: memref<6x16x64xf32, #tpu.memory_space<vmem>>, %arg5: memref<6x1x64xf32, #tpu.memory_space<vmem>>, %arg6: memref<6x32x64xf32, #tpu.memory_space<vmem>>, %arg7: memref<6x1x64xf32, #tpu.memory_space<vmem>>, %arg8: memref<6x128x64xf32, #tpu.memory_space<vmem>>, %arg9: memref<6x1x64xf32, #tpu.memory_space<vmem>>, %arg10: memref<6x256x128xf32, #tpu.memory_space<vmem>>, %arg11: memref<6x1x128xf32, #tpu.memory_space<vmem>>, %arg12: memref<6x2x1xf32, #tpu.memory_space<vmem>>, %arg13: memref<6x128xf32, #tpu.memory_space<vmem>>) attributes {dimension_semantics = [], scalar_prefetch = 0 : i64, scratch_operands = 0 : i64, tpu.core_type = #tpu.core_type<tc>} {
    %0 = tpu.iota {dimensions = array<i32: 0>} : vector<6x1xi32>
    %cst = arith.constant 0.000000e+00 : f32
    %1 = vector.broadcast %cst : f32 to vector<6x128xf32>
    %c0 = arith.constant 0 : index
    %c0_0 = arith.constant 0 : index
    %c0_1 = arith.constant 0 : index
    %2 = vector.load %arg0[%c0, %c0_0, %c0_1] : memref<6x2x16xf32, #tpu.memory_space<vmem>>, vector<1x2x16xf32>
    %3 = vector.shape_cast %2 : vector<1x2x16xf32> to vector<2x16xf32>
    %c0_2 = arith.constant 0 : index
    %c0_3 = arith.constant 0 : index
    %c0_4 = arith.constant 0 : index
    %4 = vector.load %arg4[%c0_2, %c0_3, %c0_4] : memref<6x16x64xf32, #tpu.memory_space<vmem>>, vector<1x16x64xf32>
    %5 = vector.shape_cast %4 : vector<1x16x64xf32> to vector<16x64xf32>
    %cst_5 = arith.constant dense<0.000000e+00> : vector<2x64xf32>
    %6 = tpu.matmul %3, %5, %cst_5 {dimension_numbers = #tpu.dot_dimension_numbers<[1], [0], [0], [1], [0, 0, 1, 1], [], []>} : vector<2x16xf32>, vector<16x64xf32>, vector<2x64xf32> -> vector<2x64xf32>
    %c0_6 = arith.constant 0 : index
    %c0_7 = arith.constant 0 : index
    %c0_8 = arith.constant 0 : index
    %7 = vector.load %arg5[%c0_6, %c0_7, %c0_8] : memref<6x1x64xf32, #tpu.memory_space<vmem>>, vector<1x1x64xf32>
    %8 = vector.shape_cast %7 : vector<1x1x64xf32> to vector<1x64xf32>
    %9 = vector.broadcast %8 : vector<1x64xf32> to vector<2x64xf32>
    %10 = arith.addf %6, %9 : vector<2x64xf32>
    %c0_9 = arith.constant 0 : index
    %c0_10 = arith.constant 0 : index
    %c0_11 = arith.constant 0 : index
    %11 = vector.load %arg1[%c0_9, %c0_10, %c0_11] : memref<6x2x32xf32, #tpu.memory_space<vmem>>, vector<1x2x32xf32>
    %12 = vector.shape_cast %11 : vector<1x2x32xf32> to vector<2x32xf32>
    %c0_12 = arith.constant 0 : index
    %c0_13 = arith.constant 0 : index
    %c0_14 = arith.constant 0 : index
    %13 = vector.load %arg6[%c0_12, %c0_13, %c0_14] : memref<6x32x64xf32, #tpu.memory_space<vmem>>, vector<1x32x64xf32>
    %14 = vector.shape_cast %13 : vector<1x32x64xf32> to vector<32x64xf32>
    %cst_15 = arith.constant dense<0.000000e+00> : vector<2x64xf32>
    %15 = tpu.matmul %12, %14, %cst_15 {dimension_numbers = #tpu.dot_dimension_numbers<[1], [0], [0], [1], [0, 0, 1, 1], [], []>} : vector<2x32xf32>, vector<32x64xf32>, vector<2x64xf32> -> vector<2x64xf32>
    %c0_16 = arith.constant 0 : index
    %c0_17 = arith.constant 0 : index
    %c0_18 = arith.constant 0 : index
    %16 = vector.load %arg7[%c0_16, %c0_17, %c0_18] : memref<6x1x64xf32, #tpu.memory_space<vmem>>, vector<1x1x64xf32>
    %17 = vector.shape_cast %16 : vector<1x1x64xf32> to vector<1x64xf32>
    %18 = vector.broadcast %17 : vector<1x64xf32> to vector<2x64xf32>
    %19 = arith.addf %15, %18 : vector<2x64xf32>
    %c0_19 = arith.constant 0 : index
    %c0_20 = arith.constant 0 : index
    %c0_21 = arith.constant 0 : index
    %20 = vector.load %arg3[%c0_19, %c0_20, %c0_21] : memref<6x2x128xf32, #tpu.memory_space<vmem>>, vector<1x2x128xf32>
    %21 = vector.shape_cast %20 : vector<1x2x128xf32> to vector<2x128xf32>
    %c0_22 = arith.constant 0 : index
    %c0_23 = arith.constant 0 : index
    %c0_24 = arith.constant 0 : index
    %22 = vector.load %arg8[%c0_22, %c0_23, %c0_24] : memref<6x128x64xf32, #tpu.memory_space<vmem>>, vector<1x128x64xf32>
    %23 = vector.shape_cast %22 : vector<1x128x64xf32> to vector<128x64xf32>
    %cst_25 = arith.constant dense<0.000000e+00> : vector<2x64xf32>
    %24 = tpu.matmul %21, %23, %cst_25 {dimension_numbers = #tpu.dot_dimension_numbers<[1], [0], [0], [1], [0, 0, 1, 1], [], []>} : vector<2x128xf32>, vector<128x64xf32>, vector<2x64xf32> -> vector<2x64xf32>
    %c0_26 = arith.constant 0 : index
    %c0_27 = arith.constant 0 : index
    %c0_28 = arith.constant 0 : index
    %25 = vector.load %arg9[%c0_26, %c0_27, %c0_28] : memref<6x1x64xf32, #tpu.memory_space<vmem>>, vector<1x1x64xf32>
    %26 = vector.shape_cast %25 : vector<1x1x64xf32> to vector<1x64xf32>
    %27 = vector.broadcast %26 : vector<1x64xf32> to vector<2x64xf32>
    %28 = arith.addf %24, %27 : vector<2x64xf32>
    %c0_29 = arith.constant 0 : index
    %c0_30 = arith.constant 0 : index
    %c0_31 = arith.constant 0 : index
    %29 = vector.load %arg10[%c0_29, %c0_30, %c0_31] : memref<6x256x128xf32, #tpu.memory_space<vmem>>, vector<1x256x128xf32>
    %30 = vector.shape_cast %29 : vector<1x256x128xf32> to vector<256x128xf32>
    %31 = vector.extract_strided_slice %30 {offsets = [0, 0], sizes = [64, 128], strides = [1, 1]} : vector<256x128xf32> to vector<64x128xf32>
    %cst_32 = arith.constant dense<0.000000e+00> : vector<2x128xf32>
    %32 = tpu.matmul %10, %31, %cst_32 {dimension_numbers = #tpu.dot_dimension_numbers<[1], [0], [0], [1], [0, 0, 1, 1], [], []>} : vector<2x64xf32>, vector<64x128xf32>, vector<2x128xf32> -> vector<2x128xf32>
    %33 = vector.extract_strided_slice %30 {offsets = [64, 0], sizes = [64, 128], strides = [1, 1]} : vector<256x128xf32> to vector<64x128xf32>
    %cst_33 = arith.constant dense<0.000000e+00> : vector<2x128xf32>
    %34 = tpu.matmul %19, %33, %cst_33 {dimension_numbers = #tpu.dot_dimension_numbers<[1], [0], [0], [1], [0, 0, 1, 1], [], []>} : vector<2x64xf32>, vector<64x128xf32>, vector<2x128xf32> -> vector<2x128xf32>
    %35 = arith.addf %32, %34 : vector<2x128xf32>
    %c0_34 = arith.constant 0 : index
    %c0_35 = arith.constant 0 : index
    %c0_36 = arith.constant 0 : index
    %36 = vector.load %arg2[%c0_34, %c0_35, %c0_36] : memref<6x2x64xf32, #tpu.memory_space<vmem>>, vector<1x2x64xf32>
    %37 = vector.shape_cast %36 : vector<1x2x64xf32> to vector<2x64xf32>
    %38 = vector.extract_strided_slice %30 {offsets = [128, 0], sizes = [64, 128], strides = [1, 1]} : vector<256x128xf32> to vector<64x128xf32>
    %cst_37 = arith.constant dense<0.000000e+00> : vector<2x128xf32>
    %39 = tpu.matmul %37, %38, %cst_37 {dimension_numbers = #tpu.dot_dimension_numbers<[1], [0], [0], [1], [0, 0, 1, 1], [], []>} : vector<2x64xf32>, vector<64x128xf32>, vector<2x128xf32> -> vector<2x128xf32>
    %40 = arith.addf %35, %39 : vector<2x128xf32>
    %41 = vector.extract_strided_slice %30 {offsets = [192, 0], sizes = [64, 128], strides = [1, 1]} : vector<256x128xf32> to vector<64x128xf32>
    %cst_38 = arith.constant dense<0.000000e+00> : vector<2x128xf32>
    %42 = tpu.matmul %28, %41, %cst_38 {dimension_numbers = #tpu.dot_dimension_numbers<[1], [0], [0], [1], [0, 0, 1, 1], [], []>} : vector<2x64xf32>, vector<64x128xf32>, vector<2x128xf32> -> vector<2x128xf32>
    %43 = arith.addf %40, %42 : vector<2x128xf32>
    %c0_39 = arith.constant 0 : index
    %c0_40 = arith.constant 0 : index
    %c0_41 = arith.constant 0 : index
    %44 = vector.load %arg11[%c0_39, %c0_40, %c0_41] : memref<6x1x128xf32, #tpu.memory_space<vmem>>, vector<1x1x128xf32>
    %45 = vector.shape_cast %44 : vector<1x1x128xf32> to vector<1x128xf32>
    %46 = vector.broadcast %45 : vector<1x128xf32> to vector<2x128xf32>
    %47 = arith.addf %43, %46 : vector<2x128xf32>
    %c0_42 = arith.constant 0 : index
    %c0_43 = arith.constant 0 : index
    %c0_44 = arith.constant 0 : index
    %48 = vector.load %arg12[%c0_42, %c0_43, %c0_44] : memref<6x2x1xf32, #tpu.memory_space<vmem>>, vector<1x2x1xf32>
    %49 = vector.shape_cast %48 : vector<1x2x1xf32> to vector<2x1xf32>
    %50 = vector.broadcast %49 : vector<2x1xf32> to vector<2x128xf32>
    %51 = arith.mulf %47, %50 : vector<2x128xf32>
    %cst_45 = arith.constant dense<0.000000e+00> : vector<128xf32>
    %52 = vector.multi_reduction <add>, %51, %cst_45 [0] : vector<2x128xf32> to vector<128xf32>
    %53 = vector.shape_cast %52 : vector<128xf32> to vector<1x128xf32>
    %c0_i32 = arith.constant 0 : i32
    %54 = vector.broadcast %c0_i32 : i32 to vector<6x1xi32>
    %55 = arith.cmpi eq, %0, %54 : vector<6x1xi32>
    %cst_46 = arith.constant 0.000000e+00 : f32
    %56 = vector.shape_cast %55 : vector<6x1xi1> to vector<6x1xi1>
    %57 = vector.broadcast %56 : vector<6x1xi1> to vector<6x128xi1>
    %58 = vector.shape_cast %53 : vector<1x128xf32> to vector<1x128xf32>
    %59 = vector.broadcast %58 : vector<1x128xf32> to vector<6x128xf32>
    %60 = vector.broadcast %cst_46 : f32 to vector<6x128xf32>
    %61 = arith.select %57, %59, %60 : vector<6x128xi1>, vector<6x128xf32>
    %62 = arith.addf %1, %61 : vector<6x128xf32>
    %c1 = arith.constant 1 : index
    %c0_47 = arith.constant 0 : index
    %c0_48 = arith.constant 0 : index
    %63 = vector.load %arg0[%c1, %c0_47, %c0_48] : memref<6x2x16xf32, #tpu.memory_space<vmem>>, vector<1x2x16xf32>
    %64 = vector.shape_cast %63 : vector<1x2x16xf32> to vector<2x16xf32>
    %c1_49 = arith.constant 1 : index
    %c0_50 = arith.constant 0 : index
    %c0_51 = arith.constant 0 : index
    %65 = vector.load %arg4[%c1_49, %c0_50, %c0_51] : memref<6x16x64xf32, #tpu.memory_space<vmem>>, vector<1x16x64xf32>
    %66 = vector.shape_cast %65 : vector<1x16x64xf32> to vector<16x64xf32>
    %cst_52 = arith.constant dense<0.000000e+00> : vector<2x64xf32>
    %67 = tpu.matmul %64, %66, %cst_52 {dimension_numbers = #tpu.dot_dimension_numbers<[1], [0], [0], [1], [0, 0, 1, 1], [], []>} : vector<2x16xf32>, vector<16x64xf32>, vector<2x64xf32> -> vector<2x64xf32>
    %c1_53 = arith.constant 1 : index
    %c0_54 = arith.constant 0 : index
    %c0_55 = arith.constant 0 : index
    %68 = vector.load %arg5[%c1_53, %c0_54, %c0_55] : memref<6x1x64xf32, #tpu.memory_space<vmem>>, vector<1x1x64xf32>
    %69 = vector.shape_cast %68 : vector<1x1x64xf32> to vector<1x64xf32>
    %70 = vector.broadcast %69 : vector<1x64xf32> to vector<2x64xf32>
    %71 = arith.addf %67, %70 : vector<2x64xf32>
    %c1_56 = arith.constant 1 : index
    %c0_57 = arith.constant 0 : index
    %c0_58 = arith.constant 0 : index
    %72 = vector.load %arg1[%c1_56, %c0_57, %c0_58] : memref<6x2x32xf32, #tpu.memory_space<vmem>>, vector<1x2x32xf32>
    %73 = vector.shape_cast %72 : vector<1x2x32xf32> to vector<2x32xf32>
    %c1_59 = arith.constant 1 : index
    %c0_60 = arith.constant 0 : index
    %c0_61 = arith.constant 0 : index
    %74 = vector.load %arg6[%c1_59, %c0_60, %c0_61] : memref<6x32x64xf32, #tpu.memory_space<vmem>>, vector<1x32x64xf32>
    %75 = vector.shape_cast %74 : vector<1x32x64xf32> to vector<32x64xf32>
    %cst_62 = arith.constant dense<0.000000e+00> : vector<2x64xf32>
    %76 = tpu.matmul %73, %75, %cst_62 {dimension_numbers = #tpu.dot_dimension_numbers<[1], [0], [0], [1], [0, 0, 1, 1], [], []>} : vector<2x32xf32>, vector<32x64xf32>, vector<2x64xf32> -> vector<2x64xf32>
    %c1_63 = arith.constant 1 : index
    %c0_64 = arith.constant 0 : index
    %c0_65 = arith.constant 0 : index
    %77 = vector.load %arg7[%c1_63, %c0_64, %c0_65] : memref<6x1x64xf32, #tpu.memory_space<vmem>>, vector<1x1x64xf32>
    %78 = vector.shape_cast %77 : vector<1x1x64xf32> to vector<1x64xf32>
    %79 = vector.broadcast %78 : vector<1x64xf32> to vector<2x64xf32>
    %80 = arith.addf %76, %79 : vector<2x64xf32>
    %c1_66 = arith.constant 1 : index
    %c0_67 = arith.constant 0 : index
    %c0_68 = arith.constant 0 : index
    %81 = vector.load %arg3[%c1_66, %c0_67, %c0_68] : memref<6x2x128xf32, #tpu.memory_space<vmem>>, vector<1x2x128xf32>
    %82 = vector.shape_cast %81 : vector<1x2x128xf32> to vector<2x128xf32>
    %c1_69 = arith.constant 1 : index
    %c0_70 = arith.constant 0 : index
    %c0_71 = arith.constant 0 : index
    %83 = vector.load %arg8[%c1_69, %c0_70, %c0_71] : memref<6x128x64xf32, #tpu.memory_space<vmem>>, vector<1x128x64xf32>
    %84 = vector.shape_cast %83 : vector<1x128x64xf32> to vector<128x64xf32>
    %cst_72 = arith.constant dense<0.000000e+00> : vector<2x64xf32>
    %85 = tpu.matmul %82, %84, %cst_72 {dimension_numbers = #tpu.dot_dimension_numbers<[1], [0], [0], [1], [0, 0, 1, 1], [], []>} : vector<2x128xf32>, vector<128x64xf32>, vector<2x64xf32> -> vector<2x64xf32>
    %c1_73 = arith.constant 1 : index
    %c0_74 = arith.constant 0 : index
    %c0_75 = arith.constant 0 : index
    %86 = vector.load %arg9[%c1_73, %c0_74, %c0_75] : memref<6x1x64xf32, #tpu.memory_space<vmem>>, vector<1x1x64xf32>
    %87 = vector.shape_cast %86 : vector<1x1x64xf32> to vector<1x64xf32>
    %88 = vector.broadcast %87 : vector<1x64xf32> to vector<2x64xf32>
    %89 = arith.addf %85, %88 : vector<2x64xf32>
    %c1_76 = arith.constant 1 : index
    %c0_77 = arith.constant 0 : index
    %c0_78 = arith.constant 0 : index
    %90 = vector.load %arg10[%c1_76, %c0_77, %c0_78] : memref<6x256x128xf32, #tpu.memory_space<vmem>>, vector<1x256x128xf32>
    %91 = vector.shape_cast %90 : vector<1x256x128xf32> to vector<256x128xf32>
    %92 = vector.extract_strided_slice %91 {offsets = [0, 0], sizes = [64, 128], strides = [1, 1]} : vector<256x128xf32> to vector<64x128xf32>
    %cst_79 = arith.constant dense<0.000000e+00> : vector<2x128xf32>
    %93 = tpu.matmul %71, %92, %cst_79 {dimension_numbers = #tpu.dot_dimension_numbers<[1], [0], [0], [1], [0, 0, 1, 1], [], []>} : vector<2x64xf32>, vector<64x128xf32>, vector<2x128xf32> -> vector<2x128xf32>
    %94 = vector.extract_strided_slice %91 {offsets = [64, 0], sizes = [64, 128], strides = [1, 1]} : vector<256x128xf32> to vector<64x128xf32>
    %cst_80 = arith.constant dense<0.000000e+00> : vector<2x128xf32>
    %95 = tpu.matmul %80, %94, %cst_80 {dimension_numbers = #tpu.dot_dimension_numbers<[1], [0], [0], [1], [0, 0, 1, 1], [], []>} : vector<2x64xf32>, vector<64x128xf32>, vector<2x128xf32> -> vector<2x128xf32>
    %96 = arith.addf %93, %95 : vector<2x128xf32>
    %c1_81 = arith.constant 1 : index
    %c0_82 = arith.constant 0 : index
    %c0_83 = arith.constant 0 : index
    %97 = vector.load %arg2[%c1_81, %c0_82, %c0_83] : memref<6x2x64xf32, #tpu.memory_space<vmem>>, vector<1x2x64xf32>
    %98 = vector.shape_cast %97 : vector<1x2x64xf32> to vector<2x64xf32>
    %99 = vector.extract_strided_slice %91 {offsets = [128, 0], sizes = [64, 128], strides = [1, 1]} : vector<256x128xf32> to vector<64x128xf32>
    %cst_84 = arith.constant dense<0.000000e+00> : vector<2x128xf32>
    %100 = tpu.matmul %98, %99, %cst_84 {dimension_numbers = #tpu.dot_dimension_numbers<[1], [0], [0], [1], [0, 0, 1, 1], [], []>} : vector<2x64xf32>, vector<64x128xf32>, vector<2x128xf32> -> vector<2x128xf32>
    %101 = arith.addf %96, %100 : vector<2x128xf32>
    %102 = vector.extract_strided_slice %91 {offsets = [192, 0], sizes = [64, 128], strides = [1, 1]} : vector<256x128xf32> to vector<64x128xf32>
    %cst_85 = arith.constant dense<0.000000e+00> : vector<2x128xf32>
    %103 = tpu.matmul %89, %102, %cst_85 {dimension_numbers = #tpu.dot_dimension_numbers<[1], [0], [0], [1], [0, 0, 1, 1], [], []>} : vector<2x64xf32>, vector<64x128xf32>, vector<2x128xf32> -> vector<2x128xf32>
    %104 = arith.addf %101, %103 : vector<2x128xf32>
    %c1_86 = arith.constant 1 : index
    %c0_87 = arith.constant 0 : index
    %c0_88 = arith.constant 0 : index
    %105 = vector.load %arg11[%c1_86, %c0_87, %c0_88] : memref<6x1x128xf32, #tpu.memory_space<vmem>>, vector<1x1x128xf32>
    %106 = vector.shape_cast %105 : vector<1x1x128xf32> to vector<1x128xf32>
    %107 = vector.broadcast %106 : vector<1x128xf32> to vector<2x128xf32>
    %108 = arith.addf %104, %107 : vector<2x128xf32>
    %c1_89 = arith.constant 1 : index
    %c0_90 = arith.constant 0 : index
    %c0_91 = arith.constant 0 : index
    %109 = vector.load %arg12[%c1_89, %c0_90, %c0_91] : memref<6x2x1xf32, #tpu.memory_space<vmem>>, vector<1x2x1xf32>
    %110 = vector.shape_cast %109 : vector<1x2x1xf32> to vector<2x1xf32>
    %111 = vector.broadcast %110 : vector<2x1xf32> to vector<2x128xf32>
    %112 = arith.mulf %108, %111 : vector<2x128xf32>
    %cst_92 = arith.constant dense<0.000000e+00> : vector<128xf32>
    %113 = vector.multi_reduction <add>, %112, %cst_92 [0] : vector<2x128xf32> to vector<128xf32>
    %114 = vector.shape_cast %113 : vector<128xf32> to vector<1x128xf32>
    %c1_i32 = arith.constant 1 : i32
    %115 = vector.broadcast %c1_i32 : i32 to vector<6x1xi32>
    %116 = arith.cmpi eq, %0, %115 : vector<6x1xi32>
    %cst_93 = arith.constant 0.000000e+00 : f32
    %117 = vector.shape_cast %116 : vector<6x1xi1> to vector<6x1xi1>
    %118 = vector.broadcast %117 : vector<6x1xi1> to vector<6x128xi1>
    %119 = vector.shape_cast %114 : vector<1x128xf32> to vector<1x128xf32>
    %120 = vector.broadcast %119 : vector<1x128xf32> to vector<6x128xf32>
    %121 = vector.broadcast %cst_93 : f32 to vector<6x128xf32>
    %122 = arith.select %118, %120, %121 : vector<6x128xi1>, vector<6x128xf32>
    %123 = arith.addf %62, %122 : vector<6x128xf32>
    %c2 = arith.constant 2 : index
    %c0_94 = arith.constant 0 : index
    %c0_95 = arith.constant 0 : index
    %124 = vector.load %arg0[%c2, %c0_94, %c0_95] : memref<6x2x16xf32, #tpu.memory_space<vmem>>, vector<1x2x16xf32>
    %125 = vector.shape_cast %124 : vector<1x2x16xf32> to vector<2x16xf32>
    %c2_96 = arith.constant 2 : index
    %c0_97 = arith.constant 0 : index
    %c0_98 = arith.constant 0 : index
    %126 = vector.load %arg4[%c2_96, %c0_97, %c0_98] : memref<6x16x64xf32, #tpu.memory_space<vmem>>, vector<1x16x64xf32>
    %127 = vector.shape_cast %126 : vector<1x16x64xf32> to vector<16x64xf32>
    %cst_99 = arith.constant dense<0.000000e+00> : vector<2x64xf32>
    %128 = tpu.matmul %125, %127, %cst_99 {dimension_numbers = #tpu.dot_dimension_numbers<[1], [0], [0], [1], [0, 0, 1, 1], [], []>} : vector<2x16xf32>, vector<16x64xf32>, vector<2x64xf32> -> vector<2x64xf32>
    %c2_100 = arith.constant 2 : index
    %c0_101 = arith.constant 0 : index
    %c0_102 = arith.constant 0 : index
    %129 = vector.load %arg5[%c2_100, %c0_101, %c0_102] : memref<6x1x64xf32, #tpu.memory_space<vmem>>, vector<1x1x64xf32>
    %130 = vector.shape_cast %129 : vector<1x1x64xf32> to vector<1x64xf32>
    %131 = vector.broadcast %130 : vector<1x64xf32> to vector<2x64xf32>
    %132 = arith.addf %128, %131 : vector<2x64xf32>
    %c2_103 = arith.constant 2 : index
    %c0_104 = arith.constant 0 : index
    %c0_105 = arith.constant 0 : index
    %133 = vector.load %arg1[%c2_103, %c0_104, %c0_105] : memref<6x2x32xf32, #tpu.memory_space<vmem>>, vector<1x2x32xf32>
    %134 = vector.shape_cast %133 : vector<1x2x32xf32> to vector<2x32xf32>
    %c2_106 = arith.constant 2 : index
    %c0_107 = arith.constant 0 : index
    %c0_108 = arith.constant 0 : index
    %135 = vector.load %arg6[%c2_106, %c0_107, %c0_108] : memref<6x32x64xf32, #tpu.memory_space<vmem>>, vector<1x32x64xf32>
    %136 = vector.shape_cast %135 : vector<1x32x64xf32> to vector<32x64xf32>
    %cst_109 = arith.constant dense<0.000000e+00> : vector<2x64xf32>
    %137 = tpu.matmul %134, %136, %cst_109 {dimension_numbers = #tpu.dot_dimension_numbers<[1], [0], [0], [1], [0, 0, 1, 1], [], []>} : vector<2x32xf32>, vector<32x64xf32>, vector<2x64xf32> -> vector<2x64xf32>
    %c2_110 = arith.constant 2 : index
    %c0_111 = arith.constant 0 : index
    %c0_112 = arith.constant 0 : index
    %138 = vector.load %arg7[%c2_110, %c0_111, %c0_112] : memref<6x1x64xf32, #tpu.memory_space<vmem>>, vector<1x1x64xf32>
    %139 = vector.shape_cast %138 : vector<1x1x64xf32> to vector<1x64xf32>
    %140 = vector.broadcast %139 : vector<1x64xf32> to vector<2x64xf32>
    %141 = arith.addf %137, %140 : vector<2x64xf32>
    %c2_113 = arith.constant 2 : index
    %c0_114 = arith.constant 0 : index
    %c0_115 = arith.constant 0 : index
    %142 = vector.load %arg3[%c2_113, %c0_114, %c0_115] : memref<6x2x128xf32, #tpu.memory_space<vmem>>, vector<1x2x128xf32>
    %143 = vector.shape_cast %142 : vector<1x2x128xf32> to vector<2x128xf32>
    %c2_116 = arith.constant 2 : index
    %c0_117 = arith.constant 0 : index
    %c0_118 = arith.constant 0 : index
    %144 = vector.load %arg8[%c2_116, %c0_117, %c0_118] : memref<6x128x64xf32, #tpu.memory_space<vmem>>, vector<1x128x64xf32>
    %145 = vector.shape_cast %144 : vector<1x128x64xf32> to vector<128x64xf32>
    %cst_119 = arith.constant dense<0.000000e+00> : vector<2x64xf32>
    %146 = tpu.matmul %143, %145, %cst_119 {dimension_numbers = #tpu.dot_dimension_numbers<[1], [0], [0], [1], [0, 0, 1, 1], [], []>} : vector<2x128xf32>, vector<128x64xf32>, vector<2x64xf32> -> vector<2x64xf32>
    %c2_120 = arith.constant 2 : index
    %c0_121 = arith.constant 0 : index
    %c0_122 = arith.constant 0 : index
    %147 = vector.load %arg9[%c2_120, %c0_121, %c0_122] : memref<6x1x64xf32, #tpu.memory_space<vmem>>, vector<1x1x64xf32>
    %148 = vector.shape_cast %147 : vector<1x1x64xf32> to vector<1x64xf32>
    %149 = vector.broadcast %148 : vector<1x64xf32> to vector<2x64xf32>
    %150 = arith.addf %146, %149 : vector<2x64xf32>
    %c2_123 = arith.constant 2 : index
    %c0_124 = arith.constant 0 : index
    %c0_125 = arith.constant 0 : index
    %151 = vector.load %arg10[%c2_123, %c0_124, %c0_125] : memref<6x256x128xf32, #tpu.memory_space<vmem>>, vector<1x256x128xf32>
    %152 = vector.shape_cast %151 : vector<1x256x128xf32> to vector<256x128xf32>
    %153 = vector.extract_strided_slice %152 {offsets = [0, 0], sizes = [64, 128], strides = [1, 1]} : vector<256x128xf32> to vector<64x128xf32>
    %cst_126 = arith.constant dense<0.000000e+00> : vector<2x128xf32>
    %154 = tpu.matmul %132, %153, %cst_126 {dimension_numbers = #tpu.dot_dimension_numbers<[1], [0], [0], [1], [0, 0, 1, 1], [], []>} : vector<2x64xf32>, vector<64x128xf32>, vector<2x128xf32> -> vector<2x128xf32>
    %155 = vector.extract_strided_slice %152 {offsets = [64, 0], sizes = [64, 128], strides = [1, 1]} : vector<256x128xf32> to vector<64x128xf32>
    %cst_127 = arith.constant dense<0.000000e+00> : vector<2x128xf32>
    %156 = tpu.matmul %141, %155, %cst_127 {dimension_numbers = #tpu.dot_dimension_numbers<[1], [0], [0], [1], [0, 0, 1, 1], [], []>} : vector<2x64xf32>, vector<64x128xf32>, vector<2x128xf32> -> vector<2x128xf32>
    %157 = arith.addf %154, %156 : vector<2x128xf32>
    %c2_128 = arith.constant 2 : index
    %c0_129 = arith.constant 0 : index
    %c0_130 = arith.constant 0 : index
    %158 = vector.load %arg2[%c2_128, %c0_129, %c0_130] : memref<6x2x64xf32, #tpu.memory_space<vmem>>, vector<1x2x64xf32>
    %159 = vector.shape_cast %158 : vector<1x2x64xf32> to vector<2x64xf32>
    %160 = vector.extract_strided_slice %152 {offsets = [128, 0], sizes = [64, 128], strides = [1, 1]} : vector<256x128xf32> to vector<64x128xf32>
    %cst_131 = arith.constant dense<0.000000e+00> : vector<2x128xf32>
    %161 = tpu.matmul %159, %160, %cst_131 {dimension_numbers = #tpu.dot_dimension_numbers<[1], [0], [0], [1], [0, 0, 1, 1], [], []>} : vector<2x64xf32>, vector<64x128xf32>, vector<2x128xf32> -> vector<2x128xf32>
    %162 = arith.addf %157, %161 : vector<2x128xf32>
    %163 = vector.extract_strided_slice %152 {offsets = [192, 0], sizes = [64, 128], strides = [1, 1]} : vector<256x128xf32> to vector<64x128xf32>
    %cst_132 = arith.constant dense<0.000000e+00> : vector<2x128xf32>
    %164 = tpu.matmul %150, %163, %cst_132 {dimension_numbers = #tpu.dot_dimension_numbers<[1], [0], [0], [1], [0, 0, 1, 1], [], []>} : vector<2x64xf32>, vector<64x128xf32>, vector<2x128xf32> -> vector<2x128xf32>
    %165 = arith.addf %162, %164 : vector<2x128xf32>
    %c2_133 = arith.constant 2 : index
    %c0_134 = arith.constant 0 : index
    %c0_135 = arith.constant 0 : index
    %166 = vector.load %arg11[%c2_133, %c0_134, %c0_135] : memref<6x1x128xf32, #tpu.memory_space<vmem>>, vector<1x1x128xf32>
    %167 = vector.shape_cast %166 : vector<1x1x128xf32> to vector<1x128xf32>
    %168 = vector.broadcast %167 : vector<1x128xf32> to vector<2x128xf32>
    %169 = arith.addf %165, %168 : vector<2x128xf32>
    %c2_136 = arith.constant 2 : index
    %c0_137 = arith.constant 0 : index
    %c0_138 = arith.constant 0 : index
    %170 = vector.load %arg12[%c2_136, %c0_137, %c0_138] : memref<6x2x1xf32, #tpu.memory_space<vmem>>, vector<1x2x1xf32>
    %171 = vector.shape_cast %170 : vector<1x2x1xf32> to vector<2x1xf32>
    %172 = vector.broadcast %171 : vector<2x1xf32> to vector<2x128xf32>
    %173 = arith.mulf %169, %172 : vector<2x128xf32>
    %cst_139 = arith.constant dense<0.000000e+00> : vector<128xf32>
    %174 = vector.multi_reduction <add>, %173, %cst_139 [0] : vector<2x128xf32> to vector<128xf32>
    %175 = vector.shape_cast %174 : vector<128xf32> to vector<1x128xf32>
    %c2_i32 = arith.constant 2 : i32
    %176 = vector.broadcast %c2_i32 : i32 to vector<6x1xi32>
    %177 = arith.cmpi eq, %0, %176 : vector<6x1xi32>
    %cst_140 = arith.constant 0.000000e+00 : f32
    %178 = vector.shape_cast %177 : vector<6x1xi1> to vector<6x1xi1>
    %179 = vector.broadcast %178 : vector<6x1xi1> to vector<6x128xi1>
    %180 = vector.shape_cast %175 : vector<1x128xf32> to vector<1x128xf32>
    %181 = vector.broadcast %180 : vector<1x128xf32> to vector<6x128xf32>
    %182 = vector.broadcast %cst_140 : f32 to vector<6x128xf32>
    %183 = arith.select %179, %181, %182 : vector<6x128xi1>, vector<6x128xf32>
    %184 = arith.addf %123, %183 : vector<6x128xf32>
    %c3 = arith.constant 3 : index
    %c0_141 = arith.constant 0 : index
    %c0_142 = arith.constant 0 : index
    %185 = vector.load %arg0[%c3, %c0_141, %c0_142] : memref<6x2x16xf32, #tpu.memory_space<vmem>>, vector<1x2x16xf32>
    %186 = vector.shape_cast %185 : vector<1x2x16xf32> to vector<2x16xf32>
    %c3_143 = arith.constant 3 : index
    %c0_144 = arith.constant 0 : index
    %c0_145 = arith.constant 0 : index
    %187 = vector.load %arg4[%c3_143, %c0_144, %c0_145] : memref<6x16x64xf32, #tpu.memory_space<vmem>>, vector<1x16x64xf32>
    %188 = vector.shape_cast %187 : vector<1x16x64xf32> to vector<16x64xf32>
    %cst_146 = arith.constant dense<0.000000e+00> : vector<2x64xf32>
    %189 = tpu.matmul %186, %188, %cst_146 {dimension_numbers = #tpu.dot_dimension_numbers<[1], [0], [0], [1], [0, 0, 1, 1], [], []>} : vector<2x16xf32>, vector<16x64xf32>, vector<2x64xf32> -> vector<2x64xf32>
    %c3_147 = arith.constant 3 : index
    %c0_148 = arith.constant 0 : index
    %c0_149 = arith.constant 0 : index
    %190 = vector.load %arg5[%c3_147, %c0_148, %c0_149] : memref<6x1x64xf32, #tpu.memory_space<vmem>>, vector<1x1x64xf32>
    %191 = vector.shape_cast %190 : vector<1x1x64xf32> to vector<1x64xf32>
    %192 = vector.broadcast %191 : vector<1x64xf32> to vector<2x64xf32>
    %193 = arith.addf %189, %192 : vector<2x64xf32>
    %c3_150 = arith.constant 3 : index
    %c0_151 = arith.constant 0 : index
    %c0_152 = arith.constant 0 : index
    %194 = vector.load %arg1[%c3_150, %c0_151, %c0_152] : memref<6x2x32xf32, #tpu.memory_space<vmem>>, vector<1x2x32xf32>
    %195 = vector.shape_cast %194 : vector<1x2x32xf32> to vector<2x32xf32>
    %c3_153 = arith.constant 3 : index
    %c0_154 = arith.constant 0 : index
    %c0_155 = arith.constant 0 : index
    %196 = vector.load %arg6[%c3_153, %c0_154, %c0_155] : memref<6x32x64xf32, #tpu.memory_space<vmem>>, vector<1x32x64xf32>
    %197 = vector.shape_cast %196 : vector<1x32x64xf32> to vector<32x64xf32>
    %cst_156 = arith.constant dense<0.000000e+00> : vector<2x64xf32>
    %198 = tpu.matmul %195, %197, %cst_156 {dimension_numbers = #tpu.dot_dimension_numbers<[1], [0], [0], [1], [0, 0, 1, 1], [], []>} : vector<2x32xf32>, vector<32x64xf32>, vector<2x64xf32> -> vector<2x64xf32>
    %c3_157 = arith.constant 3 : index
    %c0_158 = arith.constant 0 : index
    %c0_159 = arith.constant 0 : index
    %199 = vector.load %arg7[%c3_157, %c0_158, %c0_159] : memref<6x1x64xf32, #tpu.memory_space<vmem>>, vector<1x1x64xf32>
    %200 = vector.shape_cast %199 : vector<1x1x64xf32> to vector<1x64xf32>
    %201 = vector.broadcast %200 : vector<1x64xf32> to vector<2x64xf32>
    %202 = arith.addf %198, %201 : vector<2x64xf32>
    %c3_160 = arith.constant 3 : index
    %c0_161 = arith.constant 0 : index
    %c0_162 = arith.constant 0 : index
    %203 = vector.load %arg3[%c3_160, %c0_161, %c0_162] : memref<6x2x128xf32, #tpu.memory_space<vmem>>, vector<1x2x128xf32>
    %204 = vector.shape_cast %203 : vector<1x2x128xf32> to vector<2x128xf32>
    %c3_163 = arith.constant 3 : index
    %c0_164 = arith.constant 0 : index
    %c0_165 = arith.constant 0 : index
    %205 = vector.load %arg8[%c3_163, %c0_164, %c0_165] : memref<6x128x64xf32, #tpu.memory_space<vmem>>, vector<1x128x64xf32>
    %206 = vector.shape_cast %205 : vector<1x128x64xf32> to vector<128x64xf32>
    %cst_166 = arith.constant dense<0.000000e+00> : vector<2x64xf32>
    %207 = tpu.matmul %204, %206, %cst_166 {dimension_numbers = #tpu.dot_dimension_numbers<[1], [0], [0], [1], [0, 0, 1, 1], [], []>} : vector<2x128xf32>, vector<128x64xf32>, vector<2x64xf32> -> vector<2x64xf32>
    %c3_167 = arith.constant 3 : index
    %c0_168 = arith.constant 0 : index
    %c0_169 = arith.constant 0 : index
    %208 = vector.load %arg9[%c3_167, %c0_168, %c0_169] : memref<6x1x64xf32, #tpu.memory_space<vmem>>, vector<1x1x64xf32>
    %209 = vector.shape_cast %208 : vector<1x1x64xf32> to vector<1x64xf32>
    %210 = vector.broadcast %209 : vector<1x64xf32> to vector<2x64xf32>
    %211 = arith.addf %207, %210 : vector<2x64xf32>
    %c3_170 = arith.constant 3 : index
    %c0_171 = arith.constant 0 : index
    %c0_172 = arith.constant 0 : index
    %212 = vector.load %arg10[%c3_170, %c0_171, %c0_172] : memref<6x256x128xf32, #tpu.memory_space<vmem>>, vector<1x256x128xf32>
    %213 = vector.shape_cast %212 : vector<1x256x128xf32> to vector<256x128xf32>
    %214 = vector.extract_strided_slice %213 {offsets = [0, 0], sizes = [64, 128], strides = [1, 1]} : vector<256x128xf32> to vector<64x128xf32>
    %cst_173 = arith.constant dense<0.000000e+00> : vector<2x128xf32>
    %215 = tpu.matmul %193, %214, %cst_173 {dimension_numbers = #tpu.dot_dimension_numbers<[1], [0], [0], [1], [0, 0, 1, 1], [], []>} : vector<2x64xf32>, vector<64x128xf32>, vector<2x128xf32> -> vector<2x128xf32>
    %216 = vector.extract_strided_slice %213 {offsets = [64, 0], sizes = [64, 128], strides = [1, 1]} : vector<256x128xf32> to vector<64x128xf32>
    %cst_174 = arith.constant dense<0.000000e+00> : vector<2x128xf32>
    %217 = tpu.matmul %202, %216, %cst_174 {dimension_numbers = #tpu.dot_dimension_numbers<[1], [0], [0], [1], [0, 0, 1, 1], [], []>} : vector<2x64xf32>, vector<64x128xf32>, vector<2x128xf32> -> vector<2x128xf32>
    %218 = arith.addf %215, %217 : vector<2x128xf32>
    %c3_175 = arith.constant 3 : index
    %c0_176 = arith.constant 0 : index
    %c0_177 = arith.constant 0 : index
    %219 = vector.load %arg2[%c3_175, %c0_176, %c0_177] : memref<6x2x64xf32, #tpu.memory_space<vmem>>, vector<1x2x64xf32>
    %220 = vector.shape_cast %219 : vector<1x2x64xf32> to vector<2x64xf32>
    %221 = vector.extract_strided_slice %213 {offsets = [128, 0], sizes = [64, 128], strides = [1, 1]} : vector<256x128xf32> to vector<64x128xf32>
    %cst_178 = arith.constant dense<0.000000e+00> : vector<2x128xf32>
    %222 = tpu.matmul %220, %221, %cst_178 {dimension_numbers = #tpu.dot_dimension_numbers<[1], [0], [0], [1], [0, 0, 1, 1], [], []>} : vector<2x64xf32>, vector<64x128xf32>, vector<2x128xf32> -> vector<2x128xf32>
    %223 = arith.addf %218, %222 : vector<2x128xf32>
    %224 = vector.extract_strided_slice %213 {offsets = [192, 0], sizes = [64, 128], strides = [1, 1]} : vector<256x128xf32> to vector<64x128xf32>
    %cst_179 = arith.constant dense<0.000000e+00> : vector<2x128xf32>
    %225 = tpu.matmul %211, %224, %cst_179 {dimension_numbers = #tpu.dot_dimension_numbers<[1], [0], [0], [1], [0, 0, 1, 1], [], []>} : vector<2x64xf32>, vector<64x128xf32>, vector<2x128xf32> -> vector<2x128xf32>
    %226 = arith.addf %223, %225 : vector<2x128xf32>
    %c3_180 = arith.constant 3 : index
    %c0_181 = arith.constant 0 : index
    %c0_182 = arith.constant 0 : index
    %227 = vector.load %arg11[%c3_180, %c0_181, %c0_182] : memref<6x1x128xf32, #tpu.memory_space<vmem>>, vector<1x1x128xf32>
    %228 = vector.shape_cast %227 : vector<1x1x128xf32> to vector<1x128xf32>
    %229 = vector.broadcast %228 : vector<1x128xf32> to vector<2x128xf32>
    %230 = arith.addf %226, %229 : vector<2x128xf32>
    %c3_183 = arith.constant 3 : index
    %c0_184 = arith.constant 0 : index
    %c0_185 = arith.constant 0 : index
    %231 = vector.load %arg12[%c3_183, %c0_184, %c0_185] : memref<6x2x1xf32, #tpu.memory_space<vmem>>, vector<1x2x1xf32>
    %232 = vector.shape_cast %231 : vector<1x2x1xf32> to vector<2x1xf32>
    %233 = vector.broadcast %232 : vector<2x1xf32> to vector<2x128xf32>
    %234 = arith.mulf %230, %233 : vector<2x128xf32>
    %cst_186 = arith.constant dense<0.000000e+00> : vector<128xf32>
    %235 = vector.multi_reduction <add>, %234, %cst_186 [0] : vector<2x128xf32> to vector<128xf32>
    %236 = vector.shape_cast %235 : vector<128xf32> to vector<1x128xf32>
    %c3_i32 = arith.constant 3 : i32
    %237 = vector.broadcast %c3_i32 : i32 to vector<6x1xi32>
    %238 = arith.cmpi eq, %0, %237 : vector<6x1xi32>
    %cst_187 = arith.constant 0.000000e+00 : f32
    %239 = vector.shape_cast %238 : vector<6x1xi1> to vector<6x1xi1>
    %240 = vector.broadcast %239 : vector<6x1xi1> to vector<6x128xi1>
    %241 = vector.shape_cast %236 : vector<1x128xf32> to vector<1x128xf32>
    %242 = vector.broadcast %241 : vector<1x128xf32> to vector<6x128xf32>
    %243 = vector.broadcast %cst_187 : f32 to vector<6x128xf32>
    %244 = arith.select %240, %242, %243 : vector<6x128xi1>, vector<6x128xf32>
    %245 = arith.addf %184, %244 : vector<6x128xf32>
    %c4 = arith.constant 4 : index
    %c0_188 = arith.constant 0 : index
    %c0_189 = arith.constant 0 : index
    %246 = vector.load %arg0[%c4, %c0_188, %c0_189] : memref<6x2x16xf32, #tpu.memory_space<vmem>>, vector<1x2x16xf32>
    %247 = vector.shape_cast %246 : vector<1x2x16xf32> to vector<2x16xf32>
    %c4_190 = arith.constant 4 : index
    %c0_191 = arith.constant 0 : index
    %c0_192 = arith.constant 0 : index
    %248 = vector.load %arg4[%c4_190, %c0_191, %c0_192] : memref<6x16x64xf32, #tpu.memory_space<vmem>>, vector<1x16x64xf32>
    %249 = vector.shape_cast %248 : vector<1x16x64xf32> to vector<16x64xf32>
    %cst_193 = arith.constant dense<0.000000e+00> : vector<2x64xf32>
    %250 = tpu.matmul %247, %249, %cst_193 {dimension_numbers = #tpu.dot_dimension_numbers<[1], [0], [0], [1], [0, 0, 1, 1], [], []>} : vector<2x16xf32>, vector<16x64xf32>, vector<2x64xf32> -> vector<2x64xf32>
    %c4_194 = arith.constant 4 : index
    %c0_195 = arith.constant 0 : index
    %c0_196 = arith.constant 0 : index
    %251 = vector.load %arg5[%c4_194, %c0_195, %c0_196] : memref<6x1x64xf32, #tpu.memory_space<vmem>>, vector<1x1x64xf32>
    %252 = vector.shape_cast %251 : vector<1x1x64xf32> to vector<1x64xf32>
    %253 = vector.broadcast %252 : vector<1x64xf32> to vector<2x64xf32>
    %254 = arith.addf %250, %253 : vector<2x64xf32>
    %c4_197 = arith.constant 4 : index
    %c0_198 = arith.constant 0 : index
    %c0_199 = arith.constant 0 : index
    %255 = vector.load %arg1[%c4_197, %c0_198, %c0_199] : memref<6x2x32xf32, #tpu.memory_space<vmem>>, vector<1x2x32xf32>
    %256 = vector.shape_cast %255 : vector<1x2x32xf32> to vector<2x32xf32>
    %c4_200 = arith.constant 4 : index
    %c0_201 = arith.constant 0 : index
    %c0_202 = arith.constant 0 : index
    %257 = vector.load %arg6[%c4_200, %c0_201, %c0_202] : memref<6x32x64xf32, #tpu.memory_space<vmem>>, vector<1x32x64xf32>
    %258 = vector.shape_cast %257 : vector<1x32x64xf32> to vector<32x64xf32>
    %cst_203 = arith.constant dense<0.000000e+00> : vector<2x64xf32>
    %259 = tpu.matmul %256, %258, %cst_203 {dimension_numbers = #tpu.dot_dimension_numbers<[1], [0], [0], [1], [0, 0, 1, 1], [], []>} : vector<2x32xf32>, vector<32x64xf32>, vector<2x64xf32> -> vector<2x64xf32>
    %c4_204 = arith.constant 4 : index
    %c0_205 = arith.constant 0 : index
    %c0_206 = arith.constant 0 : index
    %260 = vector.load %arg7[%c4_204, %c0_205, %c0_206] : memref<6x1x64xf32, #tpu.memory_space<vmem>>, vector<1x1x64xf32>
    %261 = vector.shape_cast %260 : vector<1x1x64xf32> to vector<1x64xf32>
    %262 = vector.broadcast %261 : vector<1x64xf32> to vector<2x64xf32>
    %263 = arith.addf %259, %262 : vector<2x64xf32>
    %c4_207 = arith.constant 4 : index
    %c0_208 = arith.constant 0 : index
    %c0_209 = arith.constant 0 : index
    %264 = vector.load %arg3[%c4_207, %c0_208, %c0_209] : memref<6x2x128xf32, #tpu.memory_space<vmem>>, vector<1x2x128xf32>
    %265 = vector.shape_cast %264 : vector<1x2x128xf32> to vector<2x128xf32>
    %c4_210 = arith.constant 4 : index
    %c0_211 = arith.constant 0 : index
    %c0_212 = arith.constant 0 : index
    %266 = vector.load %arg8[%c4_210, %c0_211, %c0_212] : memref<6x128x64xf32, #tpu.memory_space<vmem>>, vector<1x128x64xf32>
    %267 = vector.shape_cast %266 : vector<1x128x64xf32> to vector<128x64xf32>
    %cst_213 = arith.constant dense<0.000000e+00> : vector<2x64xf32>
    %268 = tpu.matmul %265, %267, %cst_213 {dimension_numbers = #tpu.dot_dimension_numbers<[1], [0], [0], [1], [0, 0, 1, 1], [], []>} : vector<2x128xf32>, vector<128x64xf32>, vector<2x64xf32> -> vector<2x64xf32>
    %c4_214 = arith.constant 4 : index
    %c0_215 = arith.constant 0 : index
    %c0_216 = arith.constant 0 : index
    %269 = vector.load %arg9[%c4_214, %c0_215, %c0_216] : memref<6x1x64xf32, #tpu.memory_space<vmem>>, vector<1x1x64xf32>
    %270 = vector.shape_cast %269 : vector<1x1x64xf32> to vector<1x64xf32>
    %271 = vector.broadcast %270 : vector<1x64xf32> to vector<2x64xf32>
    %272 = arith.addf %268, %271 : vector<2x64xf32>
    %c4_217 = arith.constant 4 : index
    %c0_218 = arith.constant 0 : index
    %c0_219 = arith.constant 0 : index
    %273 = vector.load %arg10[%c4_217, %c0_218, %c0_219] : memref<6x256x128xf32, #tpu.memory_space<vmem>>, vector<1x256x128xf32>
    %274 = vector.shape_cast %273 : vector<1x256x128xf32> to vector<256x128xf32>
    %275 = vector.extract_strided_slice %274 {offsets = [0, 0], sizes = [64, 128], strides = [1, 1]} : vector<256x128xf32> to vector<64x128xf32>
    %cst_220 = arith.constant dense<0.000000e+00> : vector<2x128xf32>
    %276 = tpu.matmul %254, %275, %cst_220 {dimension_numbers = #tpu.dot_dimension_numbers<[1], [0], [0], [1], [0, 0, 1, 1], [], []>} : vector<2x64xf32>, vector<64x128xf32>, vector<2x128xf32> -> vector<2x128xf32>
    %277 = vector.extract_strided_slice %274 {offsets = [64, 0], sizes = [64, 128], strides = [1, 1]} : vector<256x128xf32> to vector<64x128xf32>
    %cst_221 = arith.constant dense<0.000000e+00> : vector<2x128xf32>
    %278 = tpu.matmul %263, %277, %cst_221 {dimension_numbers = #tpu.dot_dimension_numbers<[1], [0], [0], [1], [0, 0, 1, 1], [], []>} : vector<2x64xf32>, vector<64x128xf32>, vector<2x128xf32> -> vector<2x128xf32>
    %279 = arith.addf %276, %278 : vector<2x128xf32>
    %c4_222 = arith.constant 4 : index
    %c0_223 = arith.constant 0 : index
    %c0_224 = arith.constant 0 : index
    %280 = vector.load %arg2[%c4_222, %c0_223, %c0_224] : memref<6x2x64xf32, #tpu.memory_space<vmem>>, vector<1x2x64xf32>
    %281 = vector.shape_cast %280 : vector<1x2x64xf32> to vector<2x64xf32>
    %282 = vector.extract_strided_slice %274 {offsets = [128, 0], sizes = [64, 128], strides = [1, 1]} : vector<256x128xf32> to vector<64x128xf32>
    %cst_225 = arith.constant dense<0.000000e+00> : vector<2x128xf32>
    %283 = tpu.matmul %281, %282, %cst_225 {dimension_numbers = #tpu.dot_dimension_numbers<[1], [0], [0], [1], [0, 0, 1, 1], [], []>} : vector<2x64xf32>, vector<64x128xf32>, vector<2x128xf32> -> vector<2x128xf32>
    %284 = arith.addf %279, %283 : vector<2x128xf32>
    %285 = vector.extract_strided_slice %274 {offsets = [192, 0], sizes = [64, 128], strides = [1, 1]} : vector<256x128xf32> to vector<64x128xf32>
    %cst_226 = arith.constant dense<0.000000e+00> : vector<2x128xf32>
    %286 = tpu.matmul %272, %285, %cst_226 {dimension_numbers = #tpu.dot_dimension_numbers<[1], [0], [0], [1], [0, 0, 1, 1], [], []>} : vector<2x64xf32>, vector<64x128xf32>, vector<2x128xf32> -> vector<2x128xf32>
    %287 = arith.addf %284, %286 : vector<2x128xf32>
    %c4_227 = arith.constant 4 : index
    %c0_228 = arith.constant 0 : index
    %c0_229 = arith.constant 0 : index
    %288 = vector.load %arg11[%c4_227, %c0_228, %c0_229] : memref<6x1x128xf32, #tpu.memory_space<vmem>>, vector<1x1x128xf32>
    %289 = vector.shape_cast %288 : vector<1x1x128xf32> to vector<1x128xf32>
    %290 = vector.broadcast %289 : vector<1x128xf32> to vector<2x128xf32>
    %291 = arith.addf %287, %290 : vector<2x128xf32>
    %c4_230 = arith.constant 4 : index
    %c0_231 = arith.constant 0 : index
    %c0_232 = arith.constant 0 : index
    %292 = vector.load %arg12[%c4_230, %c0_231, %c0_232] : memref<6x2x1xf32, #tpu.memory_space<vmem>>, vector<1x2x1xf32>
    %293 = vector.shape_cast %292 : vector<1x2x1xf32> to vector<2x1xf32>
    %294 = vector.broadcast %293 : vector<2x1xf32> to vector<2x128xf32>
    %295 = arith.mulf %291, %294 : vector<2x128xf32>
    %cst_233 = arith.constant dense<0.000000e+00> : vector<128xf32>
    %296 = vector.multi_reduction <add>, %295, %cst_233 [0] : vector<2x128xf32> to vector<128xf32>
    %297 = vector.shape_cast %296 : vector<128xf32> to vector<1x128xf32>
    %c4_i32 = arith.constant 4 : i32
    %298 = vector.broadcast %c4_i32 : i32 to vector<6x1xi32>
    %299 = arith.cmpi eq, %0, %298 : vector<6x1xi32>
    %cst_234 = arith.constant 0.000000e+00 : f32
    %300 = vector.shape_cast %299 : vector<6x1xi1> to vector<6x1xi1>
    %301 = vector.broadcast %300 : vector<6x1xi1> to vector<6x128xi1>
    %302 = vector.shape_cast %297 : vector<1x128xf32> to vector<1x128xf32>
    %303 = vector.broadcast %302 : vector<1x128xf32> to vector<6x128xf32>
    %304 = vector.broadcast %cst_234 : f32 to vector<6x128xf32>
    %305 = arith.select %301, %303, %304 : vector<6x128xi1>, vector<6x128xf32>
    %306 = arith.addf %245, %305 : vector<6x128xf32>
    %c5 = arith.constant 5 : index
    %c0_235 = arith.constant 0 : index
    %c0_236 = arith.constant 0 : index
    %307 = vector.load %arg0[%c5, %c0_235, %c0_236] : memref<6x2x16xf32, #tpu.memory_space<vmem>>, vector<1x2x16xf32>
    %308 = vector.shape_cast %307 : vector<1x2x16xf32> to vector<2x16xf32>
    %c5_237 = arith.constant 5 : index
    %c0_238 = arith.constant 0 : index
    %c0_239 = arith.constant 0 : index
    %309 = vector.load %arg4[%c5_237, %c0_238, %c0_239] : memref<6x16x64xf32, #tpu.memory_space<vmem>>, vector<1x16x64xf32>
    %310 = vector.shape_cast %309 : vector<1x16x64xf32> to vector<16x64xf32>
    %cst_240 = arith.constant dense<0.000000e+00> : vector<2x64xf32>
    %311 = tpu.matmul %308, %310, %cst_240 {dimension_numbers = #tpu.dot_dimension_numbers<[1], [0], [0], [1], [0, 0, 1, 1], [], []>} : vector<2x16xf32>, vector<16x64xf32>, vector<2x64xf32> -> vector<2x64xf32>
    %c5_241 = arith.constant 5 : index
    %c0_242 = arith.constant 0 : index
    %c0_243 = arith.constant 0 : index
    %312 = vector.load %arg5[%c5_241, %c0_242, %c0_243] : memref<6x1x64xf32, #tpu.memory_space<vmem>>, vector<1x1x64xf32>
    %313 = vector.shape_cast %312 : vector<1x1x64xf32> to vector<1x64xf32>
    %314 = vector.broadcast %313 : vector<1x64xf32> to vector<2x64xf32>
    %315 = arith.addf %311, %314 : vector<2x64xf32>
    %c5_244 = arith.constant 5 : index
    %c0_245 = arith.constant 0 : index
    %c0_246 = arith.constant 0 : index
    %316 = vector.load %arg1[%c5_244, %c0_245, %c0_246] : memref<6x2x32xf32, #tpu.memory_space<vmem>>, vector<1x2x32xf32>
    %317 = vector.shape_cast %316 : vector<1x2x32xf32> to vector<2x32xf32>
    %c5_247 = arith.constant 5 : index
    %c0_248 = arith.constant 0 : index
    %c0_249 = arith.constant 0 : index
    %318 = vector.load %arg6[%c5_247, %c0_248, %c0_249] : memref<6x32x64xf32, #tpu.memory_space<vmem>>, vector<1x32x64xf32>
    %319 = vector.shape_cast %318 : vector<1x32x64xf32> to vector<32x64xf32>
    %cst_250 = arith.constant dense<0.000000e+00> : vector<2x64xf32>
    %320 = tpu.matmul %317, %319, %cst_250 {dimension_numbers = #tpu.dot_dimension_numbers<[1], [0], [0], [1], [0, 0, 1, 1], [], []>} : vector<2x32xf32>, vector<32x64xf32>, vector<2x64xf32> -> vector<2x64xf32>
    %c5_251 = arith.constant 5 : index
    %c0_252 = arith.constant 0 : index
    %c0_253 = arith.constant 0 : index
    %321 = vector.load %arg7[%c5_251, %c0_252, %c0_253] : memref<6x1x64xf32, #tpu.memory_space<vmem>>, vector<1x1x64xf32>
    %322 = vector.shape_cast %321 : vector<1x1x64xf32> to vector<1x64xf32>
    %323 = vector.broadcast %322 : vector<1x64xf32> to vector<2x64xf32>
    %324 = arith.addf %320, %323 : vector<2x64xf32>
    %c5_254 = arith.constant 5 : index
    %c0_255 = arith.constant 0 : index
    %c0_256 = arith.constant 0 : index
    %325 = vector.load %arg3[%c5_254, %c0_255, %c0_256] : memref<6x2x128xf32, #tpu.memory_space<vmem>>, vector<1x2x128xf32>
    %326 = vector.shape_cast %325 : vector<1x2x128xf32> to vector<2x128xf32>
    %c5_257 = arith.constant 5 : index
    %c0_258 = arith.constant 0 : index
    %c0_259 = arith.constant 0 : index
    %327 = vector.load %arg8[%c5_257, %c0_258, %c0_259] : memref<6x128x64xf32, #tpu.memory_space<vmem>>, vector<1x128x64xf32>
    %328 = vector.shape_cast %327 : vector<1x128x64xf32> to vector<128x64xf32>
    %cst_260 = arith.constant dense<0.000000e+00> : vector<2x64xf32>
    %329 = tpu.matmul %326, %328, %cst_260 {dimension_numbers = #tpu.dot_dimension_numbers<[1], [0], [0], [1], [0, 0, 1, 1], [], []>} : vector<2x128xf32>, vector<128x64xf32>, vector<2x64xf32> -> vector<2x64xf32>
    %c5_261 = arith.constant 5 : index
    %c0_262 = arith.constant 0 : index
    %c0_263 = arith.constant 0 : index
    %330 = vector.load %arg9[%c5_261, %c0_262, %c0_263] : memref<6x1x64xf32, #tpu.memory_space<vmem>>, vector<1x1x64xf32>
    %331 = vector.shape_cast %330 : vector<1x1x64xf32> to vector<1x64xf32>
    %332 = vector.broadcast %331 : vector<1x64xf32> to vector<2x64xf32>
    %333 = arith.addf %329, %332 : vector<2x64xf32>
    %c5_264 = arith.constant 5 : index
    %c0_265 = arith.constant 0 : index
    %c0_266 = arith.constant 0 : index
    %334 = vector.load %arg10[%c5_264, %c0_265, %c0_266] : memref<6x256x128xf32, #tpu.memory_space<vmem>>, vector<1x256x128xf32>
    %335 = vector.shape_cast %334 : vector<1x256x128xf32> to vector<256x128xf32>
    %336 = vector.extract_strided_slice %335 {offsets = [0, 0], sizes = [64, 128], strides = [1, 1]} : vector<256x128xf32> to vector<64x128xf32>
    %cst_267 = arith.constant dense<0.000000e+00> : vector<2x128xf32>
    %337 = tpu.matmul %315, %336, %cst_267 {dimension_numbers = #tpu.dot_dimension_numbers<[1], [0], [0], [1], [0, 0, 1, 1], [], []>} : vector<2x64xf32>, vector<64x128xf32>, vector<2x128xf32> -> vector<2x128xf32>
    %338 = vector.extract_strided_slice %335 {offsets = [64, 0], sizes = [64, 128], strides = [1, 1]} : vector<256x128xf32> to vector<64x128xf32>
    %cst_268 = arith.constant dense<0.000000e+00> : vector<2x128xf32>
    %339 = tpu.matmul %324, %338, %cst_268 {dimension_numbers = #tpu.dot_dimension_numbers<[1], [0], [0], [1], [0, 0, 1, 1], [], []>} : vector<2x64xf32>, vector<64x128xf32>, vector<2x128xf32> -> vector<2x128xf32>
    %340 = arith.addf %337, %339 : vector<2x128xf32>
    %c5_269 = arith.constant 5 : index
    %c0_270 = arith.constant 0 : index
    %c0_271 = arith.constant 0 : index
    %341 = vector.load %arg2[%c5_269, %c0_270, %c0_271] : memref<6x2x64xf32, #tpu.memory_space<vmem>>, vector<1x2x64xf32>
    %342 = vector.shape_cast %341 : vector<1x2x64xf32> to vector<2x64xf32>
    %343 = vector.extract_strided_slice %335 {offsets = [128, 0], sizes = [64, 128], strides = [1, 1]} : vector<256x128xf32> to vector<64x128xf32>
    %cst_272 = arith.constant dense<0.000000e+00> : vector<2x128xf32>
    %344 = tpu.matmul %342, %343, %cst_272 {dimension_numbers = #tpu.dot_dimension_numbers<[1], [0], [0], [1], [0, 0, 1, 1], [], []>} : vector<2x64xf32>, vector<64x128xf32>, vector<2x128xf32> -> vector<2x128xf32>
    %345 = arith.addf %340, %344 : vector<2x128xf32>
    %346 = vector.extract_strided_slice %335 {offsets = [192, 0], sizes = [64, 128], strides = [1, 1]} : vector<256x128xf32> to vector<64x128xf32>
    %cst_273 = arith.constant dense<0.000000e+00> : vector<2x128xf32>
    %347 = tpu.matmul %333, %346, %cst_273 {dimension_numbers = #tpu.dot_dimension_numbers<[1], [0], [0], [1], [0, 0, 1, 1], [], []>} : vector<2x64xf32>, vector<64x128xf32>, vector<2x128xf32> -> vector<2x128xf32>
    %348 = arith.addf %345, %347 : vector<2x128xf32>
    %c5_274 = arith.constant 5 : index
    %c0_275 = arith.constant 0 : index
    %c0_276 = arith.constant 0 : index
    %349 = vector.load %arg11[%c5_274, %c0_275, %c0_276] : memref<6x1x128xf32, #tpu.memory_space<vmem>>, vector<1x1x128xf32>
    %350 = vector.shape_cast %349 : vector<1x1x128xf32> to vector<1x128xf32>
    %351 = vector.broadcast %350 : vector<1x128xf32> to vector<2x128xf32>
    %352 = arith.addf %348, %351 : vector<2x128xf32>
    %c5_277 = arith.constant 5 : index
    %c0_278 = arith.constant 0 : index
    %c0_279 = arith.constant 0 : index
    %353 = vector.load %arg12[%c5_277, %c0_278, %c0_279] : memref<6x2x1xf32, #tpu.memory_space<vmem>>, vector<1x2x1xf32>
    %354 = vector.shape_cast %353 : vector<1x2x1xf32> to vector<2x1xf32>
    %355 = vector.broadcast %354 : vector<2x1xf32> to vector<2x128xf32>
    %356 = arith.mulf %352, %355 : vector<2x128xf32>
    %cst_280 = arith.constant dense<0.000000e+00> : vector<128xf32>
    %357 = vector.multi_reduction <add>, %356, %cst_280 [0] : vector<2x128xf32> to vector<128xf32>
    %358 = vector.shape_cast %357 : vector<128xf32> to vector<1x128xf32>
    %c5_i32 = arith.constant 5 : i32
    %359 = vector.broadcast %c5_i32 : i32 to vector<6x1xi32>
    %360 = arith.cmpi eq, %0, %359 : vector<6x1xi32>
    %cst_281 = arith.constant 0.000000e+00 : f32
    %361 = vector.shape_cast %360 : vector<6x1xi1> to vector<6x1xi1>
    %362 = vector.broadcast %361 : vector<6x1xi1> to vector<6x128xi1>
    %363 = vector.shape_cast %358 : vector<1x128xf32> to vector<1x128xf32>
    %364 = vector.broadcast %363 : vector<1x128xf32> to vector<6x128xf32>
    %365 = vector.broadcast %cst_281 : f32 to vector<6x128xf32>
    %366 = arith.select %362, %364, %365 : vector<6x128xi1>, vector<6x128xf32>
    %367 = arith.addf %306, %366 : vector<6x128xf32>
    %c0_282 = arith.constant 0 : index
    %c0_283 = arith.constant 0 : index
    %368 = vector.load %arg13[%c0_282, %c0_283] : memref<6x128xf32, #tpu.memory_space<vmem>>, vector<6x128xf32>
    tpu.vector_store %arg13[%c0_282, %c0_283], %367 {strides = array<i32>} : memref<6x128xf32, #tpu.memory_space<vmem>>, vector<6x128xf32>,
    return
  }
}

module attributes {stable_mosaic.version = 11 : i64} {
  func.func @mlp_ln_mlp_kernel(%arg0: i32, %arg1: memref<48x64xbf16, #tpu.memory_space<vmem>>, %arg2: memref<64x128xbf16, #tpu.memory_space<vmem>>, %arg3: memref<1x128xf32, #tpu.memory_space<vmem>>, %arg4: memref<128x128xbf16, #tpu.memory_space<vmem>>, %arg5: memref<1x128xf32, #tpu.memory_space<vmem>>, %arg6: memref<1x128xf32, #tpu.memory_space<vmem>>, %arg7: memref<1x128xf32, #tpu.memory_space<vmem>>, %arg8: memref<128x128xbf16, #tpu.memory_space<vmem>>, %arg9: memref<1x128xf32, #tpu.memory_space<vmem>>, %arg10: memref<128x128xbf16, #tpu.memory_space<vmem>>, %arg11: memref<1x128xf32, #tpu.memory_space<vmem>>, %arg12: memref<48x128xf32, #tpu.memory_space<vmem>>) attributes {dimension_semantics = [#tpu.dimension_semantics<parallel>], iteration_bounds = array<i64: 1>, scalar_prefetch = 0 : i64, scratch_operands = 0 : i64, tpu.core_type = #tpu.core_type<tc>, window_params = [{transform_indices = @transform_0, window_bounds = array<i64: 48, 64>}, {pipeline_mode = #tpu.pipeline_mode<synchronous>, transform_indices = @transform_1, window_bounds = array<i64: 64, 128>}, {pipeline_mode = #tpu.pipeline_mode<synchronous>, transform_indices = @transform_2, window_bounds = array<i64: 1, 128>}, {pipeline_mode = #tpu.pipeline_mode<synchronous>, transform_indices = @transform_3, window_bounds = array<i64: 128, 128>}, {pipeline_mode = #tpu.pipeline_mode<synchronous>, transform_indices = @transform_4, window_bounds = array<i64: 1, 128>}, {pipeline_mode = #tpu.pipeline_mode<synchronous>, transform_indices = @transform_5, window_bounds = array<i64: 1, 128>}, {pipeline_mode = #tpu.pipeline_mode<synchronous>, transform_indices = @transform_6, window_bounds = array<i64: 1, 128>}, {pipeline_mode = #tpu.pipeline_mode<synchronous>, transform_indices = @transform_7, window_bounds = array<i64: 128, 128>}, {pipeline_mode = #tpu.pipeline_mode<synchronous>, transform_indices = @transform_8, window_bounds = array<i64: 1, 128>}, {pipeline_mode = #tpu.pipeline_mode<synchronous>, transform_indices = @transform_9, window_bounds = array<i64: 128, 128>}, {pipeline_mode = #tpu.pipeline_mode<synchronous>, transform_indices = @transform_10, window_bounds = array<i64: 1, 128>}, {transform_indices = @transform_11, window_bounds = array<i64: 48, 128>}]} {
    %c0 = arith.constant 0 : index
    %c0_0 = arith.constant 0 : index
    %0 = vector.load %arg1[%c0, %c0_0] : memref<48x64xbf16, #tpu.memory_space<vmem>>, vector<48x64xbf16>
    %c0_1 = arith.constant 0 : index
    %c0_2 = arith.constant 0 : index
    %1 = vector.load %arg2[%c0_1, %c0_2] : memref<64x128xbf16, #tpu.memory_space<vmem>>, vector<64x128xbf16>
    %cst = arith.constant dense<0.000000e+00> : vector<48x128xf32>
    %2 = tpu.matmul %0, %1, %cst {dimension_numbers = #tpu.dot_dimension_numbers<[1], [0], [0], [1], [0, 0, 1, 1], [], []>} : vector<48x64xbf16>, vector<64x128xbf16>, vector<48x128xf32> -> vector<48x128xf32>
    %c0_3 = arith.constant 0 : index
    %c0_4 = arith.constant 0 : index
    %3 = vector.load %arg3[%c0_3, %c0_4] : memref<1x128xf32, #tpu.memory_space<vmem>>, vector<1x128xf32>
    %4 = vector.broadcast %3 : vector<1x128xf32> to vector<48x128xf32>
    %5 = arith.addf %2, %4 : vector<48x128xf32>
    %cst_5 = arith.constant 5.000000e-01 : f32
    %6 = vector.broadcast %cst_5 : f32 to vector<48x128xf32>
    %7 = arith.mulf %6, %5 : vector<48x128xf32>
    %cst_6 = arith.constant 4.471500e-02 : f32
    %8 = vector.broadcast %cst_6 : f32 to vector<48x128xf32>
    %9 = arith.mulf %8, %5 : vector<48x128xf32>
    %10 = arith.mulf %9, %5 : vector<48x128xf32>
    %11 = arith.mulf %10, %5 : vector<48x128xf32>
    %12 = arith.addf %5, %11 : vector<48x128xf32>
    %cst_7 = arith.constant 0.797884583 : f32
    %13 = vector.broadcast %cst_7 : f32 to vector<48x128xf32>
    %14 = arith.mulf %13, %12 : vector<48x128xf32>
    %15 = math.tanh %14 : vector<48x128xf32>
    %cst_8 = arith.constant 1.000000e+00 : f32
    %16 = vector.broadcast %cst_8 : f32 to vector<48x128xf32>
    %17 = arith.addf %16, %15 : vector<48x128xf32>
    %18 = arith.mulf %7, %17 : vector<48x128xf32>
    %19 = arith.truncf %18 : vector<48x128xf32> to vector<48x128xbf16>
    %c0_9 = arith.constant 0 : index
    %c0_10 = arith.constant 0 : index
    %20 = vector.load %arg4[%c0_9, %c0_10] : memref<128x128xbf16, #tpu.memory_space<vmem>>, vector<128x128xbf16>
    %cst_11 = arith.constant dense<0.000000e+00> : vector<48x128xf32>
    %21 = tpu.matmul %19, %20, %cst_11 {dimension_numbers = #tpu.dot_dimension_numbers<[1], [0], [0], [1], [0, 0, 1, 1], [], []>} : vector<48x128xbf16>, vector<128x128xbf16>, vector<48x128xf32> -> vector<48x128xf32>
    %c0_12 = arith.constant 0 : index
    %c0_13 = arith.constant 0 : index
    %22 = vector.load %arg5[%c0_12, %c0_13] : memref<1x128xf32, #tpu.memory_space<vmem>>, vector<1x128xf32>
    %23 = vector.broadcast %22 : vector<1x128xf32> to vector<48x128xf32>
    %24 = arith.addf %21, %23 : vector<48x128xf32>
    %cst_14 = arith.constant dense<0.000000e+00> : vector<48xf32>
    %25 = vector.multi_reduction <add>, %24, %cst_14 [1] : vector<48x128xf32> to vector<48xf32>
    %26 = vector.shape_cast %25 : vector<48xf32> to vector<48x1xf32>
    %cst_15 = arith.constant 3.125000e-02 : f32
    %27 = vector.broadcast %cst_15 : f32 to vector<48x1xf32>
    %28 = arith.mulf %26, %27 : vector<48x1xf32>
    %29 = arith.mulf %24, %24 : vector<48x128xf32>
    %cst_16 = arith.constant dense<0.000000e+00> : vector<48xf32>
    %30 = vector.multi_reduction <add>, %29, %cst_16 [1] : vector<48x128xf32> to vector<48xf32>
    %31 = vector.shape_cast %30 : vector<48xf32> to vector<48x1xf32>
    %cst_17 = arith.constant 3.125000e-02 : f32
    %32 = vector.broadcast %cst_17 : f32 to vector<48x1xf32>
    %33 = arith.mulf %31, %32 : vector<48x1xf32>
    %34 = vector.broadcast %28 : vector<48x1xf32> to vector<48x128xf32>
    %35 = arith.subf %24, %34 : vector<48x128xf32>
    %36 = arith.mulf %28, %28 : vector<48x1xf32>
    %37 = arith.subf %33, %36 : vector<48x1xf32>
    %cst_18 = arith.constant 9.99999974E-6 : f32
    %38 = vector.broadcast %cst_18 : f32 to vector<48x1xf32>
    %39 = arith.addf %37, %38 : vector<48x1xf32>
    %40 = math.rsqrt %39 : vector<48x1xf32>
    %41 = vector.broadcast %40 : vector<48x1xf32> to vector<48x128xf32>
    %42 = arith.mulf %35, %41 : vector<48x128xf32>
    %c0_19 = arith.constant 0 : index
    %c0_20 = arith.constant 0 : index
    %43 = vector.load %arg6[%c0_19, %c0_20] : memref<1x128xf32, #tpu.memory_space<vmem>>, vector<1x128xf32>
    %44 = vector.broadcast %43 : vector<1x128xf32> to vector<48x128xf32>
    %45 = arith.mulf %42, %44 : vector<48x128xf32>
    %c0_21 = arith.constant 0 : index
    %c0_22 = arith.constant 0 : index
    %46 = vector.load %arg7[%c0_21, %c0_22] : memref<1x128xf32, #tpu.memory_space<vmem>>, vector<1x128xf32>
    %47 = vector.broadcast %46 : vector<1x128xf32> to vector<48x128xf32>
    %48 = arith.addf %45, %47 : vector<48x128xf32>
    %49 = arith.truncf %48 : vector<48x128xf32> to vector<48x128xbf16>
    %c0_23 = arith.constant 0 : index
    %c0_24 = arith.constant 0 : index
    %50 = vector.load %arg8[%c0_23, %c0_24] : memref<128x128xbf16, #tpu.memory_space<vmem>>, vector<128x128xbf16>
    %cst_25 = arith.constant dense<0.000000e+00> : vector<48x128xf32>
    %51 = tpu.matmul %49, %50, %cst_25 {dimension_numbers = #tpu.dot_dimension_numbers<[1], [0], [0], [1], [0, 0, 1, 1], [], []>} : vector<48x128xbf16>, vector<128x128xbf16>, vector<48x128xf32> -> vector<48x128xf32>
    %c0_26 = arith.constant 0 : index
    %c0_27 = arith.constant 0 : index
    %52 = vector.load %arg9[%c0_26, %c0_27] : memref<1x128xf32, #tpu.memory_space<vmem>>, vector<1x128xf32>
    %53 = vector.broadcast %52 : vector<1x128xf32> to vector<48x128xf32>
    %54 = arith.addf %51, %53 : vector<48x128xf32>
    %cst_28 = arith.constant 5.000000e-01 : f32
    %55 = vector.broadcast %cst_28 : f32 to vector<48x128xf32>
    %56 = arith.mulf %55, %54 : vector<48x128xf32>
    %cst_29 = arith.constant 4.471500e-02 : f32
    %57 = vector.broadcast %cst_29 : f32 to vector<48x128xf32>
    %58 = arith.mulf %57, %54 : vector<48x128xf32>
    %59 = arith.mulf %58, %54 : vector<48x128xf32>
    %60 = arith.mulf %59, %54 : vector<48x128xf32>
    %61 = arith.addf %54, %60 : vector<48x128xf32>
    %cst_30 = arith.constant 0.797884583 : f32
    %62 = vector.broadcast %cst_30 : f32 to vector<48x128xf32>
    %63 = arith.mulf %62, %61 : vector<48x128xf32>
    %64 = math.tanh %63 : vector<48x128xf32>
    %cst_31 = arith.constant 1.000000e+00 : f32
    %65 = vector.broadcast %cst_31 : f32 to vector<48x128xf32>
    %66 = arith.addf %65, %64 : vector<48x128xf32>
    %67 = arith.mulf %56, %66 : vector<48x128xf32>
    %68 = arith.truncf %67 : vector<48x128xf32> to vector<48x128xbf16>
    %c0_32 = arith.constant 0 : index
    %c0_33 = arith.constant 0 : index
    %69 = vector.load %arg10[%c0_32, %c0_33] : memref<128x128xbf16, #tpu.memory_space<vmem>>, vector<128x128xbf16>
    %cst_34 = arith.constant dense<0.000000e+00> : vector<48x128xf32>
    %70 = tpu.matmul %68, %69, %cst_34 {dimension_numbers = #tpu.dot_dimension_numbers<[1], [0], [0], [1], [0, 0, 1, 1], [], []>} : vector<48x128xbf16>, vector<128x128xbf16>, vector<48x128xf32> -> vector<48x128xf32>
    %c0_35 = arith.constant 0 : index
    %c0_36 = arith.constant 0 : index
    %71 = vector.load %arg11[%c0_35, %c0_36] : memref<1x128xf32, #tpu.memory_space<vmem>>, vector<1x128xf32>
    %72 = vector.broadcast %71 : vector<1x128xf32> to vector<48x128xf32>
    %73 = arith.addf %70, %72 : vector<48x128xf32>
    %c0_37 = arith.constant 0 : index
    %c0_38 = arith.constant 0 : index
    %74 = vector.load %arg12[%c0_37, %c0_38] : memref<48x128xf32, #tpu.memory_space<vmem>>, vector<48x128xf32>
    tpu.vector_store %arg12[%c0_37, %c0_38], %73 {strides = array<i32>} : memref<48x128xf32, #tpu.memory_space<vmem>>, vector<48x128xf32>,
    return
  }
  func.func @transform_0(%arg0: i32) -> (i32, i32) {
    %c0_i32 = arith.constant 0 : i32
    %c0_i32_0 = arith.constant 0 : i32
    return %arg0, %c0_i32 : i32, i32
  }
  func.func @transform_1(%arg0: i32) -> (i32, i32) {
    %c0_i32 = arith.constant 0 : i32
    %c0_i32_0 = arith.constant 0 : i32
    %c0_i32_1 = arith.constant 0 : i32
    return %c0_i32, %c0_i32_0 : i32, i32
  }
  func.func @transform_2(%arg0: i32) -> (i32, i32) {
    %c0_i32 = arith.constant 0 : i32
    %c0_i32_0 = arith.constant 0 : i32
    %c0_i32_1 = arith.constant 0 : i32
    return %c0_i32, %c0_i32_0 : i32, i32
  }
  func.func @transform_3(%arg0: i32) -> (i32, i32) {
    %c0_i32 = arith.constant 0 : i32
    %c0_i32_0 = arith.constant 0 : i32
    %c0_i32_1 = arith.constant 0 : i32
    return %c0_i32, %c0_i32_0 : i32, i32
  }
  func.func @transform_4(%arg0: i32) -> (i32, i32) {
    %c0_i32 = arith.constant 0 : i32
    %c0_i32_0 = arith.constant 0 : i32
    %c0_i32_1 = arith.constant 0 : i32
    return %c0_i32, %c0_i32_0 : i32, i32
  }
  func.func @transform_5(%arg0: i32) -> (i32, i32) {
    %c0_i32 = arith.constant 0 : i32
    %c0_i32_0 = arith.constant 0 : i32
    %c0_i32_1 = arith.constant 0 : i32
    return %c0_i32, %c0_i32_0 : i32, i32
  }
  func.func @transform_6(%arg0: i32) -> (i32, i32) {
    %c0_i32 = arith.constant 0 : i32
    %c0_i32_0 = arith.constant 0 : i32
    %c0_i32_1 = arith.constant 0 : i32
    return %c0_i32, %c0_i32_0 : i32, i32
  }
  func.func @transform_7(%arg0: i32) -> (i32, i32) {
    %c0_i32 = arith.constant 0 : i32
    %c0_i32_0 = arith.constant 0 : i32
    %c0_i32_1 = arith.constant 0 : i32
    return %c0_i32, %c0_i32_0 : i32, i32
  }
  func.func @transform_8(%arg0: i32) -> (i32, i32) {
    %c0_i32 = arith.constant 0 : i32
    %c0_i32_0 = arith.constant 0 : i32
    %c0_i32_1 = arith.constant 0 : i32
    return %c0_i32, %c0_i32_0 : i32, i32
  }
  func.func @transform_9(%arg0: i32) -> (i32, i32) {
    %c0_i32 = arith.constant 0 : i32
    %c0_i32_0 = arith.constant 0 : i32
    %c0_i32_1 = arith.constant 0 : i32
    return %c0_i32, %c0_i32_0 : i32, i32
  }
  func.func @transform_10(%arg0: i32) -> (i32, i32) {
    %c0_i32 = arith.constant 0 : i32
    %c0_i32_0 = arith.constant 0 : i32
    %c0_i32_1 = arith.constant 0 : i32
    return %c0_i32, %c0_i32_0 : i32, i32
  }
  func.func @transform_11(%arg0: i32) -> (i32, i32) {
    %c0_i32 = arith.constant 0 : i32
    %c0_i32_0 = arith.constant 0 : i32
    return %arg0, %c0_i32 : i32, i32
  }
}

module attributes {stable_mosaic.version = 11 : i64} {
  func.func @mlp_ln_mlp_kernel(%arg0: i32, %arg1: memref<32x64xbf16, #tpu.memory_space<vmem>>, %arg2: memref<64x128xbf16, #tpu.memory_space<vmem>>, %arg3: memref<1x128xf32, #tpu.memory_space<vmem>>, %arg4: memref<128x128xbf16, #tpu.memory_space<vmem>>, %arg5: memref<1x128xf32, #tpu.memory_space<vmem>>, %arg6: memref<1x128xf32, #tpu.memory_space<vmem>>, %arg7: memref<1x128xf32, #tpu.memory_space<vmem>>, %arg8: memref<128x128xbf16, #tpu.memory_space<vmem>>, %arg9: memref<1x128xf32, #tpu.memory_space<vmem>>, %arg10: memref<128x128xbf16, #tpu.memory_space<vmem>>, %arg11: memref<1x128xf32, #tpu.memory_space<vmem>>, %arg12: memref<32x128xf32, #tpu.memory_space<vmem>>) attributes {dimension_semantics = [#tpu.dimension_semantics<parallel>], iteration_bounds = array<i64: 1>, scalar_prefetch = 0 : i64, scratch_operands = 0 : i64, tpu.core_type = #tpu.core_type<tc>, window_params = [{transform_indices = @transform_0, window_bounds = array<i64: 32, 64>}, {pipeline_mode = #tpu.pipeline_mode<synchronous>, transform_indices = @transform_1, window_bounds = array<i64: 64, 128>}, {pipeline_mode = #tpu.pipeline_mode<synchronous>, transform_indices = @transform_2, window_bounds = array<i64: 1, 128>}, {pipeline_mode = #tpu.pipeline_mode<synchronous>, transform_indices = @transform_3, window_bounds = array<i64: 128, 128>}, {pipeline_mode = #tpu.pipeline_mode<synchronous>, transform_indices = @transform_4, window_bounds = array<i64: 1, 128>}, {pipeline_mode = #tpu.pipeline_mode<synchronous>, transform_indices = @transform_5, window_bounds = array<i64: 1, 128>}, {pipeline_mode = #tpu.pipeline_mode<synchronous>, transform_indices = @transform_6, window_bounds = array<i64: 1, 128>}, {pipeline_mode = #tpu.pipeline_mode<synchronous>, transform_indices = @transform_7, window_bounds = array<i64: 128, 128>}, {pipeline_mode = #tpu.pipeline_mode<synchronous>, transform_indices = @transform_8, window_bounds = array<i64: 1, 128>}, {pipeline_mode = #tpu.pipeline_mode<synchronous>, transform_indices = @transform_9, window_bounds = array<i64: 128, 128>}, {pipeline_mode = #tpu.pipeline_mode<synchronous>, transform_indices = @transform_10, window_bounds = array<i64: 1, 128>}, {transform_indices = @transform_11, window_bounds = array<i64: 32, 128>}]} {
    %c0 = arith.constant 0 : index
    %c0_0 = arith.constant 0 : index
    %0 = vector.load %arg1[%c0, %c0_0] : memref<32x64xbf16, #tpu.memory_space<vmem>>, vector<32x64xbf16>
    %c0_1 = arith.constant 0 : index
    %c0_2 = arith.constant 0 : index
    %1 = vector.load %arg2[%c0_1, %c0_2] : memref<64x128xbf16, #tpu.memory_space<vmem>>, vector<64x128xbf16>
    %cst = arith.constant dense<0.000000e+00> : vector<32x128xf32>
    %2 = tpu.matmul %0, %1, %cst {dimension_numbers = #tpu.dot_dimension_numbers<[1], [0], [0], [1], [0, 0, 1, 1], [], []>} : vector<32x64xbf16>, vector<64x128xbf16>, vector<32x128xf32> -> vector<32x128xf32>
    %c0_3 = arith.constant 0 : index
    %c0_4 = arith.constant 0 : index
    %3 = vector.load %arg3[%c0_3, %c0_4] : memref<1x128xf32, #tpu.memory_space<vmem>>, vector<1x128xf32>
    %4 = vector.broadcast %3 : vector<1x128xf32> to vector<32x128xf32>
    %5 = arith.addf %2, %4 : vector<32x128xf32>
    %cst_5 = arith.constant 5.000000e-01 : f32
    %6 = vector.broadcast %cst_5 : f32 to vector<32x128xf32>
    %7 = arith.mulf %6, %5 : vector<32x128xf32>
    %cst_6 = arith.constant 4.471500e-02 : f32
    %8 = vector.broadcast %cst_6 : f32 to vector<32x128xf32>
    %9 = arith.mulf %8, %5 : vector<32x128xf32>
    %10 = arith.mulf %9, %5 : vector<32x128xf32>
    %11 = arith.mulf %10, %5 : vector<32x128xf32>
    %12 = arith.addf %5, %11 : vector<32x128xf32>
    %cst_7 = arith.constant 0.797884583 : f32
    %13 = vector.broadcast %cst_7 : f32 to vector<32x128xf32>
    %14 = arith.mulf %13, %12 : vector<32x128xf32>
    %15 = math.tanh %14 : vector<32x128xf32>
    %cst_8 = arith.constant 1.000000e+00 : f32
    %16 = vector.broadcast %cst_8 : f32 to vector<32x128xf32>
    %17 = arith.addf %16, %15 : vector<32x128xf32>
    %18 = arith.mulf %7, %17 : vector<32x128xf32>
    %19 = arith.truncf %18 : vector<32x128xf32> to vector<32x128xbf16>
    %c0_9 = arith.constant 0 : index
    %c0_10 = arith.constant 0 : index
    %20 = vector.load %arg4[%c0_9, %c0_10] : memref<128x128xbf16, #tpu.memory_space<vmem>>, vector<128x128xbf16>
    %cst_11 = arith.constant dense<0.000000e+00> : vector<32x128xf32>
    %21 = tpu.matmul %19, %20, %cst_11 {dimension_numbers = #tpu.dot_dimension_numbers<[1], [0], [0], [1], [0, 0, 1, 1], [], []>} : vector<32x128xbf16>, vector<128x128xbf16>, vector<32x128xf32> -> vector<32x128xf32>
    %c0_12 = arith.constant 0 : index
    %c0_13 = arith.constant 0 : index
    %22 = vector.load %arg5[%c0_12, %c0_13] : memref<1x128xf32, #tpu.memory_space<vmem>>, vector<1x128xf32>
    %23 = vector.broadcast %22 : vector<1x128xf32> to vector<32x128xf32>
    %24 = arith.addf %21, %23 : vector<32x128xf32>
    %cst_14 = arith.constant dense<0.000000e+00> : vector<32xf32>
    %25 = vector.multi_reduction <add>, %24, %cst_14 [1] : vector<32x128xf32> to vector<32xf32>
    %26 = vector.shape_cast %25 : vector<32xf32> to vector<32x1xf32>
    %cst_15 = arith.constant 3.125000e-02 : f32
    %27 = vector.broadcast %cst_15 : f32 to vector<32x1xf32>
    %28 = arith.mulf %26, %27 : vector<32x1xf32>
    %29 = arith.mulf %24, %24 : vector<32x128xf32>
    %cst_16 = arith.constant dense<0.000000e+00> : vector<32xf32>
    %30 = vector.multi_reduction <add>, %29, %cst_16 [1] : vector<32x128xf32> to vector<32xf32>
    %31 = vector.shape_cast %30 : vector<32xf32> to vector<32x1xf32>
    %cst_17 = arith.constant 3.125000e-02 : f32
    %32 = vector.broadcast %cst_17 : f32 to vector<32x1xf32>
    %33 = arith.mulf %31, %32 : vector<32x1xf32>
    %34 = vector.broadcast %28 : vector<32x1xf32> to vector<32x128xf32>
    %35 = arith.subf %24, %34 : vector<32x128xf32>
    %36 = arith.mulf %28, %28 : vector<32x1xf32>
    %37 = arith.subf %33, %36 : vector<32x1xf32>
    %cst_18 = arith.constant 9.99999974E-6 : f32
    %38 = vector.broadcast %cst_18 : f32 to vector<32x1xf32>
    %39 = arith.addf %37, %38 : vector<32x1xf32>
    %40 = math.rsqrt %39 : vector<32x1xf32>
    %41 = vector.broadcast %40 : vector<32x1xf32> to vector<32x128xf32>
    %42 = arith.mulf %35, %41 : vector<32x128xf32>
    %c0_19 = arith.constant 0 : index
    %c0_20 = arith.constant 0 : index
    %43 = vector.load %arg6[%c0_19, %c0_20] : memref<1x128xf32, #tpu.memory_space<vmem>>, vector<1x128xf32>
    %44 = vector.broadcast %43 : vector<1x128xf32> to vector<32x128xf32>
    %45 = arith.mulf %42, %44 : vector<32x128xf32>
    %c0_21 = arith.constant 0 : index
    %c0_22 = arith.constant 0 : index
    %46 = vector.load %arg7[%c0_21, %c0_22] : memref<1x128xf32, #tpu.memory_space<vmem>>, vector<1x128xf32>
    %47 = vector.broadcast %46 : vector<1x128xf32> to vector<32x128xf32>
    %48 = arith.addf %45, %47 : vector<32x128xf32>
    %49 = arith.truncf %48 : vector<32x128xf32> to vector<32x128xbf16>
    %c0_23 = arith.constant 0 : index
    %c0_24 = arith.constant 0 : index
    %50 = vector.load %arg8[%c0_23, %c0_24] : memref<128x128xbf16, #tpu.memory_space<vmem>>, vector<128x128xbf16>
    %cst_25 = arith.constant dense<0.000000e+00> : vector<32x128xf32>
    %51 = tpu.matmul %49, %50, %cst_25 {dimension_numbers = #tpu.dot_dimension_numbers<[1], [0], [0], [1], [0, 0, 1, 1], [], []>} : vector<32x128xbf16>, vector<128x128xbf16>, vector<32x128xf32> -> vector<32x128xf32>
    %c0_26 = arith.constant 0 : index
    %c0_27 = arith.constant 0 : index
    %52 = vector.load %arg9[%c0_26, %c0_27] : memref<1x128xf32, #tpu.memory_space<vmem>>, vector<1x128xf32>
    %53 = vector.broadcast %52 : vector<1x128xf32> to vector<32x128xf32>
    %54 = arith.addf %51, %53 : vector<32x128xf32>
    %cst_28 = arith.constant 5.000000e-01 : f32
    %55 = vector.broadcast %cst_28 : f32 to vector<32x128xf32>
    %56 = arith.mulf %55, %54 : vector<32x128xf32>
    %cst_29 = arith.constant 4.471500e-02 : f32
    %57 = vector.broadcast %cst_29 : f32 to vector<32x128xf32>
    %58 = arith.mulf %57, %54 : vector<32x128xf32>
    %59 = arith.mulf %58, %54 : vector<32x128xf32>
    %60 = arith.mulf %59, %54 : vector<32x128xf32>
    %61 = arith.addf %54, %60 : vector<32x128xf32>
    %cst_30 = arith.constant 0.797884583 : f32
    %62 = vector.broadcast %cst_30 : f32 to vector<32x128xf32>
    %63 = arith.mulf %62, %61 : vector<32x128xf32>
    %64 = math.tanh %63 : vector<32x128xf32>
    %cst_31 = arith.constant 1.000000e+00 : f32
    %65 = vector.broadcast %cst_31 : f32 to vector<32x128xf32>
    %66 = arith.addf %65, %64 : vector<32x128xf32>
    %67 = arith.mulf %56, %66 : vector<32x128xf32>
    %68 = arith.truncf %67 : vector<32x128xf32> to vector<32x128xbf16>
    %c0_32 = arith.constant 0 : index
    %c0_33 = arith.constant 0 : index
    %69 = vector.load %arg10[%c0_32, %c0_33] : memref<128x128xbf16, #tpu.memory_space<vmem>>, vector<128x128xbf16>
    %cst_34 = arith.constant dense<0.000000e+00> : vector<32x128xf32>
    %70 = tpu.matmul %68, %69, %cst_34 {dimension_numbers = #tpu.dot_dimension_numbers<[1], [0], [0], [1], [0, 0, 1, 1], [], []>} : vector<32x128xbf16>, vector<128x128xbf16>, vector<32x128xf32> -> vector<32x128xf32>
    %c0_35 = arith.constant 0 : index
    %c0_36 = arith.constant 0 : index
    %71 = vector.load %arg11[%c0_35, %c0_36] : memref<1x128xf32, #tpu.memory_space<vmem>>, vector<1x128xf32>
    %72 = vector.broadcast %71 : vector<1x128xf32> to vector<32x128xf32>
    %73 = arith.addf %70, %72 : vector<32x128xf32>
    %c0_37 = arith.constant 0 : index
    %c0_38 = arith.constant 0 : index
    %74 = vector.load %arg12[%c0_37, %c0_38] : memref<32x128xf32, #tpu.memory_space<vmem>>, vector<32x128xf32>
    tpu.vector_store %arg12[%c0_37, %c0_38], %73 {strides = array<i32>} : memref<32x128xf32, #tpu.memory_space<vmem>>, vector<32x128xf32>,
    return
  }
  func.func @transform_0(%arg0: i32) -> (i32, i32) {
    %c0_i32 = arith.constant 0 : i32
    %c0_i32_0 = arith.constant 0 : i32
    return %arg0, %c0_i32 : i32, i32
  }
  func.func @transform_1(%arg0: i32) -> (i32, i32) {
    %c0_i32 = arith.constant 0 : i32
    %c0_i32_0 = arith.constant 0 : i32
    %c0_i32_1 = arith.constant 0 : i32
    return %c0_i32, %c0_i32_0 : i32, i32
  }
  func.func @transform_2(%arg0: i32) -> (i32, i32) {
    %c0_i32 = arith.constant 0 : i32
    %c0_i32_0 = arith.constant 0 : i32
    %c0_i32_1 = arith.constant 0 : i32
    return %c0_i32, %c0_i32_0 : i32, i32
  }
  func.func @transform_3(%arg0: i32) -> (i32, i32) {
    %c0_i32 = arith.constant 0 : i32
    %c0_i32_0 = arith.constant 0 : i32
    %c0_i32_1 = arith.constant 0 : i32
    return %c0_i32, %c0_i32_0 : i32, i32
  }
  func.func @transform_4(%arg0: i32) -> (i32, i32) {
    %c0_i32 = arith.constant 0 : i32
    %c0_i32_0 = arith.constant 0 : i32
    %c0_i32_1 = arith.constant 0 : i32
    return %c0_i32, %c0_i32_0 : i32, i32
  }
  func.func @transform_5(%arg0: i32) -> (i32, i32) {
    %c0_i32 = arith.constant 0 : i32
    %c0_i32_0 = arith.constant 0 : i32
    %c0_i32_1 = arith.constant 0 : i32
    return %c0_i32, %c0_i32_0 : i32, i32
  }
  func.func @transform_6(%arg0: i32) -> (i32, i32) {
    %c0_i32 = arith.constant 0 : i32
    %c0_i32_0 = arith.constant 0 : i32
    %c0_i32_1 = arith.constant 0 : i32
    return %c0_i32, %c0_i32_0 : i32, i32
  }
  func.func @transform_7(%arg0: i32) -> (i32, i32) {
    %c0_i32 = arith.constant 0 : i32
    %c0_i32_0 = arith.constant 0 : i32
    %c0_i32_1 = arith.constant 0 : i32
    return %c0_i32, %c0_i32_0 : i32, i32
  }
  func.func @transform_8(%arg0: i32) -> (i32, i32) {
    %c0_i32 = arith.constant 0 : i32
    %c0_i32_0 = arith.constant 0 : i32
    %c0_i32_1 = arith.constant 0 : i32
    return %c0_i32, %c0_i32_0 : i32, i32
  }
  func.func @transform_9(%arg0: i32) -> (i32, i32) {
    %c0_i32 = arith.constant 0 : i32
    %c0_i32_0 = arith.constant 0 : i32
    %c0_i32_1 = arith.constant 0 : i32
    return %c0_i32, %c0_i32_0 : i32, i32
  }
  func.func @transform_10(%arg0: i32) -> (i32, i32) {
    %c0_i32 = arith.constant 0 : i32
    %c0_i32_0 = arith.constant 0 : i32
    %c0_i32_1 = arith.constant 0 : i32
    return %c0_i32, %c0_i32_0 : i32, i32
  }
  func.func @transform_11(%arg0: i32) -> (i32, i32) {
    %c0_i32 = arith.constant 0 : i32
    %c0_i32_0 = arith.constant 0 : i32
    return %arg0, %c0_i32 : i32, i32
  }
}

module attributes {stable_mosaic.version = 11 : i64} {
  func.func @norm_mlps_kernel(%arg0: i32, %arg1: memref<32x128xf32, #tpu.memory_space<vmem>>, %arg2: memref<32x128xf32, #tpu.memory_space<vmem>>, %arg3: memref<1x128xf32, #tpu.memory_space<vmem>>, %arg4: memref<1x128xf32, #tpu.memory_space<vmem>>, %arg5: memref<1x128xf32, #tpu.memory_space<vmem>>, %arg6: memref<1x128xf32, #tpu.memory_space<vmem>>, %arg7: memref<128x128xbf16, #tpu.memory_space<vmem>>, %arg8: memref<128x128xbf16, #tpu.memory_space<vmem>>, %arg9: memref<1x128xf32, #tpu.memory_space<vmem>>, %arg10: memref<128x128xbf16, #tpu.memory_space<vmem>>, %arg11: memref<1x128xf32, #tpu.memory_space<vmem>>, %arg12: memref<32x128xf32, #tpu.memory_space<vmem>>) attributes {dimension_semantics = [#tpu.dimension_semantics<parallel>], iteration_bounds = array<i64: 1>, scalar_prefetch = 0 : i64, scratch_operands = 0 : i64, tpu.core_type = #tpu.core_type<tc>, window_params = [{transform_indices = @transform_0, window_bounds = array<i64: 32, 128>}, {transform_indices = @transform_1, window_bounds = array<i64: 32, 128>}, {pipeline_mode = #tpu.pipeline_mode<synchronous>, transform_indices = @transform_2, window_bounds = array<i64: 1, 128>}, {pipeline_mode = #tpu.pipeline_mode<synchronous>, transform_indices = @transform_3, window_bounds = array<i64: 1, 128>}, {pipeline_mode = #tpu.pipeline_mode<synchronous>, transform_indices = @transform_4, window_bounds = array<i64: 1, 128>}, {pipeline_mode = #tpu.pipeline_mode<synchronous>, transform_indices = @transform_5, window_bounds = array<i64: 1, 128>}, {pipeline_mode = #tpu.pipeline_mode<synchronous>, transform_indices = @transform_6, window_bounds = array<i64: 128, 128>}, {pipeline_mode = #tpu.pipeline_mode<synchronous>, transform_indices = @transform_7, window_bounds = array<i64: 128, 128>}, {pipeline_mode = #tpu.pipeline_mode<synchronous>, transform_indices = @transform_8, window_bounds = array<i64: 1, 128>}, {pipeline_mode = #tpu.pipeline_mode<synchronous>, transform_indices = @transform_9, window_bounds = array<i64: 128, 128>}, {pipeline_mode = #tpu.pipeline_mode<synchronous>, transform_indices = @transform_10, window_bounds = array<i64: 1, 128>}, {transform_indices = @transform_11, window_bounds = array<i64: 32, 128>}]} {
    %c0 = arith.constant 0 : index
    %c0_0 = arith.constant 0 : index
    %0 = vector.load %arg1[%c0, %c0_0] : memref<32x128xf32, #tpu.memory_space<vmem>>, vector<32x128xf32>
    %c0_1 = arith.constant 0 : index
    %c0_2 = arith.constant 0 : index
    %1 = vector.load %arg2[%c0_1, %c0_2] : memref<32x128xf32, #tpu.memory_space<vmem>>, vector<32x128xf32>
    %cst = arith.constant dense<0.000000e+00> : vector<32xf32>
    %2 = vector.multi_reduction <add>, %0, %cst [1] : vector<32x128xf32> to vector<32xf32>
    %3 = vector.shape_cast %2 : vector<32xf32> to vector<32x1xf32>
    %cst_3 = arith.constant dense<0.000000e+00> : vector<32xf32>
    %4 = vector.multi_reduction <add>, %1, %cst_3 [1] : vector<32x128xf32> to vector<32xf32>
    %5 = vector.shape_cast %4 : vector<32xf32> to vector<32x1xf32>
    %6 = arith.addf %3, %5 : vector<32x1xf32>
    %cst_4 = arith.constant 7.812500e-03 : f32
    %7 = vector.broadcast %cst_4 : f32 to vector<32x1xf32>
    %8 = arith.mulf %6, %7 : vector<32x1xf32>
    %9 = arith.mulf %0, %0 : vector<32x128xf32>
    %cst_5 = arith.constant dense<0.000000e+00> : vector<32xf32>
    %10 = vector.multi_reduction <add>, %9, %cst_5 [1] : vector<32x128xf32> to vector<32xf32>
    %11 = vector.shape_cast %10 : vector<32xf32> to vector<32x1xf32>
    %12 = arith.mulf %1, %1 : vector<32x128xf32>
    %cst_6 = arith.constant dense<0.000000e+00> : vector<32xf32>
    %13 = vector.multi_reduction <add>, %12, %cst_6 [1] : vector<32x128xf32> to vector<32xf32>
    %14 = vector.shape_cast %13 : vector<32xf32> to vector<32x1xf32>
    %15 = arith.addf %11, %14 : vector<32x1xf32>
    %cst_7 = arith.constant 7.812500e-03 : f32
    %16 = vector.broadcast %cst_7 : f32 to vector<32x1xf32>
    %17 = arith.mulf %15, %16 : vector<32x1xf32>
    %18 = arith.mulf %8, %8 : vector<32x1xf32>
    %19 = arith.subf %17, %18 : vector<32x1xf32>
    %cst_8 = arith.constant 9.99999974E-6 : f32
    %20 = vector.broadcast %cst_8 : f32 to vector<32x1xf32>
    %21 = arith.addf %19, %20 : vector<32x1xf32>
    %22 = math.rsqrt %21 : vector<32x1xf32>
    %23 = vector.broadcast %8 : vector<32x1xf32> to vector<32x128xf32>
    %24 = arith.subf %0, %23 : vector<32x128xf32>
    %25 = vector.broadcast %22 : vector<32x1xf32> to vector<32x128xf32>
    %26 = arith.mulf %24, %25 : vector<32x128xf32>
    %c0_9 = arith.constant 0 : index
    %c0_10 = arith.constant 0 : index
    %27 = vector.load %arg3[%c0_9, %c0_10] : memref<1x128xf32, #tpu.memory_space<vmem>>, vector<1x128xf32>
    %28 = vector.broadcast %27 : vector<1x128xf32> to vector<32x128xf32>
    %29 = arith.mulf %26, %28 : vector<32x128xf32>
    %c0_11 = arith.constant 0 : index
    %c0_12 = arith.constant 0 : index
    %30 = vector.load %arg4[%c0_11, %c0_12] : memref<1x128xf32, #tpu.memory_space<vmem>>, vector<1x128xf32>
    %31 = vector.broadcast %30 : vector<1x128xf32> to vector<32x128xf32>
    %32 = arith.addf %29, %31 : vector<32x128xf32>
    %33 = vector.broadcast %8 : vector<32x1xf32> to vector<32x128xf32>
    %34 = arith.subf %1, %33 : vector<32x128xf32>
    %35 = vector.broadcast %22 : vector<32x1xf32> to vector<32x128xf32>
    %36 = arith.mulf %34, %35 : vector<32x128xf32>
    %c0_13 = arith.constant 0 : index
    %c0_14 = arith.constant 0 : index
    %37 = vector.load %arg5[%c0_13, %c0_14] : memref<1x128xf32, #tpu.memory_space<vmem>>, vector<1x128xf32>
    %38 = vector.broadcast %37 : vector<1x128xf32> to vector<32x128xf32>
    %39 = arith.mulf %36, %38 : vector<32x128xf32>
    %c0_15 = arith.constant 0 : index
    %c0_16 = arith.constant 0 : index
    %40 = vector.load %arg6[%c0_15, %c0_16] : memref<1x128xf32, #tpu.memory_space<vmem>>, vector<1x128xf32>
    %41 = vector.broadcast %40 : vector<1x128xf32> to vector<32x128xf32>
    %42 = arith.addf %39, %41 : vector<32x128xf32>
    %43 = arith.truncf %32 : vector<32x128xf32> to vector<32x128xbf16>
    %c0_17 = arith.constant 0 : index
    %c0_18 = arith.constant 0 : index
    %44 = vector.load %arg7[%c0_17, %c0_18] : memref<128x128xbf16, #tpu.memory_space<vmem>>, vector<128x128xbf16>
    %cst_19 = arith.constant dense<0.000000e+00> : vector<32x128xf32>
    %45 = tpu.matmul %43, %44, %cst_19 {dimension_numbers = #tpu.dot_dimension_numbers<[1], [0], [0], [1], [0, 0, 1, 1], [], []>} : vector<32x128xbf16>, vector<128x128xbf16>, vector<32x128xf32> -> vector<32x128xf32>
    %46 = arith.truncf %42 : vector<32x128xf32> to vector<32x128xbf16>
    %c0_20 = arith.constant 0 : index
    %c0_21 = arith.constant 0 : index
    %47 = vector.load %arg8[%c0_20, %c0_21] : memref<128x128xbf16, #tpu.memory_space<vmem>>, vector<128x128xbf16>
    %cst_22 = arith.constant dense<0.000000e+00> : vector<32x128xf32>
    %48 = tpu.matmul %46, %47, %cst_22 {dimension_numbers = #tpu.dot_dimension_numbers<[1], [0], [0], [1], [0, 0, 1, 1], [], []>} : vector<32x128xbf16>, vector<128x128xbf16>, vector<32x128xf32> -> vector<32x128xf32>
    %49 = arith.addf %45, %48 : vector<32x128xf32>
    %c0_23 = arith.constant 0 : index
    %c0_24 = arith.constant 0 : index
    %50 = vector.load %arg9[%c0_23, %c0_24] : memref<1x128xf32, #tpu.memory_space<vmem>>, vector<1x128xf32>
    %51 = vector.broadcast %50 : vector<1x128xf32> to vector<32x128xf32>
    %52 = arith.addf %49, %51 : vector<32x128xf32>
    %cst_25 = arith.constant 5.000000e-01 : f32
    %53 = vector.broadcast %cst_25 : f32 to vector<32x128xf32>
    %54 = arith.mulf %53, %52 : vector<32x128xf32>
    %cst_26 = arith.constant 4.471500e-02 : f32
    %55 = vector.broadcast %cst_26 : f32 to vector<32x128xf32>
    %56 = arith.mulf %55, %52 : vector<32x128xf32>
    %57 = arith.mulf %56, %52 : vector<32x128xf32>
    %58 = arith.mulf %57, %52 : vector<32x128xf32>
    %59 = arith.addf %52, %58 : vector<32x128xf32>
    %cst_27 = arith.constant 0.797884583 : f32
    %60 = vector.broadcast %cst_27 : f32 to vector<32x128xf32>
    %61 = arith.mulf %60, %59 : vector<32x128xf32>
    %62 = math.tanh %61 : vector<32x128xf32>
    %cst_28 = arith.constant 1.000000e+00 : f32
    %63 = vector.broadcast %cst_28 : f32 to vector<32x128xf32>
    %64 = arith.addf %63, %62 : vector<32x128xf32>
    %65 = arith.mulf %54, %64 : vector<32x128xf32>
    %66 = arith.truncf %65 : vector<32x128xf32> to vector<32x128xbf16>
    %c0_29 = arith.constant 0 : index
    %c0_30 = arith.constant 0 : index
    %67 = vector.load %arg10[%c0_29, %c0_30] : memref<128x128xbf16, #tpu.memory_space<vmem>>, vector<128x128xbf16>
    %cst_31 = arith.constant dense<0.000000e+00> : vector<32x128xf32>
    %68 = tpu.matmul %66, %67, %cst_31 {dimension_numbers = #tpu.dot_dimension_numbers<[1], [0], [0], [1], [0, 0, 1, 1], [], []>} : vector<32x128xbf16>, vector<128x128xbf16>, vector<32x128xf32> -> vector<32x128xf32>
    %c0_32 = arith.constant 0 : index
    %c0_33 = arith.constant 0 : index
    %69 = vector.load %arg11[%c0_32, %c0_33] : memref<1x128xf32, #tpu.memory_space<vmem>>, vector<1x128xf32>
    %70 = vector.broadcast %69 : vector<1x128xf32> to vector<32x128xf32>
    %71 = arith.addf %68, %70 : vector<32x128xf32>
    %c0_34 = arith.constant 0 : index
    %c0_35 = arith.constant 0 : index
    %72 = vector.load %arg12[%c0_34, %c0_35] : memref<32x128xf32, #tpu.memory_space<vmem>>, vector<32x128xf32>
    tpu.vector_store %arg12[%c0_34, %c0_35], %71 {strides = array<i32>} : memref<32x128xf32, #tpu.memory_space<vmem>>, vector<32x128xf32>,
    return
  }
  func.func @transform_0(%arg0: i32) -> (i32, i32) {
    %c0_i32 = arith.constant 0 : i32
    %c0_i32_0 = arith.constant 0 : i32
    return %arg0, %c0_i32 : i32, i32
  }
  func.func @transform_1(%arg0: i32) -> (i32, i32) {
    %c0_i32 = arith.constant 0 : i32
    %c0_i32_0 = arith.constant 0 : i32
    return %arg0, %c0_i32 : i32, i32
  }
  func.func @transform_2(%arg0: i32) -> (i32, i32) {
    %c0_i32 = arith.constant 0 : i32
    %c0_i32_0 = arith.constant 0 : i32
    %c0_i32_1 = arith.constant 0 : i32
    return %c0_i32, %c0_i32_0 : i32, i32
  }
  func.func @transform_3(%arg0: i32) -> (i32, i32) {
    %c0_i32 = arith.constant 0 : i32
    %c0_i32_0 = arith.constant 0 : i32
    %c0_i32_1 = arith.constant 0 : i32
    return %c0_i32, %c0_i32_0 : i32, i32
  }
  func.func @transform_4(%arg0: i32) -> (i32, i32) {
    %c0_i32 = arith.constant 0 : i32
    %c0_i32_0 = arith.constant 0 : i32
    %c0_i32_1 = arith.constant 0 : i32
    return %c0_i32, %c0_i32_0 : i32, i32
  }
  func.func @transform_5(%arg0: i32) -> (i32, i32) {
    %c0_i32 = arith.constant 0 : i32
    %c0_i32_0 = arith.constant 0 : i32
    %c0_i32_1 = arith.constant 0 : i32
    return %c0_i32, %c0_i32_0 : i32, i32
  }
  func.func @transform_6(%arg0: i32) -> (i32, i32) {
    %c0_i32 = arith.constant 0 : i32
    %c0_i32_0 = arith.constant 0 : i32
    %c0_i32_1 = arith.constant 0 : i32
    return %c0_i32, %c0_i32_0 : i32, i32
  }
  func.func @transform_7(%arg0: i32) -> (i32, i32) {
    %c0_i32 = arith.constant 0 : i32
    %c0_i32_0 = arith.constant 0 : i32
    %c0_i32_1 = arith.constant 0 : i32
    return %c0_i32, %c0_i32_0 : i32, i32
  }
  func.func @transform_8(%arg0: i32) -> (i32, i32) {
    %c0_i32 = arith.constant 0 : i32
    %c0_i32_0 = arith.constant 0 : i32
    %c0_i32_1 = arith.constant 0 : i32
    return %c0_i32, %c0_i32_0 : i32, i32
  }
  func.func @transform_9(%arg0: i32) -> (i32, i32) {
    %c0_i32 = arith.constant 0 : i32
    %c0_i32_0 = arith.constant 0 : i32
    %c0_i32_1 = arith.constant 0 : i32
    return %c0_i32, %c0_i32_0 : i32, i32
  }
  func.func @transform_10(%arg0: i32) -> (i32, i32) {
    %c0_i32 = arith.constant 0 : i32
    %c0_i32_0 = arith.constant 0 : i32
    %c0_i32_1 = arith.constant 0 : i32
    return %c0_i32, %c0_i32_0 : i32, i32
  }
  func.func @transform_11(%arg0: i32) -> (i32, i32) {
    %c0_i32 = arith.constant 0 : i32
    %c0_i32_0 = arith.constant 0 : i32
    return %arg0, %c0_i32 : i32, i32
  }
}

module attributes {stable_mosaic.version = 11 : i64} {
  func.func @_mlp_kernel(%arg0: i32, %arg1: memref<8x128xbf16, #tpu.memory_space<vmem>>, %arg2: memref<128x128xbf16, #tpu.memory_space<vmem>>, %arg3: memref<1x128xf32, #tpu.memory_space<vmem>>, %arg4: memref<128x128xbf16, #tpu.memory_space<vmem>>, %arg5: memref<1x128xf32, #tpu.memory_space<vmem>>, %arg6: memref<8x128xf32, #tpu.memory_space<vmem>>) attributes {dimension_semantics = [#tpu.dimension_semantics<parallel>], iteration_bounds = array<i64: 1>, scalar_prefetch = 0 : i64, scratch_operands = 0 : i64, tpu.core_type = #tpu.core_type<tc>, window_params = [{transform_indices = @transform_0, window_bounds = array<i64: 8, 128>}, {pipeline_mode = #tpu.pipeline_mode<synchronous>, transform_indices = @transform_1, window_bounds = array<i64: 128, 128>}, {pipeline_mode = #tpu.pipeline_mode<synchronous>, transform_indices = @transform_2, window_bounds = array<i64: 1, 128>}, {pipeline_mode = #tpu.pipeline_mode<synchronous>, transform_indices = @transform_3, window_bounds = array<i64: 128, 128>}, {pipeline_mode = #tpu.pipeline_mode<synchronous>, transform_indices = @transform_4, window_bounds = array<i64: 1, 128>}, {transform_indices = @transform_5, window_bounds = array<i64: 8, 128>}]} {
    %c0 = arith.constant 0 : index
    %c0_0 = arith.constant 0 : index
    %0 = vector.load %arg1[%c0, %c0_0] : memref<8x128xbf16, #tpu.memory_space<vmem>>, vector<8x128xbf16>
    %c0_1 = arith.constant 0 : index
    %c0_2 = arith.constant 0 : index
    %1 = vector.load %arg2[%c0_1, %c0_2] : memref<128x128xbf16, #tpu.memory_space<vmem>>, vector<128x128xbf16>
    %cst = arith.constant dense<0.000000e+00> : vector<8x128xf32>
    %2 = tpu.matmul %0, %1, %cst {dimension_numbers = #tpu.dot_dimension_numbers<[1], [0], [0], [1], [0, 0, 1, 1], [], []>} : vector<8x128xbf16>, vector<128x128xbf16>, vector<8x128xf32> -> vector<8x128xf32>
    %c0_3 = arith.constant 0 : index
    %c0_4 = arith.constant 0 : index
    %3 = vector.load %arg3[%c0_3, %c0_4] : memref<1x128xf32, #tpu.memory_space<vmem>>, vector<1x128xf32>
    %4 = vector.broadcast %3 : vector<1x128xf32> to vector<8x128xf32>
    %5 = arith.addf %2, %4 : vector<8x128xf32>
    %cst_5 = arith.constant 5.000000e-01 : f32
    %6 = vector.broadcast %cst_5 : f32 to vector<8x128xf32>
    %7 = arith.mulf %6, %5 : vector<8x128xf32>
    %cst_6 = arith.constant 4.471500e-02 : f32
    %8 = vector.broadcast %cst_6 : f32 to vector<8x128xf32>
    %9 = arith.mulf %8, %5 : vector<8x128xf32>
    %10 = arith.mulf %9, %5 : vector<8x128xf32>
    %11 = arith.mulf %10, %5 : vector<8x128xf32>
    %12 = arith.addf %5, %11 : vector<8x128xf32>
    %cst_7 = arith.constant 0.797884583 : f32
    %13 = vector.broadcast %cst_7 : f32 to vector<8x128xf32>
    %14 = arith.mulf %13, %12 : vector<8x128xf32>
    %15 = math.tanh %14 : vector<8x128xf32>
    %cst_8 = arith.constant 1.000000e+00 : f32
    %16 = vector.broadcast %cst_8 : f32 to vector<8x128xf32>
    %17 = arith.addf %16, %15 : vector<8x128xf32>
    %18 = arith.mulf %7, %17 : vector<8x128xf32>
    %19 = arith.truncf %18 : vector<8x128xf32> to vector<8x128xbf16>
    %c0_9 = arith.constant 0 : index
    %c0_10 = arith.constant 0 : index
    %20 = vector.load %arg4[%c0_9, %c0_10] : memref<128x128xbf16, #tpu.memory_space<vmem>>, vector<128x128xbf16>
    %cst_11 = arith.constant dense<0.000000e+00> : vector<8x128xf32>
    %21 = tpu.matmul %19, %20, %cst_11 {dimension_numbers = #tpu.dot_dimension_numbers<[1], [0], [0], [1], [0, 0, 1, 1], [], []>} : vector<8x128xbf16>, vector<128x128xbf16>, vector<8x128xf32> -> vector<8x128xf32>
    %c0_12 = arith.constant 0 : index
    %c0_13 = arith.constant 0 : index
    %22 = vector.load %arg5[%c0_12, %c0_13] : memref<1x128xf32, #tpu.memory_space<vmem>>, vector<1x128xf32>
    %23 = vector.broadcast %22 : vector<1x128xf32> to vector<8x128xf32>
    %24 = arith.addf %21, %23 : vector<8x128xf32>
    %c0_14 = arith.constant 0 : index
    %c0_15 = arith.constant 0 : index
    %25 = vector.load %arg6[%c0_14, %c0_15] : memref<8x128xf32, #tpu.memory_space<vmem>>, vector<8x128xf32>
    tpu.vector_store %arg6[%c0_14, %c0_15], %24 {strides = array<i32>} : memref<8x128xf32, #tpu.memory_space<vmem>>, vector<8x128xf32>,
    return
  }
  func.func @transform_0(%arg0: i32) -> (i32, i32) {
    %c0_i32 = arith.constant 0 : i32
    %c0_i32_0 = arith.constant 0 : i32
    return %arg0, %c0_i32 : i32, i32
  }
  func.func @transform_1(%arg0: i32) -> (i32, i32) {
    %c0_i32 = arith.constant 0 : i32
    %c0_i32_0 = arith.constant 0 : i32
    %c0_i32_1 = arith.constant 0 : i32
    return %c0_i32, %c0_i32_0 : i32, i32
  }
  func.func @transform_2(%arg0: i32) -> (i32, i32) {
    %c0_i32 = arith.constant 0 : i32
    %c0_i32_0 = arith.constant 0 : i32
    %c0_i32_1 = arith.constant 0 : i32
    return %c0_i32, %c0_i32_0 : i32, i32
  }
  func.func @transform_3(%arg0: i32) -> (i32, i32) {
    %c0_i32 = arith.constant 0 : i32
    %c0_i32_0 = arith.constant 0 : i32
    %c0_i32_1 = arith.constant 0 : i32
    return %c0_i32, %c0_i32_0 : i32, i32
  }
  func.func @transform_4(%arg0: i32) -> (i32, i32) {
    %c0_i32 = arith.constant 0 : i32
    %c0_i32_0 = arith.constant 0 : i32
    %c0_i32_1 = arith.constant 0 : i32
    return %c0_i32, %c0_i32_0 : i32, i32
  }
  func.func @transform_5(%arg0: i32) -> (i32, i32) {
    %c0_i32 = arith.constant 0 : i32
    %c0_i32_0 = arith.constant 0 : i32
    return %arg0, %c0_i32 : i32, i32
  }
}

module attributes {stable_mosaic.version = 11 : i64} {
  func.func @_mlp_kernel(%arg0: i32, %arg1: memref<12x128xbf16, #tpu.memory_space<vmem>>, %arg2: memref<128x128xbf16, #tpu.memory_space<vmem>>, %arg3: memref<1x128xf32, #tpu.memory_space<vmem>>, %arg4: memref<128x128xbf16, #tpu.memory_space<vmem>>, %arg5: memref<1x128xf32, #tpu.memory_space<vmem>>, %arg6: memref<12x128xf32, #tpu.memory_space<vmem>>) attributes {dimension_semantics = [#tpu.dimension_semantics<parallel>], iteration_bounds = array<i64: 1>, scalar_prefetch = 0 : i64, scratch_operands = 0 : i64, tpu.core_type = #tpu.core_type<tc>, window_params = [{transform_indices = @transform_0, window_bounds = array<i64: 12, 128>}, {pipeline_mode = #tpu.pipeline_mode<synchronous>, transform_indices = @transform_1, window_bounds = array<i64: 128, 128>}, {pipeline_mode = #tpu.pipeline_mode<synchronous>, transform_indices = @transform_2, window_bounds = array<i64: 1, 128>}, {pipeline_mode = #tpu.pipeline_mode<synchronous>, transform_indices = @transform_3, window_bounds = array<i64: 128, 128>}, {pipeline_mode = #tpu.pipeline_mode<synchronous>, transform_indices = @transform_4, window_bounds = array<i64: 1, 128>}, {transform_indices = @transform_5, window_bounds = array<i64: 12, 128>}]} {
    %c0 = arith.constant 0 : index
    %c0_0 = arith.constant 0 : index
    %0 = vector.load %arg1[%c0, %c0_0] : memref<12x128xbf16, #tpu.memory_space<vmem>>, vector<12x128xbf16>
    %c0_1 = arith.constant 0 : index
    %c0_2 = arith.constant 0 : index
    %1 = vector.load %arg2[%c0_1, %c0_2] : memref<128x128xbf16, #tpu.memory_space<vmem>>, vector<128x128xbf16>
    %cst = arith.constant dense<0.000000e+00> : vector<12x128xf32>
    %2 = tpu.matmul %0, %1, %cst {dimension_numbers = #tpu.dot_dimension_numbers<[1], [0], [0], [1], [0, 0, 1, 1], [], []>} : vector<12x128xbf16>, vector<128x128xbf16>, vector<12x128xf32> -> vector<12x128xf32>
    %c0_3 = arith.constant 0 : index
    %c0_4 = arith.constant 0 : index
    %3 = vector.load %arg3[%c0_3, %c0_4] : memref<1x128xf32, #tpu.memory_space<vmem>>, vector<1x128xf32>
    %4 = vector.broadcast %3 : vector<1x128xf32> to vector<12x128xf32>
    %5 = arith.addf %2, %4 : vector<12x128xf32>
    %cst_5 = arith.constant 5.000000e-01 : f32
    %6 = vector.broadcast %cst_5 : f32 to vector<12x128xf32>
    %7 = arith.mulf %6, %5 : vector<12x128xf32>
    %cst_6 = arith.constant 4.471500e-02 : f32
    %8 = vector.broadcast %cst_6 : f32 to vector<12x128xf32>
    %9 = arith.mulf %8, %5 : vector<12x128xf32>
    %10 = arith.mulf %9, %5 : vector<12x128xf32>
    %11 = arith.mulf %10, %5 : vector<12x128xf32>
    %12 = arith.addf %5, %11 : vector<12x128xf32>
    %cst_7 = arith.constant 0.797884583 : f32
    %13 = vector.broadcast %cst_7 : f32 to vector<12x128xf32>
    %14 = arith.mulf %13, %12 : vector<12x128xf32>
    %15 = math.tanh %14 : vector<12x128xf32>
    %cst_8 = arith.constant 1.000000e+00 : f32
    %16 = vector.broadcast %cst_8 : f32 to vector<12x128xf32>
    %17 = arith.addf %16, %15 : vector<12x128xf32>
    %18 = arith.mulf %7, %17 : vector<12x128xf32>
    %19 = arith.truncf %18 : vector<12x128xf32> to vector<12x128xbf16>
    %c0_9 = arith.constant 0 : index
    %c0_10 = arith.constant 0 : index
    %20 = vector.load %arg4[%c0_9, %c0_10] : memref<128x128xbf16, #tpu.memory_space<vmem>>, vector<128x128xbf16>
    %cst_11 = arith.constant dense<0.000000e+00> : vector<12x128xf32>
    %21 = tpu.matmul %19, %20, %cst_11 {dimension_numbers = #tpu.dot_dimension_numbers<[1], [0], [0], [1], [0, 0, 1, 1], [], []>} : vector<12x128xbf16>, vector<128x128xbf16>, vector<12x128xf32> -> vector<12x128xf32>
    %c0_12 = arith.constant 0 : index
    %c0_13 = arith.constant 0 : index
    %22 = vector.load %arg5[%c0_12, %c0_13] : memref<1x128xf32, #tpu.memory_space<vmem>>, vector<1x128xf32>
    %23 = vector.broadcast %22 : vector<1x128xf32> to vector<12x128xf32>
    %24 = arith.addf %21, %23 : vector<12x128xf32>
    %c0_14 = arith.constant 0 : index
    %c0_15 = arith.constant 0 : index
    %25 = vector.load %arg6[%c0_14, %c0_15] : memref<12x128xf32, #tpu.memory_space<vmem>>, vector<12x128xf32>
    tpu.vector_store %arg6[%c0_14, %c0_15], %24 {strides = array<i32>} : memref<12x128xf32, #tpu.memory_space<vmem>>, vector<12x128xf32>,
    return
  }
  func.func @transform_0(%arg0: i32) -> (i32, i32) {
    %c0_i32 = arith.constant 0 : i32
    %c0_i32_0 = arith.constant 0 : i32
    return %arg0, %c0_i32 : i32, i32
  }
  func.func @transform_1(%arg0: i32) -> (i32, i32) {
    %c0_i32 = arith.constant 0 : i32
    %c0_i32_0 = arith.constant 0 : i32
    %c0_i32_1 = arith.constant 0 : i32
    return %c0_i32, %c0_i32_0 : i32, i32
  }
  func.func @transform_2(%arg0: i32) -> (i32, i32) {
    %c0_i32 = arith.constant 0 : i32
    %c0_i32_0 = arith.constant 0 : i32
    %c0_i32_1 = arith.constant 0 : i32
    return %c0_i32, %c0_i32_0 : i32, i32
  }
  func.func @transform_3(%arg0: i32) -> (i32, i32) {
    %c0_i32 = arith.constant 0 : i32
    %c0_i32_0 = arith.constant 0 : i32
    %c0_i32_1 = arith.constant 0 : i32
    return %c0_i32, %c0_i32_0 : i32, i32
  }
  func.func @transform_4(%arg0: i32) -> (i32, i32) {
    %c0_i32 = arith.constant 0 : i32
    %c0_i32_0 = arith.constant 0 : i32
    %c0_i32_1 = arith.constant 0 : i32
    return %c0_i32, %c0_i32_0 : i32, i32
  }
  func.func @transform_5(%arg0: i32) -> (i32, i32) {
    %c0_i32 = arith.constant 0 : i32
    %c0_i32_0 = arith.constant 0 : i32
    return %arg0, %c0_i32 : i32, i32
  }
}

</mosaic_0001>

<bundles_post_ra>
// kernel: _lambda_.9
= control target key start
LH: loop header
LB: loop body
LE: loop exit
PB: predicated region body
PF: predicated region fallthrough
CT: control target
= control target key end

     0   :  { %v1034_v0 = vmov 0.0   ;;  %vm1035_vm0 = vmmov 0   ;;  %vm99_vm1 = vcmask 523264   ;;  %s1313_s1 = inlined_call_operand.vmem [shape: bf16[64,128], index: 1, kind: input, shape index: {}]   ;;  %s1314_s0 = inlined_call_operand.vmem [shape: bf16[48,64], index: 0, kind: input, shape index: {}]   ;;  %s1315_s3 = inlined_call_operand.vmem [shape: bf16[128,128], index: 3, kind: input, shape index: {}]   ;;  %s1316_s2 = inlined_call_operand.vmem [shape: f32[1,128], index: 2, kind: input, shape index: {}]   ;;  %s1317_s4 = inlined_call_operand.vmem [shape: f32[1,128], index: 4, kind: input, shape index: {}]   ;;  %s1318_s7 = inlined_call_operand.vmem [shape: bf16[128,128], index: 7, kind: input, shape index: {}]   ;;  %s1319_s5 = inlined_call_operand.vmem [shape: f32[1,128], index: 5, kind: input, shape index: {}]   ;;  %s1320_s6 = inlined_call_operand.vmem [shape: f32[1,128], index: 6, kind: input, shape index: {}]   ;;  %s1321_s9 = inlined_call_operand.vmem [shape: bf16[128,128], index: 9, kind: input, shape index: {}]   ;;  %s1322_s8 = inlined_call_operand.vmem [shape: f32[1,128], index: 8, kind: input, shape index: {}]   ;;  %s1323_s10 = inlined_call_operand.vmem [shape: f32[1,128], index: 10, kind: input, shape index: {}]   ;;  %s1324_s11 = inlined_call_operand.vmem [shape: f32[48,128], index: 11, kind: output, shape index: {}]  }
   0x1   :  { %861 = vmatprep.subr.bf16.mxu0 %v1034_v0  ;;  %v967_v1 = vld [vmem:[%s1313_s1 + $0x18] sm:$0xff]   ;;  %869 = vmatprep.mubr.msk.bf16.mxu0 %vm1035_vm0, %v1034_v0  ;;  %v968_v2 = vld [vmem:[%s1313_s1 + $0x10] sm:$0xff]   ;;  %v969_v3 = vld [vmem:[%s1313_s1 + $0x8] sm:$0xff]  }
   0x2   :  { %881 = vmatprep.subr.bf16.mxu1 %v1034_v0  ;;  %897 = vmatprep.mubr.msk.bf16.mxu1 %vm1035_vm0, %v1034_v0  ;;  %v970_v4 = vld [vmem:[%s1313_s1] sm:$0xff]   ;;  %v972_v6 = vld [vmem:[%s1314_s0 + $0x8] sm:$0xff]   ;;  %v973_v7 = vld [vmem:[%s1314_s0 + $0x10] sm:$0xff]  }
   0x3   :  { %862 = vmatpush3.bf16.msra.mxu0 %v967_v1  ;;  %v971_v5 = vld [vmem:[%s1314_s0] sm:$0xff]   ;;  %v974_v8 = vld [vmem:[%s1315_s3 + $0x38] sm:$0xff]   ;;  %v975_v9 = vld [vmem:[%s1315_s3 + $0x30] sm:$0xff]  }
   0x4   :  { %863 = vmatprep.subr.bf16.mxu0 %v1034_v0  ;;  %882 = vmatpush3.bf16.msra.mxu1 %v974_v8  ;;  %v976_v10 = vld [vmem:[%s1315_s3 + $0x28] sm:$0xff]   ;;  %v977_v11 = vld [vmem:[%s1315_s3 + $0x20] sm:$0xff]   ;;  %v978_v12 = vld [vmem:[%s1315_s3 + $0x18] sm:$0xff]  }
   0x5   :  { %883 = vmatprep.subr.bf16.mxu1 %v1034_v0  ;;  %v979_v13 = vld [vmem:[%s1315_s3 + $0x10] sm:$0xff]   ;;  %v980_v14 = vld [vmem:[%s1315_s3 + $0x8] sm:$0xff]   ;;  %v981_v15 = vld [vmem:[%s1315_s3] sm:$0xff]  }
   0x6   :  { %v781_v16 = vld [vmem:[%s1316_s2] ss:$0 sm:$0xff] }
   0x7   :  { %864 = vmatpush3.bf16.msra.mxu0 %v968_v2 }
   0x8   :  { %865 = vmatprep.subr.bf16.mxu0 %v1034_v0  ;;  %884 = vmatpush3.bf16.msra.mxu1 %v975_v9 }
   0x9   :  { %885 = vmatprep.subr.bf16.mxu1 %v1034_v0 }
   0xb   :  { %866 = vmatpush3.bf16.msra.mxu0 %v969_v3 }
   0xc   :  { %867 = vmatprep.subr.bf16.mxu0 %v1034_v0  ;;  %886 = vmatpush3.bf16.msra.mxu1 %v976_v10 }
   0xd   :  { %887 = vmatprep.subr.bf16.mxu1 %v1034_v0 }
   0xf   :  { %868 = vmatpush3.bf16.msra.mxu0 %v970_v4 }
  0x10   :  { %909 = vmatprep.subr.bf16.mxu0 %v1034_v0  ;;  %888 = vmatpush3.bf16.msra.mxu1 %v977_v11 }
  0x11   :  { %889 = vmatprep.subr.bf16.mxu1 %v1034_v0 }
  0x12   :  { %870 = vmatmul.mubr.msk.bf16.vlgmr.msra.gmra.mxu0 %vm99_vm1, %v971_v5 }
  0x13   :  { %873 = vmatprep.mubr.msk.bf16.mxu0 %vm1035_vm0, %v1034_v0 }
  0x14   :  { %890 = vmatpush3.bf16.msra.mxu1 %v978_v12 }
  0x15   :  { %891 = vmatprep.subr.bf16.mxu1 %v1034_v0 }
  0x18   :  { %892 = vmatpush3.bf16.msra.mxu1 %v979_v13 }
  0x19   :  { %893 = vmatprep.subr.bf16.mxu1 %v1034_v0 }
  0x1a   :  { %874 = vmatmul.mubr.msk.bf16.gmra.mxu0 %vm99_vm1, %v972_v6 }
  0x1b   :  { %877 = vmatprep.mubr.msk.bf16.mxu0 %vm1035_vm0, %v1034_v0 }
  0x1c   :  { %894 = vmatpush3.bf16.msra.mxu1 %v980_v14 }
  0x1d   :  { %895 = vmatprep.subr.bf16.mxu1 %v1034_v0 }
  0x20   :  { %896 = vmatpush3.bf16.msra.mxu1 %v981_v15 }
  0x21   :  { %937 = vmatprep.subr.bf16.mxu1 %v1034_v0 }
  0x22   :  { %878 = vmatmul.mubr.msk.bf16.gmra.mxu0 %vm99_vm1, %v973_v7 }
  0x23   :  { %925 = vmatprep.mubr.msk.bf16.mxu0 %vm1035_vm0, %v1034_v0 }
  0xd2   :  { %v143_v17 = vpop.f32.mrf.mxu0 }
  0xd3   :  { %v144_v18 = vadd.f32 %v781_v16, %v143_v17 }
  0xd4   :  { %v871_v19 = vpop.f32.mrf.mxu0 }
  0xd5   :  { %v172_v20 = vmul.f32 0.044715, %v144_v18  ;;  %v166_v4 = vmul.f32 0.5, %v144_v18 }
  0xd6   :  { %v146_v21 = vpop.f32.mrf.mxu0 }
  0xd7   :  { %v178_v22 = vmul.f32 %v172_v20, %v144_v18  ;;  %v147_v23 = vadd.f32 %v781_v16, %v146_v21 }
  0xd8   :  { %v872_v24 = vpop.f32.mrf.mxu0 }
  0xd9   :  { %v184_v25 = vmul.f32 %v178_v22, %v144_v18  ;;  %v173_v26 = vmul.f32 0.044715, %v147_v23  ;;  %v167_v5 = vmul.f32 0.5, %v147_v23 }
  0xda   :  { %v151_v27 = vpop.f32.mrf.mxu0 }
  0xdb   :  { %v179_v28 = vmul.f32 %v173_v26, %v147_v23  ;;  %v152_v29 = vadd.f32 %v781_v16, %v151_v27  ;;  %v190_v30 = vadd.f32 %v184_v25, %v144_v18 }
  0xdc   :  { %v875_v31 = vpop.f32.mrf.mxu0 }
  0xdd   :  { %v185_v32 = vmul.f32 %v179_v28, %v147_v23  ;;  %v174_v33 = vmul.f32 0.044715, %v152_v29  ;;  %v196_v34 = vmul.f32 0.7978846, %v190_v30  ;;  %v168_v14 = vmul.f32 0.5, %v152_v29 }
  0xde   :  { %v154_v35 = vpop.f32.mrf.mxu0 }
  0xdf   :  { %v180_v36 = vmul.f32 %v174_v33, %v152_v29  ;;  %v155_v37 = vadd.f32 %v781_v16, %v154_v35  ;;  %v191_v38 = vadd.f32 %v185_v32, %v147_v23  ;;  %998 = vtanh.f32 %v196_v34 }
  0xe0   :  { %v876_v39 = vpop.f32.mrf.mxu0 }
  0xe1   :  { %v186_v40 = vmul.f32 %v180_v36, %v152_v29  ;;  %v175_v41 = vmul.f32 0.044715, %v155_v37  ;;  %v197_v42 = vmul.f32 0.7978846, %v191_v38  ;;  %v169_v15 = vmul.f32 0.5, %v155_v37 }
  0xe2   :  { %v159_v43 = vpop.f32.mrf.mxu0 }
  0xe3   :  { %v181_v44 = vmul.f32 %v175_v41, %v155_v37  ;;  %v160_v45 = vadd.f32 %v781_v16, %v159_v43  ;;  %1000 = vtanh.f32 %v197_v42  ;;  %v192_v46 = vadd.f32 %v186_v40, %v152_v29  ;;  %v792_v29 = vld [vmem:[%s1317_s4] ss:$0 sm:$0xff] }
  0xe4   :  { %v879_v47 = vpop.f32.mrf.mxu0 }
  0xe5   :  { %v187_v48 = vmul.f32 %v181_v44, %v155_v37  ;;  %v176_v49 = vmul.f32 0.044715, %v160_v45  ;;  %v198_v50 = vmul.f32 0.7978846, %v192_v46  ;;  %v170_v23 = vmul.f32 0.5, %v160_v45 }
  0xe6   :  { %v162_v51 = vpop.f32.mrf.mxu0 }
  0xe7   :  { %v182_v52 = vmul.f32 %v176_v49, %v160_v45  ;;  %v163_v53 = vadd.f32 %v781_v16, %v162_v51  ;;  %v193_v54 = vadd.f32 %v187_v48, %v155_v37  ;;  %1002 = vtanh.f32 %v198_v50  ;;  %v983_v50 = vld [vmem:[%s1318_s7 + $0x30] sm:$0xff]  }
  0xe8   :  { %v880_v55 = vpop.f32.mrf.mxu0 }
  0xe9   :  { %v188_v56 = vmul.f32 %v182_v52, %v160_v45  ;;  %v177_v57 = vmul.f32 0.044715, %v163_v53  ;;  %v199_v58 = vmul.f32 0.7978846, %v193_v54  ;;  %v171_v24 = vmul.f32 0.5, %v163_v53  ;;  %v984_v55 = vld [vmem:[%s1318_s7 + $0x28] sm:$0xff]  }
  0xeb   :  { %v183_v59 = vmul.f32 %v177_v57, %v163_v53  ;;  %1004 = vtanh.f32 %v199_v58  ;;  %v194_v60 = vadd.f32 %v188_v56, %v160_v45  ;;  %v982_v45 = vld [vmem:[%s1318_s7 + $0x38] sm:$0xff]   ;;  %v985_v57 = vld [vmem:[%s1318_s7 + $0x20] sm:$0xff]  }
  0xec   :  { %v999_v61 = vpop.eup %998  ;;  %910 = vmatpush3.bf16.msra.mxu0 %v982_v45  ;;  %v986_v58 = vld [vmem:[%s1318_s7 + $0x18] sm:$0xff]  }
  0xed   :  { %v189_v62 = vmul.f32 %v183_v59, %v163_v53  ;;  %v200_v63 = vmul.f32 0.7978846, %v194_v60  ;;  %v208_v1 = vadd.f32 1.0, %v999_v61  ;;  %911 = vmatprep.subr.bf16.mxu0 %v1034_v0  ;;  %v987_v59 = vld [vmem:[%s1318_s7 + $0x10] sm:$0xff]   ;;  %v988_v60 = vld [vmem:[%s1318_s7 + $0x8] sm:$0xff]   ;;  %v989_v61 = vld [vmem:[%s1318_s7] sm:$0xff]  }
  0xef   :  { %v195_v2 = vadd.f32 %v189_v62, %v163_v53  ;;  %1006 = vtanh.f32 %v200_v63  ;;  %v214_v8 = vmul.f32 %v208_v1, %v166_v4 }
  0xf0   :  { %v1001_v3 = vpop.eup %1000  ;;  %912 = vmatpush3.bf16.msra.mxu0 %v983_v50 }
  0xf1   :  { %v209_v6 = vadd.f32 1.0, %v1001_v3  ;;  %v201_v7 = vmul.f32 0.7978846, %v195_v2  ;;  %913 = vmatprep.subr.bf16.mxu0 %v1034_v0 }
  0xf3   :  { %v215_v9 = vmul.f32 %v209_v6, %v167_v5  ;;  %1008 = vtanh.f32 %v201_v7 }
  0xf4   :  { %v1003_v10 = vpop.eup %1002  ;;  %914 = vmatpush3.bf16.msra.mxu0 %v984_v55 }
  0xf5   :  { %v220_v11 = vpack.c.bf16 %v215_v9, %v214_v8  ;;  %v210_v12 = vadd.f32 1.0, %v1003_v10  ;;  %915 = vmatprep.subr.bf16.mxu0 %v1034_v0 }
  0xf7   :  { %898 = vmatmul.mubr.bf16.vlgmr.msra.gmra.mxu1 %v220_v11  ;;  %v216_v17 = vmul.f32 %v210_v12, %v168_v14 }
  0xf8   :  { %v1005_v13 = vpop.eup %1004  ;;  %901 = vmatprep.mubr.msk.bf16.mxu1 %vm1035_vm0, %v1034_v0  ;;  %916 = vmatpush3.bf16.msra.mxu0 %v985_v57 }
  0xf9   :  { %v211_v16 = vadd.f32 1.0, %v1005_v13  ;;  %917 = vmatprep.subr.bf16.mxu0 %v1034_v0 }
  0xfb   :  { %v217_v19 = vmul.f32 %v211_v16, %v169_v15 }
  0xfc   :  { %v1007_v18 = vpop.eup %1006  ;;  %918 = vmatpush3.bf16.msra.mxu0 %v986_v58 }
  0xfd   :  { %v221_v20 = vpack.c.bf16 %v217_v19, %v216_v17  ;;  %v212_v21 = vadd.f32 1.0, %v1007_v18  ;;  %919 = vmatprep.subr.bf16.mxu0 %v1034_v0 }
  0xff   :  { %902 = vmatmul.mubr.bf16.gmra.mxu1 %v221_v20  ;;  %v218_v26 = vmul.f32 %v212_v21, %v170_v23 }
 0x100   :  { %v1009_v22 = vpop.eup %1008  ;;  %905 = vmatprep.mubr.msk.bf16.mxu1 %vm1035_vm0, %v1034_v0  ;;  %920 = vmatpush3.bf16.msra.mxu0 %v987_v59 }
 0x101   :  { %v213_v25 = vadd.f32 1.0, %v1009_v22  ;;  %921 = vmatprep.subr.bf16.mxu0 %v1034_v0 }
 0x103   :  { %v219_v27 = vmul.f32 %v213_v25, %v171_v24 }
 0x104   :  { %922 = vmatpush3.bf16.msra.mxu0 %v988_v60 }
 0x105   :  { %v222_v28 = vpack.c.bf16 %v219_v27, %v218_v26  ;;  %923 = vmatprep.subr.bf16.mxu0 %v1034_v0 }
 0x107   :  { %906 = vmatmul.mubr.bf16.gmra.mxu1 %v222_v28 }
 0x108   :  { %953 = vmatprep.mubr.msk.bf16.mxu1 %vm1035_vm0, %v1034_v0  ;;  %924 = vmatpush3.bf16.msra.mxu0 %v989_v61 }
 0x1b7   :  { %v328_v30 = vpop.f32.mrf.mxu1 }
 0x1b8   :  { %v1177_v31 = vadd.f32 %v792_v29, %v328_v30 }
 0x1b9   :  { %v899_v32 = vpop.f32.mrf.mxu1 }
 0x1ba   :  { %351 = vadd.xlane.f32.xlu0 %v1177_v31  ;;  %v369_v33 = vmul.f32 %v1177_v31, %v1177_v31 }
 0x1bb   :  { %v331_v34 = vpop.f32.mrf.mxu1 }
 0x1bc   :  { %v1182_v35 = vadd.f32 %v792_v29, %v331_v34  ;;  %375 = vadd.xlane.f32.xlu1 %v369_v33 }
 0x1bd   :  { %v900_v36 = vpop.f32.mrf.mxu1 }
 0x1be   :  { %353 = vadd.xlane.f32.xlu0 %v1182_v35  ;;  %v370_v37 = vmul.f32 %v1182_v35, %v1182_v35 }
 0x1bf   :  { %v336_v38 = vpop.f32.mrf.mxu1 }
 0x1c0   :  { %v1187_v39 = vadd.f32 %v792_v29, %v336_v38  ;;  %377 = vadd.xlane.f32.xlu1 %v370_v37 }
 0x1c1   :  { %v903_v40 = vpop.f32.mrf.mxu1 }
 0x1c2   :  { %355 = vadd.xlane.f32.xlu0 %v1187_v39  ;;  %v371_v43 = vmul.f32 %v1187_v39, %v1187_v39 }
 0x1c3   :  { %v339_v41 = vpop.f32.mrf.mxu1 }
 0x1c4   :  { %v1190_v42 = vadd.f32 %v792_v29, %v339_v41 }
 0x1c5   :  { %v904_v44 = vpop.f32.mrf.mxu1 }
 0x1c6   :  { %379 = vadd.xlane.f32.xlu0 %v371_v43  ;;  %357 = vadd.xlane.f32.xlu1 %v1190_v42  ;;  %v372_v48 = vmul.f32 %v1190_v42, %v1190_v42  ;;  %v801_v43 = vld [vmem:[%s1319_s5] ss:$0 sm:$0xff] }
 0x1c7   :  { %v344_v46 = vpop.f32.mrf.mxu1 }
 0x1c8   :  { %v1198_v47 = vadd.f32 %v792_v29, %v344_v46 }
 0x1c9   :  { %v907_v49 = vpop.f32.mrf.mxu1 }
 0x1ca   :  { %381 = vadd.xlane.f32.xlu1 %v372_v48  ;;  %359 = vadd.xlane.f32.xlu0 %v1198_v47  ;;  %v373_v53 = vmul.f32 %v1198_v47, %v1198_v47 }
 0x1cb   :  { %v347_v51 = vpop.f32.mrf.mxu1 }
 0x1cc   :  { %v1207_v52 = vadd.f32 %v792_v29, %v347_v51 }
 0x1cd   :  { %v908_v54 = vpop.f32.mrf.mxu1 }
 0x1ce   :  { %383 = vadd.xlane.f32.xlu0 %v373_v53  ;;  %361 = vadd.xlane.f32.xlu1 %v1207_v52  ;;  %v374_v56 = vmul.f32 %v1207_v52, %v1207_v52  ;;  %v802_v53 = vld [vmem:[%s1320_s6] ss:$0 sm:$0xff] }
 0x1d2   :  { %385 = vadd.xlane.f32.xlu1 %v374_v56 }
 0x243   :  { %v352_v62 = vpop.xlane.xlu0 %351 }
 0x244   :  { %v363_v63 = vmul.f32 0.03125, %v352_v62 }
 0x245   :  { %v376_v1 = vpop.xlane.xlu1 %375 }
 0x246   :  { %v399_v2 = vmul.f32 %v363_v63, %v363_v63  ;;  %v387_v3 = vmul.f32 0.03125, %v376_v1  ;;  %v393_v28 = vsub.f32 %v1177_v31, %v363_v63 }
 0x247   :  { %v354_v4 = vpop.xlane.xlu0 %353 }
 0x248   :  { %v405_v5 = vsub.f32 %v387_v3, %v399_v2  ;;  %v364_v6 = vmul.f32 0.03125, %v354_v4 }
 0x249   :  { %v378_v7 = vpop.xlane.xlu1 %377 }
 0x24a   :  { %v411_v8 = vadd.f32 1e-05, %v405_v5  ;;  %v400_v9 = vmul.f32 %v364_v6, %v364_v6  ;;  %v388_v10 = vmul.f32 0.03125, %v378_v7  ;;  %v394_v44 = vsub.f32 %v1182_v35, %v364_v6 }
 0x24b   :  { %v356_v11 = vpop.xlane.xlu0 %355 }
 0x24c   :  { %1010 = vrsqrt.f32 %v411_v8  ;;  %v406_v12 = vsub.f32 %v388_v10, %v400_v9  ;;  %v365_v13 = vmul.f32 0.03125, %v356_v11 }
 0x24e   :  { %v412_v14 = vadd.f32 1e-05, %v406_v12  ;;  %v401_v17 = vmul.f32 %v365_v13, %v365_v13  ;;  %v395_v56 = vsub.f32 %v1187_v39, %v365_v13 }
 0x24f   :  { %v380_v15 = vpop.xlane.xlu0 %379  ;;  %v358_v16 = vpop.xlane.xlu1 %357 }
 0x250   :  { %1012 = vrsqrt.f32 %v412_v14  ;;  %v389_v19 = vmul.f32 0.03125, %v380_v15  ;;  %v366_v18 = vmul.f32 0.03125, %v358_v16  ;;  %v992_v15 = vld [vmem:[%s1321_s9 + $0x28] sm:$0xff]   ;;  %v993_v16 = vld [vmem:[%s1321_s9 + $0x20] sm:$0xff]  }
 0x252   :  { %v407_v20 = vsub.f32 %v389_v19, %v401_v17  ;;  %v402_v24 = vmul.f32 %v366_v18, %v366_v18  ;;  %v396_v61 = vsub.f32 %v1190_v42, %v366_v18  ;;  %v994_v17 = vld [vmem:[%s1321_s9 + $0x18] sm:$0xff]   ;;  %v995_v19 = vld [vmem:[%s1321_s9 + $0x10] sm:$0xff]   ;;  %v996_v18 = vld [vmem:[%s1321_s9 + $0x8] sm:$0xff]  }
 0x253   :  { %v382_v21 = vpop.xlane.xlu1 %381  ;;  %v360_v22 = vpop.xlane.xlu0 %359 }
 0x254   :  { %v413_v23 = vadd.f32 1e-05, %v407_v20  ;;  %v390_v25 = vmul.f32 0.03125, %v382_v21  ;;  %v367_v26 = vmul.f32 0.03125, %v360_v22  ;;  %v997_v20 = vld [vmem:[%s1321_s9] sm:$0xff]  }
 0x255   :  { %v803_v21 = vld [vmem:[%s1322_s8] ss:$0 sm:$0xff] }
 0x256   :  { %1014 = vrsqrt.f32 %v413_v23  ;;  %v408_v27 = vsub.f32 %v390_v25, %v402_v24  ;;  %v403_v33 = vmul.f32 %v367_v26, %v367_v26  ;;  %v397_v2 = vsub.f32 %v1198_v47, %v367_v26  ;;  %v990_v47 = vld [vmem:[%s1321_s9 + $0x38] sm:$0xff]  }
 0x257   :  { %v384_v29 = vpop.xlane.xlu0 %383  ;;  %v362_v30 = vpop.xlane.xlu1 %361  ;;  %938 = vmatpush3.bf16.msra.mxu1 %v990_v47 }
 0x258   :  { %v414_v32 = vadd.f32 1e-05, %v408_v27  ;;  %v391_v34 = vmul.f32 0.03125, %v384_v29  ;;  %v368_v36 = vmul.f32 0.03125, %v362_v30  ;;  %939 = vmatprep.subr.bf16.mxu1 %v1034_v0 }
 0x259   :  { %v1011_v37 = vpop.eup %1010 }
 0x25a   :  { %v423_v38 = vmul.f32 %v1011_v37, %v393_v28  ;;  %1016 = vrsqrt.f32 %v414_v32  ;;  %v409_v40 = vsub.f32 %v391_v34, %v403_v33  ;;  %v404_v46 = vmul.f32 %v368_v36, %v368_v36 }
 0x25b   :  { %v386_v41 = vpop.xlane.xlu1 %385  ;;  %v398_v7 = vsub.f32 %v1207_v52, %v368_v36  ;;  %v991_v52 = vld [vmem:[%s1321_s9 + $0x30] sm:$0xff]  }
 0x25c   :  { %v415_v45 = vadd.f32 1e-05, %v409_v40  ;;  %v392_v31 = vmul.f32 0.03125, %v386_v41  ;;  %v436_v51 = vmul.f32 %v801_v43, %v423_v38  ;;  %940 = vmatpush3.bf16.msra.mxu1 %v991_v52 }
 0x25d   :  { %v1013_v48 = vpop.eup %1012  ;;  %941 = vmatprep.subr.bf16.mxu1 %v1034_v0 }
 0x25e   :  { %v424_v49 = vmul.f32 %v1013_v48, %v394_v44  ;;  %1018 = vrsqrt.f32 %v415_v45  ;;  %v410_v50 = vsub.f32 %v392_v31, %v404_v46  ;;  %v449_v57 = vadd.f32 %v802_v53, %v436_v51 }
 0x260   :  { %v416_v54 = vadd.f32 1e-05, %v410_v50  ;;  %v437_v55 = vmul.f32 %v801_v43, %v424_v49  ;;  %942 = vmatpush3.bf16.msra.mxu1 %v992_v15 }
 0x261   :  { %943 = vmatprep.subr.bf16.mxu1 %v1034_v0 }
 0x262   :  { %1020 = vrsqrt.f32 %v416_v54  ;;  %v450_v58 = vadd.f32 %v802_v53, %v437_v55 }
 0x263   :  { %v1015_v35 = vpop.eup %1014 }
 0x264   :  { %v455_v59 = vpack.c.bf16 %v450_v58, %v449_v57  ;;  %v425_v60 = vmul.f32 %v1015_v35, %v395_v56  ;;  %944 = vmatpush3.bf16.msra.mxu1 %v993_v16 }
 0x265   :  { %945 = vmatprep.subr.bf16.mxu1 %v1034_v0 }
 0x266   :  { %926 = vmatmul.mubr.bf16.vlgmr.msra.gmra.mxu0 %v455_v59  ;;  %v438_v1 = vmul.f32 %v801_v43, %v425_v60 }
 0x267   :  { %v1017_v62 = vpop.eup %1016  ;;  %929 = vmatprep.mubr.msk.bf16.mxu0 %vm1035_vm0, %v1034_v0 }
 0x268   :  { %v426_v63 = vmul.f32 %v1017_v62, %v396_v61  ;;  %v451_v39 = vadd.f32 %v802_v53, %v438_v1  ;;  %946 = vmatpush3.bf16.msra.mxu1 %v994_v17 }
 0x269   :  { %947 = vmatprep.subr.bf16.mxu1 %v1034_v0 }
 0x26a   :  { %v439_v3 = vmul.f32 %v801_v43, %v426_v63 }
 0x26b   :  { %v1019_v4 = vpop.eup %1018 }
 0x26c   :  { %v452_v5 = vadd.f32 %v802_v53, %v439_v3  ;;  %v427_v6 = vmul.f32 %v1019_v4, %v397_v2  ;;  %948 = vmatpush3.bf16.msra.mxu1 %v995_v19 }
 0x26d   :  { %949 = vmatprep.subr.bf16.mxu1 %v1034_v0 }
 0x26e   :  { %v456_v8 = vpack.c.bf16 %v452_v5, %v451_v39  ;;  %v440_v10 = vmul.f32 %v801_v43, %v427_v6 }
 0x26f   :  { %v1021_v9 = vpop.eup %1020 }
 0x270   :  { %930 = vmatmul.mubr.bf16.gmra.mxu0 %v456_v8  ;;  %v428_v42 = vmul.f32 %v1021_v9, %v398_v7  ;;  %v453_v12 = vadd.f32 %v802_v53, %v440_v10  ;;  %950 = vmatpush3.bf16.msra.mxu1 %v996_v18 }
 0x271   :  { %933 = vmatprep.mubr.msk.bf16.mxu0 %vm1035_vm0, %v1034_v0  ;;  %951 = vmatprep.subr.bf16.mxu1 %v1034_v0 }
 0x272   :  { %v441_v11 = vmul.f32 %v801_v43, %v428_v42 }
 0x274   :  { %v454_v13 = vadd.f32 %v802_v53, %v441_v11  ;;  %952 = vmatpush3.bf16.msra.mxu1 %v997_v20 }
 0x276   :  { %v457_v14 = vpack.c.bf16 %v454_v13, %v453_v12 }
 0x278   :  { %934 = vmatmul.mubr.bf16.gmra.mxu0 %v457_v14 }
 0x326   :  { %v563_v22 = vpop.f32.mrf.mxu0 }
 0x327   :  { %v564_v23 = vadd.f32 %v803_v21, %v563_v22 }
 0x328   :  { %v927_v24 = vpop.f32.mrf.mxu0 }
 0x329   :  { %v592_v25 = vmul.f32 0.044715, %v564_v23  ;;  %v586_v10 = vmul.f32 0.5, %v564_v23 }
 0x32a   :  { %v566_v26 = vpop.f32.mrf.mxu0 }
 0x32b   :  { %v598_v27 = vmul.f32 %v592_v25, %v564_v23  ;;  %v567_v28 = vadd.f32 %v803_v21, %v566_v26 }
 0x32c   :  { %v928_v29 = vpop.f32.mrf.mxu0 }
 0x32d   :  { %v604_v30 = vmul.f32 %v598_v27, %v564_v23  ;;  %v593_v32 = vmul.f32 0.044715, %v567_v28  ;;  %v587_v11 = vmul.f32 0.5, %v567_v28 }
 0x32f   :  { %v610_v33 = vadd.f32 %v604_v30, %v564_v23  ;;  %v599_v34 = vmul.f32 %v593_v32, %v567_v28 }
 0x330   :  { %v571_v36 = vpop.f32.mrf.mxu0 }
 0x331   :  { %v616_v37 = vmul.f32 0.7978846, %v610_v33  ;;  %v605_v38 = vmul.f32 %v599_v34, %v567_v28  ;;  %v572_v40 = vadd.f32 %v803_v21, %v571_v36  ;;  %v812_v36 = vld [vmem:[%s1323_s10] ss:$0 sm:$0xff] }
 0x332   :  { %v931_v41 = vpop.f32.mrf.mxu0 }
 0x333   :  { %1022 = vtanh.f32 %v616_v37  ;;  %v611_v43 = vadd.f32 %v605_v38, %v567_v28  ;;  %v594_v44 = vmul.f32 0.044715, %v572_v40  ;;  %v588_v18 = vmul.f32 0.5, %v572_v40 }
 0x334   :  { %v574_v45 = vpop.f32.mrf.mxu0 }
 0x335   :  { %v617_v46 = vmul.f32 0.7978846, %v611_v43  ;;  %v600_v31 = vmul.f32 %v594_v44, %v572_v40  ;;  %v575_v48 = vadd.f32 %v803_v21, %v574_v45 }
 0x336   :  { %v932_v49 = vpop.f32.mrf.mxu0 }
 0x337   :  { %1024 = vtanh.f32 %v617_v46  ;;  %v606_v50 = vmul.f32 %v600_v31, %v572_v40  ;;  %v595_v51 = vmul.f32 0.044715, %v575_v48  ;;  %v589_v20 = vmul.f32 0.5, %v575_v48 }
 0x338   :  { %v579_v53 = vpop.f32.mrf.mxu0 }
 0x339   :  { %v601_v54 = vmul.f32 %v595_v51, %v575_v48  ;;  %v580_v55 = vadd.f32 %v803_v21, %v579_v53  ;;  %v612_v56 = vadd.f32 %v606_v50, %v572_v40 }
 0x33a   :  { %v935_v57 = vpop.f32.mrf.mxu0 }
 0x33b   :  { %v607_v58 = vmul.f32 %v601_v54, %v575_v48  ;;  %v596_v35 = vmul.f32 0.044715, %v580_v55  ;;  %v618_v59 = vmul.f32 0.7978846, %v612_v56  ;;  %v590_v28 = vmul.f32 0.5, %v580_v55 }
 0x33c   :  { %v582_v60 = vpop.f32.mrf.mxu0 }
 0x33d   :  { %v602_v61 = vmul.f32 %v596_v35, %v580_v55  ;;  %v583_v62 = vadd.f32 %v803_v21, %v582_v60  ;;  %v613_v63 = vadd.f32 %v607_v58, %v575_v48  ;;  %1026 = vtanh.f32 %v618_v59 }
 0x33e   :  { %v936_v1 = vpop.f32.mrf.mxu0 }
 0x33f   :  { %v608_v2 = vmul.f32 %v602_v61, %v580_v55  ;;  %v597_v3 = vmul.f32 0.044715, %v583_v62  ;;  %v619_v4 = vmul.f32 0.7978846, %v613_v63  ;;  %v591_v29 = vmul.f32 0.5, %v583_v62 }
 0x340   :  { %v1023_v39 = vpop.eup %1022 }
 0x341   :  { %v603_v5 = vmul.f32 %v597_v3, %v583_v62  ;;  %1028 = vtanh.f32 %v619_v4  ;;  %v614_v6 = vadd.f32 %v608_v2, %v580_v55  ;;  %v628_v8 = vadd.f32 1.0, %v1023_v39 }
 0x343   :  { %v609_v7 = vmul.f32 %v603_v5, %v583_v62  ;;  %v620_v9 = vmul.f32 0.7978846, %v614_v6  ;;  %v634_v14 = vmul.f32 %v628_v8, %v586_v10 }
 0x344   :  { %v1025_v42 = vpop.eup %1024 }
 0x345   :  { %v629_v12 = vadd.f32 1.0, %v1025_v42  ;;  %v615_v13 = vadd.f32 %v609_v7, %v583_v62  ;;  %1030 = vtanh.f32 %v620_v9 }
 0x347   :  { %v635_v47 = vmul.f32 %v629_v12, %v587_v11  ;;  %v621_v52 = vmul.f32 0.7978846, %v615_v13 }
 0x349   :  { %v640_v15 = vpack.c.bf16 %v635_v47, %v634_v14  ;;  %1032 = vtanh.f32 %v621_v52 }
 0x34a   :  { %v1027_v16 = vpop.eup %1026 }
 0x34b   :  { %954 = vmatmul.mubr.bf16.vlgmr.msra.gmra.mxu1 %v640_v15  ;;  %v630_v17 = vadd.f32 1.0, %v1027_v16 }
 0x34c   :  { %957 = vmatprep.mubr.msk.bf16.mxu1 %vm1035_vm0, %v1034_v0 }
 0x34d   :  { %v636_v22 = vmul.f32 %v630_v17, %v588_v18 }
 0x34e   :  { %v1029_v19 = vpop.eup %1028 }
 0x34f   :  { %v631_v21 = vadd.f32 1.0, %v1029_v19 }
 0x351   :  { %v637_v23 = vmul.f32 %v631_v21, %v589_v20 }
 0x352   :  { %v1031_v24 = vpop.eup %1030 }
 0x353   :  { %v641_v25 = vpack.c.bf16 %v637_v23, %v636_v22  ;;  %v632_v26 = vadd.f32 1.0, %v1031_v24 }
 0x355   :  { %958 = vmatmul.mubr.bf16.gmra.mxu1 %v641_v25  ;;  %v638_v32 = vmul.f32 %v632_v26, %v590_v28 }
 0x356   :  { %v1033_v27 = vpop.eup %1032  ;;  %961 = vmatprep.mubr.msk.bf16.mxu1 %vm1035_vm0, %v1034_v0 }
 0x357   :  { %v633_v30 = vadd.f32 1.0, %v1033_v27 }
 0x359   :  { %v639_v33 = vmul.f32 %v633_v30, %v591_v29 }
 0x35b   :  { %v642_v34 = vpack.c.bf16 %v639_v33, %v638_v32 }
 0x35d   :  { %962 = vmatmul.mubr.bf16.gmra.mxu1 %v642_v34 }
 0x40b   :  { %v748_v37 = vpop.f32.mrf.mxu1 }
 0x40c   :  { %v749_v38 = vadd.f32 %v812_v36, %v748_v37 }
 0x40d   :  { %v955_v40 = vpop.f32.mrf.mxu1 }
 0x40e   :  { %771 = vst [vmem:[%s1324_s11] sm:$0xff] %v749_v38 }
 0x40f   :  { %v751_v41 = vpop.f32.mrf.mxu1 }
 0x410   :  { %v752_v0 = vadd.f32 %v812_v36, %v751_v41 }
 0x411   :  { %v956_v43 = vpop.f32.mrf.mxu1 }
 0x412   :  { %772 = vst [vmem:[%s1324_s11 + $0x8] sm:$0xff] %v752_v0 }
 0x415   :  { %v756_v44 = vpop.f32.mrf.mxu1 }
 0x416   :  { %v757_v45 = vadd.f32 %v812_v36, %v756_v44 }
 0x417   :  { %v959_v46 = vpop.f32.mrf.mxu1 }
 0x418   :  { %773 = vst [vmem:[%s1324_s11 + $0x10] sm:$0xff] %v757_v45 }
 0x419   :  { %v759_v31 = vpop.f32.mrf.mxu1 }
 0x41a   :  { %v760_v48 = vadd.f32 %v812_v36, %v759_v31 }
 0x41b   :  { %v960_v49 = vpop.f32.mrf.mxu1 }
 0x41c   :  { %774 = vst [vmem:[%s1324_s11 + $0x18] sm:$0xff] %v760_v48 }
 0x41d   :  { %v764_v50 = vpop.f32.mrf.mxu1 }
 0x41e   :  { %v765_v51 = vadd.f32 %v812_v36, %v764_v50 }
 0x41f   :  { %v963_v53 = vpop.f32.mrf.mxu1 }
 0x420   :  { %775 = vst [vmem:[%s1324_s11 + $0x20] sm:$0xff] %v765_v51 }
 0x421   :  { %v767_v54 = vpop.f32.mrf.mxu1 }
 0x422   :  { %v768_v55 = vadd.f32 %v812_v36, %v767_v54 }
 0x423   :  { %v964_v56 = vpop.f32.mrf.mxu1 }
 0x424   :  { %776 = vst [vmem:[%s1324_s11 + $0x28] sm:$0xff] %v768_v55 }

// kernel: _lambda_.11
= control target key start
LH: loop header
LB: loop body
LE: loop exit
PB: predicated region body
PF: predicated region fallthrough
CT: control target
= control target key end

     0   :  { %18 = vsyncpa [#allocation3], 0  ;;  %s6460_s0 = inlined_call_operand.hbm [shape: f32[6,2,16], index: 0, kind: input, shape index: {}]   ;;  %s6461_s1 = inlined_call_operand.hbm [shape: f32[6,2,32], index: 1, kind: input, shape index: {}]   ;;  %s6462_s2 = inlined_call_operand.hbm [shape: f32[6,2,64], index: 2, kind: input, shape index: {}]   ;;  %s6463_s3 = inlined_call_operand.hbm [shape: f32[6,2,128], index: 3, kind: input, shape index: {}]   ;;  %s6464_s4 = inlined_call_operand.hbm [shape: f32[6,16,64], index: 4, kind: input, shape index: {}]   ;;  %s6465_s5 = inlined_call_operand.hbm [shape: f32[6,1,64], index: 5, kind: input, shape index: {}]   ;;  %s6466_s6 = inlined_call_operand.hbm [shape: f32[6,32,64], index: 6, kind: input, shape index: {}]   ;;  %s6467_s7 = inlined_call_operand.hbm [shape: f32[6,1,64], index: 7, kind: input, shape index: {}]   ;;  %s6468_s8 = inlined_call_operand.vmem [shape: f32[6,128,64], index: 8, kind: input, shape index: {}]   ;;  %s6469_s9 = inlined_call_operand.hbm [shape: f32[6,1,64], index: 9, kind: input, shape index: {}]   ;;  %s6470_s10 = inlined_call_operand.hbm [shape: f32[6,256,128], index: 10, kind: input, shape index: {}]   ;;  %s6471_s11 = inlined_call_operand.hbm [shape: f32[6,1,128], index: 11, kind: input, shape index: {}]   ;;  %s6472_s12 = inlined_call_operand.vmem [shape: f32[6,2,1], index: 12, kind: input, shape index: {}]   ;;  %s6473_s13 = inlined_call_operand.vmem [shape: f32[6,128], index: 13, kind: output, shape index: {}]  }
   0x1   :  { %19 = vsyncpa [#allocation5], 0 }
   0x2   :  { %20 = vsyncpa [#allocation8], 0 }
   0x3   :  { %21 = vsyncpa [#allocation11], 0 }
   0x4   :  { %22 = vsyncpa [#allocation14], 0 }
   0x5   :  { %23 = vsyncpa [#allocation17], 0  ;;  %s5510_s25 = smov [#allocation4]   ;;  %s5511_s27 = smov [#allocation7]  }
   0x6   :  { %s41_s26 = sshll.u32 %s5510_s25, 4  ;;  %s65_s28 = sshll.u32 %s5511_s27, 4  ;;  %s42_s26 = int_to_ptr.vmem [resolvable:$true] %s41_s26  ;;  %s66_s28 = int_to_ptr.vmem [resolvable:$true] %s65_s28 }
   0x7   :  { %s5286_s29 = scalar_lea.vmem %s42_s26, 192  ;;  %p5291_p1 = scmp.lt.s32.totalorder %s42_s26, %s42_s26 }
   0x8   :  { %p5287_p0 = scmp.ne.s32.totalorder %s42_s26, %s5286_s29  ;;  %p5292_p2 = scmp.lt.s32.totalorder %s5286_s29, %s5286_s29 }
   0xa   :  { %p5293_p3 = por %p5292_p2, %p5291_p1 }
   0xc   :  { %p5294_p4 = pnand %p5293_p3, %p5287_p0 }
   0xe   :  { %5297 = shalt.err (!%p5294_p4)
}
   0xf   :  { %s5512_s30 = smov 32   ;;  %s5513_s14 = smov 2  }
  0x10   :  { %47 = dma.hbm_to_vmem [thread:$0]  %s6461_s1, 192, %s42_s26, [#allocation5], %s5512_s30, %s5512_s30, %s5513_s14  }
  0x11   :  { %s5306_s17 = scalar_lea.vmem %s66_s28, 192  ;;  %p5311_p6 = scmp.lt.s32.totalorder %s66_s28, %s66_s28 }
  0x12   :  { %p5307_p5 = scmp.ne.s32.totalorder %s66_s28, %s5306_s17  ;;  %p5312_p7 = scmp.lt.s32.totalorder %s5306_s17, %s5306_s17 }
  0x14   :  { %p5313_p8 = por %p5312_p7, %p5311_p6 }
  0x16   :  { %p5314_p9 = pnand %p5313_p8, %p5307_p5 }
  0x18   :  { %5317 = shalt.err (!%p5314_p9)
}
  0x19   :  { %71 = dma.hbm_to_vmem [thread:$0]  %s6463_s3, 192, %s66_s28, [#allocation8], %s5512_s30, %s5512_s30, %s5513_s14  }
  0x1a   :  { %s5514_s20 = smov [#allocation10]  }
  0x1b   :  { %s89_s21 = sshll.u32 %s5514_s20, 4  ;;  %s90_s21 = int_to_ptr.vmem [resolvable:$true] %s89_s21 }
  0x1c   :  { %s5326_s22 = scalar_lea.vmem %s90_s21, 96  ;;  %p5331_p11 = scmp.lt.s32.totalorder %s90_s21, %s90_s21 }
  0x1d   :  { %p5327_p10 = scmp.ne.s32.totalorder %s90_s21, %s5326_s22  ;;  %p5332_p12 = scmp.lt.s32.totalorder %s5326_s22, %s5326_s22 }
  0x1f   :  { %p5333_p13 = por %p5332_p12, %p5331_p11 }
  0x21   :  { %p5334_p0 = pnand %p5333_p13, %p5327_p10 }
  0x23   :  { %5337 = shalt.err (!%p5334_p0)
}
  0x24   :  { %s5515_s1 = smov 16   ;;  %s5516_s23 = smov 1  }
  0x25   :  { %95 = dma.hbm_to_vmem [thread:$0]  %s6465_s5, 96, %s90_s21, [#allocation11], %s5515_s1, %s5515_s1, %s5516_s23  }
  0x26   :  { %s5517_s3 = smov [#allocation13]  }
  0x27   :  { %s113_s26 = sshll.u32 %s5517_s3, 4  ;;  %s114_s26 = int_to_ptr.vmem [resolvable:$true] %s113_s26 }
  0x28   :  { %s5346_s27 = scalar_lea.vmem %s114_s26, 96  ;;  %p5351_p2 = scmp.lt.s32.totalorder %s114_s26, %s114_s26 }
  0x29   :  { %p5347_p1 = scmp.ne.s32.totalorder %s114_s26, %s5346_s27  ;;  %p5352_p3 = scmp.lt.s32.totalorder %s5346_s27, %s5346_s27 }
  0x2b   :  { %p5353_p4 = por %p5352_p3, %p5351_p2 }
  0x2d   :  { %p5354_p5 = pnand %p5353_p4, %p5347_p1 }
  0x2f   :  { %5357 = shalt.err (!%p5354_p5)
}
  0x30   :  { %119 = dma.hbm_to_vmem [thread:$0]  %s6467_s7, 96, %s114_s26, [#allocation14], %s5515_s1, %s5515_s1, %s5516_s23  }
  0x31   :  { %s5518_s15 = smov [#allocation16]   ;;  %s5519_s5 = smov [#allocation2]  }
  0x32   :  { %s139_s16 = sshll.u32 %s5518_s15, 4  ;;  %s29_s17 = sshll.u32 %s5519_s5, 4  ;;  %s140_s16 = int_to_ptr.vmem [resolvable:$true] %s139_s16  ;;  %s30_s17 = int_to_ptr.vmem [resolvable:$true] %s29_s17 }
  0x33   :  { %s5366_s18 = scalar_lea.vmem %s140_s16, 24576  ;;  %p5371_p7 = scmp.lt.s32.totalorder %s140_s16, %s140_s16 }
  0x34   :  { %p5367_p6 = scmp.ne.s32.totalorder %s140_s16, %s5366_s18  ;;  %p5372_p8 = scmp.lt.s32.totalorder %s5366_s18, %s5366_s18 }
  0x36   :  { %p5373_p9 = por %p5372_p8, %p5371_p7 }
  0x38   :  { %p5374_p10 = pnand %p5373_p9, %p5367_p6 }
  0x3a   :  { %5377 = shalt.err (!%p5374_p10)
}
  0x3b   :  { %s5520_s19 = smov 128   ;;  %s5521_s20 = smov 8  }
  0x3c   :  { %145 = dma.hbm_to_vmem [thread:$0]  %s6470_s10, 24576, %s140_s16, [#allocation17], %s5520_s19, %s5520_s19, %s5521_s20  }
  0x3d   :  { %s5386_s22 = scalar_lea.vmem %s30_s17, 192  ;;  %p5391_p12 = scmp.lt.s32.totalorder %s30_s17, %s30_s17 }
  0x3e   :  { %p5387_p11 = scmp.ne.s32.totalorder %s30_s17, %s5386_s22  ;;  %p5392_p13 = scmp.lt.s32.totalorder %s5386_s22, %s5386_s22 }
  0x40   :  { %p5393_p0 = por %p5392_p13, %p5391_p12 }
  0x42   :  { %p5394_p1 = pnand %p5393_p0, %p5387_p11 }
  0x44   :  { %5397 = shalt.err (!%p5394_p1)
}
  0x45   :  { %35 = dma.hbm_to_vmem [thread:$0]  %s6460_s0, 192, %s30_s17, [#allocation3], %s5512_s30, %s5512_s30, %s5513_s14  }
  0x46   :  { %s5522_s3 = smov [#allocation6]   ;;  %s5523_s27 = smov [#allocation9]  }
  0x47   :  { %s53_s26 = sshll.u32 %s5522_s3, 4  ;;  %s77_s28 = sshll.u32 %s5523_s27, 4  ;;  %s54_s26 = int_to_ptr.vmem [resolvable:$true] %s53_s26  ;;  %s78_s28 = int_to_ptr.vmem [resolvable:$true] %s77_s28 }
  0x48   :  { %s5406_s10 = scalar_lea.vmem %s54_s26, 192  ;;  %p5411_p3 = scmp.lt.s32.totalorder %s54_s26, %s54_s26 }
  0x49   :  { %p5407_p2 = scmp.ne.s32.totalorder %s54_s26, %s5406_s10  ;;  %p5412_p4 = scmp.lt.s32.totalorder %s5406_s10, %s5406_s10 }
  0x4b   :  { %p5413_p5 = por %p5412_p4, %p5411_p3 }
  0x4d   :  { %p5414_p6 = pnand %p5413_p5, %p5407_p2 }
  0x4f   :  { %5417 = shalt.err (!%p5414_p6)
}
  0x50   :  { %59 = dma.hbm_to_vmem [thread:$0]  %s6462_s2, 192, %s54_s26, [#allocation5], %s5512_s30, %s5512_s30, %s5513_s14  }
  0x51   :  { %s5426_s0 = scalar_lea.vmem %s78_s28, 1536  ;;  %p5431_p8 = scmp.lt.s32.totalorder %s78_s28, %s78_s28 }
  0x52   :  { %p5427_p7 = scmp.ne.s32.totalorder %s78_s28, %s5426_s0  ;;  %p5432_p9 = scmp.lt.s32.totalorder %s5426_s0, %s5426_s0 }
  0x54   :  { %p5433_p10 = por %p5432_p9, %p5431_p8 }
  0x56   :  { %p5434_p11 = pnand %p5433_p10, %p5427_p7 }
  0x58   :  { %5437 = shalt.err (!%p5434_p11)
}
  0x59   :  { %83 = dma.hbm_to_vmem [thread:$0]  %s6464_s4, 1536, %s78_s28, [#allocation8], %s5520_s19, %s5520_s19, %s5521_s20  }
  0x5a   :  { %s5524_s17 = smov [#allocation12]   ;;  %s5525_s21 = smov [#allocation15]  }
  0x5b   :  { %s101_s18 = sshll.u32 %s5524_s17, 4  ;;  %s127_s7 = sshll.u32 %s5525_s21, 4  ;;  %s102_s18 = int_to_ptr.vmem [resolvable:$true] %s101_s18  ;;  %s128_s7 = int_to_ptr.vmem [resolvable:$true] %s127_s7 }
  0x5c   :  { %s5446_s2 = scalar_lea.vmem %s102_s18, 3072  ;;  %p5451_p13 = scmp.lt.s32.totalorder %s102_s18, %s102_s18 }
  0x5d   :  { %p5447_p12 = scmp.ne.s32.totalorder %s102_s18, %s5446_s2  ;;  %p5452_p0 = scmp.lt.s32.totalorder %s5446_s2, %s5446_s2 }
  0x5f   :  { %p5453_p1 = por %p5452_p0, %p5451_p13 }
  0x61   :  { %p5454_p2 = pnand %p5453_p1, %p5447_p12 }
  0x63   :  { %5457 = shalt.err (!%p5454_p2)
}
  0x64   :  { %107 = dma.hbm_to_vmem [thread:$0]  %s6466_s6, 3072, %s102_s18, [#allocation11], %s5520_s19, %s5520_s19, %s5521_s20  }
  0x65   :  { %s5466_s4 = scalar_lea.vmem %s128_s7, 96  ;;  %p5471_p4 = scmp.lt.s32.totalorder %s128_s7, %s128_s7 }
  0x66   :  { %p5467_p3 = scmp.ne.s32.totalorder %s128_s7, %s5466_s4  ;;  %p5472_p5 = scmp.lt.s32.totalorder %s5466_s4, %s5466_s4 }
  0x68   :  { %p5473_p6 = por %p5472_p5, %p5471_p4 }
  0x6a   :  { %p5474_p7 = pnand %p5473_p6, %p5467_p3 }
  0x6c   :  { %5477 = shalt.err (!%p5474_p7)
}
  0x6d   :  { %133 = dma.hbm_to_vmem [thread:$0]  %s6469_s9, 96, %s128_s7, [#allocation14], %s5515_s1, %s5515_s1, %s5516_s23  }
  0x6e   :  { %s5526_s25 = smov [#allocation18]  }
  0x6f   :  { %s151_s3 = sshll.u32 %s5526_s25, 4  ;;  %s152_s3 = int_to_ptr.vmem [resolvable:$true] %s151_s3 }
  0x70   :  { %s5486_s26 = scalar_lea.vmem %s152_s3, 96  ;;  %p5491_p9 = scmp.lt.s32.totalorder %s152_s3, %s152_s3 }
  0x71   :  { %p5487_p8 = scmp.ne.s32.totalorder %s152_s3, %s5486_s26  ;;  %p5492_p10 = scmp.lt.s32.totalorder %s5486_s26, %s5486_s26 }
  0x73   :  { %p5493_p11 = por %p5492_p10, %p5491_p9 }
  0x75   :  { %p5494_p12 = pnand %p5493_p11, %p5487_p8 }
  0x77   :  { %5497 = shalt.err (!%p5494_p12)
}
  0x78   :  { %157 = dma.hbm_to_vmem [thread:$0]  %s6471_s11, 96, %s152_s3, [#allocation17], %s5515_s1, %s5515_s1, %s5516_s23  }
  0x79   :  { %5498 = dma.done.wait [#allocation3], 192  }
  0x7a   :  { %5499 = vsyncadd [#allocation3], 4294967104 }
  0x7b   :  { %5500 = dma.done.wait [#allocation5], 384  }
  0x7c   :  { %5501 = vsyncadd [#allocation5], 4294966912 }
  0x7d   :  { %5502 = dma.done.wait [#allocation8], 1728  }
  0x7e   :  { %5503 = vsyncadd [#allocation8], 4294965568 }
  0x7f   :  { %5504 = dma.done.wait [#allocation11], 3168  }
  0x80   :  { %5505 = vsyncadd [#allocation11], 4294964128 }
  0x81   :  { %5506 = dma.done.wait [#allocation14], 192  }
  0x82   :  { %5507 = vsyncadd [#allocation14], 4294967104 }
  0x83   :  { %5508 = dma.done.wait [#allocation17], 24672  }
  0x84   :  { %5509 = vsyncadd [#allocation17], 4294942624  ;;  %v5527_v0 = vmov 0.0   ;;  %vm5528_vm0 = vmmov 0   ;;  %v197_v1 = vld [vmem:[#allocation9 + $0x8] sm:$0xff]  ;;  %v196_v2 = vld [vmem:[#allocation9] sm:$0xff] }
  0x85   :  { %4482 = vmatprep.subr.mxu1 %v5527_v0  ;;  %4486 = vmatprep.mubr.msk.f32.mxu1 %vm5528_vm0, %v5527_v0  ;;  %v195_v3 = vld [vmem:[#allocation2] sm:$0x3]  ;;  %vm205_vm1 = vcmask 130048   ;;  %v283_v4 = vld [vmem:[#allocation12 + $0x18] sm:$0xff]  ;;  %v381_v5 = vld [vmem:[%s6468_s8 + $0x78] sm:$0xff]  ;;  %vm291_vm2 = vcmask 261120  }
  0x86   :  { %4500 = vmatprep.subr.mxu0 %v5527_v0  ;;  %4532 = vmatprep.mubr.msk.f32.mxu0 %vm5528_vm0, %v5527_v0  ;;  %v282_v6 = vld [vmem:[#allocation12 + $0x10] sm:$0xff]  ;;  %v380_v7 = vld [vmem:[%s6468_s8 + $0x70] sm:$0xff]  ;;  %v281_v8 = vld [vmem:[#allocation12 + $0x8] sm:$0xff]  ;;  %vm491_vm3 = vcmask 523264   ;;  %v5529_v54 = vmov 0   ;;  %vm802_vm4 = vcmask 1041408  }
  0x87   :  { %4483 = vmatpush3.msra.mxu1 %v197_v1  ;;  %4501 = vmatpush3.msra.mxu0 %v381_v5  ;;  %v379_v9 = vld [vmem:[%s6468_s8 + $0x68] sm:$0xff]  ;;  %v280_v10 = vld [vmem:[#allocation12] sm:$0xff]  ;;  %v378_v11 = vld [vmem:[%s6468_s8 + $0x60] sm:$0xff] }
  0x88   :  { %4484 = vmatprep.subr.mxu1 %v5527_v0  ;;  %4502 = vmatprep.subr.mxu0 %v5527_v0  ;;  %v279_v12 = vld [vmem:[#allocation4] sm:$0x3]  ;;  %v377_v13 = vld [vmem:[%s6468_s8 + $0x58] sm:$0xff]  ;;  %v376_v15 = vld [vmem:[%s6468_s8 + $0x50] sm:$0xff] }
  0x89   :  { %4485 = vmatpush3.msra.mxu1 %v196_v2  ;;  %4503 = vmatpush3.msra.mxu0 %v380_v7  ;;  %v474_v14 = vld [vmem:[#allocation16 + $0x78] sm:$0xff]  ;;  %v473_v16 = vld [vmem:[#allocation16 + $0x70] sm:$0xff]  ;;  %v375_v17 = vld [vmem:[%s6468_s8 + $0x48] sm:$0xff] }
  0x8a   :  { %4487 = vmatmul.mubr.msk.f32.vlgmr.msra.gmra.mxu1 %vm205_vm1, %v195_v3  ;;  %4489 = vmatprep.subr.mxu1 %v5527_v0  ;;  %v472_v18 = vld [vmem:[#allocation16 + $0x68] sm:$0xff]  ;;  %v374_v19 = vld [vmem:[%s6468_s8 + $0x40] sm:$0xff]  ;;  %v373_v20 = vld [vmem:[%s6468_s8 + $0x38] sm:$0xff] }
  0x8b   :  { %4490 = vmatpush3.msra.mxu1 %v283_v4  ;;  %4497 = vmatprep.mubr.msk.f32.mxu1 %vm5528_vm0, %v5527_v0  ;;  %v372_v21 = vld [vmem:[%s6468_s8 + $0x30] sm:$0xff]  ;;  %v371_v22 = vld [vmem:[%s6468_s8 + $0x28] sm:$0xff]  ;;  %v370_v23 = vld [vmem:[%s6468_s8 + $0x20] sm:$0xff] }
  0x8c   :  { %4491 = vmatprep.subr.mxu1 %v5527_v0  ;;  %4504 = vmatprep.subr.mxu0 %v5527_v0  ;;  %v369_v24 = vld [vmem:[%s6468_s8 + $0x18] sm:$0xff]  ;;  %v368_v25 = vld [vmem:[%s6468_s8 + $0x10] sm:$0xff]  ;;  %v367_v26 = vld [vmem:[%s6468_s8 + $0x8] sm:$0xff] }
  0x8d   :  { %4492 = vmatpush3.msra.mxu1 %v282_v6  ;;  %4505 = vmatpush3.msra.mxu0 %v379_v9  ;;  %v366_v27 = vld [vmem:[%s6468_s8] sm:$0xff]  ;;  %v481_v30 = vld [vmem:[#allocation16 + $0xb0] sm:$0xff]  ;;  %v480_v31 = vld [vmem:[#allocation16 + $0xa8] sm:$0xff] }
  0x8e   :  { %4493 = vmatprep.subr.mxu1 %v5527_v0  ;;  %4506 = vmatprep.subr.mxu0 %v5527_v0  ;;  %v365_v28 = vld [vmem:[#allocation7] sm:$0x3]  ;;  %v482_v29 = vld [vmem:[#allocation16 + $0xb8] sm:$0xff]  ;;  %v477_v35 = vld [vmem:[#allocation16 + $0x90] sm:$0xff] }
  0x8f   :  { %4494 = vmatpush3.msra.mxu1 %v281_v8  ;;  %4507 = vmatpush3.msra.mxu0 %v378_v11  ;;  %v479_v32 = vld [vmem:[#allocation16 + $0xa0] sm:$0xff]  ;;  %v478_v33 = vld [vmem:[#allocation16 + $0x98] sm:$0xff]  ;;  %v476_v37 = vld [vmem:[#allocation16 + $0x88] sm:$0xff] }
  0x90   :  { %4495 = vmatprep.subr.mxu1 %v5527_v0  ;;  %4508 = vmatprep.subr.mxu0 %v5527_v0  ;;  %v471_v34 = vld [vmem:[#allocation16 + $0x60] sm:$0xff]  ;;  %v470_v36 = vld [vmem:[#allocation16 + $0x58] sm:$0xff]  ;;  %v469_v38 = vld [vmem:[#allocation16 + $0x50] sm:$0xff] }
  0x91   :  { %4496 = vmatpush3.msra.mxu1 %v280_v10  ;;  %4509 = vmatpush3.msra.mxu0 %v377_v13  ;;  %v475_v39 = vld [vmem:[#allocation16 + $0x80] sm:$0xff]  ;;  %v468_v40 = vld [vmem:[#allocation16 + $0x48] sm:$0xff]  ;;  %v638_v41 = vld [vmem:[#allocation6] sm:$0x3] }
  0x92   :  { %4498 = vmatmul.mubr.msk.f32.vlgmr.msra.gmra.mxu1 %vm291_vm2, %v279_v12  ;;  %4535 = vmatprep.subr.mxu1 %v5527_v0  ;;  %v819_v42 = vld [vmem:[#allocation9 + $0x18] sm:$0xff]  ;;  %v818_v44 = vld [vmem:[#allocation9 + $0x10] sm:$0xff]  ;;  %v904_v49 = vld [vmem:[#allocation12 + $0x20] sm:$0xff] }
  0x93   :  { %4510 = vmatprep.subr.mxu0 %v5527_v0  ;;  %4536 = vmatpush3.msra.mxu1 %v474_v14  ;;  %v467_v43 = vld [vmem:[#allocation16 + $0x40] sm:$0xff]  ;;  %v907_v46 = vld [vmem:[#allocation12 + $0x38] sm:$0xff]  ;;  %v795_v51 = vld [vmem:[%s6472_s12] sm:$0x3] }
  0x94   :  { %4511 = vmatpush3.msra.mxu0 %v376_v15  ;;  %4537 = vmatprep.subr.mxu1 %v5527_v0  ;;  %v816_v45 = vld [vmem:[#allocation2 + $0x2] sm:$0x3]  ;;  %v906_v47 = vld [vmem:[#allocation12 + $0x30] sm:$0xff]  ;;  %v902_v50 = vld [vmem:[#allocation4 + $0x2] sm:$0x3] }
  0x95   :  { %4512 = vmatprep.subr.mxu0 %v5527_v0  ;;  %4538 = vmatpush3.msra.mxu1 %v473_v16  ;;  %v905_v48 = vld [vmem:[#allocation12 + $0x28] sm:$0xff]  ;;  %v1101_v53 = vld [vmem:[#allocation16 + $0x170] sm:$0xff]  ;;  %v1100_v55 = vld [vmem:[#allocation16 + $0x168] sm:$0xff] }
  0x96   :  { %4513 = vmatpush3.msra.mxu0 %v375_v17  ;;  %4539 = vmatprep.subr.mxu1 %v5527_v0  ;;  %v1102_v52 = vld [vmem:[#allocation16 + $0x178] sm:$0xff]  ;;  %v3973_v58 = vld [vmem:[#allocation13] ss:$0 sm:$0xff]  ;;  %v464_v1 = vld [vmem:[#allocation16 + $0x28] sm:$0xff] }
  0x97   :  { %4514 = vmatprep.subr.mxu0 %v5527_v0  ;;  %4540 = vmatpush3.msra.mxu1 %v472_v18  ;;  %v466_v61 = vld [vmem:[#allocation16 + $0x38] sm:$0xff]  ;;  %v465_v63 = vld [vmem:[#allocation16 + $0x30] sm:$0xff]  ;;  %v463_v2 = vld [vmem:[#allocation16 + $0x20] sm:$0xff] }
  0x98   :  { %4515 = vmatpush3.msra.mxu0 %v374_v19  ;;  %4541 = vmatprep.subr.mxu1 %v5527_v0  ;;  %v462_v3 = vld [vmem:[#allocation16 + $0x18] sm:$0xff]  ;;  %v461_v4 = vld [vmem:[#allocation16 + $0x10] sm:$0xff]  ;;  %v460_v5 = vld [vmem:[#allocation16 + $0x8] sm:$0xff] }
  0x99   :  { %4516 = vmatprep.subr.mxu0 %v5527_v0  ;;  %4551 = vmatprep.mubr.msk.f32.mxu1 %vm5528_vm0, %v5527_v0  ;;  %v3971_v6 = vld [vmem:[#allocation10] ss:$0 sm:$0xff]  ;;  %v459_v7 = vld [vmem:[#allocation16] sm:$0xff]  ;;  %v490_v9 = vld [vmem:[#allocation16 + $0xf8] sm:$0xff] }
  0x9a   :  { %4517 = vmatpush3.msra.mxu0 %v373_v20  ;;  %4542 = vmatpush3.msra.mxu1 %v471_v34  ;;  %v489_v10 = vld [vmem:[#allocation16 + $0xf0] sm:$0xff]  ;;  %v488_v11 = vld [vmem:[#allocation16 + $0xe8] sm:$0xff]  ;;  %v487_v12 = vld [vmem:[#allocation16 + $0xe0] sm:$0xff] }
  0x9b   :  { %4518 = vmatprep.subr.mxu0 %v5527_v0  ;;  %4543 = vmatprep.subr.mxu1 %v5527_v0  ;;  %v486_v14 = vld [vmem:[#allocation16 + $0xd8] sm:$0xff]  ;;  %v485_v16 = vld [vmem:[#allocation16 + $0xd0] sm:$0xff]  ;;  %v484_v18 = vld [vmem:[#allocation16 + $0xc8] sm:$0xff] }
  0x9c   :  { %4519 = vmatpush3.msra.mxu0 %v372_v21  ;;  %4544 = vmatpush3.msra.mxu1 %v470_v36  ;;  %v3975_v17 = vld [vmem:[#allocation15] ss:$0 sm:$0xff]  ;;  %v483_v20 = vld [vmem:[#allocation16 + $0xc0] sm:$0xff]  ;;  %v3987_v34 = vld [vmem:[%s6468_s8 + $0x90] sm:$0xff] }
  0x9d   :  { %4520 = vmatprep.subr.mxu0 %v5527_v0  ;;  %4545 = vmatprep.subr.mxu1 %v5527_v0  ;;  %v4000_v21 = vld [vmem:[%s6468_s8 + $0xf8] sm:$0xff]  ;;  %v3985_v36 = vld [vmem:[%s6468_s8 + $0x80] sm:$0xff] }
  0x9e   :  { %4521 = vmatpush3.msra.mxu0 %v371_v22  ;;  %4546 = vmatpush3.msra.mxu1 %v469_v38  ;;  %v3999_v22 = vld [vmem:[%s6468_s8 + $0xf0] sm:$0xff]  ;;  %v990_v38 = vld [vmem:[#allocation7 + $0x2] sm:$0x3] }
  0x9f   :  { %4522 = vmatprep.subr.mxu0 %v5527_v0  ;;  %4547 = vmatprep.subr.mxu1 %v5527_v0 }
  0xa0   :  { %4523 = vmatpush3.msra.mxu0 %v370_v23  ;;  %4548 = vmatpush3.msra.mxu1 %v468_v40  ;;  %v3998_v23 = vld [vmem:[%s6468_s8 + $0xe8] sm:$0xff] }
  0xa1   :  { %4524 = vmatprep.subr.mxu0 %v5527_v0  ;;  %4549 = vmatprep.subr.mxu1 %v5527_v0  ;;  %v1099_v40 = vld [vmem:[#allocation16 + $0x160] sm:$0xff] }
  0xa2   :  { %4525 = vmatpush3.msra.mxu0 %v369_v24  ;;  %4550 = vmatpush3.msra.mxu1 %v467_v43  ;;  %v3997_v24 = vld [vmem:[%s6468_s8 + $0xe0] sm:$0xff]  ;;  %v1097_v43 = vld [vmem:[#allocation16 + $0x150] sm:$0xff] }
  0xa3   :  { %4526 = vmatprep.subr.mxu0 %v5527_v0  ;;  %4554 = vmatprep.subr.mxu1 %v5527_v0 }
  0xa4   :  { %4527 = vmatpush3.msra.mxu0 %v368_v25  ;;  %5276 = vset.pattern.permute.xlu0 %v5529_v54  ;;  %v3996_v25 = vld [vmem:[%s6468_s8 + $0xd8] sm:$0xff] }
  0xa5   :  { %4528 = vmatprep.subr.mxu0 %v5527_v0  ;;  %798 = vperm.xlu0 %5276, %v795_v51   ;;  %v1094_v51 = vld [vmem:[#allocation16 + $0x138] sm:$0xff] }
  0xa6   :  { %4529 = vmatpush3.msra.mxu0 %v367_v26  ;;  %5277 = vset.pattern.permute.xlu1 %v5529_v54  ;;  %v3995_v26 = vld [vmem:[%s6468_s8 + $0xd0] sm:$0xff] }
  0xa7   :  { %4530 = vmatprep.subr.mxu0 %v5527_v0  ;;  %v1092_v54 = vld [vmem:[#allocation16 + $0x128] sm:$0xff] }
  0xa8   :  { %4531 = vmatpush3.msra.mxu0 %v366_v27  ;;  %v3994_v27 = vld [vmem:[%s6468_s8 + $0xc8] sm:$0xff] }
  0xa9   :  { %4533 = vmatmul.mubr.f32.vlgmr.msra.gmra.mxu0 %v365_v28  ;;  %4573 = vmatprep.subr.mxu0 %v5527_v0  ;;  %v3993_v28 = vld [vmem:[%s6468_s8 + $0xc0] sm:$0xff] }
  0xaa   :  { %4574 = vmatpush3.msra.mxu0 %v482_v29  ;;  %4589 = vmatprep.mubr.msk.f32.mxu0 %vm5528_vm0, %v5527_v0  ;;  %v3992_v29 = vld [vmem:[%s6468_s8 + $0xb8] sm:$0xff] }
  0xab   :  { %4575 = vmatprep.subr.mxu0 %v5527_v0 }
  0xac   :  { %4576 = vmatpush3.msra.mxu0 %v481_v30  ;;  %v3991_v30 = vld [vmem:[%s6468_s8 + $0xb0] sm:$0xff] }
  0xad   :  { %4577 = vmatprep.subr.mxu0 %v5527_v0 }
  0xae   :  { %4578 = vmatpush3.msra.mxu0 %v480_v31  ;;  %v3990_v31 = vld [vmem:[%s6468_s8 + $0xa8] sm:$0xff] }
  0xaf   :  { %4579 = vmatprep.subr.mxu0 %v5527_v0 }
  0xb0   :  { %4580 = vmatpush3.msra.mxu0 %v479_v32  ;;  %v3989_v32 = vld [vmem:[%s6468_s8 + $0xa0] sm:$0xff] }
  0xb1   :  { %4581 = vmatprep.subr.mxu0 %v5527_v0 }
  0xb2   :  { %4582 = vmatpush3.msra.mxu0 %v478_v33  ;;  %v3988_v33 = vld [vmem:[%s6468_s8 + $0x98] sm:$0xff] }
  0xb3   :  { %4583 = vmatprep.subr.mxu0 %v5527_v0 }
  0xb4   :  { %4584 = vmatpush3.msra.mxu0 %v477_v35  ;;  %v3986_v35 = vld [vmem:[%s6468_s8 + $0x88] sm:$0xff] }
  0xb5   :  { %4585 = vmatprep.subr.mxu0 %v5527_v0 }
  0xb6   :  { %4586 = vmatpush3.msra.mxu0 %v476_v37 }
  0xb7   :  { %4587 = vmatprep.subr.mxu0 %v5527_v0 }
  0xb8   :  { %4588 = vmatpush3.msra.mxu0 %v475_v39 }
  0xb9   :  { %4611 = vmatprep.subr.mxu0 %v5527_v0  ;;  %4590 = vmatmul.mubr.msk.f32.vlgmr.msra.gmra.mxu0 %vm491_vm3, %v638_v41  ;;  %v1098_v41 = vld [vmem:[#allocation16 + $0x158] sm:$0xff] }
  0xba   :  { %4612 = vmatpush3.msra.mxu0 %v819_v42  ;;  %4615 = vmatprep.mubr.msk.f32.mxu0 %vm5528_vm0, %v5527_v0 }
  0xbb   :  { %4613 = vmatprep.subr.mxu0 %v5527_v0 }
  0xbc   :  { %4614 = vmatpush3.msra.mxu0 %v818_v44 }
  0xbd   :  { %4618 = vmatprep.subr.mxu0 %v5527_v0  ;;  %4616 = vmatmul.mubr.msk.f32.vlgmr.msra.gmra.mxu0 %vm205_vm1, %v816_v45  ;;  %v1096_v45 = vld [vmem:[#allocation16 + $0x148] sm:$0xff] }
  0xbe   :  { %4619 = vmatpush3.msra.mxu0 %v907_v46  ;;  %4626 = vmatprep.mubr.msk.f32.mxu0 %vm5528_vm0, %v5527_v0  ;;  %v1110_v46 = vld [vmem:[#allocation16 + $0x1b8] sm:$0xff] }
  0xbf   :  { %4620 = vmatprep.subr.mxu0 %v5527_v0 }
  0xc0   :  { %4621 = vmatpush3.msra.mxu0 %v906_v47  ;;  %v1095_v47 = vld [vmem:[#allocation16 + $0x140] sm:$0xff] }
  0xc1   :  { %4622 = vmatprep.subr.mxu0 %v5527_v0 }
  0xc2   :  { %4623 = vmatpush3.msra.mxu0 %v905_v48  ;;  %v3983_v48 = vld [vmem:[#allocation13 + $0x1] ss:$0 sm:$0xff] }
  0xc3   :  { %4624 = vmatprep.subr.mxu0 %v5527_v0 }
  0xc4   :  { %4625 = vmatpush3.msra.mxu0 %v904_v49 }
  0xc5   :  { %4627 = vmatmul.mubr.msk.f32.vlgmr.msra.gmra.mxu0 %vm291_vm2, %v902_v50  ;;  %4664 = vmatprep.subr.mxu0 %v5527_v0 }
  0xc6   :  { %4680 = vmatprep.mubr.msk.f32.mxu0 %vm5528_vm0, %v5527_v0  ;;  %4665 = vmatpush3.msra.mxu0 %v1102_v52 }
  0xc7   :  { %4666 = vmatprep.subr.mxu0 %v5527_v0 }
  0xc8   :  { %4667 = vmatpush3.msra.mxu0 %v1101_v53  ;;  %v1093_v53 = vld [vmem:[#allocation16 + $0x130] sm:$0xff] }
  0xc9   :  { %4668 = vmatprep.subr.mxu0 %v5527_v0 }
  0xca   :  { %4669 = vmatpush3.msra.mxu0 %v1100_v55  ;;  %v1091_v55 = vld [vmem:[#allocation16 + $0x120] sm:$0xff] }
  0xcb   :  { %4670 = vmatprep.subr.mxu0 %v5527_v0 }
  0xcc   :  { %4671 = vmatpush3.msra.mxu0 %v1099_v40 }
  0xcd   :  { %4672 = vmatprep.subr.mxu0 %v5527_v0 }
  0xce   :  { %4673 = vmatpush3.msra.mxu0 %v1098_v41 }
  0xcf   :  { %4674 = vmatprep.subr.mxu0 %v5527_v0 }
  0xd0   :  { %4675 = vmatpush3.msra.mxu0 %v1097_v43 }
  0xd1   :  { %4676 = vmatprep.subr.mxu0 %v5527_v0 }
  0xd2   :  { %4677 = vmatpush3.msra.mxu0 %v1096_v45  ;;  %v4027_v45 = vld [vmem:[%s6468_s8 + $0x178] sm:$0xff] }
  0xd3   :  { %4678 = vmatprep.subr.mxu0 %v5527_v0 }
  0xd4   :  { %4679 = vmatpush3.msra.mxu0 %v1095_v47  ;;  %v4026_v47 = vld [vmem:[%s6468_s8 + $0x170] sm:$0xff] }
  0xd5   :  { %4683 = vmatprep.subr.mxu0 %v5527_v0 }
 0x14a   :  { %v275_v56 = vpop.f32.mrf.mxu1 }
 0x14b   :  { %v276_v8 = vadd.f32 %v3971_v6, %v275_v56  ;;  %v1109_v56 = vld [vmem:[#allocation16 + $0x1b0] sm:$0xff]  ;;  %v1266_v6 = vld [vmem:[#allocation6 + $0x2] sm:$0x3] }
 0x14c   :  { %v4488_v57 = vpop.f32.mrf.mxu1 }
 0x14d   :  { %v1090_v57 = vld [vmem:[#allocation16 + $0x118] sm:$0xff] }
 0x152   :  { %v361_v59 = vpop.f32.mrf.mxu1 }
 0x153   :  { %v362_v60 = vadd.f32 %v3973_v58, %v361_v59  ;;  %v1108_v58 = vld [vmem:[#allocation16 + $0x1a8] sm:$0xff]  ;;  %v1107_v59 = vld [vmem:[#allocation16 + $0x1a0] sm:$0xff] }
 0x154   :  { %v4499_v62 = vpop.f32.mrf.mxu1 }
 0x155   :  { %4552 = vmatmul.mubr.msk.f32.vlgmr.msra.gmra.mxu1 %vm491_vm3, %v362_v60  ;;  %v1089_v60 = vld [vmem:[#allocation16 + $0x110] sm:$0xff]  ;;  %v3981_v62 = vld [vmem:[#allocation10 + $0x1] ss:$0 sm:$0xff] }
 0x156   :  { %4555 = vmatpush3.msra.mxu1 %v466_v61  ;;  %4570 = vmatprep.mubr.msk.f32.mxu1 %vm5528_vm0, %v5527_v0  ;;  %v1106_v61 = vld [vmem:[#allocation16 + $0x198] sm:$0xff] }
 0x157   :  { %4556 = vmatprep.subr.mxu1 %v5527_v0 }
 0x158   :  { %4557 = vmatpush3.msra.mxu1 %v465_v63  ;;  %v1088_v63 = vld [vmem:[#allocation16 + $0x108] sm:$0xff] }
 0x159   :  { %4558 = vmatprep.subr.mxu1 %v5527_v0 }
 0x15a   :  { %4559 = vmatpush3.msra.mxu1 %v464_v1  ;;  %v1105_v1 = vld [vmem:[#allocation16 + $0x190] sm:$0xff] }
 0x15b   :  { %4560 = vmatprep.subr.mxu1 %v5527_v0 }
 0x15c   :  { %4561 = vmatpush3.msra.mxu1 %v463_v2 }
 0x15d   :  { %4562 = vmatprep.subr.mxu1 %v5527_v0 }
 0x15e   :  { %4563 = vmatpush3.msra.mxu1 %v462_v3  ;;  %v1087_v3 = vld [vmem:[#allocation16 + $0x100] sm:$0xff] }
 0x15f   :  { %4564 = vmatprep.subr.mxu1 %v5527_v0 }
 0x160   :  { %4565 = vmatpush3.msra.mxu1 %v461_v4  ;;  %v1104_v4 = vld [vmem:[#allocation16 + $0x188] sm:$0xff] }
 0x161   :  { %4566 = vmatprep.subr.mxu1 %v5527_v0 }
 0x162   :  { %4567 = vmatpush3.msra.mxu1 %v460_v5  ;;  %v1103_v5 = vld [vmem:[#allocation16 + $0x180] sm:$0xff] }
 0x163   :  { %4568 = vmatprep.subr.mxu1 %v5527_v0 }
 0x164   :  { %4569 = vmatpush3.msra.mxu1 %v459_v7  ;;  %v1448_v7 = vld [vmem:[#allocation9 + $0x28] sm:$0xff] }
 0x165   :  { %4571 = vmatmul.mubr.msk.f32.vlgmr.msra.gmra.mxu1 %vm491_vm3, %v276_v8  ;;  %4592 = vmatprep.subr.mxu1 %v5527_v0  ;;  %v1447_v8 = vld [vmem:[#allocation9 + $0x20] sm:$0xff] }
 0x166   :  { %4593 = vmatpush3.msra.mxu1 %v490_v9  ;;  %4608 = vmatprep.mubr.msk.f32.mxu1 %vm5528_vm0, %v5527_v0  ;;  %v1445_v9 = vld [vmem:[#allocation2 + $0x4] sm:$0x3] }
 0x167   :  { %4594 = vmatprep.subr.mxu1 %v5527_v0 }
 0x168   :  { %4595 = vmatpush3.msra.mxu1 %v489_v10  ;;  %v1536_v10 = vld [vmem:[#allocation12 + $0x58] sm:$0xff] }
 0x169   :  { %4596 = vmatprep.subr.mxu1 %v5527_v0  ;;  %v455_v13 = vpop.f32.mrf.mxu0 }
 0x16a   :  { %4597 = vmatpush3.msra.mxu1 %v488_v11  ;;  %v456_v19 = vadd.f32 %v3975_v17, %v455_v13  ;;  %v1535_v11 = vld [vmem:[#allocation12 + $0x50] sm:$0xff]  ;;  %v1533_v13 = vld [vmem:[#allocation12 + $0x40] sm:$0xff] }
 0x16b   :  { %4598 = vmatprep.subr.mxu1 %v5527_v0  ;;  %v4534_v15 = vpop.f32.mrf.mxu0  ;;  %v1116_v17 = vld [vmem:[#allocation16 + $0x1e8] sm:$0xff] }
 0x16c   :  { %4599 = vmatpush3.msra.mxu1 %v487_v12  ;;  %v1534_v12 = vld [vmem:[#allocation12 + $0x48] sm:$0xff] }
 0x16d   :  { %4600 = vmatprep.subr.mxu1 %v5527_v0  ;;  %v1118_v15 = vld [vmem:[#allocation16 + $0x1f8] sm:$0xff] }
 0x16e   :  { %4601 = vmatpush3.msra.mxu1 %v486_v14  ;;  %v1531_v14 = vld [vmem:[#allocation4 + $0x4] sm:$0x3] }
 0x16f   :  { %4602 = vmatprep.subr.mxu1 %v5527_v0 }
 0x170   :  { %4603 = vmatpush3.msra.mxu1 %v485_v16  ;;  %v1117_v16 = vld [vmem:[#allocation16 + $0x1f0] sm:$0xff] }
 0x171   :  { %4604 = vmatprep.subr.mxu1 %v5527_v0 }
 0x172   :  { %4605 = vmatpush3.msra.mxu1 %v484_v18  ;;  %v1115_v18 = vld [vmem:[#allocation16 + $0x1e0] sm:$0xff] }
 0x173   :  { %4606 = vmatprep.subr.mxu1 %v5527_v0 }
 0x174   :  { %4607 = vmatpush3.msra.mxu1 %v483_v20  ;;  %v1113_v20 = vld [vmem:[#allocation16 + $0x1d0] sm:$0xff] }
 0x175   :  { %4609 = vmatmul.mubr.msk.f32.vlgmr.msra.gmra.mxu1 %vm491_vm3, %v456_v19  ;;  %4629 = vmatprep.subr.mxu1 %v5527_v0  ;;  %v1114_v19 = vld [vmem:[#allocation16 + $0x1d8] sm:$0xff] }
 0x176   :  { %4630 = vmatpush3.msra.mxu1 %v4000_v21  ;;  %4661 = vmatprep.mubr.msk.f32.mxu1 %vm5528_vm0, %v5527_v0  ;;  %v1112_v21 = vld [vmem:[#allocation16 + $0x1c8] sm:$0xff] }
 0x177   :  { %4631 = vmatprep.subr.mxu1 %v5527_v0 }
 0x178   :  { %4632 = vmatpush3.msra.mxu1 %v3999_v22  ;;  %v1111_v22 = vld [vmem:[#allocation16 + $0x1c0] sm:$0xff] }
 0x179   :  { %4633 = vmatprep.subr.mxu1 %v5527_v0  ;;  %v5874_v37 = vpop.f32.mrf.mxu0 }
 0x17a   :  { %4634 = vmatpush3.msra.mxu1 %v3998_v23  ;;  %v4007_v23 = vld [vmem:[%s6472_s12 + $0x2] sm:$0x3] }
 0x17b   :  { %4635 = vmatprep.subr.mxu1 %v5527_v0  ;;  %v4591_v39 = vpop.f32.mrf.mxu0  ;;  %1428 = vperm.xlu0 %5276, %v4007_v23   ;;  %v1732_v23 = vld [vmem:[#allocation16 + $0x280] sm:$0xff] }
 0x17c   :  { %4636 = vmatpush3.msra.mxu1 %v3997_v24  ;;  %v1731_v24 = vld [vmem:[#allocation16 + $0x278] sm:$0xff] }
 0x17d   :  { %4637 = vmatprep.subr.mxu1 %v5527_v0  ;;  %v897_v42 = vpop.f32.mrf.mxu0 }
 0x17e   :  { %4638 = vmatpush3.msra.mxu1 %v3996_v25  ;;  %v898_v2 = vadd.f32 %v3981_v62, %v897_v42  ;;  %v1730_v25 = vld [vmem:[#allocation16 + $0x270] sm:$0xff]  ;;  %v4001_v42 = vld [vmem:[#allocation15 + $0x1] ss:$0 sm:$0xff]  ;;  %v4013_v62 = vld [vmem:[%s6468_s8 + $0x108] sm:$0xff] }
 0x17f   :  { %4639 = vmatprep.subr.mxu1 %v5527_v0  ;;  %v4617_v44 = vpop.f32.mrf.mxu0 }
 0x180   :  { %4640 = vmatpush3.msra.mxu1 %v3995_v26  ;;  %v1729_v26 = vld [vmem:[#allocation16 + $0x268] sm:$0xff] }
 0x181   :  { %4641 = vmatprep.subr.mxu1 %v5527_v0 }
 0x182   :  { %4642 = vmatpush3.msra.mxu1 %v3994_v27  ;;  %v1728_v27 = vld [vmem:[#allocation16 + $0x260] sm:$0xff] }
 0x183   :  { %4643 = vmatprep.subr.mxu1 %v5527_v0 }
 0x184   :  { %4644 = vmatpush3.msra.mxu1 %v3993_v28  ;;  %v1727_v28 = vld [vmem:[#allocation16 + $0x258] sm:$0xff] }
 0x185   :  { %4645 = vmatprep.subr.mxu1 %v5527_v0  ;;  %v985_v49 = vpop.f32.mrf.mxu0 }
 0x186   :  { %4646 = vmatpush3.msra.mxu1 %v3992_v29  ;;  %v986_v50 = vadd.f32 %v3983_v48, %v985_v49  ;;  %v1726_v29 = vld [vmem:[#allocation16 + $0x250] sm:$0xff]  ;;  %v4024_v48 = vld [vmem:[%s6468_s8 + $0x160] sm:$0xff] }
 0x187   :  { %4647 = vmatprep.subr.mxu1 %v5527_v0  ;;  %v4628_v52 = vpop.f32.mrf.mxu0  ;;  %v4023_v49 = vld [vmem:[%s6468_s8 + $0x158] sm:$0xff] }
 0x188   :  { %4648 = vmatpush3.msra.mxu1 %v3991_v30  ;;  %4681 = vmatmul.mubr.msk.f32.vlgmr.msra.gmra.mxu0 %vm491_vm3, %v986_v50  ;;  %v1725_v30 = vld [vmem:[#allocation16 + $0x248] sm:$0xff] }
 0x189   :  { %4649 = vmatprep.subr.mxu1 %v5527_v0  ;;  %4684 = vmatpush3.msra.mxu0 %v1094_v51  ;;  %v4022_v50 = vld [vmem:[%s6468_s8 + $0x150] sm:$0xff]  ;;  %v4021_v52 = vld [vmem:[%s6468_s8 + $0x148] sm:$0xff] }
 0x18a   :  { %4650 = vmatpush3.msra.mxu1 %v3990_v31  ;;  %4699 = vmatprep.mubr.msk.f32.mxu0 %vm5528_vm0, %v5527_v0  ;;  %v1724_v31 = vld [vmem:[#allocation16 + $0x240] sm:$0xff] }
 0x18b   :  { %4651 = vmatprep.subr.mxu1 %v5527_v0  ;;  %4685 = vmatprep.subr.mxu0 %v5527_v0 }
 0x18c   :  { %4652 = vmatpush3.msra.mxu1 %v3989_v32  ;;  %4686 = vmatpush3.msra.mxu0 %v1093_v53 }
 0x18d   :  { %4653 = vmatprep.subr.mxu1 %v5527_v0  ;;  %4687 = vmatprep.subr.mxu0 %v5527_v0 }
 0x18e   :  { %4654 = vmatpush3.msra.mxu1 %v3988_v33  ;;  %4688 = vmatpush3.msra.mxu0 %v1092_v54  ;;  %v4020_v54 = vld [vmem:[%s6468_s8 + $0x140] sm:$0xff] }
 0x18f   :  { %4655 = vmatprep.subr.mxu1 %v5527_v0  ;;  %4689 = vmatprep.subr.mxu0 %v5527_v0 }
 0x190   :  { %4656 = vmatpush3.msra.mxu1 %v3987_v34  ;;  %4690 = vmatpush3.msra.mxu0 %v1091_v55  ;;  %v4019_v55 = vld [vmem:[%s6468_s8 + $0x138] sm:$0xff] }
 0x191   :  { %4657 = vmatprep.subr.mxu1 %v5527_v0  ;;  %4691 = vmatprep.subr.mxu0 %v5527_v0 }
 0x192   :  { %4658 = vmatpush3.msra.mxu1 %v3986_v35  ;;  %4692 = vmatpush3.msra.mxu0 %v1090_v57  ;;  %v4017_v57 = vld [vmem:[%s6468_s8 + $0x128] sm:$0xff] }
 0x193   :  { %4659 = vmatprep.subr.mxu1 %v5527_v0  ;;  %4693 = vmatprep.subr.mxu0 %v5527_v0 }
 0x194   :  { %4660 = vmatpush3.msra.mxu1 %v3985_v36  ;;  %4694 = vmatpush3.msra.mxu0 %v1089_v60  ;;  %v4014_v60 = vld [vmem:[%s6468_s8 + $0x110] sm:$0xff] }
 0x195   :  { %4662 = vmatmul.mubr.f32.vlgmr.msra.gmra.mxu1 %v990_v38  ;;  %4702 = vmatprep.subr.mxu1 %v5527_v0 }
 0x196   :  { %4718 = vmatprep.mubr.msk.f32.mxu1 %vm5528_vm0, %v5527_v0  ;;  %4703 = vmatpush3.msra.mxu1 %v1110_v46 }
 0x197   :  { %4704 = vmatprep.subr.mxu1 %v5527_v0  ;;  %4695 = vmatprep.subr.mxu0 %v5527_v0 }
 0x198   :  { %4705 = vmatpush3.msra.mxu1 %v1109_v56  ;;  %4696 = vmatpush3.msra.mxu0 %v1088_v63  ;;  %v4018_v56 = vld [vmem:[%s6468_s8 + $0x130] sm:$0xff] }
 0x199   :  { %4706 = vmatprep.subr.mxu1 %v5527_v0  ;;  %4697 = vmatprep.subr.mxu0 %v5527_v0 }
 0x19a   :  { %4707 = vmatpush3.msra.mxu1 %v1108_v58  ;;  %4698 = vmatpush3.msra.mxu0 %v1087_v3  ;;  %v4016_v58 = vld [vmem:[%s6468_s8 + $0x120] sm:$0xff] }
 0x19b   :  { %4708 = vmatprep.subr.mxu1 %v5527_v0  ;;  %4700 = vmatmul.mubr.msk.f32.vlgmr.msra.gmra.mxu0 %vm491_vm3, %v898_v2  ;;  %v4012_v3 = vld [vmem:[%s6468_s8 + $0x100] sm:$0xff] }
 0x19c   :  { %4709 = vmatpush3.msra.mxu1 %v1107_v59  ;;  %4721 = vmatprep.subr.mxu0 %v5527_v0  ;;  %v4015_v59 = vld [vmem:[%s6468_s8 + $0x118] sm:$0xff] }
 0x19d   :  { %4710 = vmatprep.subr.mxu1 %v5527_v0  ;;  %4737 = vmatprep.mubr.msk.f32.mxu0 %vm5528_vm0, %v5527_v0 }
 0x19e   :  { %4711 = vmatpush3.msra.mxu1 %v1106_v61  ;;  %4722 = vmatpush3.msra.mxu0 %v1118_v15 }
 0x19f   :  { %4712 = vmatprep.subr.mxu1 %v5527_v0  ;;  %4723 = vmatprep.subr.mxu0 %v5527_v0 }
 0x1a0   :  { %4713 = vmatpush3.msra.mxu1 %v1105_v1  ;;  %4724 = vmatpush3.msra.mxu0 %v1117_v16  ;;  %v1734_v16 = vld [vmem:[#allocation16 + $0x290] sm:$0xff] }
 0x1a1   :  { %4714 = vmatprep.subr.mxu1 %v5527_v0  ;;  %4725 = vmatprep.subr.mxu0 %v5527_v0 }
 0x1a2   :  { %4715 = vmatpush3.msra.mxu1 %v1104_v4  ;;  %4726 = vmatpush3.msra.mxu0 %v1116_v17 }
 0x1a3   :  { %4716 = vmatprep.subr.mxu1 %v5527_v0  ;;  %4727 = vmatprep.subr.mxu0 %v5527_v0 }
 0x1a4   :  { %4717 = vmatpush3.msra.mxu1 %v1103_v5  ;;  %4728 = vmatpush3.msra.mxu0 %v1115_v18  ;;  %v1619_v5 = vld [vmem:[#allocation7 + $0x4] sm:$0x3]  ;;  %v1723_v18 = vld [vmem:[#allocation16 + $0x238] sm:$0xff] }
 0x1a5   :  { %4719 = vmatmul.mubr.msk.f32.vlgmr.msra.gmra.mxu1 %vm491_vm3, %v1266_v6  ;;  %4740 = vmatprep.subr.mxu1 %v5527_v0 }
 0x1a6   :  { %4741 = vmatpush3.msra.mxu1 %v1448_v7  ;;  %4744 = vmatprep.mubr.msk.f32.mxu1 %vm5528_vm0, %v5527_v0  ;;  %v1739_v7 = vld [vmem:[#allocation16 + $0x2b8] sm:$0xff] }
 0x1a7   :  { %4742 = vmatprep.subr.mxu1 %v5527_v0  ;;  %4729 = vmatprep.subr.mxu0 %v5527_v0 }
 0x1a8   :  { %4743 = vmatpush3.msra.mxu1 %v1447_v8  ;;  %4730 = vmatpush3.msra.mxu0 %v1114_v19 }
 0x1a9   :  { %4747 = vmatprep.subr.mxu1 %v5527_v0  ;;  %4745 = vmatmul.mubr.msk.f32.vlgmr.msra.gmra.mxu1 %vm205_vm1, %v1445_v9  ;;  %v1738_v9 = vld [vmem:[#allocation16 + $0x2b0] sm:$0xff] }
 0x1aa   :  { %4748 = vmatpush3.msra.mxu1 %v1536_v10  ;;  %4755 = vmatprep.mubr.msk.f32.mxu1 %vm5528_vm0, %v5527_v0 }
 0x1ab   :  { %4749 = vmatprep.subr.mxu1 %v5527_v0  ;;  %4731 = vmatprep.subr.mxu0 %v5527_v0 }
 0x1ac   :  { %4750 = vmatpush3.msra.mxu1 %v1535_v11  ;;  %4732 = vmatpush3.msra.mxu0 %v1113_v20  ;;  %v1737_v11 = vld [vmem:[#allocation16 + $0x2a8] sm:$0xff]  ;;  %v1722_v20 = vld [vmem:[#allocation16 + $0x230] sm:$0xff] }
 0x1ad   :  { %4751 = vmatprep.subr.mxu1 %v5527_v0  ;;  %4733 = vmatprep.subr.mxu0 %v5527_v0 }
 0x1ae   :  { %4752 = vmatpush3.msra.mxu1 %v1534_v12  ;;  %4734 = vmatpush3.msra.mxu0 %v1112_v21  ;;  %v1736_v12 = vld [vmem:[#allocation16 + $0x2a0] sm:$0xff]  ;;  %v1733_v21 = vld [vmem:[#allocation16 + $0x288] sm:$0xff] }
 0x1af   :  { %4753 = vmatprep.subr.mxu1 %v5527_v0  ;;  %4735 = vmatprep.subr.mxu0 %v5527_v0 }
 0x1b0   :  { %4754 = vmatpush3.msra.mxu1 %v1533_v13  ;;  %4736 = vmatpush3.msra.mxu0 %v1111_v22  ;;  %v4010_v13 = vld [vmem:[#allocation13 + $0x2] ss:$0 sm:$0xff]  ;;  %v1721_v22 = vld [vmem:[#allocation16 + $0x228] sm:$0xff] }
 0x1b1   :  { %4756 = vmatmul.mubr.msk.f32.vlgmr.msra.gmra.mxu1 %vm291_vm2, %v1531_v14  ;;  %4793 = vmatprep.subr.mxu1 %v5527_v0  ;;  %v1735_v14 = vld [vmem:[#allocation16 + $0x298] sm:$0xff] }
 0x1b2   :  { %4809 = vmatprep.mubr.msk.f32.mxu1 %vm5528_vm0, %v5527_v0  ;;  %4758 = vmatprep.subr.mxu0 %v5527_v0 }
 0x1b3   :  { %4794 = vmatpush3.msra.mxu1 %v1731_v24  ;;  %v1895_v24 = vld [vmem:[#allocation6 + $0x4] sm:$0x3] }
 0x1b4   :  { %4795 = vmatprep.subr.mxu1 %v5527_v0 }
 0x1b5   :  { %4796 = vmatpush3.msra.mxu1 %v1730_v25  ;;  %v1720_v25 = vld [vmem:[#allocation16 + $0x220] sm:$0xff] }
 0x1b6   :  { %4797 = vmatprep.subr.mxu1 %v5527_v0 }
 0x1b7   :  { %4798 = vmatpush3.msra.mxu1 %v1729_v26  ;;  %v2077_v26 = vld [vmem:[#allocation9 + $0x38] sm:$0xff] }
 0x1b8   :  { %4799 = vmatprep.subr.mxu1 %v5527_v0 }
 0x1b9   :  { %4800 = vmatpush3.msra.mxu1 %v1728_v27  ;;  %v1719_v27 = vld [vmem:[#allocation16 + $0x218] sm:$0xff] }
 0x1ba   :  { %4801 = vmatprep.subr.mxu1 %v5527_v0 }
 0x1bb   :  { %4802 = vmatpush3.msra.mxu1 %v1727_v28  ;;  %v1718_v28 = vld [vmem:[#allocation16 + $0x210] sm:$0xff] }
 0x1bc   :  { %4803 = vmatprep.subr.mxu1 %v5527_v0 }
 0x1bd   :  { %4804 = vmatpush3.msra.mxu1 %v1726_v29  ;;  %v4008_v29 = vld [vmem:[#allocation10 + $0x2] ss:$0 sm:$0xff] }
 0x1be   :  { %4805 = vmatprep.subr.mxu1 %v5527_v0 }
 0x1bf   :  { %4806 = vmatpush3.msra.mxu1 %v1725_v30  ;;  %v1717_v30 = vld [vmem:[#allocation16 + $0x208] sm:$0xff] }
 0x1c0   :  { %4807 = vmatprep.subr.mxu1 %v5527_v0 }
 0x1c1   :  { %4808 = vmatpush3.msra.mxu1 %v1724_v31 }
 0x1c2   :  { %4812 = vmatprep.subr.mxu1 %v5527_v0 }
 0x215   :  { %v561_v32 = vpop.f32.mrf.mxu1 }
 0x217   :  { %v4553_v33 = vpop.f32.mrf.mxu1 }
 0x218   :  { %v2076_v33 = vld [vmem:[#allocation9 + $0x30] sm:$0xff] }
 0x225   :  { %v634_v34 = vpop.f32.mrf.mxu1 }
 0x226   :  { %v635_v35 = vadd.f32 %v634_v34, %v561_v32  ;;  %v1716_v32 = vld [vmem:[#allocation16 + $0x200] sm:$0xff] }
 0x227   :  { %v4572_v36 = vpop.f32.mrf.mxu1  ;;  %v2074_v34 = vld [vmem:[#allocation2 + $0x6] sm:$0x3] }
 0x228   :  { %v712_v38 = vadd.f32 %v5874_v37, %v635_v35  ;;  %v4025_v37 = vld [vmem:[%s6468_s8 + $0x168] sm:$0xff] }
 0x229   :  { %v2165_v35 = vld [vmem:[#allocation12 + $0x78] sm:$0xff]  ;;  %v2164_v36 = vld [vmem:[#allocation12 + $0x70] sm:$0xff] }
 0x235   :  { %v782_v39 = vpop.f32.mrf.mxu1 }
 0x236   :  { %v5942_v40 = vadd.f32 %v782_v39, %v712_v38  ;;  %v2163_v38 = vld [vmem:[#allocation12 + $0x68] sm:$0xff]  ;;  %v2162_v39 = vld [vmem:[#allocation12 + $0x60] sm:$0xff] }
 0x237   :  { %v4610_v41 = vpop.f32.mrf.mxu1 }
 0x238   :  { %v2160_v41 = vld [vmem:[#allocation4 + $0x6] sm:$0x3] }
 0x248   :  { %v1188_v51 = vpop.f32.mrf.mxu0 }
 0x24a   :  { %v4682_v53 = vpop.f32.mrf.mxu0 }
 0x24b   :  { %v2357_v53 = vld [vmem:[#allocation16 + $0x360] sm:$0xff] }
 0x255   :  { %v1082_v43 = vpop.f32.mrf.mxu1 }
 0x256   :  { %v1083_v44 = vadd.f32 %v4001_v42, %v1082_v43  ;;  %v1747_v42 = vld [vmem:[#allocation16 + $0x2f8] sm:$0xff]  ;;  %v1746_v43 = vld [vmem:[#allocation16 + $0x2f0] sm:$0xff] }
 0x257   :  { %v4663_v46 = vpop.f32.mrf.mxu1 }
 0x258   :  { %4738 = vmatmul.mubr.msk.f32.vlgmr.msra.gmra.mxu0 %vm491_vm3, %v1083_v44  ;;  %v1745_v44 = vld [vmem:[#allocation16 + $0x2e8] sm:$0xff]  ;;  %v1743_v46 = vld [vmem:[#allocation16 + $0x2d8] sm:$0xff] }
 0x259   :  { %4759 = vmatpush3.msra.mxu0 %v4027_v45  ;;  %4790 = vmatprep.mubr.msk.f32.mxu0 %vm5528_vm0, %v5527_v0  ;;  %v1744_v45 = vld [vmem:[#allocation16 + $0x2e0] sm:$0xff] }
 0x25a   :  { %4760 = vmatprep.subr.mxu0 %v5527_v0 }
 0x25b   :  { %4761 = vmatpush3.msra.mxu0 %v4026_v47  ;;  %v1261_v61 = vpop.f32.mrf.mxu0  ;;  %v1742_v47 = vld [vmem:[#allocation16 + $0x2d0] sm:$0xff] }
 0x25c   :  { %4762 = vmatprep.subr.mxu0 %v5527_v0  ;;  %v1262_v63 = vadd.f32 %v1261_v61, %v1188_v51  ;;  %v2359_v51 = vld [vmem:[#allocation16 + $0x370] sm:$0xff] }
 0x25d   :  { %4763 = vmatpush3.msra.mxu0 %v4025_v37  ;;  %v4701_v1 = vpop.f32.mrf.mxu0  ;;  %v1741_v37 = vld [vmem:[#allocation16 + $0x2c8] sm:$0xff] }
 0x25e   :  { %4764 = vmatprep.subr.mxu0 %v5527_v0 }
 0x25f   :  { %4765 = vmatpush3.msra.mxu0 %v4024_v48  ;;  %v1740_v48 = vld [vmem:[#allocation16 + $0x2c0] sm:$0xff] }
 0x260   :  { %4766 = vmatprep.subr.mxu0 %v5527_v0 }
 0x261   :  { %4767 = vmatpush3.msra.mxu0 %v4023_v49  ;;  %v4034_v49 = vld [vmem:[%s6472_s12 + $0x4] sm:$0x3] }
 0x262   :  { %4768 = vmatprep.subr.mxu0 %v5527_v0  ;;  %2057 = vperm.xlu1 %5277, %v4034_v49   ;;  %v4040_v49 = vld [vmem:[%s6468_s8 + $0x188] sm:$0xff] }
 0x263   :  { %4769 = vmatpush3.msra.mxu0 %v4022_v50  ;;  %v2360_v50 = vld [vmem:[#allocation16 + $0x378] sm:$0xff] }
 0x264   :  { %4770 = vmatprep.subr.mxu0 %v5527_v0 }
 0x265   :  { %4771 = vmatpush3.msra.mxu0 %v4021_v52  ;;  %v1336_v2 = vpop.f32.mrf.mxu1  ;;  %v2358_v52 = vld [vmem:[#allocation16 + $0x368] sm:$0xff] }
 0x266   :  { %4772 = vmatprep.subr.mxu0 %v5527_v0  ;;  %v6009_v4 = vadd.f32 %v1336_v2, %v1262_v63 }
 0x267   :  { %4773 = vmatpush3.msra.mxu0 %v4020_v54  ;;  %v4720_v6 = vpop.f32.mrf.mxu1  ;;  %v2356_v54 = vld [vmem:[#allocation16 + $0x358] sm:$0xff] }
 0x268   :  { %4774 = vmatprep.subr.mxu0 %v5527_v0 }
 0x269   :  { %4775 = vmatpush3.msra.mxu0 %v4019_v55  ;;  %v1526_v8 = vpop.f32.mrf.mxu1  ;;  %v2355_v55 = vld [vmem:[#allocation16 + $0x350] sm:$0xff] }
 0x26a   :  { %4776 = vmatprep.subr.mxu0 %v5527_v0  ;;  %v1527_v31 = vadd.f32 %v4008_v29, %v1526_v8  ;;  %v4053_v29 = vld [vmem:[%s6468_s8 + $0x1f0] sm:$0xff] }
 0x26b   :  { %4777 = vmatpush3.msra.mxu0 %v4018_v56  ;;  %v4746_v10 = vpop.f32.mrf.mxu1  ;;  %v2354_v56 = vld [vmem:[#allocation16 + $0x348] sm:$0xff] }
 0x26c   :  { %4778 = vmatprep.subr.mxu0 %v5527_v0 }
 0x26d   :  { %4779 = vmatpush3.msra.mxu0 %v4017_v57  ;;  %v2353_v57 = vld [vmem:[#allocation16 + $0x340] sm:$0xff] }
 0x26e   :  { %4780 = vmatprep.subr.mxu0 %v5527_v0 }
 0x26f   :  { %4781 = vmatpush3.msra.mxu0 %v4016_v58  ;;  %v3980_v58 = vld [vmem:[#allocation18] ss:$0 sm:$0xff] }
 0x270   :  { %4782 = vmatprep.subr.mxu0 %v5527_v0 }
 0x271   :  { %4783 = vmatpush3.msra.mxu0 %v4015_v59  ;;  %v1614_v15 = vpop.f32.mrf.mxu1  ;;  %v794_v59 = vadd.f32 %v3980_v58, %v5942_v40  ;;  %v2366_v58 = vld [vmem:[#allocation16 + $0x3a8] sm:$0xff] }
 0x272   :  { %4784 = vmatprep.subr.mxu0 %v5527_v0  ;;  %v1615_v17 = vadd.f32 %v4010_v13, %v1614_v15  ;;  %v193_v13 = vlaneseq }
 0x273   :  { %4785 = vmatpush3.msra.mxu0 %v4014_v60  ;;  %v4757_v19 = vpop.f32.mrf.mxu1  ;;  %v799_v60 = vpop.permute.xlu0 %798 }
 0x274   :  { %4786 = vmatprep.subr.mxu0 %v5527_v0  ;;  %4810 = vmatmul.mubr.msk.f32.vlgmr.msra.gmra.mxu1 %vm491_vm3, %v1615_v17  ;;  %v801_v61 = vmul.f32 %v799_v60, %v794_v59  ;;  %v6075_v17 = vshrl.u32 %v193_v13, 7  ;;  %v2365_v59 = vld [vmem:[#allocation16 + $0x3a0] sm:$0xff]  ;;  %v4037_v60 = vld [vmem:[#allocation13 + $0x3] ss:$0 sm:$0xff]  ;;  %v4035_v13 = vld [vmem:[#allocation10 + $0x3] ss:$0 sm:$0xff] }
 0x275   :  { %4787 = vmatpush3.msra.mxu0 %v4013_v62  ;;  %4813 = vmatpush3.msra.mxu1 %v1723_v18 }
 0x276   :  { %4788 = vmatprep.subr.mxu0 %v5527_v0  ;;  %4828 = vmatprep.mubr.msk.f32.mxu1 %vm5528_vm0, %v5527_v0  ;;  %v803_v62 = vsel %vm802_vm4, %v801_v61, 0.0  ;;  %vm810_vm5 = vcmp.eq.s32.totalorder %v6075_v17, 0  ;;  %vm1439_vm6 = vcmp.eq.s32.totalorder %v6075_v17, 1  ;;  %v2364_v61 = vld [vmem:[#allocation16 + $0x398] sm:$0xff]  ;;  %vm2068_vm7 = vcmp.eq.s32.totalorder %v6075_v17, 2 }
 0x277   :  { %4789 = vmatpush3.msra.mxu0 %v4012_v3  ;;  %4814 = vmatprep.subr.mxu1 %v5527_v0  ;;  %v804_v63 = vrot.slane %v803_v62, 4  ;;  %v4006_v3 = vld [vmem:[#allocation18 + $0x1] ss:$0 sm:$0xff]  ;;  %vm2697_vm8 = vcmp.eq.s32.totalorder %v6075_v17, 3  ;;  %vm3326_vm9 = vcmp.eq.s32.totalorder %v6075_v17, 4  ;;  %vm3955_vm10 = vcmp.eq.s32.totalorder %v6075_v17, 5 }
 0x278   :  { %4791 = vmatmul.mubr.f32.vlgmr.msra.gmra.mxu0 %v1619_v5  ;;  %4831 = vmatprep.subr.mxu0 %v5527_v0 }
 0x279   :  { %4832 = vmatpush3.msra.mxu0 %v1739_v7  ;;  %4847 = vmatprep.mubr.msk.f32.mxu0 %vm5528_vm0, %v5527_v0  ;;  %v805_v1 = vadd.f32 %v804_v63, %v803_v62  ;;  %v1429_v7 = vpop.permute.xlu0 %1428  ;;  %v2363_v63 = vld [vmem:[#allocation16 + $0x390] sm:$0xff] }
 0x27a   :  { %4833 = vmatprep.subr.mxu0 %v5527_v0  ;;  %4815 = vmatpush3.msra.mxu1 %v1722_v20 }
 0x27b   :  { %4834 = vmatpush3.msra.mxu0 %v1738_v9  ;;  %4816 = vmatprep.subr.mxu1 %v5527_v0  ;;  %v806_v9 = vrot.slane %v805_v1, 2 }
 0x27c   :  { %4835 = vmatprep.subr.mxu0 %v5527_v0  ;;  %4817 = vmatpush3.msra.mxu1 %v1721_v22 }
 0x27d   :  { %4836 = vmatpush3.msra.mxu0 %v1737_v11  ;;  %4818 = vmatprep.subr.mxu1 %v5527_v0 }
 0x27e   :  { %4837 = vmatprep.subr.mxu0 %v5527_v0  ;;  %4819 = vmatpush3.msra.mxu1 %v1720_v25 }
 0x27f   :  { %4838 = vmatpush3.msra.mxu0 %v1736_v12  ;;  %4820 = vmatprep.subr.mxu1 %v5527_v0  ;;  %v807_v12 = vadd.f32 %v806_v9, %v805_v1  ;;  %v2524_v9 = vld [vmem:[#allocation6 + $0x6] sm:$0x3] }
 0x280   :  { %4839 = vmatprep.subr.mxu0 %v5527_v0  ;;  %4821 = vmatpush3.msra.mxu1 %v1719_v27  ;;  %v4054_v27 = vld [vmem:[%s6468_s8 + $0x1f8] sm:$0xff] }
 0x281   :  { %4840 = vmatpush3.msra.mxu0 %v1735_v14  ;;  %4822 = vmatprep.subr.mxu1 %v5527_v0  ;;  %v808_v15 = vrot.slane %v807_v12, 1 }
 0x282   :  { %4841 = vmatprep.subr.mxu0 %v5527_v0  ;;  %4823 = vmatpush3.msra.mxu1 %v1718_v28 }
 0x283   :  { %4842 = vmatpush3.msra.mxu0 %v1734_v16  ;;  %4824 = vmatprep.subr.mxu1 %v5527_v0  ;;  %v809_v19 = vadd.f32 %v808_v15, %v807_v12  ;;  %v2348_v12 = vld [vmem:[#allocation16 + $0x318] sm:$0xff] }
 0x284   :  { %4843 = vmatprep.subr.mxu0 %v5527_v0  ;;  %4825 = vmatpush3.msra.mxu1 %v1717_v30  ;;  %v4052_v30 = vld [vmem:[%s6468_s8 + $0x1e8] sm:$0xff] }
 0x285   :  { %4844 = vmatpush3.msra.mxu0 %v1733_v21  ;;  %4826 = vmatprep.subr.mxu1 %v5527_v0  ;;  %v813_v21 = vsel %vm810_vm5, %v809_v19, 0.0  ;;  %v2703_v19 = vld [vmem:[#allocation2 + $0x8] sm:$0x3] }
 0x286   :  { %4845 = vmatprep.subr.mxu0 %v5527_v0  ;;  %4827 = vmatpush3.msra.mxu1 %v1716_v32  ;;  %v4050_v32 = vld [vmem:[%s6468_s8 + $0x1d8] sm:$0xff] }
 0x287   :  { %4846 = vmatpush3.msra.mxu0 %v1732_v23  ;;  %4829 = vmatmul.mubr.msk.f32.vlgmr.msra.gmra.mxu1 %vm491_vm3, %v1527_v31  ;;  %v4051_v31 = vld [vmem:[%s6468_s8 + $0x1e0] sm:$0xff] }
 0x288   :  { %4848 = vmatmul.mubr.msk.f32.vlgmr.msra.gmra.mxu0 %vm491_vm3, %v1895_v24  ;;  %4869 = vmatprep.subr.mxu0 %v5527_v0  ;;  %v4028_v24 = vld [vmem:[#allocation15 + $0x2] ss:$0 sm:$0xff] }
 0x289   :  { %4870 = vmatpush3.msra.mxu0 %v2077_v26  ;;  %4873 = vmatprep.mubr.msk.f32.mxu0 %vm5528_vm0, %v5527_v0 }
 0x28a   :  { %4871 = vmatprep.subr.mxu0 %v5527_v0  ;;  %4850 = vmatprep.subr.mxu1 %v5527_v0 }
 0x28b   :  { %4866 = vmatprep.mubr.msk.f32.mxu1 %vm5528_vm0, %v5527_v0  ;;  %4872 = vmatpush3.msra.mxu0 %v2076_v33  ;;  %v4049_v33 = vld [vmem:[%s6468_s8 + $0x1d0] sm:$0xff] }
 0x28c   :  { %4876 = vmatprep.subr.mxu0 %v5527_v0  ;;  %4874 = vmatmul.mubr.msk.f32.vlgmr.msra.gmra.mxu0 %vm205_vm1, %v2074_v34 }
 0x28d   :  { %4877 = vmatpush3.msra.mxu0 %v2165_v35  ;;  %4884 = vmatprep.mubr.msk.f32.mxu0 %vm5528_vm0, %v5527_v0  ;;  %v4048_v35 = vld [vmem:[%s6468_s8 + $0x1c8] sm:$0xff] }
 0x28e   :  { %4878 = vmatprep.subr.mxu0 %v5527_v0  ;;  %4851 = vmatpush3.msra.mxu1 %v1747_v42  ;;  %v4045_v42 = vld [vmem:[%s6468_s8 + $0x1b0] sm:$0xff] }
 0x28f   :  { %4879 = vmatpush3.msra.mxu0 %v2164_v36  ;;  %4852 = vmatprep.subr.mxu1 %v5527_v0 }
 0x290   :  { %4880 = vmatprep.subr.mxu0 %v5527_v0  ;;  %4853 = vmatpush3.msra.mxu1 %v1746_v43 }
 0x291   :  { %4881 = vmatpush3.msra.mxu0 %v2163_v38  ;;  %4854 = vmatprep.subr.mxu1 %v5527_v0  ;;  %v4047_v38 = vld [vmem:[%s6468_s8 + $0x1c0] sm:$0xff] }
 0x292   :  { %4882 = vmatprep.subr.mxu0 %v5527_v0  ;;  %4855 = vmatpush3.msra.mxu1 %v1745_v44  ;;  %v4044_v44 = vld [vmem:[%s6468_s8 + $0x1a8] sm:$0xff] }
 0x293   :  { %4883 = vmatpush3.msra.mxu0 %v2162_v39  ;;  %4856 = vmatprep.subr.mxu1 %v5527_v0  ;;  %v4046_v39 = vld [vmem:[%s6468_s8 + $0x1b8] sm:$0xff] }
 0x294   :  { %4885 = vmatmul.mubr.msk.f32.vlgmr.msra.gmra.mxu0 %vm291_vm2, %v2160_v41  ;;  %4922 = vmatprep.subr.mxu0 %v5527_v0 }
 0x295   :  { %4938 = vmatprep.mubr.msk.f32.mxu0 %vm5528_vm0, %v5527_v0  ;;  %4857 = vmatpush3.msra.mxu1 %v1744_v45  ;;  %v4043_v45 = vld [vmem:[%s6468_s8 + $0x1a0] sm:$0xff] }
 0x296   :  { %4858 = vmatprep.subr.mxu1 %v5527_v0  ;;  %4923 = vmatpush3.msra.mxu0 %v2360_v50 }
 0x297   :  { %4859 = vmatpush3.msra.mxu1 %v1743_v46  ;;  %4924 = vmatprep.subr.mxu0 %v5527_v0  ;;  %v4042_v46 = vld [vmem:[%s6468_s8 + $0x198] sm:$0xff] }
 0x298   :  { %4860 = vmatprep.subr.mxu1 %v5527_v0  ;;  %4925 = vmatpush3.msra.mxu0 %v2359_v51 }
 0x299   :  { %4861 = vmatpush3.msra.mxu1 %v1742_v47  ;;  %4926 = vmatprep.subr.mxu0 %v5527_v0  ;;  %v4041_v47 = vld [vmem:[%s6468_s8 + $0x190] sm:$0xff] }
 0x29a   :  { %4862 = vmatprep.subr.mxu1 %v5527_v0  ;;  %4927 = vmatpush3.msra.mxu0 %v2358_v52  ;;  %v4039_v52 = vld [vmem:[%s6468_s8 + $0x180] sm:$0xff] }
 0x29b   :  { %4863 = vmatpush3.msra.mxu1 %v1741_v37  ;;  %4928 = vmatprep.subr.mxu0 %v5527_v0 }
 0x29c   :  { %4864 = vmatprep.subr.mxu1 %v5527_v0  ;;  %4929 = vmatpush3.msra.mxu0 %v2357_v53  ;;  %v2248_v53 = vld [vmem:[#allocation7 + $0x6] sm:$0x3] }
 0x29d   :  { %4865 = vmatpush3.msra.mxu1 %v1740_v48  ;;  %4930 = vmatprep.subr.mxu0 %v5527_v0 }
 0x29e   :  { %4887 = vmatprep.subr.mxu1 %v5527_v0  ;;  %4931 = vmatpush3.msra.mxu0 %v2356_v54  ;;  %v2368_v54 = vld [vmem:[#allocation16 + $0x3b8] sm:$0xff] }
 0x29f   :  { %4932 = vmatprep.subr.mxu0 %v5527_v0 }
 0x2a0   :  { %4933 = vmatpush3.msra.mxu0 %v2355_v55 }
 0x2a1   :  { %4934 = vmatprep.subr.mxu0 %v5527_v0 }
 0x2a2   :  { %4935 = vmatpush3.msra.mxu0 %v2354_v56  ;;  %v2367_v56 = vld [vmem:[#allocation16 + $0x3b0] sm:$0xff] }
 0x2a3   :  { %4936 = vmatprep.subr.mxu0 %v5527_v0 }
 0x2a4   :  { %4937 = vmatpush3.msra.mxu0 %v2353_v57 }
 0x2a5   :  { %4941 = vmatprep.subr.mxu0 %v5527_v0 }
 0x318   :  { %v1410_v2 = vpop.f32.mrf.mxu0 }
 0x319   :  { %v1414_v5 = vadd.f32 %v1410_v2, %v6009_v4  ;;  %v2352_v2 = vld [vmem:[#allocation16 + $0x338] sm:$0xff] }
 0x31a   :  { %v4739_v6 = vpop.f32.mrf.mxu0 }
 0x31b   :  { %v1423_v8 = vadd.f32 %v4006_v3, %v1414_v5  ;;  %v2351_v5 = vld [vmem:[#allocation16 + $0x330] sm:$0xff]  ;;  %v2362_v6 = vld [vmem:[#allocation16 + $0x388] sm:$0xff] }
 0x31d   :  { %v1431_v10 = vmul.f32 %v1429_v7, %v1423_v8  ;;  %v2350_v7 = vld [vmem:[#allocation16 + $0x328] sm:$0xff]  ;;  %v2361_v8 = vld [vmem:[#allocation16 + $0x380] sm:$0xff] }
 0x31f   :  { %v1432_v11 = vsel %vm802_vm4, %v1431_v10, 0.0  ;;  %v2349_v10 = vld [vmem:[#allocation16 + $0x320] sm:$0xff] }
 0x320   :  { %v1433_v40 = vrot.slane %v1432_v11, 4 }
 0x322   :  { %v1434_v14 = vadd.f32 %v1433_v40, %v1432_v11  ;;  %v2706_v11 = vld [vmem:[#allocation9 + $0x48] sm:$0xff] }
 0x323   :  { %v2347_v40 = vld [vmem:[#allocation16 + $0x310] sm:$0xff] }
 0x324   :  { %v1435_v16 = vrot.slane %v1434_v14, 2 }
 0x326   :  { %v1436_v18 = vadd.f32 %v1435_v16, %v1434_v14  ;;  %v2346_v14 = vld [vmem:[#allocation16 + $0x308] sm:$0xff]  ;;  %v2345_v16 = vld [vmem:[#allocation16 + $0x300] sm:$0xff] }
 0x328   :  { %v1437_v20 = vrot.slane %v1436_v18, 1 }
 0x32a   :  { %v1438_v4 = vadd.f32 %v1437_v20, %v1436_v18  ;;  %v2705_v18 = vld [vmem:[#allocation9 + $0x40] sm:$0xff] }
 0x32b   :  { %v2794_v20 = vld [vmem:[#allocation12 + $0x98] sm:$0xff] }
 0x32c   :  { %v1442_v22 = vsel %vm1439_vm6, %v1438_v4, 0.0  ;;  %v2793_v4 = vld [vmem:[#allocation12 + $0x90] sm:$0xff] }
 0x32d   :  { %v6079_v23 = vadd.f32 %v1442_v22, %v813_v21  ;;  %v2792_v21 = vld [vmem:[#allocation12 + $0x88] sm:$0xff]  ;;  %v2791_v22 = vld [vmem:[#allocation12 + $0x80] sm:$0xff] }
 0x334   :  { %v1817_v34 = vpop.f32.mrf.mxu1 }
 0x336   :  { %v4811_v36 = vpop.f32.mrf.mxu1 }
 0x337   :  { %v2987_v36 = vld [vmem:[#allocation16 + $0x468] sm:$0xff] }
 0x338   :  { %v1711_v25 = vpop.f32.mrf.mxu0 }
 0x339   :  { %v1712_v26 = vadd.f32 %v4028_v24, %v1711_v25  ;;  %v2789_v24 = vld [vmem:[#allocation4 + $0x8] sm:$0x3]  ;;  %v2376_v25 = vld [vmem:[#allocation16 + $0x3f8] sm:$0xff] }
 0x33a   :  { %v4792_v28 = vpop.f32.mrf.mxu0 }
 0x33b   :  { %4867 = vmatmul.mubr.msk.f32.vlgmr.msra.gmra.mxu1 %vm491_vm3, %v1712_v26  ;;  %v2375_v26 = vld [vmem:[#allocation16 + $0x3f0] sm:$0xff]  ;;  %v2373_v28 = vld [vmem:[#allocation16 + $0x3e0] sm:$0xff] }
 0x33c   :  { %4888 = vmatpush3.msra.mxu1 %v4054_v27  ;;  %4919 = vmatprep.mubr.msk.f32.mxu1 %vm5528_vm0, %v5527_v0  ;;  %v2374_v27 = vld [vmem:[#allocation16 + $0x3e8] sm:$0xff] }
 0x33d   :  { %4889 = vmatprep.subr.mxu1 %v5527_v0 }
 0x33e   :  { %4890 = vmatpush3.msra.mxu1 %v4053_v29  ;;  %v2372_v29 = vld [vmem:[#allocation16 + $0x3d8] sm:$0xff] }
 0x33f   :  { %4891 = vmatprep.subr.mxu1 %v5527_v0 }
 0x340   :  { %4892 = vmatpush3.msra.mxu1 %v4052_v30  ;;  %v2371_v30 = vld [vmem:[#allocation16 + $0x3d0] sm:$0xff] }
 0x341   :  { %4893 = vmatprep.subr.mxu1 %v5527_v0 }
 0x342   :  { %4894 = vmatpush3.msra.mxu1 %v4051_v31  ;;  %v2370_v31 = vld [vmem:[#allocation16 + $0x3c8] sm:$0xff] }
 0x343   :  { %4895 = vmatprep.subr.mxu1 %v5527_v0 }
 0x344   :  { %4896 = vmatpush3.msra.mxu1 %v4050_v32  ;;  %v2369_v32 = vld [vmem:[#allocation16 + $0x3c0] sm:$0xff] }
 0x345   :  { %4897 = vmatprep.subr.mxu1 %v5527_v0 }
 0x346   :  { %4898 = vmatpush3.msra.mxu1 %v4049_v33  ;;  %v4061_v33 = vld [vmem:[%s6472_s12 + $0x6] sm:$0x3] }
 0x347   :  { %4899 = vmatprep.subr.mxu1 %v5527_v0  ;;  %v1890_v37 = vpop.f32.mrf.mxu1  ;;  %2686 = vperm.xlu1 %5277, %v4061_v33  }
 0x348   :  { %4900 = vmatpush3.msra.mxu1 %v4048_v35  ;;  %v1965_v41 = vpop.f32.mrf.mxu0  ;;  %v1891_v48 = vadd.f32 %v1890_v37, %v1817_v34  ;;  %v2989_v34 = vld [vmem:[#allocation16 + $0x478] sm:$0xff]  ;;  %v2988_v35 = vld [vmem:[#allocation16 + $0x470] sm:$0xff]  ;;  %v2058_v37 = vpop.permute.xlu1 %2057 }
 0x349   :  { %4901 = vmatprep.subr.mxu1 %v5527_v0  ;;  %v4830_v50 = vpop.f32.mrf.mxu1 }
 0x34a   :  { %4902 = vmatpush3.msra.mxu1 %v4047_v38  ;;  %v4849_v43 = vpop.f32.mrf.mxu0  ;;  %v6142_v51 = vadd.f32 %v1965_v41, %v1891_v48  ;;  %v2986_v38 = vld [vmem:[#allocation16 + $0x460] sm:$0xff]  ;;  %v2984_v41 = vld [vmem:[#allocation16 + $0x450] sm:$0xff] }
 0x34b   :  { %4903 = vmatprep.subr.mxu1 %v5527_v0  ;;  %v2982_v43 = vld [vmem:[#allocation16 + $0x440] sm:$0xff] }
 0x34c   :  { %4904 = vmatpush3.msra.mxu1 %v4046_v39  ;;  %v2155_v55 = vpop.f32.mrf.mxu0  ;;  %v2985_v39 = vld [vmem:[#allocation16 + $0x458] sm:$0xff] }
 0x34d   :  { %4905 = vmatprep.subr.mxu1 %v5527_v0  ;;  %v2156_v15 = vadd.f32 %v4035_v13, %v2155_v55  ;;  %v4071_v13 = vld [vmem:[%s6468_s8 + $0x228] sm:$0xff] }
 0x34e   :  { %4906 = vmatpush3.msra.mxu1 %v4045_v42  ;;  %v4875_v57 = vpop.f32.mrf.mxu0  ;;  %v2983_v42 = vld [vmem:[#allocation16 + $0x448] sm:$0xff] }
 0x34f   :  { %4907 = vmatprep.subr.mxu1 %v5527_v0 }
 0x350   :  { %4908 = vmatpush3.msra.mxu1 %v4044_v44 }
 0x351   :  { %4909 = vmatprep.subr.mxu1 %v5527_v0 }
 0x352   :  { %4910 = vmatpush3.msra.mxu1 %v4043_v45  ;;  %v4033_v45 = vld [vmem:[#allocation18 + $0x2] ss:$0 sm:$0xff] }
 0x353   :  { %4911 = vmatprep.subr.mxu1 %v5527_v0 }
 0x354   :  { %4912 = vmatpush3.msra.mxu1 %v4042_v46  ;;  %v2243_v62 = vpop.f32.mrf.mxu0 }
 0x355   :  { %4913 = vmatprep.subr.mxu1 %v5527_v0  ;;  %v2244_v1 = vadd.f32 %v4037_v60, %v2243_v62  ;;  %v4055_v60 = vld [vmem:[#allocation15 + $0x3] ss:$0 sm:$0xff] }
 0x356   :  { %4914 = vmatpush3.msra.mxu1 %v4041_v47  ;;  %v4886_v3 = vpop.f32.mrf.mxu0  ;;  %v4081_v62 = vld [vmem:[%s6468_s8 + $0x278] sm:$0xff] }
 0x357   :  { %4915 = vmatprep.subr.mxu1 %v5527_v0  ;;  %4939 = vmatmul.mubr.msk.f32.vlgmr.msra.gmra.mxu0 %vm491_vm3, %v2244_v1  ;;  %v4080_v1 = vld [vmem:[%s6468_s8 + $0x270] sm:$0xff]  ;;  %v4077_v3 = vld [vmem:[%s6468_s8 + $0x258] sm:$0xff] }
 0x358   :  { %4916 = vmatpush3.msra.mxu1 %v4040_v49  ;;  %4942 = vmatpush3.msra.mxu0 %v2352_v2  ;;  %v4078_v2 = vld [vmem:[%s6468_s8 + $0x260] sm:$0xff] }
 0x359   :  { %4917 = vmatprep.subr.mxu1 %v5527_v0  ;;  %4957 = vmatprep.mubr.msk.f32.mxu0 %vm5528_vm0, %v5527_v0 }
 0x35a   :  { %4918 = vmatpush3.msra.mxu1 %v4039_v52  ;;  %4943 = vmatprep.subr.mxu0 %v5527_v0 }
 0x35b   :  { %4920 = vmatmul.mubr.f32.vlgmr.msra.gmra.mxu1 %v2248_v53  ;;  %4960 = vmatprep.subr.mxu1 %v5527_v0 }
 0x35c   :  { %4961 = vmatpush3.msra.mxu1 %v2368_v54  ;;  %4976 = vmatprep.mubr.msk.f32.mxu1 %vm5528_vm0, %v5527_v0 }
 0x35d   :  { %4962 = vmatprep.subr.mxu1 %v5527_v0  ;;  %4944 = vmatpush3.msra.mxu0 %v2351_v5  ;;  %v4076_v5 = vld [vmem:[%s6468_s8 + $0x250] sm:$0xff] }
 0x35e   :  { %4963 = vmatpush3.msra.mxu1 %v2367_v56  ;;  %4945 = vmatprep.subr.mxu0 %v5527_v0 }
 0x35f   :  { %4964 = vmatprep.subr.mxu1 %v5527_v0  ;;  %4946 = vmatpush3.msra.mxu0 %v2350_v7  ;;  %v4075_v7 = vld [vmem:[%s6468_s8 + $0x248] sm:$0xff] }
 0x360   :  { %4965 = vmatpush3.msra.mxu1 %v2366_v58  ;;  %4947 = vmatprep.subr.mxu0 %v5527_v0 }
 0x361   :  { %4966 = vmatprep.subr.mxu1 %v5527_v0  ;;  %4948 = vmatpush3.msra.mxu0 %v2349_v10  ;;  %v4073_v10 = vld [vmem:[%s6468_s8 + $0x238] sm:$0xff] }
 0x362   :  { %4967 = vmatpush3.msra.mxu1 %v2365_v59  ;;  %4949 = vmatprep.subr.mxu0 %v5527_v0 }
 0x363   :  { %4968 = vmatprep.subr.mxu1 %v5527_v0  ;;  %4950 = vmatpush3.msra.mxu0 %v2348_v12  ;;  %v4072_v12 = vld [vmem:[%s6468_s8 + $0x230] sm:$0xff] }
 0x364   :  { %4969 = vmatpush3.msra.mxu1 %v2364_v61  ;;  %4951 = vmatprep.subr.mxu0 %v5527_v0 }
 0x365   :  { %4970 = vmatprep.subr.mxu1 %v5527_v0  ;;  %4952 = vmatpush3.msra.mxu0 %v2347_v40 }
 0x366   :  { %4971 = vmatpush3.msra.mxu1 %v2363_v63  ;;  %4953 = vmatprep.subr.mxu0 %v5527_v0 }
 0x367   :  { %4972 = vmatprep.subr.mxu1 %v5527_v0  ;;  %4954 = vmatpush3.msra.mxu0 %v2346_v14  ;;  %v4070_v14 = vld [vmem:[%s6468_s8 + $0x220] sm:$0xff] }
 0x368   :  { %4973 = vmatpush3.msra.mxu1 %v2362_v6  ;;  %4955 = vmatprep.subr.mxu0 %v5527_v0 }
 0x369   :  { %4974 = vmatprep.subr.mxu1 %v5527_v0  ;;  %4956 = vmatpush3.msra.mxu0 %v2345_v16  ;;  %v4068_v16 = vld [vmem:[%s6468_s8 + $0x210] sm:$0xff] }
 0x36a   :  { %4975 = vmatpush3.msra.mxu1 %v2361_v8  ;;  %4958 = vmatmul.mubr.msk.f32.vlgmr.msra.gmra.mxu0 %vm491_vm3, %v2156_v15  ;;  %v4069_v15 = vld [vmem:[%s6468_s8 + $0x218] sm:$0xff] }
 0x36b   :  { %4977 = vmatmul.mubr.msk.f32.vlgmr.msra.gmra.mxu1 %vm491_vm3, %v2524_v9  ;;  %4998 = vmatprep.subr.mxu1 %v5527_v0  ;;  %v4074_v9 = vld [vmem:[%s6468_s8 + $0x240] sm:$0xff] }
 0x36c   :  { %4999 = vmatpush3.msra.mxu1 %v2706_v11  ;;  %5002 = vmatprep.mubr.msk.f32.mxu1 %vm5528_vm0, %v5527_v0 }
 0x36d   :  { %5000 = vmatprep.subr.mxu1 %v5527_v0  ;;  %4979 = vmatprep.subr.mxu0 %v5527_v0 }
 0x36e   :  { %4995 = vmatprep.mubr.msk.f32.mxu0 %vm5528_vm0, %v5527_v0  ;;  %5001 = vmatpush3.msra.mxu1 %v2705_v18 }
 0x36f   :  { %5005 = vmatprep.subr.mxu1 %v5527_v0  ;;  %5003 = vmatmul.mubr.msk.f32.vlgmr.msra.gmra.mxu1 %vm205_vm1, %v2703_v19 }
 0x370   :  { %5006 = vmatpush3.msra.mxu1 %v2794_v20  ;;  %5013 = vmatprep.mubr.msk.f32.mxu1 %vm5528_vm0, %v5527_v0  ;;  %v4067_v20 = vld [vmem:[%s6468_s8 + $0x208] sm:$0xff] }
 0x371   :  { %5007 = vmatprep.subr.mxu1 %v5527_v0  ;;  %4980 = vmatpush3.msra.mxu0 %v2376_v25  ;;  %v2997_v25 = vld [vmem:[#allocation16 + $0x4b8] sm:$0xff] }
 0x372   :  { %5008 = vmatpush3.msra.mxu1 %v2793_v4  ;;  %4981 = vmatprep.subr.mxu0 %v5527_v0 }
 0x373   :  { %5009 = vmatprep.subr.mxu1 %v5527_v0  ;;  %4982 = vmatpush3.msra.mxu0 %v2375_v26 }
 0x374   :  { %5010 = vmatpush3.msra.mxu1 %v2792_v21  ;;  %4983 = vmatprep.subr.mxu0 %v5527_v0 }
 0x375   :  { %5011 = vmatprep.subr.mxu1 %v5527_v0  ;;  %4984 = vmatpush3.msra.mxu0 %v2374_v27  ;;  %v2996_v27 = vld [vmem:[#allocation16 + $0x4b0] sm:$0xff] }
 0x376   :  { %5012 = vmatpush3.msra.mxu1 %v2791_v22  ;;  %4985 = vmatprep.subr.mxu0 %v5527_v0  ;;  %v4066_v22 = vld [vmem:[%s6468_s8 + $0x200] sm:$0xff] }
 0x377   :  { %5014 = vmatmul.mubr.msk.f32.vlgmr.msra.gmra.mxu1 %vm291_vm2, %v2789_v24  ;;  %5051 = vmatprep.subr.mxu1 %v5527_v0  ;;  %v2877_v24 = vld [vmem:[#allocation7 + $0x8] sm:$0x3] }
 0x378   :  { %5067 = vmatprep.mubr.msk.f32.mxu1 %vm5528_vm0, %v5527_v0  ;;  %4986 = vmatpush3.msra.mxu0 %v2373_v28 }
 0x379   :  { %4987 = vmatprep.subr.mxu0 %v5527_v0  ;;  %5052 = vmatpush3.msra.mxu1 %v2989_v34  ;;  %v2992_v34 = vld [vmem:[#allocation16 + $0x490] sm:$0xff] }
 0x37a   :  { %4988 = vmatpush3.msra.mxu0 %v2372_v29  ;;  %5053 = vmatprep.subr.mxu1 %v5527_v0  ;;  %v2995_v29 = vld [vmem:[#allocation16 + $0x4a8] sm:$0xff] }
 0x37b   :  { %4989 = vmatprep.subr.mxu0 %v5527_v0  ;;  %5054 = vmatpush3.msra.mxu1 %v2988_v35 }
 0x37c   :  { %4990 = vmatpush3.msra.mxu0 %v2371_v30  ;;  %5055 = vmatprep.subr.mxu1 %v5527_v0  ;;  %v2994_v30 = vld [vmem:[#allocation16 + $0x4a0] sm:$0xff] }
 0x37d   :  { %4991 = vmatprep.subr.mxu0 %v5527_v0  ;;  %5056 = vmatpush3.msra.mxu1 %v2987_v36  ;;  %v2981_v36 = vld [vmem:[#allocation16 + $0x438] sm:$0xff] }
 0x37e   :  { %4992 = vmatpush3.msra.mxu0 %v2370_v31  ;;  %5057 = vmatprep.subr.mxu1 %v5527_v0  ;;  %v4064_v31 = vld [vmem:[#allocation13 + $0x4] ss:$0 sm:$0xff] }
 0x37f   :  { %4993 = vmatprep.subr.mxu0 %v5527_v0  ;;  %5058 = vmatpush3.msra.mxu1 %v2986_v38 }
 0x380   :  { %4994 = vmatpush3.msra.mxu0 %v2369_v32  ;;  %5059 = vmatprep.subr.mxu1 %v5527_v0  ;;  %v2993_v32 = vld [vmem:[#allocation16 + $0x498] sm:$0xff] }
 0x381   :  { %5016 = vmatprep.subr.mxu0 %v5527_v0  ;;  %5060 = vmatpush3.msra.mxu1 %v2985_v39  ;;  %v2980_v39 = vld [vmem:[#allocation16 + $0x430] sm:$0xff] }
 0x382   :  { %5061 = vmatprep.subr.mxu1 %v5527_v0 }
 0x383   :  { %5062 = vmatpush3.msra.mxu1 %v2984_v41  ;;  %v2991_v41 = vld [vmem:[#allocation16 + $0x488] sm:$0xff] }
 0x384   :  { %5063 = vmatprep.subr.mxu1 %v5527_v0 }
 0x385   :  { %5064 = vmatpush3.msra.mxu1 %v2983_v42  ;;  %v2979_v42 = vld [vmem:[#allocation16 + $0x428] sm:$0xff] }
 0x386   :  { %5065 = vmatprep.subr.mxu1 %v5527_v0 }
 0x387   :  { %5066 = vmatpush3.msra.mxu1 %v2982_v43  ;;  %v2990_v43 = vld [vmem:[#allocation16 + $0x480] sm:$0xff] }
 0x388   :  { %5070 = vmatprep.subr.mxu1 %v5527_v0 }
 0x3fb   :  { %v2039_v44 = vpop.f32.mrf.mxu1 }
 0x3fc   :  { %v2043_v46 = vadd.f32 %v2039_v44, %v6142_v51  ;;  %v3153_v44 = vld [vmem:[#allocation6 + $0x8] sm:$0x3] }
 0x3fd   :  { %v4868_v47 = vpop.f32.mrf.mxu1 }
 0x3fe   :  { %v2052_v48 = vadd.f32 %v4033_v45, %v2043_v46  ;;  %v2978_v45 = vld [vmem:[#allocation16 + $0x420] sm:$0xff]  ;;  %v2977_v47 = vld [vmem:[#allocation16 + $0x418] sm:$0xff] }
 0x3ff   :  { %v3335_v46 = vld [vmem:[#allocation9 + $0x58] sm:$0xff] }
 0x400   :  { %v2060_v49 = vmul.f32 %v2058_v37, %v2052_v48  ;;  %v2976_v37 = vld [vmem:[#allocation16 + $0x410] sm:$0xff] }
 0x401   :  { %v4062_v48 = vld [vmem:[#allocation10 + $0x4] ss:$0 sm:$0xff] }
 0x402   :  { %v2061_v50 = vsel %vm802_vm4, %v2060_v49, 0.0  ;;  %v2975_v49 = vld [vmem:[#allocation16 + $0x408] sm:$0xff] }
 0x403   :  { %v2062_v52 = vrot.slane %v2061_v50, 4 }
 0x405   :  { %v2063_v53 = vadd.f32 %v2062_v52, %v2061_v50  ;;  %v2974_v52 = vld [vmem:[#allocation16 + $0x400] sm:$0xff] }
 0x407   :  { %v2064_v54 = vrot.slane %v2063_v53, 2 }
 0x409   :  { %v2065_v55 = vadd.f32 %v2064_v54, %v2063_v53  ;;  %v3334_v53 = vld [vmem:[#allocation9 + $0x50] sm:$0xff]  ;;  %v3332_v54 = vld [vmem:[#allocation2 + $0xa] sm:$0x3] }
 0x40b   :  { %v2066_v56 = vrot.slane %v2065_v55, 1 }
 0x40d   :  { %v2067_v57 = vadd.f32 %v2066_v56, %v2065_v55  ;;  %v3423_v55 = vld [vmem:[#allocation12 + $0xb8] sm:$0xff]  ;;  %v3422_v56 = vld [vmem:[#allocation12 + $0xb0] sm:$0xff] }
 0x40f   :  { %v2071_v58 = vsel %vm2068_vm7, %v2067_v57, 0.0  ;;  %v3421_v57 = vld [vmem:[#allocation12 + $0xa8] sm:$0xff] }
 0x410   :  { %v6212_v59 = vadd.f32 %v2071_v58, %v6079_v23  ;;  %v4079_v23 = vld [vmem:[%s6468_s8 + $0x268] sm:$0xff]  ;;  %v3420_v58 = vld [vmem:[#allocation12 + $0xa0] sm:$0xff] }
 0x417   :  { %v2446_v6 = vpop.f32.mrf.mxu0 }
 0x419   :  { %v4940_v8 = vpop.f32.mrf.mxu0 }
 0x41a   :  { %v3616_v8 = vld [vmem:[#allocation16 + $0x568] sm:$0xff] }
 0x41b   :  { %v2340_v51 = vpop.f32.mrf.mxu1 }
 0x41c   :  { %v2341_v61 = vadd.f32 %v4055_v60, %v2340_v51  ;;  %v3418_v60 = vld [vmem:[#allocation4 + $0xa] sm:$0x3]  ;;  %v3005_v51 = vld [vmem:[#allocation16 + $0x4f8] sm:$0xff] }
 0x41d   :  { %v4921_v63 = vpop.f32.mrf.mxu1 }
 0x41e   :  { %4996 = vmatmul.mubr.msk.f32.vlgmr.msra.gmra.mxu0 %vm491_vm3, %v2341_v61  ;;  %v3004_v61 = vld [vmem:[#allocation16 + $0x4f0] sm:$0xff]  ;;  %v3002_v63 = vld [vmem:[#allocation16 + $0x4e0] sm:$0xff] }
 0x41f   :  { %5017 = vmatpush3.msra.mxu0 %v4081_v62  ;;  %5048 = vmatprep.mubr.msk.f32.mxu0 %vm5528_vm0, %v5527_v0  ;;  %v3003_v62 = vld [vmem:[#allocation16 + $0x4e8] sm:$0xff] }
 0x420   :  { %5018 = vmatprep.subr.mxu0 %v5527_v0 }
 0x421   :  { %5019 = vmatpush3.msra.mxu0 %v4080_v1  ;;  %v3001_v1 = vld [vmem:[#allocation16 + $0x4d8] sm:$0xff] }
 0x422   :  { %5020 = vmatprep.subr.mxu0 %v5527_v0 }
 0x423   :  { %5021 = vmatpush3.msra.mxu0 %v4079_v23  ;;  %v3000_v23 = vld [vmem:[#allocation16 + $0x4d0] sm:$0xff] }
 0x424   :  { %5022 = vmatprep.subr.mxu0 %v5527_v0 }
 0x425   :  { %5023 = vmatpush3.msra.mxu0 %v4078_v2  ;;  %v2999_v2 = vld [vmem:[#allocation16 + $0x4c8] sm:$0xff] }
 0x426   :  { %5024 = vmatprep.subr.mxu0 %v5527_v0 }
 0x427   :  { %5025 = vmatpush3.msra.mxu0 %v4077_v3  ;;  %v2998_v3 = vld [vmem:[#allocation16 + $0x4c0] sm:$0xff] }
 0x428   :  { %5026 = vmatprep.subr.mxu0 %v5527_v0 }
 0x429   :  { %5027 = vmatpush3.msra.mxu0 %v4076_v5  ;;  %v4088_v5 = vld [vmem:[%s6472_s12 + $0x8] sm:$0x3] }
 0x42a   :  { %5028 = vmatprep.subr.mxu0 %v5527_v0  ;;  %v2519_v18 = vpop.f32.mrf.mxu0  ;;  %3315 = vperm.xlu0 %5276, %v4088_v5  }
 0x42b   :  { %5029 = vmatpush3.msra.mxu0 %v4075_v7  ;;  %v2594_v11 = vpop.f32.mrf.mxu1  ;;  %v2520_v19 = vadd.f32 %v2519_v18, %v2446_v6  ;;  %v3618_v6 = vld [vmem:[#allocation16 + $0x578] sm:$0xff]  ;;  %v3617_v7 = vld [vmem:[#allocation16 + $0x570] sm:$0xff]  ;;  %v2687_v18 = vpop.permute.xlu1 %2686 }
 0x42c   :  { %5030 = vmatprep.subr.mxu0 %v5527_v0  ;;  %v4959_v4 = vpop.f32.mrf.mxu0 }
 0x42d   :  { %5031 = vmatpush3.msra.mxu0 %v4074_v9  ;;  %v4978_v40 = vpop.f32.mrf.mxu1  ;;  %v6275_v21 = vadd.f32 %v2594_v11, %v2520_v19  ;;  %v3615_v9 = vld [vmem:[#allocation16 + $0x560] sm:$0xff]  ;;  %v3613_v11 = vld [vmem:[#allocation16 + $0x550] sm:$0xff] }
 0x42e   :  { %5032 = vmatprep.subr.mxu0 %v5527_v0  ;;  %v3611_v40 = vld [vmem:[#allocation16 + $0x540] sm:$0xff] }
 0x42f   :  { %5033 = vmatpush3.msra.mxu0 %v4073_v10  ;;  %v2784_v26 = vpop.f32.mrf.mxu1  ;;  %v3614_v10 = vld [vmem:[#allocation16 + $0x558] sm:$0xff] }
 0x430   :  { %5034 = vmatprep.subr.mxu0 %v5527_v0  ;;  %v2785_v50 = vadd.f32 %v4062_v48, %v2784_v26  ;;  %v4098_v48 = vld [vmem:[%s6468_s8 + $0x2a8] sm:$0xff] }
 0x431   :  { %5035 = vmatpush3.msra.mxu0 %v4072_v12  ;;  %v5004_v28 = vpop.f32.mrf.mxu1  ;;  %v3612_v12 = vld [vmem:[#allocation16 + $0x548] sm:$0xff] }
 0x432   :  { %5036 = vmatprep.subr.mxu0 %v5527_v0 }
 0x433   :  { %5037 = vmatpush3.msra.mxu0 %v4071_v13 }
 0x434   :  { %5038 = vmatprep.subr.mxu0 %v5527_v0 }
 0x435   :  { %5039 = vmatpush3.msra.mxu0 %v4070_v14  ;;  %v4060_v14 = vld [vmem:[#allocation18 + $0x3] ss:$0 sm:$0xff] }
 0x436   :  { %5040 = vmatprep.subr.mxu0 %v5527_v0 }
 0x437   :  { %5041 = vmatpush3.msra.mxu0 %v4069_v15  ;;  %v2872_v33 = vpop.f32.mrf.mxu1 }
 0x438   :  { %5042 = vmatprep.subr.mxu0 %v5527_v0  ;;  %v2873_v35 = vadd.f32 %v4064_v31, %v2872_v33  ;;  %v4082_v31 = vld [vmem:[#allocation15 + $0x4] ss:$0 sm:$0xff]  ;;  %v4108_v33 = vld [vmem:[%s6468_s8 + $0x2f8] sm:$0xff] }
 0x439   :  { %5043 = vmatpush3.msra.mxu0 %v4068_v16  ;;  %v5015_v38 = vpop.f32.mrf.mxu1 }
 0x43a   :  { %5044 = vmatprep.subr.mxu0 %v5527_v0  ;;  %5068 = vmatmul.mubr.msk.f32.vlgmr.msra.gmra.mxu1 %vm491_vm3, %v2873_v35  ;;  %v4107_v35 = vld [vmem:[%s6468_s8 + $0x2f0] sm:$0xff]  ;;  %v4104_v38 = vld [vmem:[%s6468_s8 + $0x2d8] sm:$0xff] }
 0x43b   :  { %5045 = vmatpush3.msra.mxu0 %v4067_v20  ;;  %5071 = vmatpush3.msra.mxu1 %v2981_v36  ;;  %v4105_v36 = vld [vmem:[%s6468_s8 + $0x2e0] sm:$0xff] }
 0x43c   :  { %5046 = vmatprep.subr.mxu0 %v5527_v0  ;;  %5086 = vmatprep.mubr.msk.f32.mxu1 %vm5528_vm0, %v5527_v0 }
 0x43d   :  { %5047 = vmatpush3.msra.mxu0 %v4066_v22  ;;  %5072 = vmatprep.subr.mxu1 %v5527_v0 }
 0x43e   :  { %5049 = vmatmul.mubr.f32.vlgmr.msra.gmra.mxu0 %v2877_v24  ;;  %5089 = vmatprep.subr.mxu0 %v5527_v0 }
 0x43f   :  { %5090 = vmatpush3.msra.mxu0 %v2997_v25  ;;  %5105 = vmatprep.mubr.msk.f32.mxu0 %vm5528_vm0, %v5527_v0 }
 0x440   :  { %5091 = vmatprep.subr.mxu0 %v5527_v0  ;;  %5073 = vmatpush3.msra.mxu1 %v2980_v39  ;;  %v4103_v39 = vld [vmem:[%s6468_s8 + $0x2d0] sm:$0xff] }
 0x441   :  { %5092 = vmatpush3.msra.mxu0 %v2996_v27  ;;  %5074 = vmatprep.subr.mxu1 %v5527_v0 }
 0x442   :  { %5093 = vmatprep.subr.mxu0 %v5527_v0  ;;  %5075 = vmatpush3.msra.mxu1 %v2979_v42  ;;  %v4102_v42 = vld [vmem:[%s6468_s8 + $0x2c8] sm:$0xff] }
 0x443   :  { %5094 = vmatpush3.msra.mxu0 %v2995_v29  ;;  %5076 = vmatprep.subr.mxu1 %v5527_v0 }
 0x444   :  { %5095 = vmatprep.subr.mxu0 %v5527_v0  ;;  %5077 = vmatpush3.msra.mxu1 %v2978_v45  ;;  %v4100_v45 = vld [vmem:[%s6468_s8 + $0x2b8] sm:$0xff] }
 0x445   :  { %5096 = vmatpush3.msra.mxu0 %v2994_v30  ;;  %5078 = vmatprep.subr.mxu1 %v5527_v0 }
 0x446   :  { %5097 = vmatprep.subr.mxu0 %v5527_v0  ;;  %5079 = vmatpush3.msra.mxu1 %v2977_v47  ;;  %v4099_v47 = vld [vmem:[%s6468_s8 + $0x2b0] sm:$0xff] }
 0x447   :  { %5098 = vmatpush3.msra.mxu0 %v2993_v32  ;;  %5080 = vmatprep.subr.mxu1 %v5527_v0 }
 0x448   :  { %5099 = vmatprep.subr.mxu0 %v5527_v0  ;;  %5081 = vmatpush3.msra.mxu1 %v2976_v37 }
 0x449   :  { %5100 = vmatpush3.msra.mxu0 %v2992_v34  ;;  %5082 = vmatprep.subr.mxu1 %v5527_v0 }
 0x44a   :  { %5101 = vmatprep.subr.mxu0 %v5527_v0  ;;  %5083 = vmatpush3.msra.mxu1 %v2975_v49  ;;  %v4097_v49 = vld [vmem:[%s6468_s8 + $0x2a0] sm:$0xff] }
 0x44b   :  { %5102 = vmatpush3.msra.mxu0 %v2991_v41  ;;  %5084 = vmatprep.subr.mxu1 %v5527_v0 }
 0x44c   :  { %5103 = vmatprep.subr.mxu0 %v5527_v0  ;;  %5085 = vmatpush3.msra.mxu1 %v2974_v52  ;;  %v4095_v52 = vld [vmem:[%s6468_s8 + $0x290] sm:$0xff] }
 0x44d   :  { %5104 = vmatpush3.msra.mxu0 %v2990_v43  ;;  %5087 = vmatmul.mubr.msk.f32.vlgmr.msra.gmra.mxu1 %vm491_vm3, %v2785_v50  ;;  %v4096_v50 = vld [vmem:[%s6468_s8 + $0x298] sm:$0xff] }
 0x44e   :  { %5106 = vmatmul.mubr.msk.f32.vlgmr.msra.gmra.mxu0 %vm491_vm3, %v3153_v44  ;;  %5127 = vmatprep.subr.mxu0 %v5527_v0  ;;  %v4101_v44 = vld [vmem:[%s6468_s8 + $0x2c0] sm:$0xff] }
 0x44f   :  { %5128 = vmatpush3.msra.mxu0 %v3335_v46  ;;  %5131 = vmatprep.mubr.msk.f32.mxu0 %vm5528_vm0, %v5527_v0 }
 0x450   :  { %5129 = vmatprep.subr.mxu0 %v5527_v0  ;;  %5108 = vmatprep.subr.mxu1 %v5527_v0 }
 0x451   :  { %5124 = vmatprep.mubr.msk.f32.mxu1 %vm5528_vm0, %v5527_v0  ;;  %5130 = vmatpush3.msra.mxu0 %v3334_v53 }
 0x452   :  { %5134 = vmatprep.subr.mxu0 %v5527_v0  ;;  %5132 = vmatmul.mubr.msk.f32.vlgmr.msra.gmra.mxu0 %vm205_vm1, %v3332_v54 }
 0x453   :  { %5135 = vmatpush3.msra.mxu0 %v3423_v55  ;;  %5142 = vmatprep.mubr.msk.f32.mxu0 %vm5528_vm0, %v5527_v0  ;;  %v4094_v55 = vld [vmem:[%s6468_s8 + $0x288] sm:$0xff] }
 0x454   :  { %5136 = vmatprep.subr.mxu0 %v5527_v0  ;;  %5109 = vmatpush3.msra.mxu1 %v3005_v51  ;;  %v3626_v51 = vld [vmem:[#allocation16 + $0x5b8] sm:$0xff] }
 0x455   :  { %5137 = vmatpush3.msra.mxu0 %v3422_v56  ;;  %5110 = vmatprep.subr.mxu1 %v5527_v0 }
 0x456   :  { %5138 = vmatprep.subr.mxu0 %v5527_v0  ;;  %5111 = vmatpush3.msra.mxu1 %v3004_v61 }
 0x457   :  { %5139 = vmatpush3.msra.mxu0 %v3421_v57  ;;  %5112 = vmatprep.subr.mxu1 %v5527_v0 }
 0x458   :  { %5140 = vmatprep.subr.mxu0 %v5527_v0  ;;  %5113 = vmatpush3.msra.mxu1 %v3003_v62  ;;  %v3625_v62 = vld [vmem:[#allocation16 + $0x5b0] sm:$0xff] }
 0x459   :  { %5141 = vmatpush3.msra.mxu0 %v3420_v58  ;;  %5114 = vmatprep.subr.mxu1 %v5527_v0  ;;  %v4093_v58 = vld [vmem:[%s6468_s8 + $0x280] sm:$0xff] }
 0x45a   :  { %5143 = vmatmul.mubr.msk.f32.vlgmr.msra.gmra.mxu0 %vm291_vm2, %v3418_v60  ;;  %5180 = vmatprep.subr.mxu0 %v5527_v0  ;;  %v3506_v60 = vld [vmem:[#allocation7 + $0xa] sm:$0x3] }
 0x45b   :  { %5196 = vmatprep.mubr.msk.f32.mxu0 %vm5528_vm0, %v5527_v0  ;;  %5115 = vmatpush3.msra.mxu1 %v3002_v63 }
 0x45c   :  { %5116 = vmatprep.subr.mxu1 %v5527_v0  ;;  %5181 = vmatpush3.msra.mxu0 %v3618_v6  ;;  %v3621_v6 = vld [vmem:[#allocation16 + $0x590] sm:$0xff] }
 0x45d   :  { %5117 = vmatpush3.msra.mxu1 %v3001_v1  ;;  %5182 = vmatprep.subr.mxu0 %v5527_v0  ;;  %v3624_v1 = vld [vmem:[#allocation16 + $0x5a8] sm:$0xff] }
 0x45e   :  { %5118 = vmatprep.subr.mxu1 %v5527_v0  ;;  %5183 = vmatpush3.msra.mxu0 %v3617_v7 }
 0x45f   :  { %5119 = vmatpush3.msra.mxu1 %v3000_v23  ;;  %5184 = vmatprep.subr.mxu0 %v5527_v0  ;;  %v3623_v23 = vld [vmem:[#allocation16 + $0x5a0] sm:$0xff] }
 0x460   :  { %5120 = vmatprep.subr.mxu1 %v5527_v0  ;;  %5185 = vmatpush3.msra.mxu0 %v3616_v8  ;;  %v3610_v8 = vld [vmem:[#allocation16 + $0x538] sm:$0xff] }
 0x461   :  { %5121 = vmatpush3.msra.mxu1 %v2999_v2  ;;  %5186 = vmatprep.subr.mxu0 %v5527_v0  ;;  %v4091_v2 = vld [vmem:[#allocation13 + $0x5] ss:$0 sm:$0xff] }
 0x462   :  { %5122 = vmatprep.subr.mxu1 %v5527_v0  ;;  %5187 = vmatpush3.msra.mxu0 %v3615_v9 }
 0x463   :  { %5123 = vmatpush3.msra.mxu1 %v2998_v3  ;;  %5188 = vmatprep.subr.mxu0 %v5527_v0  ;;  %v3622_v3 = vld [vmem:[#allocation16 + $0x598] sm:$0xff] }
 0x464   :  { %5145 = vmatprep.subr.mxu1 %v5527_v0  ;;  %5189 = vmatpush3.msra.mxu0 %v3614_v10  ;;  %v3609_v10 = vld [vmem:[#allocation16 + $0x530] sm:$0xff] }
 0x465   :  { %5190 = vmatprep.subr.mxu0 %v5527_v0 }
 0x466   :  { %5191 = vmatpush3.msra.mxu0 %v3613_v11  ;;  %v3620_v11 = vld [vmem:[#allocation16 + $0x588] sm:$0xff] }
 0x467   :  { %5192 = vmatprep.subr.mxu0 %v5527_v0 }
 0x468   :  { %5193 = vmatpush3.msra.mxu0 %v3612_v12  ;;  %v3608_v12 = vld [vmem:[#allocation16 + $0x528] sm:$0xff] }
 0x469   :  { %5194 = vmatprep.subr.mxu0 %v5527_v0 }
 0x46a   :  { %5195 = vmatpush3.msra.mxu0 %v3611_v40  ;;  %v3619_v40 = vld [vmem:[#allocation16 + $0x580] sm:$0xff] }
 0x46b   :  { %5199 = vmatprep.subr.mxu0 %v5527_v0 }
 0x4de   :  { %v2668_v13 = vpop.f32.mrf.mxu0 }
 0x4df   :  { %v2672_v15 = vadd.f32 %v2668_v13, %v6275_v21  ;;  %v3782_v13 = vld [vmem:[#allocation6 + $0xa] sm:$0x3] }
 0x4e0   :  { %v4997_v16 = vpop.f32.mrf.mxu0 }
 0x4e1   :  { %v2681_v19 = vadd.f32 %v4060_v14, %v2672_v15  ;;  %v3607_v14 = vld [vmem:[#allocation16 + $0x520] sm:$0xff]  ;;  %v3606_v15 = vld [vmem:[#allocation16 + $0x518] sm:$0xff]  ;;  %v3605_v16 = vld [vmem:[#allocation16 + $0x510] sm:$0xff] }
 0x4e3   :  { %v2689_v20 = vmul.f32 %v2687_v18, %v2681_v19  ;;  %v4089_v18 = vld [vmem:[#allocation10 + $0x5] ss:$0 sm:$0xff]  ;;  %v3604_v19 = vld [vmem:[#allocation16 + $0x508] sm:$0xff] }
 0x4e5   :  { %v2690_v4 = vsel %vm802_vm4, %v2689_v20, 0.0 }
 0x4e6   :  { %v2691_v22 = vrot.slane %v2690_v4, 4 }
 0x4e8   :  { %v2692_v24 = vadd.f32 %v2691_v22, %v2690_v4  ;;  %v3603_v4 = vld [vmem:[#allocation16 + $0x500] sm:$0xff]  ;;  %v3634_v22 = vld [vmem:[#allocation16 + $0x5f8] sm:$0xff] }
 0x4ea   :  { %v2693_v25 = vrot.slane %v2692_v24, 2 }
 0x4ec   :  { %v2694_v26 = vadd.f32 %v2693_v25, %v2692_v24  ;;  %v3633_v24 = vld [vmem:[#allocation16 + $0x5f0] sm:$0xff]  ;;  %v3632_v25 = vld [vmem:[#allocation16 + $0x5e8] sm:$0xff] }
 0x4ee   :  { %v2695_v27 = vrot.slane %v2694_v26, 1 }
 0x4f0   :  { %v2696_v28 = vadd.f32 %v2695_v27, %v2694_v26  ;;  %v3631_v26 = vld [vmem:[#allocation16 + $0x5e0] sm:$0xff]  ;;  %v3630_v27 = vld [vmem:[#allocation16 + $0x5d8] sm:$0xff] }
 0x4f2   :  { %v2700_v29 = vsel %vm2697_vm8, %v2696_v28, 0.0  ;;  %v3629_v28 = vld [vmem:[#allocation16 + $0x5d0] sm:$0xff] }
 0x4f3   :  { %v6345_v30 = vadd.f32 %v2700_v29, %v6212_v59  ;;  %v4106_v59 = vld [vmem:[%s6468_s8 + $0x2e8] sm:$0xff] }
 0x4f4   :  { %v3628_v29 = vld [vmem:[#allocation16 + $0x5c8] sm:$0xff] }
 0x4fa   :  { %v3075_v41 = vpop.f32.mrf.mxu1 }
 0x4fc   :  { %v5069_v43 = vpop.f32.mrf.mxu1 }
 0x4fe   :  { %v2969_v21 = vpop.f32.mrf.mxu0 }
 0x4ff   :  { %v2970_v32 = vadd.f32 %v4082_v31, %v2969_v21  ;;  %v3627_v31 = vld [vmem:[#allocation16 + $0x5c0] sm:$0xff]  ;;  %v4115_v21 = vld [vmem:[%s6472_s12 + $0xa] sm:$0x3] }
 0x500   :  { %v5050_v34 = vpop.f32.mrf.mxu0  ;;  %3944 = vperm.xlu1 %5277, %v4115_v21  }
 0x501   :  { %5125 = vmatmul.mubr.msk.f32.vlgmr.msra.gmra.mxu1 %vm491_vm3, %v2970_v32 }
 0x502   :  { %5146 = vmatpush3.msra.mxu1 %v4108_v33  ;;  %5177 = vmatprep.mubr.msk.f32.mxu1 %vm5528_vm0, %v5527_v0  ;;  %v4087_v33 = vld [vmem:[#allocation18 + $0x4] ss:$0 sm:$0xff] }
 0x503   :  { %5147 = vmatprep.subr.mxu1 %v5527_v0 }
 0x504   :  { %5148 = vmatpush3.msra.mxu1 %v4107_v35 }
 0x505   :  { %5149 = vmatprep.subr.mxu1 %v5527_v0 }
 0x506   :  { %5150 = vmatpush3.msra.mxu1 %v4106_v59  ;;  %v3316_v59 = vpop.permute.xlu0 %3315 }
 0x507   :  { %5151 = vmatprep.subr.mxu1 %v5527_v0 }
 0x508   :  { %5152 = vmatpush3.msra.mxu1 %v4105_v36 }
 0x509   :  { %5153 = vmatprep.subr.mxu1 %v5527_v0 }
 0x50a   :  { %5154 = vmatpush3.msra.mxu1 %v4104_v38 }
 0x50b   :  { %5155 = vmatprep.subr.mxu1 %v5527_v0 }
 0x50c   :  { %5156 = vmatpush3.msra.mxu1 %v4103_v39 }
 0x50d   :  { %5157 = vmatprep.subr.mxu1 %v5527_v0  ;;  %v3148_v53 = vpop.f32.mrf.mxu1 }
 0x50e   :  { %5158 = vmatpush3.msra.mxu1 %v4102_v42  ;;  %v3223_v46 = vpop.f32.mrf.mxu0  ;;  %v3149_v54 = vadd.f32 %v3148_v53, %v3075_v41 }
 0x50f   :  { %5159 = vmatprep.subr.mxu1 %v5527_v0  ;;  %v5088_v56 = vpop.f32.mrf.mxu1 }
 0x510   :  { %5160 = vmatpush3.msra.mxu1 %v4101_v44  ;;  %v5107_v37 = vpop.f32.mrf.mxu0  ;;  %v6408_v57 = vadd.f32 %v3223_v46, %v3149_v54 }
 0x511   :  { %5161 = vmatprep.subr.mxu1 %v5527_v0  ;;  %v4109_v37 = vld [vmem:[#allocation15 + $0x5] ss:$0 sm:$0xff] }
 0x512   :  { %5162 = vmatpush3.msra.mxu1 %v4100_v45  ;;  %v3413_v61 = vpop.f32.mrf.mxu0 }
 0x513   :  { %5163 = vmatprep.subr.mxu1 %v5527_v0  ;;  %v3414_v20 = vadd.f32 %v4089_v18, %v3413_v61  ;;  %v4114_v61 = vld [vmem:[#allocation18 + $0x5] ss:$0 sm:$0xff] }
 0x514   :  { %5164 = vmatpush3.msra.mxu1 %v4099_v47  ;;  %v5133_v63 = vpop.f32.mrf.mxu0 }
 0x515   :  { %5165 = vmatprep.subr.mxu1 %v5527_v0 }
 0x516   :  { %5166 = vmatpush3.msra.mxu1 %v4098_v48 }
 0x517   :  { %5167 = vmatprep.subr.mxu1 %v5527_v0 }
 0x518   :  { %5168 = vmatpush3.msra.mxu1 %v4097_v49 }
 0x519   :  { %5169 = vmatprep.subr.mxu1 %v5527_v0 }
 0x51a   :  { %5170 = vmatpush3.msra.mxu1 %v4096_v50  ;;  %v3501_v5 = vpop.f32.mrf.mxu0 }
 0x51b   :  { %5171 = vmatprep.subr.mxu1 %v5527_v0  ;;  %v3502_v7 = vadd.f32 %v4091_v2, %v3501_v5 }
 0x51c   :  { %5172 = vmatpush3.msra.mxu1 %v4095_v52  ;;  %v5144_v9 = vpop.f32.mrf.mxu0 }
 0x51d   :  { %5173 = vmatprep.subr.mxu1 %v5527_v0  ;;  %5197 = vmatmul.mubr.msk.f32.vlgmr.msra.gmra.mxu0 %vm491_vm3, %v3502_v7 }
 0x51e   :  { %5174 = vmatpush3.msra.mxu1 %v4094_v55  ;;  %5200 = vmatpush3.msra.mxu0 %v3610_v8 }
 0x51f   :  { %5175 = vmatprep.subr.mxu1 %v5527_v0  ;;  %5215 = vmatprep.mubr.msk.f32.mxu0 %vm5528_vm0, %v5527_v0 }
 0x520   :  { %5176 = vmatpush3.msra.mxu1 %v4093_v58  ;;  %5201 = vmatprep.subr.mxu0 %v5527_v0 }
 0x521   :  { %5178 = vmatmul.mubr.f32.vlgmr.msra.gmra.mxu1 %v3506_v60  ;;  %5218 = vmatprep.subr.mxu1 %v5527_v0 }
 0x522   :  { %5219 = vmatpush3.msra.mxu1 %v3626_v51  ;;  %5234 = vmatprep.mubr.msk.f32.mxu1 %vm5528_vm0, %v5527_v0 }
 0x523   :  { %5220 = vmatprep.subr.mxu1 %v5527_v0  ;;  %5202 = vmatpush3.msra.mxu0 %v3609_v10 }
 0x524   :  { %5221 = vmatpush3.msra.mxu1 %v3625_v62  ;;  %5203 = vmatprep.subr.mxu0 %v5527_v0 }
 0x525   :  { %5222 = vmatprep.subr.mxu1 %v5527_v0  ;;  %5204 = vmatpush3.msra.mxu0 %v3608_v12 }
 0x526   :  { %5223 = vmatpush3.msra.mxu1 %v3624_v1  ;;  %5205 = vmatprep.subr.mxu0 %v5527_v0 }
 0x527   :  { %5224 = vmatprep.subr.mxu1 %v5527_v0  ;;  %5206 = vmatpush3.msra.mxu0 %v3607_v14 }
 0x528   :  { %5225 = vmatpush3.msra.mxu1 %v3623_v23  ;;  %5207 = vmatprep.subr.mxu0 %v5527_v0 }
 0x529   :  { %5226 = vmatprep.subr.mxu1 %v5527_v0  ;;  %5208 = vmatpush3.msra.mxu0 %v3606_v15 }
 0x52a   :  { %5227 = vmatpush3.msra.mxu1 %v3622_v3  ;;  %5209 = vmatprep.subr.mxu0 %v5527_v0 }
 0x52b   :  { %5228 = vmatprep.subr.mxu1 %v5527_v0  ;;  %5210 = vmatpush3.msra.mxu0 %v3605_v16 }
 0x52c   :  { %5229 = vmatpush3.msra.mxu1 %v3621_v6  ;;  %5211 = vmatprep.subr.mxu0 %v5527_v0 }
 0x52d   :  { %5230 = vmatprep.subr.mxu1 %v5527_v0  ;;  %5212 = vmatpush3.msra.mxu0 %v3604_v19 }
 0x52e   :  { %5231 = vmatpush3.msra.mxu1 %v3620_v11  ;;  %5213 = vmatprep.subr.mxu0 %v5527_v0 }
 0x52f   :  { %5232 = vmatprep.subr.mxu1 %v5527_v0  ;;  %5214 = vmatpush3.msra.mxu0 %v3603_v4 }
 0x530   :  { %5233 = vmatpush3.msra.mxu1 %v3619_v40  ;;  %5216 = vmatmul.mubr.msk.f32.vlgmr.msra.gmra.mxu0 %vm491_vm3, %v3414_v20 }
 0x531   :  { %5235 = vmatmul.mubr.msk.f32.vlgmr.msra.gmra.mxu1 %vm491_vm3, %v3782_v13  ;;  %5237 = vmatprep.subr.mxu0 %v5527_v0 }
 0x532   :  { %5253 = vmatprep.mubr.msk.f32.mxu0 %vm5528_vm0, %v5527_v0  ;;  %5238 = vmatpush3.msra.mxu0 %v3634_v22 }
 0x533   :  { %5239 = vmatprep.subr.mxu0 %v5527_v0 }
 0x534   :  { %5240 = vmatpush3.msra.mxu0 %v3633_v24 }
 0x535   :  { %5241 = vmatprep.subr.mxu0 %v5527_v0 }
 0x536   :  { %5242 = vmatpush3.msra.mxu0 %v3632_v25 }
 0x537   :  { %5243 = vmatprep.subr.mxu0 %v5527_v0 }
 0x538   :  { %5244 = vmatpush3.msra.mxu0 %v3631_v26 }
 0x539   :  { %5245 = vmatprep.subr.mxu0 %v5527_v0 }
 0x53a   :  { %5246 = vmatpush3.msra.mxu0 %v3630_v27 }
 0x53b   :  { %5247 = vmatprep.subr.mxu0 %v5527_v0 }
 0x53c   :  { %5248 = vmatpush3.msra.mxu0 %v3629_v28 }
 0x53d   :  { %5249 = vmatprep.subr.mxu0 %v5527_v0 }
 0x53e   :  { %5250 = vmatpush3.msra.mxu0 %v3628_v29 }
 0x53f   :  { %5251 = vmatprep.subr.mxu0 %v5527_v0 }
 0x540   :  { %5252 = vmatpush3.msra.mxu0 %v3627_v31 }
 0x5c1   :  { %v3297_v32 = vpop.f32.mrf.mxu1 }
 0x5c2   :  { %v3301_v34 = vadd.f32 %v3297_v32, %v6408_v57 }
 0x5c3   :  { %v5126_v35 = vpop.f32.mrf.mxu1 }
 0x5c4   :  { %v3310_v36 = vadd.f32 %v4087_v33, %v3301_v34 }
 0x5c6   :  { %v3318_v38 = vmul.f32 %v3316_v59, %v3310_v36 }
 0x5c8   :  { %v3319_v39 = vsel %vm802_vm4, %v3318_v38, 0.0 }
 0x5c9   :  { %v3320_v41 = vrot.slane %v3319_v39, 4 }
 0x5cb   :  { %v3321_v42 = vadd.f32 %v3320_v41, %v3319_v39 }
 0x5cd   :  { %v3322_v0 = vrot.slane %v3321_v42, 2 }
 0x5cf   :  { %v3323_v43 = vadd.f32 %v3322_v0, %v3321_v42 }
 0x5d1   :  { %v3324_v44 = vrot.slane %v3323_v43, 1 }
 0x5d3   :  { %v3325_v45 = vadd.f32 %v3324_v44, %v3323_v43 }
 0x5d5   :  { %v3329_v46 = vsel %vm3326_vm9, %v3325_v45, 0.0 }
 0x5d6   :  { %v3330_v47 = vadd.f32 %v3329_v46, %v6345_v30  ;;  %v3945_v30 = vpop.permute.xlu1 %3944 }
 0x5dd   :  { %v3704_v52 = vpop.f32.mrf.mxu0 }
 0x5df   :  { %v5198_v53 = vpop.f32.mrf.mxu0 }
 0x5e1   :  { %v3598_v48 = vpop.f32.mrf.mxu1 }
 0x5e2   :  { %v3599_v49 = vadd.f32 %v4109_v37, %v3598_v48 }
 0x5e3   :  { %v5179_v50 = vpop.f32.mrf.mxu1 }
 0x5e4   :  { %5254 = vmatmul.mubr.msk.f32.vlgmr.msra.gmra.mxu0 %vm491_vm3, %v3599_v49 }
 0x5f0   :  { %v3777_v56 = vpop.f32.mrf.mxu0 }
 0x5f1   :  { %v3852_v54 = vpop.f32.mrf.mxu1  ;;  %v3778_v57 = vadd.f32 %v3777_v56, %v3704_v52 }
 0x5f2   :  { %v5217_v58 = vpop.f32.mrf.mxu0 }
 0x5f3   :  { %v5236_v55 = vpop.f32.mrf.mxu1  ;;  %v3856_v60 = vadd.f32 %v3852_v54, %v3778_v57 }
 0x6a4   :  { %v3926_v51 = vpop.f32.mrf.mxu0 }
 0x6a5   :  { %v3930_v62 = vadd.f32 %v3926_v51, %v3856_v60 }
 0x6a6   :  { %v5255_v63 = vpop.f32.mrf.mxu0 }
 0x6a7   :  { %v3939_v1 = vadd.f32 %v4114_v61, %v3930_v62 }
 0x6a9   :  { %v3947_v23 = vmul.f32 %v3945_v30, %v3939_v1 }
 0x6ab   :  { %v3948_v2 = vsel %vm802_vm4, %v3947_v23, 0.0 }
 0x6ac   :  { %v3949_v3 = vrot.slane %v3948_v2, 4 }
 0x6ae   :  { %v3950_v5 = vadd.f32 %v3949_v3, %v3948_v2 }
 0x6b0   :  { %v3951_v6 = vrot.slane %v3950_v5, 2 }
 0x6b2   :  { %v3952_v7 = vadd.f32 %v3951_v6, %v3950_v5 }
 0x6b4   :  { %v3953_v8 = vrot.slane %v3952_v7, 1 }
 0x6b6   :  { %v3954_v9 = vadd.f32 %v3953_v8, %v3952_v7 }
 0x6b8   :  { %v3958_v10 = vsel %vm3955_vm10, %v3954_v9, 0.0 }
 0x6b9   :  { %v3959_v11 = vadd.f32 %v3958_v10, %v3330_v47 }
 0x6bb   :  { %3960 = vst [vmem:[%s6473_s13] sm:$0x3f] %v3959_v11 }
 0x6bc   :  { %3965 = vsyncpa [#allocation3], 1 }
 0x6bd   :  { %3966 = vsyncpa [#allocation5], 1 }
 0x6be   :  { %3967 = vsyncpa [#allocation8], 1 }
 0x6bf   :  { %3968 = vsyncpa [#allocation11], 1 }
 0x6c0   :  { %3969 = vsyncpa [#allocation14], 1 }
 0x6c1   :  { %3970 = vsyncpa [#allocation17], 1 }

// kernel: _lambda_.8
= control target key start
LH: loop header
LB: loop body
LE: loop exit
PB: predicated region body
PF: predicated region fallthrough
CT: control target
= control target key end

     0   :  { %vm92_vm0 = vcmask 523264   ;;  %s1072_s1 = inlined_call_operand.vmem [shape: bf16[64,128], index: 1, kind: input, shape index: {}]   ;;  %s1073_s0 = inlined_call_operand.vmem [shape: bf16[32,64], index: 0, kind: input, shape index: {}]   ;;  %s1074_s3 = inlined_call_operand.vmem [shape: bf16[128,128], index: 3, kind: input, shape index: {}]   ;;  %s1075_s2 = inlined_call_operand.vmem [shape: f32[1,128], index: 2, kind: input, shape index: {}]   ;;  %s1076_s4 = inlined_call_operand.vmem [shape: f32[1,128], index: 4, kind: input, shape index: {}]   ;;  %s1077_s7 = inlined_call_operand.vmem [shape: bf16[128,128], index: 7, kind: input, shape index: {}]   ;;  %s1078_s5 = inlined_call_operand.vmem [shape: f32[1,128], index: 5, kind: input, shape index: {}]   ;;  %s1079_s6 = inlined_call_operand.vmem [shape: f32[1,128], index: 6, kind: input, shape index: {}]   ;;  %s1080_s9 = inlined_call_operand.vmem [shape: bf16[128,128], index: 9, kind: input, shape index: {}]   ;;  %s1081_s8 = inlined_call_operand.vmem [shape: f32[1,128], index: 8, kind: input, shape index: {}]   ;;  %s1082_s10 = inlined_call_operand.vmem [shape: f32[1,128], index: 10, kind: input, shape index: {}]   ;;  %s1083_s11 = inlined_call_operand.vmem [shape: f32[32,128], index: 11, kind: output, shape index: {}]  }
   0x1   :  { %v814_v0 = vld [vmem:[%s1072_s1 + $0x18] sm:$0xff]   ;;  %v815_v1 = vld [vmem:[%s1072_s1 + $0x10] sm:$0xff]   ;;  %v816_v2 = vld [vmem:[%s1072_s1 + $0x8] sm:$0xff]  }
   0x2   :  { %742 = vmatprep.subr.bf16.mxu0 %v814_v0  ;;  %v818_v3 = vld [vmem:[%s1073_s0] sm:$0xff]   ;;  %v819_v5 = vld [vmem:[%s1073_s0 + $0x8] sm:$0xff]   ;;  %v820_v6 = vld [vmem:[%s1074_s3 + $0x38] sm:$0xff]  }
   0x3   :  { %743 = vmatpush3.bf16.msra.mxu0 %v814_v0  ;;  %750 = vmatprep.mubr.msk.bf16.mxu0 %vm92_vm0, %v818_v3  ;;  %v817_v4 = vld [vmem:[%s1072_s1] sm:$0xff]   ;;  %v821_v7 = vld [vmem:[%s1074_s3 + $0x30] sm:$0xff]   ;;  %v822_v8 = vld [vmem:[%s1074_s3 + $0x28] sm:$0xff]  }
   0x4   :  { %744 = vmatprep.subr.bf16.mxu0 %v815_v1  ;;  %754 = vmatprep.subr.bf16.mxu1 %v820_v6  ;;  %v823_v9 = vld [vmem:[%s1074_s3 + $0x20] sm:$0xff]   ;;  %v824_v10 = vld [vmem:[%s1074_s3 + $0x18] sm:$0xff]   ;;  %v825_v11 = vld [vmem:[%s1074_s3 + $0x10] sm:$0xff]  }
   0x5   :  { %755 = vmatpush3.bf16.msra.mxu1 %v820_v6  ;;  %v826_v12 = vld [vmem:[%s1074_s3 + $0x8] sm:$0xff]   ;;  %v827_v13 = vld [vmem:[%s1074_s3] sm:$0xff]  }
   0x6   :  { %756 = vmatprep.subr.bf16.mxu1 %v821_v7  ;;  %v668_v14 = vld [vmem:[%s1075_s2] ss:$0 sm:$0xff] }
   0x7   :  { %745 = vmatpush3.bf16.msra.mxu0 %v815_v1  ;;  %v677_v61 = vld [vmem:[%s1076_s4] ss:$0 sm:$0xff] }
   0x8   :  { %746 = vmatprep.subr.bf16.mxu0 %v816_v2 }
   0x9   :  { %757 = vmatpush3.bf16.msra.mxu1 %v821_v7 }
   0xa   :  { %758 = vmatprep.subr.bf16.mxu1 %v822_v8 }
   0xb   :  { %747 = vmatpush3.bf16.msra.mxu0 %v816_v2 }
   0xc   :  { %748 = vmatprep.subr.bf16.mxu0 %v817_v4 }
   0xd   :  { %759 = vmatpush3.bf16.msra.mxu1 %v822_v8 }
   0xe   :  { %760 = vmatprep.subr.bf16.mxu1 %v823_v9 }
   0xf   :  { %749 = vmatpush3.bf16.msra.mxu0 %v817_v4 }
  0x11   :  { %761 = vmatpush3.bf16.msra.mxu1 %v823_v9 }
  0x12   :  { %751 = vmatmul.mubr.msk.bf16.vlgmr.msra.gmra.mxu0 %vm92_vm0, %v819_v5  ;;  %762 = vmatprep.subr.bf16.mxu1 %v824_v10 }
  0x15   :  { %763 = vmatpush3.bf16.msra.mxu1 %v824_v10  ;;  %v828_v10 = vld [vmem:[%s1077_s7 + $0x38] sm:$0xff]  }
  0x16   :  { %764 = vmatprep.subr.bf16.mxu1 %v825_v11  ;;  %774 = vmatprep.subr.bf16.mxu0 %v828_v10 }
  0x17   :  { %775 = vmatpush3.bf16.msra.mxu0 %v828_v10  ;;  %v840_v10 = vld [vmem:[%s1080_s9 + $0x18] sm:$0xff]  }
  0x19   :  { %765 = vmatpush3.bf16.msra.mxu1 %v825_v11  ;;  %v829_v11 = vld [vmem:[%s1077_s7 + $0x30] sm:$0xff]  }
  0x1a   :  { %766 = vmatprep.subr.bf16.mxu1 %v826_v12  ;;  %776 = vmatprep.subr.bf16.mxu0 %v829_v11 }
  0x1b   :  { %777 = vmatpush3.bf16.msra.mxu0 %v829_v11  ;;  %v841_v11 = vld [vmem:[%s1080_s9 + $0x10] sm:$0xff]  }
  0x1d   :  { %767 = vmatpush3.bf16.msra.mxu1 %v826_v12  ;;  %v830_v12 = vld [vmem:[%s1077_s7 + $0x28] sm:$0xff]  }
  0x1e   :  { %768 = vmatprep.subr.bf16.mxu1 %v827_v13  ;;  %778 = vmatprep.subr.bf16.mxu0 %v830_v12 }
  0x1f   :  { %779 = vmatpush3.bf16.msra.mxu0 %v830_v12  ;;  %v842_v12 = vld [vmem:[%s1080_s9 + $0x8] sm:$0xff]  }
  0x21   :  { %769 = vmatpush3.bf16.msra.mxu1 %v827_v13  ;;  %v831_v13 = vld [vmem:[%s1077_s7 + $0x20] sm:$0xff]  }
  0x22   :  { %780 = vmatprep.subr.bf16.mxu0 %v831_v13 }
  0x23   :  { %781 = vmatpush3.bf16.msra.mxu0 %v831_v13  ;;  %v843_v13 = vld [vmem:[%s1080_s9] sm:$0xff]  }
  0xd2   :  { %v752_v15 = vpop.f32.mrf.mxu0 }
  0xd3   :  { %v142_v16 = vadd.f32 %v752_v15, %v668_v14  ;;  %v833_v15 = vld [vmem:[%s1077_s7 + $0x10] sm:$0xff]  }
  0xd4   :  { %v133_v17 = vpop.f32.mrf.mxu0 }
  0xd5   :  { %v154_v18 = vmul.f32 0.044715, %v142_v16  ;;  %v134_v19 = vadd.f32 %v668_v14, %v133_v17  ;;  %v150_v54 = vmul.f32 0.5, %v142_v16  ;;  %v835_v17 = vld [vmem:[%s1077_s7] sm:$0xff]  }
  0xd6   :  { %v753_v20 = vpop.f32.mrf.mxu0 }
  0xd7   :  { %v158_v21 = vmul.f32 %v154_v18, %v142_v16  ;;  %v152_v22 = vmul.f32 0.044715, %v134_v19  ;;  %v145_v23 = vadd.f32 %v753_v20, %v668_v14  ;;  %v148_v51 = vmul.f32 0.5, %v134_v19 }
  0xd8   :  { %v136_v24 = vpop.f32.mrf.mxu0 }
  0xd9   :  { %v162_v25 = vmul.f32 %v158_v21, %v142_v16  ;;  %v155_v26 = vmul.f32 0.044715, %v145_v23  ;;  %v137_v27 = vadd.f32 %v668_v14, %v136_v24  ;;  %v156_v28 = vmul.f32 %v152_v22, %v134_v19  ;;  %v832_v14 = vld [vmem:[%s1077_s7 + $0x18] sm:$0xff]  }
  0xda   :  { %v151_v49 = vmul.f32 0.5, %v145_v23  ;;  %782 = vmatprep.subr.bf16.mxu0 %v832_v14 }
  0xdb   :  { %v159_v29 = vmul.f32 %v155_v26, %v145_v23  ;;  %v153_v30 = vmul.f32 0.044715, %v137_v27  ;;  %v160_v31 = vmul.f32 %v156_v28, %v134_v19  ;;  %v166_v32 = vadd.f32 %v162_v25, %v142_v16  ;;  %783 = vmatpush3.bf16.msra.mxu0 %v832_v14  ;;  %v834_v16 = vld [vmem:[%s1077_s7 + $0x8] sm:$0xff]   ;;  %v688_v14 = vld [vmem:[%s1081_s8] ss:$0 sm:$0xff] }
  0xdc   :  { %v149_v52 = vmul.f32 0.5, %v137_v27  ;;  %784 = vmatprep.subr.bf16.mxu0 %v833_v15 }
  0xdd   :  { %v163_v33 = vmul.f32 %v159_v29, %v145_v23  ;;  %v157_v34 = vmul.f32 %v153_v30, %v137_v27  ;;  %v164_v35 = vadd.f32 %v160_v31, %v134_v19  ;;  %v170_v36 = vmul.f32 0.7978846, %v166_v32 }
  0xdf   :  { %v161_v37 = vmul.f32 %v157_v34, %v137_v27  ;;  %v168_v38 = vmul.f32 0.7978846, %v164_v35  ;;  %v167_v39 = vadd.f32 %v163_v33, %v145_v23  ;;  %785 = vmatpush3.bf16.msra.mxu0 %v833_v15 }
  0xe0   :  { %786 = vmatprep.subr.bf16.mxu0 %v834_v16 }
  0xe1   :  { %v165_v40 = vadd.f32 %v161_v37, %v137_v27  ;;  %844 = vtanh.f32 %v168_v38  ;;  %v171_v41 = vmul.f32 0.7978846, %v167_v39 }
  0xe2   :  { %846 = vtanh.f32 %v170_v36 }
  0xe3   :  { %v169_v42 = vmul.f32 0.7978846, %v165_v40  ;;  %848 = vtanh.f32 %v171_v41  ;;  %787 = vmatpush3.bf16.msra.mxu0 %v834_v16 }
  0xe4   :  { %788 = vmatprep.subr.bf16.mxu0 %v835_v17 }
  0xe5   :  { %850 = vtanh.f32 %v169_v42 }
  0xe7   :  { %789 = vmatpush3.bf16.msra.mxu0 %v835_v17 }
  0xee   :  { %v845_v43 = vpop.eup %844 }
  0xef   :  { %v847_v44 = vpop.eup %846  ;;  %v176_v46 = vadd.f32 1.0, %v845_v43 }
  0xf0   :  { %v849_v45 = vpop.eup %848  ;;  %v178_v50 = vadd.f32 1.0, %v847_v44 }
  0xf1   :  { %v179_v47 = vadd.f32 1.0, %v849_v45  ;;  %v180_v56 = vmul.f32 %v176_v46, %v148_v51 }
  0xf2   :  { %v851_v48 = vpop.eup %850  ;;  %v182_v58 = vmul.f32 %v178_v50, %v150_v54 }
  0xf3   :  { %v177_v53 = vadd.f32 1.0, %v851_v48  ;;  %v183_v55 = vmul.f32 %v179_v47, %v151_v49  ;;  %v686_v49 = vld [vmem:[%s1078_s5] ss:$0 sm:$0xff] }
  0xf5   :  { %v181_v57 = vmul.f32 %v177_v53, %v149_v52  ;;  %v185_v60 = vpack.c.bf16 %v183_v55, %v182_v58  ;;  %v687_v58 = vld [vmem:[%s1079_s6] ss:$0 sm:$0xff] }
  0xf7   :  { %v184_v59 = vpack.c.bf16 %v181_v57, %v180_v56 }
  0xf9   :  { %770 = vmatprep.mubr.bf16.mxu1 %v184_v59 }
  0xfa   :  { %771 = vmatmul.mubr.bf16.vlgmr.msra.gmra.mxu1 %v185_v60 }
 0x1ba   :  { %v772_v62 = vpop.f32.mrf.mxu1 }
 0x1bb   :  { %v976_v63 = vadd.f32 %v772_v62, %v677_v61 }
 0x1bc   :  { %v291_v0 = vpop.f32.mrf.mxu1 }
 0x1bd   :  { %v978_v1 = vadd.f32 %v677_v61, %v291_v0  ;;  %310 = vadd.xlane.f32.xlu1 %v976_v63  ;;  %v320_v9 = vmul.f32 %v976_v63, %v976_v63 }
 0x1be   :  { %v773_v2 = vpop.f32.mrf.mxu1 }
 0x1bf   :  { %v981_v3 = vadd.f32 %v773_v2, %v677_v61  ;;  %306 = vadd.xlane.f32.xlu0 %v978_v1  ;;  %v318_v6 = vmul.f32 %v978_v1, %v978_v1 }
 0x1c0   :  { %v294_v4 = vpop.f32.mrf.mxu1 }
 0x1c1   :  { %v984_v5 = vadd.f32 %v677_v61, %v294_v4  ;;  %312 = vadd.xlane.f32.xlu1 %v981_v3  ;;  %v321_v8 = vmul.f32 %v981_v3, %v981_v3 }
 0x1c3   :  { %322 = vadd.xlane.f32.xlu0 %v318_v6  ;;  %v319_v7 = vmul.f32 %v984_v5, %v984_v5 }
 0x1c5   :  { %324 = vadd.xlane.f32.xlu1 %v319_v7  ;;  %v837_v7 = vld [vmem:[%s1080_s9 + $0x30] sm:$0xff]  }
 0x1c7   :  { %308 = vadd.xlane.f32.xlu0 %v984_v5 }
 0x1c9   :  { %328 = vadd.xlane.f32.xlu1 %v321_v8  ;;  %v838_v8 = vld [vmem:[%s1080_s9 + $0x28] sm:$0xff]  }
 0x1cb   :  { %326 = vadd.xlane.f32.xlu0 %v320_v9  ;;  %v839_v9 = vld [vmem:[%s1080_s9 + $0x20] sm:$0xff]  }
 0x246   :  { %v311_v18 = vpop.xlane.xlu1 %310 }
 0x247   :  { %v316_v29 = vmul.f32 0.03125, %v311_v18 }
 0x248   :  { %v307_v19 = vpop.xlane.xlu0 %306 }
 0x249   :  { %v314_v20 = vmul.f32 0.03125, %v307_v19  ;;  %v340_v38 = vmul.f32 %v316_v29, %v316_v29  ;;  %v336_v54 = vsub.f32 %v976_v63, %v316_v29  ;;  %v836_v63 = vld [vmem:[%s1080_s9 + $0x38] sm:$0xff]  }
 0x24a   :  { %v313_v21 = vpop.xlane.xlu1 %312  ;;  %794 = vmatprep.subr.bf16.mxu1 %v836_v63 }
 0x24b   :  { %v338_v23 = vmul.f32 %v314_v20, %v314_v20  ;;  %v317_v25 = vmul.f32 0.03125, %v313_v21  ;;  %v334_v47 = vsub.f32 %v978_v1, %v314_v20  ;;  %795 = vmatpush3.bf16.msra.mxu1 %v836_v63 }
 0x24c   :  { %v323_v22 = vpop.xlane.xlu0 %322  ;;  %796 = vmatprep.subr.bf16.mxu1 %v837_v7 }
 0x24d   :  { %v330_v24 = vmul.f32 0.03125, %v323_v22  ;;  %v341_v32 = vmul.f32 %v317_v25, %v317_v25  ;;  %v337_v52 = vsub.f32 %v981_v3, %v317_v25 }
 0x24e   :  { %v325_v26 = vpop.xlane.xlu1 %324 }
 0x24f   :  { %v342_v27 = vsub.f32 %v330_v24, %v338_v23  ;;  %v331_v34 = vmul.f32 0.03125, %v325_v26  ;;  %797 = vmatpush3.bf16.msra.mxu1 %v837_v7 }
 0x250   :  { %v309_v28 = vpop.xlane.xlu0 %308  ;;  %798 = vmatprep.subr.bf16.mxu1 %v838_v8 }
 0x251   :  { %v346_v30 = vadd.f32 1e-05, %v342_v27  ;;  %v315_v31 = vmul.f32 0.03125, %v309_v28 }
 0x252   :  { %v329_v33 = vpop.xlane.xlu1 %328 }
 0x253   :  { %852 = vrsqrt.f32 %v346_v30  ;;  %v339_v35 = vmul.f32 %v315_v31, %v315_v31  ;;  %v333_v36 = vmul.f32 0.03125, %v329_v33  ;;  %v335_v50 = vsub.f32 %v984_v5, %v315_v31  ;;  %799 = vmatpush3.bf16.msra.mxu1 %v838_v8 }
 0x254   :  { %v327_v37 = vpop.xlane.xlu0 %326  ;;  %800 = vmatprep.subr.bf16.mxu1 %v839_v9 }
 0x255   :  { %v343_v39 = vsub.f32 %v331_v34, %v339_v35  ;;  %v345_v40 = vsub.f32 %v333_v36, %v341_v32  ;;  %v332_v41 = vmul.f32 0.03125, %v327_v37 }
 0x257   :  { %v347_v42 = vadd.f32 1e-05, %v343_v39  ;;  %v349_v43 = vadd.f32 1e-05, %v345_v40  ;;  %v344_v44 = vsub.f32 %v332_v41, %v340_v38  ;;  %801 = vmatpush3.bf16.msra.mxu1 %v839_v9 }
 0x258   :  { %802 = vmatprep.subr.bf16.mxu1 %v840_v10 }
 0x259   :  { %854 = vrsqrt.f32 %v347_v42  ;;  %v348_v45 = vadd.f32 1e-05, %v344_v44 }
 0x25a   :  { %856 = vrsqrt.f32 %v349_v43 }
 0x25b   :  { %858 = vrsqrt.f32 %v348_v45  ;;  %803 = vmatpush3.bf16.msra.mxu1 %v840_v10 }
 0x25c   :  { %804 = vmatprep.subr.bf16.mxu1 %v841_v11 }
 0x25f   :  { %805 = vmatpush3.bf16.msra.mxu1 %v841_v11 }
 0x260   :  { %v853_v46 = vpop.eup %852  ;;  %806 = vmatprep.subr.bf16.mxu1 %v842_v12 }
 0x261   :  { %v354_v48 = vmul.f32 %v853_v46, %v334_v47 }
 0x263   :  { %v365_v56 = vmul.f32 %v686_v49, %v354_v48  ;;  %807 = vmatpush3.bf16.msra.mxu1 %v842_v12 }
 0x264   :  { %808 = vmatprep.subr.bf16.mxu1 %v843_v13 }
 0x265   :  { %v376_v0 = vadd.f32 %v687_v58, %v365_v56 }
 0x266   :  { %v855_v51 = vpop.eup %854 }
 0x267   :  { %v857_v53 = vpop.eup %856  ;;  %v355_v55 = vmul.f32 %v855_v51, %v335_v50  ;;  %809 = vmatpush3.bf16.msra.mxu1 %v843_v13 }
 0x268   :  { %v859_v57 = vpop.eup %858  ;;  %v357_v59 = vmul.f32 %v857_v53, %v337_v52 }
 0x269   :  { %v366_v60 = vmul.f32 %v686_v49, %v355_v55  ;;  %v356_v61 = vmul.f32 %v859_v57, %v336_v54 }
 0x26a   :  { %v368_v62 = vmul.f32 %v686_v49, %v357_v59 }
 0x26b   :  { %v377_v1 = vadd.f32 %v687_v58, %v366_v60  ;;  %v367_v2 = vmul.f32 %v686_v49, %v356_v61  ;;  %v697_v61 = vld [vmem:[%s1082_s10] ss:$0 sm:$0xff] }
 0x26c   :  { %v379_v3 = vadd.f32 %v687_v58, %v368_v62 }
 0x26d   :  { %v380_v4 = vpack.c.bf16 %v377_v1, %v376_v0  ;;  %v378_v5 = vadd.f32 %v687_v58, %v367_v2 }
 0x26f   :  { %790 = vmatprep.mubr.bf16.mxu0 %v380_v4  ;;  %v381_v6 = vpack.c.bf16 %v379_v3, %v378_v5 }
 0x271   :  { %791 = vmatmul.mubr.bf16.vlgmr.msra.gmra.mxu0 %v381_v6 }
 0x331   :  { %v792_v15 = vpop.f32.mrf.mxu0 }
 0x332   :  { %v496_v16 = vadd.f32 %v792_v15, %v688_v14 }
 0x333   :  { %v487_v17 = vpop.f32.mrf.mxu0 }
 0x334   :  { %v508_v18 = vmul.f32 0.044715, %v496_v16  ;;  %v488_v19 = vadd.f32 %v688_v14, %v487_v17  ;;  %v504_v54 = vmul.f32 0.5, %v496_v16 }
 0x335   :  { %v793_v20 = vpop.f32.mrf.mxu0 }
 0x336   :  { %v512_v21 = vmul.f32 %v508_v18, %v496_v16  ;;  %v506_v22 = vmul.f32 0.044715, %v488_v19  ;;  %v499_v23 = vadd.f32 %v793_v20, %v688_v14  ;;  %v502_v51 = vmul.f32 0.5, %v488_v19 }
 0x337   :  { %v490_v24 = vpop.f32.mrf.mxu0 }
 0x338   :  { %v516_v25 = vmul.f32 %v512_v21, %v496_v16  ;;  %v510_v26 = vmul.f32 %v506_v22, %v488_v19  ;;  %v509_v27 = vmul.f32 0.044715, %v499_v23  ;;  %v491_v28 = vadd.f32 %v688_v14, %v490_v24 }
 0x339   :  { %v505_v49 = vmul.f32 0.5, %v499_v23 }
 0x33a   :  { %v520_v29 = vadd.f32 %v516_v25, %v496_v16  ;;  %v514_v30 = vmul.f32 %v510_v26, %v488_v19  ;;  %v513_v31 = vmul.f32 %v509_v27, %v499_v23  ;;  %v507_v32 = vmul.f32 0.044715, %v491_v28 }
 0x33b   :  { %v503_v52 = vmul.f32 0.5, %v491_v28 }
 0x33c   :  { %v517_v33 = vmul.f32 %v513_v31, %v499_v23  ;;  %v511_v34 = vmul.f32 %v507_v32, %v491_v28  ;;  %v518_v35 = vadd.f32 %v514_v30, %v488_v19  ;;  %v524_v36 = vmul.f32 0.7978846, %v520_v29 }
 0x33e   :  { %v521_v37 = vadd.f32 %v517_v33, %v499_v23  ;;  %v515_v38 = vmul.f32 %v511_v34, %v491_v28  ;;  %v522_v39 = vmul.f32 0.7978846, %v518_v35 }
 0x340   :  { %v525_v40 = vmul.f32 0.7978846, %v521_v37  ;;  %v519_v41 = vadd.f32 %v515_v38, %v491_v28  ;;  %860 = vtanh.f32 %v522_v39 }
 0x341   :  { %862 = vtanh.f32 %v524_v36 }
 0x342   :  { %864 = vtanh.f32 %v525_v40  ;;  %v523_v42 = vmul.f32 0.7978846, %v519_v41 }
 0x344   :  { %866 = vtanh.f32 %v523_v42 }
 0x34d   :  { %v861_v43 = vpop.eup %860 }
 0x34e   :  { %v863_v44 = vpop.eup %862  ;;  %v530_v46 = vadd.f32 1.0, %v861_v43 }
 0x34f   :  { %v865_v45 = vpop.eup %864  ;;  %v532_v50 = vadd.f32 1.0, %v863_v44 }
 0x350   :  { %v533_v47 = vadd.f32 1.0, %v865_v45  ;;  %v534_v56 = vmul.f32 %v530_v46, %v502_v51 }
 0x351   :  { %v867_v48 = vpop.eup %866  ;;  %v536_v58 = vmul.f32 %v532_v50, %v504_v54 }
 0x352   :  { %v531_v53 = vadd.f32 1.0, %v867_v48  ;;  %v537_v55 = vmul.f32 %v533_v47, %v505_v49 }
 0x354   :  { %v535_v57 = vmul.f32 %v531_v53, %v503_v52  ;;  %v539_v60 = vpack.c.bf16 %v537_v55, %v536_v58 }
 0x356   :  { %v538_v59 = vpack.c.bf16 %v535_v57, %v534_v56 }
 0x358   :  { %810 = vmatprep.mubr.bf16.mxu1 %v538_v59 }
 0x359   :  { %811 = vmatmul.mubr.bf16.vlgmr.msra.gmra.mxu1 %v539_v60 }
 0x419   :  { %v812_v62 = vpop.f32.mrf.mxu1 }
 0x41a   :  { %v654_v0 = vadd.f32 %v812_v62, %v697_v61 }
 0x41b   :  { %v645_v1 = vpop.f32.mrf.mxu1 }
 0x41c   :  { %662 = vst [vmem:[%s1083_s11 + $0x10] sm:$0xff] %v654_v0  ;;  %v646_v2 = vadd.f32 %v697_v61, %v645_v1 }
 0x41d   :  { %v813_v4 = vpop.f32.mrf.mxu1 }
 0x41e   :  { %660 = vst [vmem:[%s1083_s11] sm:$0xff] %v646_v2  ;;  %v657_v5 = vadd.f32 %v813_v4, %v697_v61 }
 0x41f   :  { %v648_v3 = vpop.f32.mrf.mxu1 }
 0x420   :  { %663 = vst [vmem:[%s1083_s11 + $0x18] sm:$0xff] %v657_v5  ;;  %v649_v6 = vadd.f32 %v697_v61, %v648_v3 }
 0x422   :  { %661 = vst [vmem:[%s1083_s11 + $0x8] sm:$0xff] %v649_v6 }

// kernel: _lambda_.10
= control target key start
LH: loop header
LB: loop body
LE: loop exit
PB: predicated region body
PF: predicated region fallthrough
CT: control target
= control target key end

     0   :  { %s980_s1 = inlined_call_operand.vmem [shape: f32[32,128], index: 1, kind: input, shape index: {}]   ;;  %s981_s0 = inlined_call_operand.vmem [shape: f32[32,128], index: 0, kind: input, shape index: {}]   ;;  %s982_s7 = inlined_call_operand.vmem [shape: bf16[128,128], index: 7, kind: input, shape index: {}]   ;;  %s983_s6 = inlined_call_operand.vmem [shape: bf16[128,128], index: 6, kind: input, shape index: {}]   ;;  %s984_s4 = inlined_call_operand.vmem [shape: f32[1,128], index: 4, kind: input, shape index: {}]   ;;  %s985_s2 = inlined_call_operand.vmem [shape: f32[1,128], index: 2, kind: input, shape index: {}]   ;;  %s986_s5 = inlined_call_operand.vmem [shape: f32[1,128], index: 5, kind: input, shape index: {}]   ;;  %s987_s3 = inlined_call_operand.vmem [shape: f32[1,128], index: 3, kind: input, shape index: {}]   ;;  %s988_s9 = inlined_call_operand.vmem [shape: bf16[128,128], index: 9, kind: input, shape index: {}]   ;;  %s989_s8 = inlined_call_operand.vmem [shape: f32[1,128], index: 8, kind: input, shape index: {}]   ;;  %s990_s10 = inlined_call_operand.vmem [shape: f32[1,128], index: 10, kind: input, shape index: {}]   ;;  %s991_s11 = inlined_call_operand.vmem [shape: f32[32,128], index: 11, kind: output, shape index: {}]  }
   0x1   :  { %v809_v0 = vld [vmem:[%s980_s1] sm:$0xff]  ;;  %v821_v2 = vld [vmem:[%s980_s1 + $0x8] sm:$0xff]  ;;  %v833_v4 = vld [vmem:[%s981_s0 + $0x18] sm:$0xff] }
   0x2   :  { %v814_v1 = vld [vmem:[%s981_s0] sm:$0xff]  ;;  %55 = vadd.xlane.f32.xlu1 %v809_v0  ;;  %v826_v3 = vld [vmem:[%s981_s0 + $0x8] sm:$0xff]  ;;  %v838_v5 = vld [vmem:[%s981_s0 + $0x10] sm:$0xff]  ;;  %v84_v10 = vmul.f32 %v821_v2, %v821_v2  ;;  %v83_v11 = vmul.f32 %v809_v0, %v809_v0  ;;  %v74_v12 = vmul.f32 %v833_v4, %v833_v4 }
   0x3   :  { %47 = vadd.xlane.f32.xlu0 %v814_v1  ;;  %v845_v6 = vld [vmem:[%s980_s1 + $0x18] sm:$0xff]  ;;  %v850_v7 = vld [vmem:[%s980_s1 + $0x10] sm:$0xff]  ;;  %v72_v8 = vmul.f32 %v826_v3, %v826_v3  ;;  %v71_v9 = vmul.f32 %v814_v1, %v814_v1  ;;  %v73_v13 = vmul.f32 %v838_v5, %v838_v5  ;;  %v710_v20 = vld [vmem:[%s982_s7 + $0x28] sm:$0xff]  }
   0x4   :  { %v86_v14 = vmul.f32 %v845_v6, %v845_v6  ;;  %v85_v15 = vmul.f32 %v850_v7, %v850_v7  ;;  %v706_v16 = vld [vmem:[%s982_s7 + $0x38] sm:$0xff]   ;;  %v708_v18 = vld [vmem:[%s982_s7 + $0x30] sm:$0xff]   ;;  %v711_v21 = vld [vmem:[%s983_s6 + $0x28] sm:$0xff]  }
   0x5   :  { %v707_v17 = vld [vmem:[%s983_s6 + $0x38] sm:$0xff]   ;;  %646 = vmatprep.subr.bf16.mxu0 %v706_v16  ;;  %v709_v19 = vld [vmem:[%s983_s6 + $0x30] sm:$0xff]   ;;  %v712_v22 = vld [vmem:[%s982_s7 + $0x20] sm:$0xff]  }
   0x6   :  { %57 = vadd.xlane.f32.xlu1 %v821_v2  ;;  %666 = vmatprep.subr.bf16.mxu1 %v707_v17  ;;  %v713_v23 = vld [vmem:[%s983_s6 + $0x20] sm:$0xff]   ;;  %v714_v24 = vld [vmem:[%s982_s7 + $0x18] sm:$0xff]   ;;  %v716_v26 = vld [vmem:[%s982_s7 + $0x10] sm:$0xff]  }
   0x7   :  { %49 = vadd.xlane.f32.xlu0 %v826_v3  ;;  %647 = vmatpush3.bf16.msra.mxu0 %v706_v16  ;;  %v715_v25 = vld [vmem:[%s983_s6 + $0x18] sm:$0xff]   ;;  %v717_v27 = vld [vmem:[%s983_s6 + $0x10] sm:$0xff]   ;;  %v718_v28 = vld [vmem:[%s982_s7 + $0x8] sm:$0xff]  }
   0x8   :  { %667 = vmatpush3.bf16.msra.mxu1 %v707_v17  ;;  %648 = vmatprep.subr.bf16.mxu0 %v708_v18  ;;  %v719_v29 = vld [vmem:[%s983_s6 + $0x8] sm:$0xff]   ;;  %v720_v30 = vld [vmem:[%s982_s7] sm:$0xff]  }
   0x9   :  { %668 = vmatprep.subr.bf16.mxu1 %v709_v19  ;;  %v721_v31 = vld [vmem:[%s983_s6] sm:$0xff]  }
   0xa   :  { %53 = vadd.xlane.f32.xlu1 %v833_v4 }
   0xb   :  { %51 = vadd.xlane.f32.xlu0 %v838_v5  ;;  %649 = vmatpush3.bf16.msra.mxu0 %v708_v18 }
   0xc   :  { %669 = vmatpush3.bf16.msra.mxu1 %v709_v19  ;;  %650 = vmatprep.subr.bf16.mxu0 %v710_v20 }
   0xd   :  { %670 = vmatprep.subr.bf16.mxu1 %v711_v21 }
   0xe   :  { %61 = vadd.xlane.f32.xlu1 %v845_v6 }
   0xf   :  { %59 = vadd.xlane.f32.xlu0 %v850_v7  ;;  %651 = vmatpush3.bf16.msra.mxu0 %v710_v20 }
  0x10   :  { %671 = vmatpush3.bf16.msra.mxu1 %v711_v21  ;;  %652 = vmatprep.subr.bf16.mxu0 %v712_v22 }
  0x11   :  { %672 = vmatprep.subr.bf16.mxu1 %v713_v23 }
  0x12   :  { %77 = vadd.xlane.f32.xlu1 %v72_v8 }
  0x13   :  { %75 = vadd.xlane.f32.xlu0 %v71_v9  ;;  %653 = vmatpush3.bf16.msra.mxu0 %v712_v22 }
  0x14   :  { %673 = vmatpush3.bf16.msra.mxu1 %v713_v23  ;;  %654 = vmatprep.subr.bf16.mxu0 %v714_v24 }
  0x15   :  { %674 = vmatprep.subr.bf16.mxu1 %v715_v25 }
  0x16   :  { %89 = vadd.xlane.f32.xlu1 %v84_v10 }
  0x17   :  { %87 = vadd.xlane.f32.xlu0 %v83_v11  ;;  %655 = vmatpush3.bf16.msra.mxu0 %v714_v24 }
  0x18   :  { %675 = vmatpush3.bf16.msra.mxu1 %v715_v25  ;;  %656 = vmatprep.subr.bf16.mxu0 %v716_v26  ;;  %v588_v25 = vld [vmem:[%s984_s4] ss:$0 sm:$0xff] }
  0x19   :  { %676 = vmatprep.subr.bf16.mxu1 %v717_v27 }
  0x1a   :  { %81 = vadd.xlane.f32.xlu1 %v74_v12 }
  0x1b   :  { %79 = vadd.xlane.f32.xlu0 %v73_v13  ;;  %657 = vmatpush3.bf16.msra.mxu0 %v716_v26  ;;  %v586_v26 = vld [vmem:[%s985_s2] ss:$0 sm:$0xff] }
  0x1c   :  { %677 = vmatpush3.bf16.msra.mxu1 %v717_v27  ;;  %658 = vmatprep.subr.bf16.mxu0 %v718_v28 }
  0x1d   :  { %678 = vmatprep.subr.bf16.mxu1 %v719_v29 }
  0x1e   :  { %93 = vadd.xlane.f32.xlu1 %v86_v14 }
  0x1f   :  { %91 = vadd.xlane.f32.xlu0 %v85_v15  ;;  %659 = vmatpush3.bf16.msra.mxu0 %v718_v28 }
  0x20   :  { %679 = vmatpush3.bf16.msra.mxu1 %v719_v29  ;;  %660 = vmatprep.subr.bf16.mxu0 %v720_v30 }
  0x21   :  { %680 = vmatprep.subr.bf16.mxu1 %v721_v31 }
  0x23   :  { %661 = vmatpush3.bf16.msra.mxu0 %v720_v30 }
  0x24   :  { %681 = vmatpush3.bf16.msra.mxu1 %v721_v31 }
  0x8b   :  { %v56_v32 = vpop.xlane.xlu1 %55 }
  0x8c   :  { %v48_v33 = vpop.xlane.xlu0 %47 }
  0x8d   :  { %v63_v40 = vadd.f32 %v56_v32, %v48_v33 }
  0x8f   :  { %v58_v34 = vpop.xlane.xlu1 %57  ;;  %v67_v44 = vmul.f32 0.0078125, %v63_v40 }
  0x90   :  { %v50_v35 = vpop.xlane.xlu0 %49 }
  0x91   :  { %v64_v41 = vadd.f32 %v58_v34, %v50_v35  ;;  %v103_v51 = vmul.f32 %v67_v44, %v67_v44  ;;  %v119_v23 = vsub.f32 %v814_v1, %v67_v44  ;;  %v149_v24 = vsub.f32 %v809_v0, %v67_v44  ;;  %v587_v0 = vld [vmem:[%s987_s3] ss:$0 sm:$0xff] }
  0x93   :  { %v54_v36 = vpop.xlane.xlu1 %53  ;;  %v68_v45 = vmul.f32 0.0078125, %v64_v41 }
  0x94   :  { %v52_v37 = vpop.xlane.xlu0 %51 }
  0x95   :  { %v104_v50 = vmul.f32 %v68_v45, %v68_v45  ;;  %v120_v20 = vsub.f32 %v826_v3, %v68_v45  ;;  %v150_v21 = vsub.f32 %v821_v2, %v68_v45  ;;  %v589_v2 = vld [vmem:[%s986_s5] ss:$0 sm:$0xff] }
  0x97   :  { %v62_v38 = vpop.xlane.xlu1 %61 }
  0x98   :  { %v60_v39 = vpop.xlane.xlu0 %59  ;;  %v66_v52 = vadd.f32 %v62_v38, %v54_v36 }
  0x99   :  { %v65_v53 = vadd.f32 %v60_v39, %v52_v37 }
  0x9a   :  { %v70_v60 = vmul.f32 0.0078125, %v66_v52 }
  0x9b   :  { %v78_v42 = vpop.xlane.xlu1 %77  ;;  %v69_v61 = vmul.f32 0.0078125, %v65_v53 }
  0x9c   :  { %v76_v43 = vpop.xlane.xlu0 %75  ;;  %v106_v12 = vmul.f32 %v70_v60, %v70_v60  ;;  %v122_v38 = vsub.f32 %v833_v4, %v70_v60  ;;  %v152_v39 = vsub.f32 %v845_v6, %v70_v60  ;;  %v726_v60 = vld [vmem:[%s988_s9 + $0x18] sm:$0xff]  }
  0x9d   :  { %v105_v14 = vmul.f32 %v69_v61, %v69_v61  ;;  %v121_v41 = vsub.f32 %v838_v5, %v69_v61 }
  0x9f   :  { %v90_v46 = vpop.xlane.xlu1 %89 }
  0xa0   :  { %v88_v47 = vpop.xlane.xlu0 %87  ;;  %v96_v48 = vadd.f32 %v90_v46, %v78_v42  ;;  %v151_v42 = vsub.f32 %v850_v7, %v69_v61  ;;  %v722_v7 = vld [vmem:[%s988_s9 + $0x38] sm:$0xff]   ;;  %v727_v61 = vld [vmem:[%s988_s9 + $0x10] sm:$0xff]  }
  0xa1   :  { %v95_v49 = vadd.f32 %v88_v47, %v76_v43  ;;  %686 = vmatprep.subr.bf16.mxu0 %v722_v7 }
  0xa2   :  { %v100_v54 = vmul.f32 0.0078125, %v96_v48 }
  0xa3   :  { %v99_v55 = vmul.f32 0.0078125, %v95_v49  ;;  %v82_v56 = vpop.xlane.xlu1 %81 }
  0xa4   :  { %v80_v57 = vpop.xlane.xlu0 %79  ;;  %v108_v58 = vsub.f32 %v100_v54, %v104_v50 }
  0xa5   :  { %v107_v59 = vsub.f32 %v99_v55, %v103_v51 }
  0xa6   :  { %v112_v62 = vadd.f32 1e-05, %v108_v58  ;;  %v724_v58 = vld [vmem:[%s988_s9 + $0x28] sm:$0xff]  }
  0xa7   :  { %v111_v63 = vadd.f32 1e-05, %v107_v59  ;;  %v94_v8 = vpop.xlane.xlu1 %93  ;;  %v725_v59 = vld [vmem:[%s988_s9 + $0x20] sm:$0xff]  }
  0xa8   :  { %v92_v9 = vpop.xlane.xlu0 %91  ;;  %730 = vrsqrt.f32 %v112_v62  ;;  %v98_v10 = vadd.f32 %v94_v8, %v82_v56  ;;  %v728_v62 = vld [vmem:[%s988_s9 + $0x8] sm:$0xff]  }
  0xa9   :  { %v97_v11 = vadd.f32 %v92_v9, %v80_v57  ;;  %732 = vrsqrt.f32 %v111_v63  ;;  %v723_v57 = vld [vmem:[%s988_s9 + $0x30] sm:$0xff]   ;;  %v729_v63 = vld [vmem:[%s988_s9] sm:$0xff]  }
  0xaa   :  { %v102_v13 = vmul.f32 0.0078125, %v98_v10  ;;  %v606_v10 = vld [vmem:[%s989_s8] ss:$0 sm:$0xff] }
  0xab   :  { %v101_v15 = vmul.f32 0.0078125, %v97_v11 }
  0xac   :  { %v110_v16 = vsub.f32 %v102_v13, %v106_v12 }
  0xad   :  { %v109_v17 = vsub.f32 %v101_v15, %v105_v14 }
  0xae   :  { %v114_v18 = vadd.f32 1e-05, %v110_v16 }
  0xaf   :  { %v113_v19 = vadd.f32 1e-05, %v109_v17 }
  0xb0   :  { %734 = vrsqrt.f32 %v114_v18 }
  0xb1   :  { %736 = vrsqrt.f32 %v113_v19 }
  0xb5   :  { %v731_v22 = vpop.eup %730 }
  0xb6   :  { %v733_v27 = vpop.eup %732  ;;  %v154_v28 = vmul.f32 %v731_v22, %v150_v21  ;;  %v124_v29 = vmul.f32 %v731_v22, %v120_v20 }
  0xb7   :  { %v153_v30 = vmul.f32 %v733_v27, %v149_v24  ;;  %v123_v3 = vmul.f32 %v733_v27, %v119_v23 }
  0xb8   :  { %v165_v1 = vmul.f32 %v588_v25, %v154_v28  ;;  %v135_v31 = vmul.f32 %v586_v26, %v124_v29 }
  0xb9   :  { %v164_v32 = vmul.f32 %v588_v25, %v153_v30  ;;  %v134_v33 = vmul.f32 %v586_v26, %v123_v3 }
  0xba   :  { %v176_v34 = vadd.f32 %v589_v2, %v165_v1  ;;  %v146_v35 = vadd.f32 %v587_v0, %v135_v31 }
  0xbb   :  { %v175_v36 = vadd.f32 %v589_v2, %v164_v32  ;;  %v145_v37 = vadd.f32 %v587_v0, %v134_v33 }
  0xbd   :  { %v735_v40 = vpop.eup %734  ;;  %v197_v43 = vpack.c.bf16 %v176_v34, %v175_v36  ;;  %v179_v44 = vpack.c.bf16 %v146_v35, %v145_v37 }
  0xbe   :  { %v737_v45 = vpop.eup %736  ;;  %v156_v46 = vmul.f32 %v735_v40, %v152_v39  ;;  %v126_v47 = vmul.f32 %v735_v40, %v122_v38 }
  0xbf   :  { %662 = vmatprep.mubr.bf16.mxu0 %v197_v43  ;;  %682 = vmatprep.mubr.bf16.mxu1 %v179_v44  ;;  %v155_v48 = vmul.f32 %v737_v45, %v151_v42  ;;  %v125_v49 = vmul.f32 %v737_v45, %v121_v41 }
  0xc0   :  { %v167_v50 = vmul.f32 %v588_v25, %v156_v46  ;;  %v137_v51 = vmul.f32 %v586_v26, %v126_v47 }
  0xc1   :  { %v166_v52 = vmul.f32 %v588_v25, %v155_v48  ;;  %v136_v4 = vmul.f32 %v586_v26, %v125_v49 }
  0xc2   :  { %v178_v53 = vadd.f32 %v589_v2, %v167_v50  ;;  %v148_v6 = vadd.f32 %v587_v0, %v137_v51 }
  0xc3   :  { %v177_v54 = vadd.f32 %v589_v2, %v166_v52  ;;  %v147_v55 = vadd.f32 %v587_v0, %v136_v4 }
  0xc5   :  { %v198_v5 = vpack.c.bf16 %v178_v53, %v177_v54  ;;  %v180_v56 = vpack.c.bf16 %v148_v6, %v147_v55 }
  0xc7   :  { %663 = vmatmul.mubr.bf16.vlgmr.msra.gmra.mxu0 %v198_v5  ;;  %683 = vmatmul.mubr.bf16.vlgmr.msra.gmra.mxu1 %v180_v56  ;;  %v607_v56 = vld [vmem:[%s990_s10] ss:$0 sm:$0xff] }
  0xc8   :  { %687 = vmatpush3.bf16.msra.mxu0 %v722_v7 }
  0xc9   :  { %688 = vmatprep.subr.bf16.mxu0 %v723_v57 }
  0xcc   :  { %689 = vmatpush3.bf16.msra.mxu0 %v723_v57 }
  0xcd   :  { %690 = vmatprep.subr.bf16.mxu0 %v724_v58 }
  0xd0   :  { %691 = vmatpush3.bf16.msra.mxu0 %v724_v58 }
  0xd1   :  { %692 = vmatprep.subr.bf16.mxu0 %v725_v59 }
  0xd4   :  { %693 = vmatpush3.bf16.msra.mxu0 %v725_v59 }
  0xd5   :  { %694 = vmatprep.subr.bf16.mxu0 %v726_v60 }
  0xd8   :  { %695 = vmatpush3.bf16.msra.mxu0 %v726_v60 }
  0xd9   :  { %696 = vmatprep.subr.bf16.mxu0 %v727_v61 }
  0xdc   :  { %697 = vmatpush3.bf16.msra.mxu0 %v727_v61 }
  0xdd   :  { %698 = vmatprep.subr.bf16.mxu0 %v728_v62 }
  0xe0   :  { %699 = vmatpush3.bf16.msra.mxu0 %v728_v62 }
  0xe1   :  { %700 = vmatprep.subr.bf16.mxu0 %v729_v63 }
  0xe4   :  { %701 = vmatpush3.bf16.msra.mxu0 %v729_v63 }
 0x187   :  { %v664_v8 = vpop.f32.mrf.mxu0  ;;  %v684_v9 = vpop.f32.mrf.mxu1 }
 0x188   :  { %v403_v11 = vadd.f32 %v684_v9, %v664_v8 }
 0x189   :  { %v297_v12 = vpop.f32.mrf.mxu0  ;;  %v394_v13 = vpop.f32.mrf.mxu1 }
 0x18a   :  { %v418_v14 = vadd.f32 %v606_v10, %v403_v11  ;;  %v395_v15 = vadd.f32 %v394_v13, %v297_v12 }
 0x18b   :  { %v665_v16 = vpop.f32.mrf.mxu0  ;;  %v685_v17 = vpop.f32.mrf.mxu1 }
 0x18c   :  { %v426_v18 = vmul.f32 0.044715, %v418_v14  ;;  %v416_v19 = vadd.f32 %v606_v10, %v395_v15  ;;  %v406_v20 = vadd.f32 %v685_v17, %v665_v16  ;;  %v422_v52 = vmul.f32 0.5, %v418_v14 }
 0x18d   :  { %v300_v21 = vpop.f32.mrf.mxu0  ;;  %v397_v22 = vpop.f32.mrf.mxu1 }
 0x18e   :  { %v430_v23 = vmul.f32 %v426_v18, %v418_v14  ;;  %v424_v24 = vmul.f32 0.044715, %v416_v19  ;;  %v419_v25 = vadd.f32 %v606_v10, %v406_v20  ;;  %v398_v26 = vadd.f32 %v397_v22, %v300_v21 }
 0x18f   :  { %v420_v49 = vmul.f32 0.5, %v416_v19 }
 0x190   :  { %v434_v27 = vmul.f32 %v430_v23, %v418_v14  ;;  %v428_v28 = vmul.f32 %v424_v24, %v416_v19  ;;  %v427_v29 = vmul.f32 0.044715, %v419_v25  ;;  %v417_v30 = vadd.f32 %v606_v10, %v398_v26 }
 0x191   :  { %v423_v47 = vmul.f32 0.5, %v419_v25 }
 0x192   :  { %v438_v2 = vadd.f32 %v434_v27, %v418_v14  ;;  %v431_v3 = vmul.f32 %v427_v29, %v419_v25  ;;  %v425_v0 = vmul.f32 0.044715, %v417_v30  ;;  %v432_v1 = vmul.f32 %v428_v28, %v416_v19 }
 0x193   :  { %v421_v50 = vmul.f32 0.5, %v417_v30 }
 0x194   :  { %v435_v31 = vmul.f32 %v431_v3, %v419_v25  ;;  %v429_v32 = vmul.f32 %v425_v0, %v417_v30  ;;  %v442_v33 = vmul.f32 0.7978846, %v438_v2  ;;  %v436_v34 = vadd.f32 %v432_v1, %v416_v19 }
 0x196   :  { %v439_v35 = vadd.f32 %v435_v31, %v419_v25  ;;  %v433_v36 = vmul.f32 %v429_v32, %v417_v30  ;;  %v440_v37 = vmul.f32 0.7978846, %v436_v34  ;;  %738 = vtanh.f32 %v442_v33 }
 0x198   :  { %v437_v38 = vadd.f32 %v433_v36, %v417_v30  ;;  %v443_v39 = vmul.f32 0.7978846, %v439_v35  ;;  %740 = vtanh.f32 %v440_v37 }
 0x19a   :  { %v441_v40 = vmul.f32 0.7978846, %v437_v38  ;;  %742 = vtanh.f32 %v443_v39 }
 0x19c   :  { %744 = vtanh.f32 %v441_v40 }
 0x1a3   :  { %v739_v41 = vpop.eup %738 }
 0x1a4   :  { %v450_v48 = vadd.f32 1.0, %v739_v41 }
 0x1a5   :  { %v741_v42 = vpop.eup %740 }
 0x1a6   :  { %v448_v44 = vadd.f32 1.0, %v741_v42  ;;  %v454_v54 = vmul.f32 %v450_v48, %v422_v52 }
 0x1a7   :  { %v743_v43 = vpop.eup %742 }
 0x1a8   :  { %v451_v45 = vadd.f32 1.0, %v743_v43  ;;  %v452_v53 = vmul.f32 %v448_v44, %v420_v49 }
 0x1a9   :  { %v745_v46 = vpop.eup %744 }
 0x1aa   :  { %v449_v51 = vadd.f32 1.0, %v745_v46  ;;  %v455_v4 = vmul.f32 %v451_v45, %v423_v47 }
 0x1ac   :  { %v453_v6 = vmul.f32 %v449_v51, %v421_v50  ;;  %v457_v5 = vpack.c.bf16 %v455_v4, %v454_v54 }
 0x1ae   :  { %v456_v55 = vpack.c.bf16 %v453_v6, %v452_v53 }
 0x1b0   :  { %702 = vmatprep.mubr.bf16.mxu0 %v456_v55 }
 0x1b1   :  { %703 = vmatmul.mubr.bf16.vlgmr.msra.gmra.mxu0 %v457_v5 }
 0x271   :  { %v704_v7 = vpop.f32.mrf.mxu0 }
 0x272   :  { %v572_v57 = vadd.f32 %v704_v7, %v607_v56 }
 0x273   :  { %v563_v58 = vpop.f32.mrf.mxu0 }
 0x274   :  { %580 = vst [vmem:[%s991_s11 + $0x10] sm:$0xff] %v572_v57  ;;  %v564_v59 = vadd.f32 %v607_v56, %v563_v58 }
 0x275   :  { %v705_v60 = vpop.f32.mrf.mxu0 }
 0x276   :  { %578 = vst [vmem:[%s991_s11] sm:$0xff] %v564_v59  ;;  %v575_v61 = vadd.f32 %v705_v60, %v607_v56 }
 0x277   :  { %v566_v62 = vpop.f32.mrf.mxu0 }
 0x278   :  { %581 = vst [vmem:[%s991_s11 + $0x18] sm:$0xff] %v575_v61  ;;  %v567_v63 = vadd.f32 %v607_v56, %v566_v62 }
 0x27a   :  { %579 = vst [vmem:[%s991_s11 + $0x8] sm:$0xff] %v567_v63 }

// kernel: _lambda_.6
= control target key start
LH: loop header
LB: loop body
LE: loop exit
PB: predicated region body
PF: predicated region fallthrough
CT: control target
= control target key end

     0   :  { %v389_v1 = vmov 0.0   ;;  %vm390_vm0 = vmmov 0   ;;  %s482_s0 = inlined_call_operand.vmem [shape: bf16[8,128], index: 0, kind: input, shape index: {}]   ;;  %s483_s1 = inlined_call_operand.vmem [shape: bf16[128,128], index: 1, kind: input, shape index: {}]   ;;  %s484_s2 = inlined_call_operand.vmem [shape: f32[1,128], index: 2, kind: input, shape index: {}]   ;;  %s485_s3 = inlined_call_operand.vmem [shape: bf16[128,128], index: 3, kind: input, shape index: {}]   ;;  %s486_s4 = inlined_call_operand.vmem [shape: f32[1,128], index: 4, kind: input, shape index: {}]   ;;  %s487_s5 = inlined_call_operand.hbm [shape: f32[8,128], index: 5, kind: output, shape index: {}]  }
   0x1   :  { %v349_v0 = vld [vmem:[%s483_s1 + $0x38] sm:$0xff]   ;;  %306 = vmatprep.subr.bf16.mxu0 %v389_v1  ;;  %326 = vmatprep.subr.bf16.mxu1 %v389_v1  ;;  %v350_v2 = vld [vmem:[%s483_s1 + $0x30] sm:$0xff]   ;;  %v351_v3 = vld [vmem:[%s483_s1 + $0x28] sm:$0xff]  }
   0x2   :  { %307 = vmatpush3.bf16.msra.mxu0 %v349_v0  ;;  %322 = vmatprep.mubr.msk.bf16.mxu0 %vm390_vm0, %v389_v1  ;;  %v352_v4 = vld [vmem:[%s483_s1 + $0x20] sm:$0xff]   ;;  %v353_v5 = vld [vmem:[%s483_s1 + $0x18] sm:$0xff]  }
   0x3   :  { %308 = vmatprep.subr.bf16.mxu0 %v389_v1  ;;  %342 = vmatprep.mubr.msk.bf16.mxu1 %vm390_vm0, %v389_v1 }
   0x6   :  { %309 = vmatpush3.bf16.msra.mxu0 %v350_v2 }
   0x7   :  { %310 = vmatprep.subr.bf16.mxu0 %v389_v1 }
   0xa   :  { %311 = vmatpush3.bf16.msra.mxu0 %v351_v3 }
   0xb   :  { %312 = vmatprep.subr.bf16.mxu0 %v389_v1 }
   0xe   :  { %313 = vmatpush3.bf16.msra.mxu0 %v352_v4 }
   0xf   :  { %10 = vsyncpa [#allocation3], 0  ;;  %314 = vmatprep.subr.bf16.mxu0 %v389_v1  ;;  %v354_v6 = vld [vmem:[%s483_s1 + $0x10] sm:$0xff]   ;;  %v355_v7 = vld [vmem:[%s483_s1 + $0x8] sm:$0xff]  }
  0x10   :  { %v356_v8 = vld [vmem:[%s483_s1] sm:$0xff]   ;;  %v357_v10 = vld [vmem:[%s485_s3 + $0x38] sm:$0xff]   ;;  %v358_v11 = vld [vmem:[%s485_s3 + $0x30] sm:$0xff]  }
  0x11   :  { %v22_v9 = vld [vmem:[%s482_s0] sm:$0xf]  ;;  %327 = vmatpush3.bf16.msra.mxu1 %v357_v10  ;;  %v359_v12 = vld [vmem:[%s485_s3 + $0x28] sm:$0xff]   ;;  %v361_v14 = vld [vmem:[%s485_s3 + $0x18] sm:$0xff]  }
  0x12   :  { %315 = vmatpush3.bf16.msra.mxu0 %v353_v5  ;;  %328 = vmatprep.subr.bf16.mxu1 %v389_v1  ;;  %v360_v13 = vld [vmem:[%s485_s3 + $0x20] sm:$0xff]   ;;  %v362_v15 = vld [vmem:[%s485_s3 + $0x10] sm:$0xff]   ;;  %v363_v16 = vld [vmem:[%s485_s3 + $0x8] sm:$0xff]  }
  0x13   :  { %316 = vmatprep.subr.bf16.mxu0 %v389_v1  ;;  %v364_v17 = vld [vmem:[%s485_s3] sm:$0xff]  }
  0x14   :  { %v270_v18 = vld [vmem:[%s484_s2] ss:$0 sm:$0xff]  ;;  %s391_s2 = smov [#allocation2]  }
  0x15   :  { %329 = vmatpush3.bf16.msra.mxu1 %v358_v11  ;;  %v279_v34 = vld [vmem:[%s486_s4] ss:$0 sm:$0xff]  ;;  %s262_s28 = sshll.u32 %s391_s2, 4  ;;  %s263_s28 = int_to_ptr.vmem [resolvable:$true] %s262_s28 }
  0x16   :  { %317 = vmatpush3.bf16.msra.mxu0 %v354_v6  ;;  %330 = vmatprep.subr.bf16.mxu1 %v389_v1  ;;  %s367_s29 = scalar_lea.vmem %s263_s28, 128  ;;  %p372_p1 = scmp.lt.s32.totalorder %s263_s28, %s263_s28 }
  0x17   :  { %318 = vmatprep.subr.bf16.mxu0 %v389_v1  ;;  %p368_p0 = scmp.ne.s32.totalorder %s263_s28, %s367_s29  ;;  %p373_p2 = scmp.lt.s32.totalorder %s367_s29, %s367_s29 }
  0x19   :  { %331 = vmatpush3.bf16.msra.mxu1 %v359_v12  ;;  %p374_p3 = por %p373_p2, %p372_p1 }
  0x1a   :  { %319 = vmatpush3.bf16.msra.mxu0 %v355_v7  ;;  %332 = vmatprep.subr.bf16.mxu1 %v389_v1 }
  0x1b   :  { %320 = vmatprep.subr.bf16.mxu0 %v389_v1  ;;  %p375_p4 = pnand %p374_p3, %p368_p0 }
  0x1d   :  { %333 = vmatpush3.bf16.msra.mxu1 %v360_v13 }
  0x1e   :  { %321 = vmatpush3.bf16.msra.mxu0 %v356_v8  ;;  %334 = vmatprep.subr.bf16.mxu1 %v389_v1 }
  0x21   :  { %323 = vmatmul.mubr.bf16.vlgmr.msra.gmra.mxu0 %v22_v9  ;;  %335 = vmatpush3.bf16.msra.mxu1 %v361_v14 }
  0x22   :  { %336 = vmatprep.subr.bf16.mxu1 %v389_v1 }
  0x25   :  { %337 = vmatpush3.bf16.msra.mxu1 %v362_v15 }
  0x26   :  { %338 = vmatprep.subr.bf16.mxu1 %v389_v1 }
  0x29   :  { %339 = vmatpush3.bf16.msra.mxu1 %v363_v16 }
  0x2a   :  { %340 = vmatprep.subr.bf16.mxu1 %v389_v1 }
  0x2d   :  { %341 = vmatpush3.bf16.msra.mxu1 %v364_v17 }
  0xe1   :  { %v128_v19 = vpop.f32.mrf.mxu0 }
  0xe2   :  { %v129_v20 = vadd.f32 %v270_v18, %v128_v19 }
  0xe3   :  { %v324_v21 = vpop.f32.mrf.mxu0 }
  0xe4   :  { %v135_v22 = vmul.f32 0.044715, %v129_v20  ;;  %v134_v30 = vmul.f32 0.5, %v129_v20 }
  0xe5   :  { %v131_v23 = vpop.f32.mrf.mxu0 }
  0xe6   :  { %v136_v24 = vmul.f32 %v135_v22, %v129_v20 }
  0xe7   :  { %v325_v25 = vpop.f32.mrf.mxu0 }
  0xe8   :  { %v137_v26 = vmul.f32 %v136_v24, %v129_v20 }
  0xea   :  { %v138_v27 = vadd.f32 %v137_v26, %v129_v20 }
  0xec   :  { %v139_v28 = vmul.f32 0.7978846, %v138_v27 }
  0xee   :  { %365 = vtanh.f32 %v139_v28 }
  0xfb   :  { %v366_v29 = vpop.eup %365 }
  0xfc   :  { %v141_v31 = vadd.f32 1.0, %v366_v29 }
  0xfe   :  { %v142_v32 = vmul.f32 %v141_v31, %v134_v30 }
 0x100   :  { %v143_v33 = vpack.c.bf16 %v142_v32, %v142_v32 }
 0x102   :  { %343 = vmatmul.mubr.bf16.vlgmr.msra.gmra.mxu1 %v143_v33 }
 0x1c2   :  { %v249_v35 = vpop.f32.mrf.mxu1 }
 0x1c3   :  { %v250_v36 = vadd.f32 %v279_v34, %v249_v35 }
 0x1c4   :  { %v344_v37 = vpop.f32.mrf.mxu1 }
 0x1c5   :  { %255 = vst [vmem:[#allocation2] sm:$0xff] %v250_v36 }
 0x1c6   :  { %v252_v38 = vpop.f32.mrf.mxu1 }
 0x1c7   :  { %378 = shalt.err (!%p375_p4)
}
 0x1c8   :  { %265 = dma.vmem_to_hbm [thread:$0]  %s263_s28, 128, %s487_s5, [#allocation3]   ;;  %v345_v39 = vpop.f32.mrf.mxu1 }
 0x1c9   :  { %387 = dma.done.wait [#allocation3], 128  }
 0x1ca   :  { %388 = vsyncadd [#allocation3], 4294967168 }
 0x1cb   :  { %269 = vsyncpa [#allocation3], 1 }

// kernel: _lambda_.7
= control target key start
LH: loop header
LB: loop body
LE: loop exit
PB: predicated region body
PF: predicated region fallthrough
CT: control target
= control target key end

     0   :  { %v378_v0 = vmov 0.0   ;;  %vm379_vm0 = vmmov 0   ;;  %s473_s1 = inlined_call_operand.vmem [shape: bf16[128,128], index: 1, kind: input, shape index: {}]   ;;  %s474_s0 = inlined_call_operand.vmem [shape: bf16[12,128], index: 0, kind: input, shape index: {}]   ;;  %s475_s3 = inlined_call_operand.vmem [shape: bf16[128,128], index: 3, kind: input, shape index: {}]   ;;  %s476_s2 = inlined_call_operand.vmem [shape: f32[1,128], index: 2, kind: input, shape index: {}]   ;;  %s477_s4 = inlined_call_operand.vmem [shape: f32[1,128], index: 4, kind: input, shape index: {}]   ;;  %s478_s5 = inlined_call_operand.vmem [shape: f32[12,128], index: 5, kind: output, shape index: {}]  }
   0x1   :  { %315 = vmatprep.subr.bf16.mxu0 %v378_v0  ;;  %v357_v1 = vld [vmem:[%s473_s1 + $0x38] sm:$0xff]   ;;  %331 = vmatprep.mubr.msk.bf16.mxu0 %vm379_vm0, %v378_v0  ;;  %v358_v2 = vld [vmem:[%s473_s1 + $0x30] sm:$0xff]   ;;  %v359_v3 = vld [vmem:[%s473_s1 + $0x28] sm:$0xff]  }
   0x2   :  { %335 = vmatprep.subr.bf16.mxu1 %v378_v0  ;;  %351 = vmatprep.mubr.msk.bf16.mxu1 %vm379_vm0, %v378_v0  ;;  %v360_v4 = vld [vmem:[%s473_s1 + $0x20] sm:$0xff]   ;;  %v361_v5 = vld [vmem:[%s473_s1 + $0x18] sm:$0xff]   ;;  %v362_v6 = vld [vmem:[%s473_s1 + $0x10] sm:$0xff]  }
   0x3   :  { %316 = vmatpush3.bf16.msra.mxu0 %v357_v1  ;;  %v363_v7 = vld [vmem:[%s473_s1 + $0x8] sm:$0xff]   ;;  %v364_v8 = vld [vmem:[%s473_s1] sm:$0xff]   ;;  %v366_v10 = vld [vmem:[%s475_s3 + $0x38] sm:$0xff]  }
   0x4   :  { %317 = vmatprep.subr.bf16.mxu0 %v378_v0  ;;  %v365_v9 = vld [vmem:[%s474_s0] sm:$0x3f]   ;;  %336 = vmatpush3.bf16.msra.mxu1 %v366_v10  ;;  %v367_v11 = vld [vmem:[%s475_s3 + $0x30] sm:$0xff]   ;;  %v368_v12 = vld [vmem:[%s475_s3 + $0x28] sm:$0xff]  }
   0x5   :  { %337 = vmatprep.subr.bf16.mxu1 %v378_v0  ;;  %v369_v13 = vld [vmem:[%s475_s3 + $0x20] sm:$0xff]   ;;  %v370_v14 = vld [vmem:[%s475_s3 + $0x18] sm:$0xff]   ;;  %v371_v15 = vld [vmem:[%s475_s3 + $0x10] sm:$0xff]  }
   0x6   :  { %v372_v16 = vld [vmem:[%s475_s3 + $0x8] sm:$0xff]   ;;  %v373_v17 = vld [vmem:[%s475_s3] sm:$0xff]  }
   0x7   :  { %318 = vmatpush3.bf16.msra.mxu0 %v358_v2  ;;  %v278_v18 = vld [vmem:[%s476_s2] ss:$0 sm:$0xff] }
   0x8   :  { %319 = vmatprep.subr.bf16.mxu0 %v378_v0  ;;  %338 = vmatpush3.bf16.msra.mxu1 %v367_v11  ;;  %v288_v44 = vld [vmem:[%s477_s4] ss:$0 sm:$0xff] }
   0x9   :  { %339 = vmatprep.subr.bf16.mxu1 %v378_v0 }
   0xb   :  { %320 = vmatpush3.bf16.msra.mxu0 %v359_v3 }
   0xc   :  { %321 = vmatprep.subr.bf16.mxu0 %v378_v0  ;;  %340 = vmatpush3.bf16.msra.mxu1 %v368_v12 }
   0xd   :  { %341 = vmatprep.subr.bf16.mxu1 %v378_v0 }
   0xf   :  { %322 = vmatpush3.bf16.msra.mxu0 %v360_v4 }
  0x10   :  { %323 = vmatprep.subr.bf16.mxu0 %v378_v0  ;;  %342 = vmatpush3.bf16.msra.mxu1 %v369_v13 }
  0x11   :  { %343 = vmatprep.subr.bf16.mxu1 %v378_v0 }
  0x13   :  { %324 = vmatpush3.bf16.msra.mxu0 %v361_v5 }
  0x14   :  { %325 = vmatprep.subr.bf16.mxu0 %v378_v0  ;;  %344 = vmatpush3.bf16.msra.mxu1 %v370_v14 }
  0x15   :  { %345 = vmatprep.subr.bf16.mxu1 %v378_v0 }
  0x17   :  { %326 = vmatpush3.bf16.msra.mxu0 %v362_v6 }
  0x18   :  { %327 = vmatprep.subr.bf16.mxu0 %v378_v0  ;;  %346 = vmatpush3.bf16.msra.mxu1 %v371_v15 }
  0x19   :  { %347 = vmatprep.subr.bf16.mxu1 %v378_v0 }
  0x1b   :  { %328 = vmatpush3.bf16.msra.mxu0 %v363_v7 }
  0x1c   :  { %329 = vmatprep.subr.bf16.mxu0 %v378_v0  ;;  %348 = vmatpush3.bf16.msra.mxu1 %v372_v16 }
  0x1d   :  { %349 = vmatprep.subr.bf16.mxu1 %v378_v0 }
  0x1f   :  { %330 = vmatpush3.bf16.msra.mxu0 %v364_v8 }
  0x20   :  { %350 = vmatpush3.bf16.msra.mxu1 %v373_v17 }
  0x22   :  { %332 = vmatmul.mubr.bf16.vlgmr.msra.gmra.mxu0 %v365_v9 }
  0xe2   :  { %v134_v19 = vpop.f32.mrf.mxu0 }
  0xe3   :  { %v135_v20 = vadd.f32 %v278_v18, %v134_v19 }
  0xe4   :  { %v333_v21 = vpop.f32.mrf.mxu0 }
  0xe5   :  { %v143_v22 = vmul.f32 0.044715, %v135_v20  ;;  %v141_v38 = vmul.f32 0.5, %v135_v20 }
  0xe6   :  { %v137_v23 = vpop.f32.mrf.mxu0 }
  0xe7   :  { %v145_v24 = vmul.f32 %v143_v22, %v135_v20  ;;  %v138_v25 = vadd.f32 %v278_v18, %v137_v23 }
  0xe8   :  { %v334_v26 = vpop.f32.mrf.mxu0 }
  0xe9   :  { %v147_v27 = vmul.f32 %v145_v24, %v135_v20  ;;  %v144_v28 = vmul.f32 0.044715, %v138_v25  ;;  %v142_v39 = vmul.f32 0.5, %v138_v25 }
  0xeb   :  { %v146_v29 = vmul.f32 %v144_v28, %v138_v25  ;;  %v149_v30 = vadd.f32 %v147_v27, %v135_v20 }
  0xed   :  { %v148_v31 = vmul.f32 %v146_v29, %v138_v25  ;;  %v151_v32 = vmul.f32 0.7978846, %v149_v30 }
  0xef   :  { %v150_v33 = vadd.f32 %v148_v31, %v138_v25  ;;  %374 = vtanh.f32 %v151_v32 }
  0xf1   :  { %v152_v34 = vmul.f32 0.7978846, %v150_v33 }
  0xf3   :  { %376 = vtanh.f32 %v152_v34 }
  0xfc   :  { %v375_v35 = vpop.eup %374 }
  0xfd   :  { %v155_v36 = vadd.f32 1.0, %v375_v35 }
  0xff   :  { %v157_v41 = vmul.f32 %v155_v36, %v141_v38 }
 0x100   :  { %v377_v37 = vpop.eup %376 }
 0x101   :  { %v156_v40 = vadd.f32 1.0, %v377_v37 }
 0x103   :  { %v158_v42 = vmul.f32 %v156_v40, %v142_v39 }
 0x105   :  { %v159_v43 = vpack.c.bf16 %v158_v42, %v157_v41 }
 0x107   :  { %352 = vmatmul.mubr.bf16.vlgmr.msra.gmra.mxu1 %v159_v43 }
 0x1c7   :  { %v265_v45 = vpop.f32.mrf.mxu1 }
 0x1c8   :  { %v266_v46 = vadd.f32 %v288_v44, %v265_v45 }
 0x1c9   :  { %v353_v47 = vpop.f32.mrf.mxu1 }
 0x1ca   :  { %272 = vst [vmem:[%s478_s5] sm:$0xff] %v266_v46 }
 0x1cb   :  { %v268_v48 = vpop.f32.mrf.mxu1 }
 0x1cc   :  { %v269_v49 = vadd.f32 %v288_v44, %v268_v48 }
 0x1cd   :  { %v354_v50 = vpop.f32.mrf.mxu1 }
 0x1ce   :  { %273 = vst [vmem:[%s478_s5 + $0x8] sm:$0xf] %v269_v49 }

</bundles_post_ra>
